<compile_context>
chip_gen: v6e
topology: v6e:2x2x1
jax: 0.10.0
libtpu: 0.0.40
codegen_flags: <defaults>
</compile_context>

<pallas_src>
import jax
import jax.numpy as jnp
from jax.experimental import pallas as pl
from jax.experimental.pallas import tpu as pltpu

_EPS = 1e-5


# --------------------------------------------------------------------------- #
# helpers
# --------------------------------------------------------------------------- #
def _round_up(x, m):
    return (x + m - 1) // m * m


def _pick_td(d, target=4):
    """Largest depth-tile <= target that divides d."""
    for t in range(min(d, target), 0, -1):
        if d % t == 0:
            return t
    return 1


def _pad_vec(v, n):
    return jnp.pad(v.astype(jnp.float32), (0, n - v.shape[0]))


def _pack_weights(w, cin_p, cout_p):
    """(Cout, Cin, 3, 3, 3) -> (27, Cin_p, Cout_p) zero-padded, MXU-ready."""
    cout, cin = w.shape[0], w.shape[1]
    wt = jnp.transpose(w.astype(jnp.float32), (2, 3, 4, 1, 0))      # (3,3,3,Cin,Cout)
    wt = jnp.pad(wt, ((0, 0), (0, 0), (0, 0),
                      (0, cin_p - cin), (0, cout_p - cout)))
    return wt.reshape(27, cin_p, cout_p)


# --------------------------------------------------------------------------- #
# Pallas kernel 1: 3x3x3 conv (bias) on the MXU + per-tile BN partial stats
# --------------------------------------------------------------------------- #
def _conv3d_kernel(x_hbm, w_ref, b_ref, y_ref, stats_ref, slab_ref, acc_ref, sem):
    """Refs:
      x_hbm     : (N, D+2, H+2, W+2, Cin_p)  zero-padded input, HBM (pl.ANY)
      w_ref     : (27, Cin_p, Cout_p)        conv weights               [VMEM]
      b_ref     : (1, Cout_p)                conv bias (lane-dense row) [VMEM]
      y_ref     : (1, td, H, W, Cout_p)      pre-BN conv output tile    [VMEM out]
      stats_ref : (1, 1, 2, Cout_p)          per-tile (sum, sumsq)      [VMEM out]
      slab_ref  : (td+2, H+2, W+2, Cin_p)    depth slab w/ halo         [VMEM scratch]
      acc_ref   : (td*H*W, Cout_p)           f32 matmul accumulator     [VMEM scratch]
      sem       : (1,) DMA semaphore
    """
    n = pl.program_id(0)
    dt = pl.program_id(1)

    td_p2, Hp, Wp, cin_p = slab_ref.shape
    td = td_p2 - 2
    H, W = Hp - 2, Wp - 2
    cout_p = acc_ref.shape[1]
    rows = td * H * W

    # ---- fetch the (td + halo) depth slab for sample n ----------------------
    d0 = pl.multiple_of(dt * td, td)
    cp = pltpu.make_async_copy(x_hbm.at[n, pl.ds(d0, td_p2)], slab_ref, sem.at[0])
    cp.start()
    # TODO(synk): double-buffer this slab fetch across grid steps.
    cp.wait()

    # ---- conv as 27 accumulating MXU matmuls --------------------------------
    acc_ref[...] = jnp.zeros_like(acc_ref)
    for kd in range(3):
        for kh in range(3):
            for kw in range(3):
                t = (kd * 3 + kh) * 3 + kw
                patch = slab_ref[kd:kd + td, kh:kh + H, kw:kw + W, :]
                acc_ref[...] += jnp.dot(patch.reshape(rows, cin_p), w_ref[t],
                                        preferred_element_type=jnp.float32)

    acc = acc_ref[...] + b_ref[...]                       # (rows, Cout_p)

    # ---- per-tile BN partials (sum, sum of squares) per output channel ------
    s = jnp.sum(acc, axis=0, keepdims=True)               # (1, Cout_p)
    ss = jnp.sum(acc * acc, axis=0, keepdims=True)        # (1, Cout_p)
    stats_ref[0, 0] = jnp.concatenate([s, ss], axis=0)    # (2, Cout_p)

    # ---- write pre-BN conv output (lane-dense, unmasked stores) -------------
    y_ref[0] = acc.reshape(td, H, W, cout_p)


def _conv3d_pass(xpad, w27, bias_row, td):
    """xpad: (N, D+2, H+2, W+2, Cin_p) channels-last padded input."""
    N, Dp, Hp, Wp, cin_p = xpad.shape
    D, H, W = Dp - 2, Hp - 2, Wp - 2
    cout_p = w27.shape[2]
    n_dt = D // td
    rows = td * H * W

    return pl.pallas_call(
        _conv3d_kernel,
        out_shape=(jax.ShapeDtypeStruct((N, D, H, W, cout_p), jnp.float32),
                   jax.ShapeDtypeStruct((N, n_dt, 2, cout_p), jnp.float32)),
        grid=(N, n_dt),
        in_specs=[
            pl.BlockSpec(memory_space=pl.ANY),                              # x in HBM
            pl.BlockSpec((27, cin_p, cout_p), lambda n, d: (0, 0, 0)),      # weights
            pl.BlockSpec((1, cout_p), lambda n, d: (0, 0)),                 # bias row
        ],
        out_specs=(
            pl.BlockSpec((1, td, H, W, cout_p), lambda n, d: (n, d, 0, 0, 0)),
            pl.BlockSpec((1, 1, 2, cout_p), lambda n, d: (n, d, 0, 0)),
        ),
        scratch_shapes=[
            pltpu.VMEM((td + 2, Hp, Wp, cin_p), jnp.float32),
            pltpu.VMEM((rows, cout_p), jnp.float32),
            pltpu.SemaphoreType.DMA((1,)),
        ],
        compiler_params=pltpu.CompilerParams(
            dimension_semantics=("parallel", "parallel"),
            vmem_limit_bytes=48 * 1024 * 1024),
    )(xpad, w27, bias_row)


# --------------------------------------------------------------------------- #
# Pallas kernel 2: fused BatchNorm affine (precomputed scale/shift) + ReLU
# --------------------------------------------------------------------------- #
def _bn_relu_kernel(x_ref, scale_ref, shift_ref, o_ref):
    o_ref[...] = jnp.maximum(x_ref[...] * scale_ref[...] + shift_ref[...], 0.0)


def _bn_relu_pass(y_pre, scale, shift, td):
    N, D, H, W, cp = y_pre.shape
    n_dt = D // td
    return pl.pallas_call(
        _bn_relu_kernel,
        out_shape=jax.ShapeDtypeStruct(y_pre.shape, jnp.float32),
        grid=(N, n_dt),
        in_specs=[
            pl.BlockSpec((1, td, H, W, cp), lambda n, d: (n, d, 0, 0, 0)),
            pl.BlockSpec((1, 1, 1, 1, cp), lambda n, d: (0, 0, 0, 0, 0)),
            pl.BlockSpec((1, 1, 1, 1, cp), lambda n, d: (0, 0, 0, 0, 0)),
        ],
        out_specs=pl.BlockSpec((1, td, H, W, cp), lambda n, d: (n, d, 0, 0, 0)),
        compiler_params=pltpu.CompilerParams(
            dimension_semantics=("parallel", "parallel")),
    )(y_pre, scale, shift)


# --------------------------------------------------------------------------- #
# tiny O(C) glue: partial (sum, sumsq) -> per-channel BN scale/shift
# --------------------------------------------------------------------------- #
def _bn_affine(partial_stats, gamma_p, beta_p, count):
    s = jnp.sum(partial_stats[:, :, 0, :], axis=(0, 1))       # (Cp,)
    ss = jnp.sum(partial_stats[:, :, 1, :], axis=(0, 1))      # (Cp,)
    mean = s / count
    var = jnp.maximum(ss / count - mean * mean, 0.0)          # biased variance
    scale = gamma_p * jax.lax.rsqrt(var + _EPS)
    shift = beta_p - mean * scale
    cp = scale.shape[0]
    return scale.reshape(1, 1, 1, 1, cp), shift.reshape(1, 1, 1, 1, cp)


# --------------------------------------------------------------------------- #
# Plain-JAX glue: trilinear upsample (align_corners=True), concat
# --------------------------------------------------------------------------- #
def _interp_matrix(n_in, n_out):
    if n_in == 1:
        return jnp.ones((n_out, 1), jnp.float32)
    o = jnp.arange(n_out, dtype=jnp.float32)
    src = o * (n_in - 1) / (n_out - 1)                 # align_corners=True
    lo = jnp.clip(jnp.floor(src).astype(jnp.int32), 0, n_in - 2)
    frac = src - lo.astype(jnp.float32)
    m = jnp.zeros((n_out, n_in), jnp.float32)
    rows = jnp.arange(n_out)
    m = m.at[rows, lo].add(1.0 - frac)
    m = m.at[rows, lo + 1].add(frac)
    return m


def trilinear_upsample(x, scale):
    # x: (N, C, D, H, W)
    _, _, D, H, W = x.shape
    md = _interp_matrix(D, D * scale)
    mh = _interp_matrix(H, H * scale)
    mw = _interp_matrix(W, W * scale)
    y = jnp.einsum('ncdhw,pd->ncphw', x, md)
    y = jnp.einsum('ncphw,qh->ncpqw', y, mh)
    y = jnp.einsum('ncpqw,rw->ncpqr', y, mw)
    return y


# --------------------------------------------------------------------------- #
# Top-level forward (PyTorch NCDHW in / NCDHW out)
# --------------------------------------------------------------------------- #
def decoder_bottleneck_forward(x, x_concat, params, scale_factor=2, d_tile=4):
    w1, b1, g1, be1, w2, b2, g2, be2 = params

    # TODO(synk): fold upsample + concat into the first conv kernel (per-axis
    # interp matmuls on the resident tile) to skip these full-volume HBM passes.
    x_up = trilinear_upsample(x, scale_factor)
    x_in = jnp.concatenate([x_concat, x_up], axis=1) if x_concat is not None else x_up

    N, Cin, D, H, W = x_in.shape
    Cmid, Cout = b1.shape[0], b2.shape[0]
    Cin_p = _round_up(Cin, 128)
    Cmid_p = _round_up(Cmid, 128)
    Cout_p = _round_up(Cout, 128)
    td = _pick_td(D, d_tile)
    count = N * D * H * W

    # channels-last (lane-dense), channel pad, spatial halo pad.
    # TODO(synk): fuse this zero halo padding into the conv kernel via masks.
    x_nd = jnp.transpose(x_in, (0, 2, 3, 4, 1)).astype(jnp.float32)
    x_nd = jnp.pad(x_nd, ((0, 0), (1, 1), (1, 1), (1, 1), (0, Cin_p - Cin)))

    # ---- layer 1: conv -> (two-pass) BN -> ReLU ------------------------------
    w1m = _pack_weights(w1, Cin_p, Cmid_p)
    b1r = _pad_vec(b1, Cmid_p).reshape(1, Cmid_p)
    y1_pre, st1 = _conv3d_pass(x_nd, w1m, b1r, td)
    sc1, sh1 = _bn_affine(st1, _pad_vec(g1, Cmid_p), _pad_vec(be1, Cmid_p), count)
    y1 = _bn_relu_pass(y1_pre, sc1, sh1, td)

    # ---- layer 2: conv -> (two-pass) BN -> ReLU ------------------------------
    y1_pad = jnp.pad(y1, ((0, 0), (1, 1), (1, 1), (1, 1), (0, 0)))
    w2m = _pack_weights(w2, Cmid_p, Cout_p)
    b2r = _pad_vec(b2, Cout_p).reshape(1, Cout_p)
    y2_pre, st2 = _conv3d_pass(y1_pad, w2m, b2r, td)
    sc2, sh2 = _bn_affine(st2, _pad_vec(g2, Cout_p), _pad_vec(be2, Cout_p), count)
    y2 = _bn_relu_pass(y2_pre, sc2, sh2, td)

    # back to NCDHW, drop channel padding
    return jnp.transpose(y2[..., :Cout], (0, 4, 1, 2, 3))


# --------------------------------------------------------------------------- #
# Pure-JAX reference (for correctness check)
# --------------------------------------------------------------------------- #
def _conv_bn_relu_ref(x, w, b, g, be):
    y = jax.lax.conv_general_dilated(
        x, w, window_strides=(1, 1, 1), padding=[(1, 1), (1, 1), (1, 1)],
        dimension_numbers=('NCDHW', 'OIDHW', 'NCDHW'))
    y = y + b[None, :, None, None, None]
    mean = jnp.mean(y, axis=(0, 2, 3, 4), keepdims=True)
    var = jnp.mean((y - mean) ** 2, axis=(0, 2, 3, 4), keepdims=True)
    y = (y - mean) / jnp.sqrt(var + _EPS) * g[None, :, None, None, None] \
        + be[None, :, None, None, None]
    return jnp.maximum(y, 0.0)


def reference_forward(x, x_concat, params, scale_factor=2):
    w1, b1, g1, be1, w2, b2, g2, be2 = params
    x_up = trilinear_upsample(x, scale_factor)
    x_in = jnp.concatenate([x_concat, x_up], axis=1) if x_concat is not None else x_up
    y = _conv_bn_relu_ref(x_in, w1, b1, g1, be1)
    return _conv_bn_relu_ref(y, w2, b2, g2, be2)


# --------------------------------------------------------------------------- #
if __name__ == "__main__":
    key = jax.random.PRNGKey(0)
    ks = jax.random.split(key, 12)

    N = 2
    cx, cc = 2, 2                 # channels of x and of the skip connection
    in_channels = cx + cc         # conv1 input channels (post concat) = 4
    out_channels = 2
    d = h = w = 4                 # x spatial; upsampled -> 8

    x = jax.random.normal(ks[0], (N, cx, d, h, w), jnp.float32)
    x_concat = jax.random.normal(ks[1], (N, cc, 2 * d, 2 * h, 2 * w), jnp.float32)

    w1 = 0.1 * jax.random.normal(ks[2], (out_channels, in_channels, 3, 3, 3), jnp.float32)
    b1 = 0.1 * jax.random.normal(ks[3], (out_channels,), jnp.float32)
    g1 = 1.0 + 0.1 * jax.random.normal(ks[4], (out_channels,), jnp.float32)
    be1 = 0.1 * jax.random.normal(ks[5], (out_channels,), jnp.float32)
    w2 = 0.1 * jax.random.normal(ks[6], (out_channels, out_channels, 3, 3, 3), jnp.float32)
    b2 = 0.1 * jax.random.normal(ks[7], (out_channels,), jnp.float32)
    g2 = 1.0 + 0.1 * jax.random.normal(ks[8], (out_channels,), jnp.float32)
    be2 = 0.1 * jax.random.normal(ks[9], (out_channels,), jnp.float32)
    params = (w1, b1, g1, be1, w2, b2, g2, be2)

    fwd = jax.jit(lambda a, b_, p: decoder_bottleneck_forward(a, b_, p, scale_factor=2))
    out = jax.block_until_ready(fwd(x, x_concat, params))

    assert out.shape == (N, out_channels, 2 * d, 2 * h, 2 * w), out.shape

    ref = jax.block_until_ready(reference_forward(x, x_concat, params, scale_factor=2))
    max_err = float(jnp.max(jnp.abs(out - ref)))
    assert max_err < 2e-3, f"mismatch vs reference: {max_err}"

    print("KERNEL_OK")
</pallas_src>

<mosaic_0001>
module attributes {stable_mosaic.version = 11 : i64} {
  func.func private @main(%arg0: i32) attributes {dimension_semantics = [#tpu.dimension_semantics<core_parallel>], iteration_bounds = array<i64: 2>, tpu.core_type = #tpu.core_type<sc_scalar_subcore>, window_params = []} {
    return
  }
}

module attributes {stable_mosaic.version = 11 : i64} {
  func.func private @main(%arg0: i32) attributes {dimension_semantics = [#tpu.dimension_semantics<core_parallel>], iteration_bounds = array<i64: 2>, tpu.core_type = #tpu.core_type<sc_scalar_subcore>, window_params = []} {
    return
  }
}

module attributes {stable_mosaic.version = 11 : i64} {
  func.func @_conv3d_kernel(%arg0: i32, %arg1: i32, %arg2: memref<2x10x10x10x128xf32, #tpu.memory_space<any>>, %arg3: memref<27x128x128xf32, #tpu.memory_space<vmem>>, %arg4: memref<1x128xf32, #tpu.memory_space<vmem>>, %arg5: memref<1x4x8x8x128xf32, #tpu.memory_space<vmem>>, %arg6: memref<1x1x2x128xf32, #tpu.memory_space<vmem>>, %arg7: memref<6x10x10x128xf32, #tpu.memory_space<vmem>>, %arg8: memref<256x128xf32, #tpu.memory_space<vmem>>, %arg9: memref<1x!tpu.dma_semaphore, #tpu.memory_space<semaphore_mem>>) attributes {dimension_semantics = [#tpu.dimension_semantics<parallel>, #tpu.dimension_semantics<parallel>], iteration_bounds = array<i64: 2, 2>, scalar_prefetch = 0 : i64, scratch_operands = 3 : i64, tpu.core_type = #tpu.core_type<tc>, window_params = [{}, {pipeline_mode = #tpu.pipeline_mode<synchronous>, transform_indices = @transform_1, window_bounds = array<i64: 27, 128, 128>}, {pipeline_mode = #tpu.pipeline_mode<synchronous>, transform_indices = @transform_2, window_bounds = array<i64: 1, 128>}, {transform_indices = @transform_3, window_bounds = array<i64: 1, 4, 8, 8, 128>}, {transform_indices = @transform_4, window_bounds = array<i64: 1, 1, 2, 128>}]} {
    %c4_i32 = arith.constant 4 : i32
    %0 = arith.muli %arg1, %c4_i32 : i32
    %1 = tpu.assume_multiple %0, 4 : i32
    %c0_i32 = arith.constant 0 : i32
    %c0_i32_0 = arith.constant 0 : i32
    %c0_i32_1 = arith.constant 0 : i32
    %c0_i32_2 = arith.constant 0 : i32
    %2 = tpu.memref_slice %arg2[%arg0, %1, %c0_i32_0, %c0_i32_1, %c0_i32_2] : memref<2x10x10x10x128xf32, #tpu.memory_space<any>> -> memref<1x6x10x10x128xf32, #tpu.memory_space<any>>
    %3 = tpu.memref_squeeze %2 : memref<1x6x10x10x128xf32, #tpu.memory_space<any>> -> memref<6x10x10x128xf32, #tpu.memory_space<any>>
    %4 = tpu.memref_slice %arg9[%c0_i32] : memref<1x!tpu.dma_semaphore, #tpu.memory_space<semaphore_mem>> -> memref<1x!tpu.dma_semaphore, #tpu.memory_space<semaphore_mem>>
    %5 = tpu.memref_squeeze %4 : memref<1x!tpu.dma_semaphore, #tpu.memory_space<semaphore_mem>> -> memref<!tpu.dma_semaphore, #tpu.memory_space<semaphore_mem>>
    tpu.enqueue_dma source(%3 : memref<6x10x10x128xf32, #tpu.memory_space<any>>) target(%arg7 : memref<6x10x10x128xf32, #tpu.memory_space<vmem>>) target_semaphore(%5 : memref<!tpu.dma_semaphore, #tpu.memory_space<semaphore_mem>>)
    %c0_i32_3 = arith.constant 0 : i32
    %c0_i32_4 = arith.constant 0 : i32
    %c0_i32_5 = arith.constant 0 : i32
    %c0_i32_6 = arith.constant 0 : i32
    %6 = tpu.memref_slice %arg2[%arg0, %1, %c0_i32_4, %c0_i32_5, %c0_i32_6] : memref<2x10x10x10x128xf32, #tpu.memory_space<any>> -> memref<1x6x10x10x128xf32, #tpu.memory_space<any>>
    %7 = tpu.memref_squeeze %6 : memref<1x6x10x10x128xf32, #tpu.memory_space<any>> -> memref<6x10x10x128xf32, #tpu.memory_space<any>>
    %8 = tpu.memref_slice %arg9[%c0_i32_3] : memref<1x!tpu.dma_semaphore, #tpu.memory_space<semaphore_mem>> -> memref<1x!tpu.dma_semaphore, #tpu.memory_space<semaphore_mem>>
    %9 = tpu.memref_squeeze %8 : memref<1x!tpu.dma_semaphore, #tpu.memory_space<semaphore_mem>> -> memref<!tpu.dma_semaphore, #tpu.memory_space<semaphore_mem>>
    tpu.wait_dma2 semaphore(%9 : memref<!tpu.dma_semaphore, #tpu.memory_space<semaphore_mem>>) src(%7 : memref<6x10x10x128xf32, #tpu.memory_space<any>>) dst(%arg7 : memref<6x10x10x128xf32, #tpu.memory_space<vmem>>)
    %cst = arith.constant 0.000000e+00 : f32
    %10 = vector.broadcast %cst : f32 to vector<256x128xf32>
    %c0 = arith.constant 0 : index
    %c0_7 = arith.constant 0 : index
    %11 = vector.load %arg8[%c0, %c0_7] : memref<256x128xf32, #tpu.memory_space<vmem>>, vector<256x128xf32>
    tpu.vector_store %arg8[%c0, %c0_7], %10 {strides = array<i32>} : memref<256x128xf32, #tpu.memory_space<vmem>>, vector<256x128xf32>,
    %c0_8 = arith.constant 0 : index
    %c0_9 = arith.constant 0 : index
    %c0_10 = arith.constant 0 : index
    %c0_11 = arith.constant 0 : index
    %12 = vector.load %arg7[%c0_8, %c0_9, %c0_10, %c0_11] : memref<6x10x10x128xf32, #tpu.memory_space<vmem>>, vector<4x8x8x128xf32>
    %c0_12 = arith.constant 0 : index
    %c0_13 = arith.constant 0 : index
    %13 = vector.load %arg8[%c0_12, %c0_13] : memref<256x128xf32, #tpu.memory_space<vmem>>, vector<256x128xf32>
    %14 = vector.shape_cast %12 : vector<4x8x8x128xf32> to vector<256x128xf32>
    %c0_14 = arith.constant 0 : index
    %c0_15 = arith.constant 0 : index
    %c0_16 = arith.constant 0 : index
    %15 = vector.load %arg3[%c0_14, %c0_15, %c0_16] : memref<27x128x128xf32, #tpu.memory_space<vmem>>, vector<1x128x128xf32>
    %16 = vector.shape_cast %15 : vector<1x128x128xf32> to vector<128x128xf32>
    %cst_17 = arith.constant dense<0.000000e+00> : vector<256x128xf32>
    %17 = tpu.matmul %14, %16, %cst_17 {dimension_numbers = #tpu.dot_dimension_numbers<[1], [0], [0], [1], [0, 0, 1, 1], [], []>} : vector<256x128xf32>, vector<128x128xf32>, vector<256x128xf32> -> vector<256x128xf32>
    %18 = arith.addf %13, %17 : vector<256x128xf32>
    %c0_18 = arith.constant 0 : index
    %c0_19 = arith.constant 0 : index
    %19 = vector.load %arg8[%c0_18, %c0_19] : memref<256x128xf32, #tpu.memory_space<vmem>>, vector<256x128xf32>
    tpu.vector_store %arg8[%c0_18, %c0_19], %18 {strides = array<i32>} : memref<256x128xf32, #tpu.memory_space<vmem>>, vector<256x128xf32>,
    %c0_20 = arith.constant 0 : index
    %c0_21 = arith.constant 0 : index
    %c1 = arith.constant 1 : index
    %c0_22 = arith.constant 0 : index
    %20 = vector.load %arg7[%c0_20, %c0_21, %c1, %c0_22] : memref<6x10x10x128xf32, #tpu.memory_space<vmem>>, vector<4x8x8x128xf32>
    %c0_23 = arith.constant 0 : index
    %c0_24 = arith.constant 0 : index
    %21 = vector.load %arg8[%c0_23, %c0_24] : memref<256x128xf32, #tpu.memory_space<vmem>>, vector<256x128xf32>
    %22 = vector.shape_cast %20 : vector<4x8x8x128xf32> to vector<256x128xf32>
    %c1_25 = arith.constant 1 : index
    %c0_26 = arith.constant 0 : index
    %c0_27 = arith.constant 0 : index
    %23 = vector.load %arg3[%c1_25, %c0_26, %c0_27] : memref<27x128x128xf32, #tpu.memory_space<vmem>>, vector<1x128x128xf32>
    %24 = vector.shape_cast %23 : vector<1x128x128xf32> to vector<128x128xf32>
    %cst_28 = arith.constant dense<0.000000e+00> : vector<256x128xf32>
    %25 = tpu.matmul %22, %24, %cst_28 {dimension_numbers = #tpu.dot_dimension_numbers<[1], [0], [0], [1], [0, 0, 1, 1], [], []>} : vector<256x128xf32>, vector<128x128xf32>, vector<256x128xf32> -> vector<256x128xf32>
    %26 = arith.addf %21, %25 : vector<256x128xf32>
    %c0_29 = arith.constant 0 : index
    %c0_30 = arith.constant 0 : index
    %27 = vector.load %arg8[%c0_29, %c0_30] : memref<256x128xf32, #tpu.memory_space<vmem>>, vector<256x128xf32>
    tpu.vector_store %arg8[%c0_29, %c0_30], %26 {strides = array<i32>} : memref<256x128xf32, #tpu.memory_space<vmem>>, vector<256x128xf32>,
    %c0_31 = arith.constant 0 : index
    %c0_32 = arith.constant 0 : index
    %c2 = arith.constant 2 : index
    %c0_33 = arith.constant 0 : index
    %28 = vector.load %arg7[%c0_31, %c0_32, %c2, %c0_33] : memref<6x10x10x128xf32, #tpu.memory_space<vmem>>, vector<4x8x8x128xf32>
    %c0_34 = arith.constant 0 : index
    %c0_35 = arith.constant 0 : index
    %29 = vector.load %arg8[%c0_34, %c0_35] : memref<256x128xf32, #tpu.memory_space<vmem>>, vector<256x128xf32>
    %30 = vector.shape_cast %28 : vector<4x8x8x128xf32> to vector<256x128xf32>
    %c2_36 = arith.constant 2 : index
    %c0_37 = arith.constant 0 : index
    %c0_38 = arith.constant 0 : index
    %31 = vector.load %arg3[%c2_36, %c0_37, %c0_38] : memref<27x128x128xf32, #tpu.memory_space<vmem>>, vector<1x128x128xf32>
    %32 = vector.shape_cast %31 : vector<1x128x128xf32> to vector<128x128xf32>
    %cst_39 = arith.constant dense<0.000000e+00> : vector<256x128xf32>
    %33 = tpu.matmul %30, %32, %cst_39 {dimension_numbers = #tpu.dot_dimension_numbers<[1], [0], [0], [1], [0, 0, 1, 1], [], []>} : vector<256x128xf32>, vector<128x128xf32>, vector<256x128xf32> -> vector<256x128xf32>
    %34 = arith.addf %29, %33 : vector<256x128xf32>
    %c0_40 = arith.constant 0 : index
    %c0_41 = arith.constant 0 : index
    %35 = vector.load %arg8[%c0_40, %c0_41] : memref<256x128xf32, #tpu.memory_space<vmem>>, vector<256x128xf32>
    tpu.vector_store %arg8[%c0_40, %c0_41], %34 {strides = array<i32>} : memref<256x128xf32, #tpu.memory_space<vmem>>, vector<256x128xf32>,
    %c0_42 = arith.constant 0 : index
    %c1_43 = arith.constant 1 : index
    %c0_44 = arith.constant 0 : index
    %c0_45 = arith.constant 0 : index
    %36 = vector.load %arg7[%c0_42, %c1_43, %c0_44, %c0_45] : memref<6x10x10x128xf32, #tpu.memory_space<vmem>>, vector<4x8x8x128xf32>
    %c0_46 = arith.constant 0 : index
    %c0_47 = arith.constant 0 : index
    %37 = vector.load %arg8[%c0_46, %c0_47] : memref<256x128xf32, #tpu.memory_space<vmem>>, vector<256x128xf32>
    %38 = vector.shape_cast %36 : vector<4x8x8x128xf32> to vector<256x128xf32>
    %c3 = arith.constant 3 : index
    %c0_48 = arith.constant 0 : index
    %c0_49 = arith.constant 0 : index
    %39 = vector.load %arg3[%c3, %c0_48, %c0_49] : memref<27x128x128xf32, #tpu.memory_space<vmem>>, vector<1x128x128xf32>
    %40 = vector.shape_cast %39 : vector<1x128x128xf32> to vector<128x128xf32>
    %cst_50 = arith.constant dense<0.000000e+00> : vector<256x128xf32>
    %41 = tpu.matmul %38, %40, %cst_50 {dimension_numbers = #tpu.dot_dimension_numbers<[1], [0], [0], [1], [0, 0, 1, 1], [], []>} : vector<256x128xf32>, vector<128x128xf32>, vector<256x128xf32> -> vector<256x128xf32>
    %42 = arith.addf %37, %41 : vector<256x128xf32>
    %c0_51 = arith.constant 0 : index
    %c0_52 = arith.constant 0 : index
    %43 = vector.load %arg8[%c0_51, %c0_52] : memref<256x128xf32, #tpu.memory_space<vmem>>, vector<256x128xf32>
    tpu.vector_store %arg8[%c0_51, %c0_52], %42 {strides = array<i32>} : memref<256x128xf32, #tpu.memory_space<vmem>>, vector<256x128xf32>,
    %c0_53 = arith.constant 0 : index
    %c1_54 = arith.constant 1 : index
    %c1_55 = arith.constant 1 : index
    %c0_56 = arith.constant 0 : index
    %44 = vector.load %arg7[%c0_53, %c1_54, %c1_55, %c0_56] : memref<6x10x10x128xf32, #tpu.memory_space<vmem>>, vector<4x8x8x128xf32>
    %c0_57 = arith.constant 0 : index
    %c0_58 = arith.constant 0 : index
    %45 = vector.load %arg8[%c0_57, %c0_58] : memref<256x128xf32, #tpu.memory_space<vmem>>, vector<256x128xf32>
    %46 = vector.shape_cast %44 : vector<4x8x8x128xf32> to vector<256x128xf32>
    %c4 = arith.constant 4 : index
    %c0_59 = arith.constant 0 : index
    %c0_60 = arith.constant 0 : index
    %47 = vector.load %arg3[%c4, %c0_59, %c0_60] : memref<27x128x128xf32, #tpu.memory_space<vmem>>, vector<1x128x128xf32>
    %48 = vector.shape_cast %47 : vector<1x128x128xf32> to vector<128x128xf32>
    %cst_61 = arith.constant dense<0.000000e+00> : vector<256x128xf32>
    %49 = tpu.matmul %46, %48, %cst_61 {dimension_numbers = #tpu.dot_dimension_numbers<[1], [0], [0], [1], [0, 0, 1, 1], [], []>} : vector<256x128xf32>, vector<128x128xf32>, vector<256x128xf32> -> vector<256x128xf32>
    %50 = arith.addf %45, %49 : vector<256x128xf32>
    %c0_62 = arith.constant 0 : index
    %c0_63 = arith.constant 0 : index
    %51 = vector.load %arg8[%c0_62, %c0_63] : memref<256x128xf32, #tpu.memory_space<vmem>>, vector<256x128xf32>
    tpu.vector_store %arg8[%c0_62, %c0_63], %50 {strides = array<i32>} : memref<256x128xf32, #tpu.memory_space<vmem>>, vector<256x128xf32>,
    %c0_64 = arith.constant 0 : index
    %c1_65 = arith.constant 1 : index
    %c2_66 = arith.constant 2 : index
    %c0_67 = arith.constant 0 : index
    %52 = vector.load %arg7[%c0_64, %c1_65, %c2_66, %c0_67] : memref<6x10x10x128xf32, #tpu.memory_space<vmem>>, vector<4x8x8x128xf32>
    %c0_68 = arith.constant 0 : index
    %c0_69 = arith.constant 0 : index
    %53 = vector.load %arg8[%c0_68, %c0_69] : memref<256x128xf32, #tpu.memory_space<vmem>>, vector<256x128xf32>
    %54 = vector.shape_cast %52 : vector<4x8x8x128xf32> to vector<256x128xf32>
    %c5 = arith.constant 5 : index
    %c0_70 = arith.constant 0 : index
    %c0_71 = arith.constant 0 : index
    %55 = vector.load %arg3[%c5, %c0_70, %c0_71] : memref<27x128x128xf32, #tpu.memory_space<vmem>>, vector<1x128x128xf32>
    %56 = vector.shape_cast %55 : vector<1x128x128xf32> to vector<128x128xf32>
    %cst_72 = arith.constant dense<0.000000e+00> : vector<256x128xf32>
    %57 = tpu.matmul %54, %56, %cst_72 {dimension_numbers = #tpu.dot_dimension_numbers<[1], [0], [0], [1], [0, 0, 1, 1], [], []>} : vector<256x128xf32>, vector<128x128xf32>, vector<256x128xf32> -> vector<256x128xf32>
    %58 = arith.addf %53, %57 : vector<256x128xf32>
    %c0_73 = arith.constant 0 : index
    %c0_74 = arith.constant 0 : index
    %59 = vector.load %arg8[%c0_73, %c0_74] : memref<256x128xf32, #tpu.memory_space<vmem>>, vector<256x128xf32>
    tpu.vector_store %arg8[%c0_73, %c0_74], %58 {strides = array<i32>} : memref<256x128xf32, #tpu.memory_space<vmem>>, vector<256x128xf32>,
    %c0_75 = arith.constant 0 : index
    %c2_76 = arith.constant 2 : index
    %c0_77 = arith.constant 0 : index
    %c0_78 = arith.constant 0 : index
    %60 = vector.load %arg7[%c0_75, %c2_76, %c0_77, %c0_78] : memref<6x10x10x128xf32, #tpu.memory_space<vmem>>, vector<4x8x8x128xf32>
    %c0_79 = arith.constant 0 : index
    %c0_80 = arith.constant 0 : index
    %61 = vector.load %arg8[%c0_79, %c0_80] : memref<256x128xf32, #tpu.memory_space<vmem>>, vector<256x128xf32>
    %62 = vector.shape_cast %60 : vector<4x8x8x128xf32> to vector<256x128xf32>
    %c6 = arith.constant 6 : index
    %c0_81 = arith.constant 0 : index
    %c0_82 = arith.constant 0 : index
    %63 = vector.load %arg3[%c6, %c0_81, %c0_82] : memref<27x128x128xf32, #tpu.memory_space<vmem>>, vector<1x128x128xf32>
    %64 = vector.shape_cast %63 : vector<1x128x128xf32> to vector<128x128xf32>
    %cst_83 = arith.constant dense<0.000000e+00> : vector<256x128xf32>
    %65 = tpu.matmul %62, %64, %cst_83 {dimension_numbers = #tpu.dot_dimension_numbers<[1], [0], [0], [1], [0, 0, 1, 1], [], []>} : vector<256x128xf32>, vector<128x128xf32>, vector<256x128xf32> -> vector<256x128xf32>
    %66 = arith.addf %61, %65 : vector<256x128xf32>
    %c0_84 = arith.constant 0 : index
    %c0_85 = arith.constant 0 : index
    %67 = vector.load %arg8[%c0_84, %c0_85] : memref<256x128xf32, #tpu.memory_space<vmem>>, vector<256x128xf32>
    tpu.vector_store %arg8[%c0_84, %c0_85], %66 {strides = array<i32>} : memref<256x128xf32, #tpu.memory_space<vmem>>, vector<256x128xf32>,
    %c0_86 = arith.constant 0 : index
    %c2_87 = arith.constant 2 : index
    %c1_88 = arith.constant 1 : index
    %c0_89 = arith.constant 0 : index
    %68 = vector.load %arg7[%c0_86, %c2_87, %c1_88, %c0_89] : memref<6x10x10x128xf32, #tpu.memory_space<vmem>>, vector<4x8x8x128xf32>
    %c0_90 = arith.constant 0 : index
    %c0_91 = arith.constant 0 : index
    %69 = vector.load %arg8[%c0_90, %c0_91] : memref<256x128xf32, #tpu.memory_space<vmem>>, vector<256x128xf32>
    %70 = vector.shape_cast %68 : vector<4x8x8x128xf32> to vector<256x128xf32>
    %c7 = arith.constant 7 : index
    %c0_92 = arith.constant 0 : index
    %c0_93 = arith.constant 0 : index
    %71 = vector.load %arg3[%c7, %c0_92, %c0_93] : memref<27x128x128xf32, #tpu.memory_space<vmem>>, vector<1x128x128xf32>
    %72 = vector.shape_cast %71 : vector<1x128x128xf32> to vector<128x128xf32>
    %cst_94 = arith.constant dense<0.000000e+00> : vector<256x128xf32>
    %73 = tpu.matmul %70, %72, %cst_94 {dimension_numbers = #tpu.dot_dimension_numbers<[1], [0], [0], [1], [0, 0, 1, 1], [], []>} : vector<256x128xf32>, vector<128x128xf32>, vector<256x128xf32> -> vector<256x128xf32>
    %74 = arith.addf %69, %73 : vector<256x128xf32>
    %c0_95 = arith.constant 0 : index
    %c0_96 = arith.constant 0 : index
    %75 = vector.load %arg8[%c0_95, %c0_96] : memref<256x128xf32, #tpu.memory_space<vmem>>, vector<256x128xf32>
    tpu.vector_store %arg8[%c0_95, %c0_96], %74 {strides = array<i32>} : memref<256x128xf32, #tpu.memory_space<vmem>>, vector<256x128xf32>,
    %c0_97 = arith.constant 0 : index
    %c2_98 = arith.constant 2 : index
    %c2_99 = arith.constant 2 : index
    %c0_100 = arith.constant 0 : index
    %76 = vector.load %arg7[%c0_97, %c2_98, %c2_99, %c0_100] : memref<6x10x10x128xf32, #tpu.memory_space<vmem>>, vector<4x8x8x128xf32>
    %c0_101 = arith.constant 0 : index
    %c0_102 = arith.constant 0 : index
    %77 = vector.load %arg8[%c0_101, %c0_102] : memref<256x128xf32, #tpu.memory_space<vmem>>, vector<256x128xf32>
    %78 = vector.shape_cast %76 : vector<4x8x8x128xf32> to vector<256x128xf32>
    %c8 = arith.constant 8 : index
    %c0_103 = arith.constant 0 : index
    %c0_104 = arith.constant 0 : index
    %79 = vector.load %arg3[%c8, %c0_103, %c0_104] : memref<27x128x128xf32, #tpu.memory_space<vmem>>, vector<1x128x128xf32>
    %80 = vector.shape_cast %79 : vector<1x128x128xf32> to vector<128x128xf32>
    %cst_105 = arith.constant dense<0.000000e+00> : vector<256x128xf32>
    %81 = tpu.matmul %78, %80, %cst_105 {dimension_numbers = #tpu.dot_dimension_numbers<[1], [0], [0], [1], [0, 0, 1, 1], [], []>} : vector<256x128xf32>, vector<128x128xf32>, vector<256x128xf32> -> vector<256x128xf32>
    %82 = arith.addf %77, %81 : vector<256x128xf32>
    %c0_106 = arith.constant 0 : index
    %c0_107 = arith.constant 0 : index
    %83 = vector.load %arg8[%c0_106, %c0_107] : memref<256x128xf32, #tpu.memory_space<vmem>>, vector<256x128xf32>
    tpu.vector_store %arg8[%c0_106, %c0_107], %82 {strides = array<i32>} : memref<256x128xf32, #tpu.memory_space<vmem>>, vector<256x128xf32>,
    %c1_108 = arith.constant 1 : index
    %c0_109 = arith.constant 0 : index
    %c0_110 = arith.constant 0 : index
    %c0_111 = arith.constant 0 : index
    %84 = vector.load %arg7[%c1_108, %c0_109, %c0_110, %c0_111] : memref<6x10x10x128xf32, #tpu.memory_space<vmem>>, vector<4x8x8x128xf32>
    %c0_112 = arith.constant 0 : index
    %c0_113 = arith.constant 0 : index
    %85 = vector.load %arg8[%c0_112, %c0_113] : memref<256x128xf32, #tpu.memory_space<vmem>>, vector<256x128xf32>
    %86 = vector.shape_cast %84 : vector<4x8x8x128xf32> to vector<256x128xf32>
    %c9 = arith.constant 9 : index
    %c0_114 = arith.constant 0 : index
    %c0_115 = arith.constant 0 : index
    %87 = vector.load %arg3[%c9, %c0_114, %c0_115] : memref<27x128x128xf32, #tpu.memory_space<vmem>>, vector<1x128x128xf32>
    %88 = vector.shape_cast %87 : vector<1x128x128xf32> to vector<128x128xf32>
    %cst_116 = arith.constant dense<0.000000e+00> : vector<256x128xf32>
    %89 = tpu.matmul %86, %88, %cst_116 {dimension_numbers = #tpu.dot_dimension_numbers<[1], [0], [0], [1], [0, 0, 1, 1], [], []>} : vector<256x128xf32>, vector<128x128xf32>, vector<256x128xf32> -> vector<256x128xf32>
    %90 = arith.addf %85, %89 : vector<256x128xf32>
    %c0_117 = arith.constant 0 : index
    %c0_118 = arith.constant 0 : index
    %91 = vector.load %arg8[%c0_117, %c0_118] : memref<256x128xf32, #tpu.memory_space<vmem>>, vector<256x128xf32>
    tpu.vector_store %arg8[%c0_117, %c0_118], %90 {strides = array<i32>} : memref<256x128xf32, #tpu.memory_space<vmem>>, vector<256x128xf32>,
    %c1_119 = arith.constant 1 : index
    %c0_120 = arith.constant 0 : index
    %c1_121 = arith.constant 1 : index
    %c0_122 = arith.constant 0 : index
    %92 = vector.load %arg7[%c1_119, %c0_120, %c1_121, %c0_122] : memref<6x10x10x128xf32, #tpu.memory_space<vmem>>, vector<4x8x8x128xf32>
    %c0_123 = arith.constant 0 : index
    %c0_124 = arith.constant 0 : index
    %93 = vector.load %arg8[%c0_123, %c0_124] : memref<256x128xf32, #tpu.memory_space<vmem>>, vector<256x128xf32>
    %94 = vector.shape_cast %92 : vector<4x8x8x128xf32> to vector<256x128xf32>
    %c10 = arith.constant 10 : index
    %c0_125 = arith.constant 0 : index
    %c0_126 = arith.constant 0 : index
    %95 = vector.load %arg3[%c10, %c0_125, %c0_126] : memref<27x128x128xf32, #tpu.memory_space<vmem>>, vector<1x128x128xf32>
    %96 = vector.shape_cast %95 : vector<1x128x128xf32> to vector<128x128xf32>
    %cst_127 = arith.constant dense<0.000000e+00> : vector<256x128xf32>
    %97 = tpu.matmul %94, %96, %cst_127 {dimension_numbers = #tpu.dot_dimension_numbers<[1], [0], [0], [1], [0, 0, 1, 1], [], []>} : vector<256x128xf32>, vector<128x128xf32>, vector<256x128xf32> -> vector<256x128xf32>
    %98 = arith.addf %93, %97 : vector<256x128xf32>
    %c0_128 = arith.constant 0 : index
    %c0_129 = arith.constant 0 : index
    %99 = vector.load %arg8[%c0_128, %c0_129] : memref<256x128xf32, #tpu.memory_space<vmem>>, vector<256x128xf32>
    tpu.vector_store %arg8[%c0_128, %c0_129], %98 {strides = array<i32>} : memref<256x128xf32, #tpu.memory_space<vmem>>, vector<256x128xf32>,
    %c1_130 = arith.constant 1 : index
    %c0_131 = arith.constant 0 : index
    %c2_132 = arith.constant 2 : index
    %c0_133 = arith.constant 0 : index
    %100 = vector.load %arg7[%c1_130, %c0_131, %c2_132, %c0_133] : memref<6x10x10x128xf32, #tpu.memory_space<vmem>>, vector<4x8x8x128xf32>
    %c0_134 = arith.constant 0 : index
    %c0_135 = arith.constant 0 : index
    %101 = vector.load %arg8[%c0_134, %c0_135] : memref<256x128xf32, #tpu.memory_space<vmem>>, vector<256x128xf32>
    %102 = vector.shape_cast %100 : vector<4x8x8x128xf32> to vector<256x128xf32>
    %c11 = arith.constant 11 : index
    %c0_136 = arith.constant 0 : index
    %c0_137 = arith.constant 0 : index
    %103 = vector.load %arg3[%c11, %c0_136, %c0_137] : memref<27x128x128xf32, #tpu.memory_space<vmem>>, vector<1x128x128xf32>
    %104 = vector.shape_cast %103 : vector<1x128x128xf32> to vector<128x128xf32>
    %cst_138 = arith.constant dense<0.000000e+00> : vector<256x128xf32>
    %105 = tpu.matmul %102, %104, %cst_138 {dimension_numbers = #tpu.dot_dimension_numbers<[1], [0], [0], [1], [0, 0, 1, 1], [], []>} : vector<256x128xf32>, vector<128x128xf32>, vector<256x128xf32> -> vector<256x128xf32>
    %106 = arith.addf %101, %105 : vector<256x128xf32>
    %c0_139 = arith.constant 0 : index
    %c0_140 = arith.constant 0 : index
    %107 = vector.load %arg8[%c0_139, %c0_140] : memref<256x128xf32, #tpu.memory_space<vmem>>, vector<256x128xf32>
    tpu.vector_store %arg8[%c0_139, %c0_140], %106 {strides = array<i32>} : memref<256x128xf32, #tpu.memory_space<vmem>>, vector<256x128xf32>,
    %c1_141 = arith.constant 1 : index
    %c1_142 = arith.constant 1 : index
    %c0_143 = arith.constant 0 : index
    %c0_144 = arith.constant 0 : index
    %108 = vector.load %arg7[%c1_141, %c1_142, %c0_143, %c0_144] : memref<6x10x10x128xf32, #tpu.memory_space<vmem>>, vector<4x8x8x128xf32>
    %c0_145 = arith.constant 0 : index
    %c0_146 = arith.constant 0 : index
    %109 = vector.load %arg8[%c0_145, %c0_146] : memref<256x128xf32, #tpu.memory_space<vmem>>, vector<256x128xf32>
    %110 = vector.shape_cast %108 : vector<4x8x8x128xf32> to vector<256x128xf32>
    %c12 = arith.constant 12 : index
    %c0_147 = arith.constant 0 : index
    %c0_148 = arith.constant 0 : index
    %111 = vector.load %arg3[%c12, %c0_147, %c0_148] : memref<27x128x128xf32, #tpu.memory_space<vmem>>, vector<1x128x128xf32>
    %112 = vector.shape_cast %111 : vector<1x128x128xf32> to vector<128x128xf32>
    %cst_149 = arith.constant dense<0.000000e+00> : vector<256x128xf32>
    %113 = tpu.matmul %110, %112, %cst_149 {dimension_numbers = #tpu.dot_dimension_numbers<[1], [0], [0], [1], [0, 0, 1, 1], [], []>} : vector<256x128xf32>, vector<128x128xf32>, vector<256x128xf32> -> vector<256x128xf32>
    %114 = arith.addf %109, %113 : vector<256x128xf32>
    %c0_150 = arith.constant 0 : index
    %c0_151 = arith.constant 0 : index
    %115 = vector.load %arg8[%c0_150, %c0_151] : memref<256x128xf32, #tpu.memory_space<vmem>>, vector<256x128xf32>
    tpu.vector_store %arg8[%c0_150, %c0_151], %114 {strides = array<i32>} : memref<256x128xf32, #tpu.memory_space<vmem>>, vector<256x128xf32>,
    %c1_152 = arith.constant 1 : index
    %c1_153 = arith.constant 1 : index
    %c1_154 = arith.constant 1 : index
    %c0_155 = arith.constant 0 : index
    %116 = vector.load %arg7[%c1_152, %c1_153, %c1_154, %c0_155] : memref<6x10x10x128xf32, #tpu.memory_space<vmem>>, vector<4x8x8x128xf32>
    %c0_156 = arith.constant 0 : index
    %c0_157 = arith.constant 0 : index
    %117 = vector.load %arg8[%c0_156, %c0_157] : memref<256x128xf32, #tpu.memory_space<vmem>>, vector<256x128xf32>
    %118 = vector.shape_cast %116 : vector<4x8x8x128xf32> to vector<256x128xf32>
    %c13 = arith.constant 13 : index
    %c0_158 = arith.constant 0 : index
    %c0_159 = arith.constant 0 : index
    %119 = vector.load %arg3[%c13, %c0_158, %c0_159] : memref<27x128x128xf32, #tpu.memory_space<vmem>>, vector<1x128x128xf32>
    %120 = vector.shape_cast %119 : vector<1x128x128xf32> to vector<128x128xf32>
    %cst_160 = arith.constant dense<0.000000e+00> : vector<256x128xf32>
    %121 = tpu.matmul %118, %120, %cst_160 {dimension_numbers = #tpu.dot_dimension_numbers<[1], [0], [0], [1], [0, 0, 1, 1], [], []>} : vector<256x128xf32>, vector<128x128xf32>, vector<256x128xf32> -> vector<256x128xf32>
    %122 = arith.addf %117, %121 : vector<256x128xf32>
    %c0_161 = arith.constant 0 : index
    %c0_162 = arith.constant 0 : index
    %123 = vector.load %arg8[%c0_161, %c0_162] : memref<256x128xf32, #tpu.memory_space<vmem>>, vector<256x128xf32>
    tpu.vector_store %arg8[%c0_161, %c0_162], %122 {strides = array<i32>} : memref<256x128xf32, #tpu.memory_space<vmem>>, vector<256x128xf32>,
    %c1_163 = arith.constant 1 : index
    %c1_164 = arith.constant 1 : index
    %c2_165 = arith.constant 2 : index
    %c0_166 = arith.constant 0 : index
    %124 = vector.load %arg7[%c1_163, %c1_164, %c2_165, %c0_166] : memref<6x10x10x128xf32, #tpu.memory_space<vmem>>, vector<4x8x8x128xf32>
    %c0_167 = arith.constant 0 : index
    %c0_168 = arith.constant 0 : index
    %125 = vector.load %arg8[%c0_167, %c0_168] : memref<256x128xf32, #tpu.memory_space<vmem>>, vector<256x128xf32>
    %126 = vector.shape_cast %124 : vector<4x8x8x128xf32> to vector<256x128xf32>
    %c14 = arith.constant 14 : index
    %c0_169 = arith.constant 0 : index
    %c0_170 = arith.constant 0 : index
    %127 = vector.load %arg3[%c14, %c0_169, %c0_170] : memref<27x128x128xf32, #tpu.memory_space<vmem>>, vector<1x128x128xf32>
    %128 = vector.shape_cast %127 : vector<1x128x128xf32> to vector<128x128xf32>
    %cst_171 = arith.constant dense<0.000000e+00> : vector<256x128xf32>
    %129 = tpu.matmul %126, %128, %cst_171 {dimension_numbers = #tpu.dot_dimension_numbers<[1], [0], [0], [1], [0, 0, 1, 1], [], []>} : vector<256x128xf32>, vector<128x128xf32>, vector<256x128xf32> -> vector<256x128xf32>
    %130 = arith.addf %125, %129 : vector<256x128xf32>
    %c0_172 = arith.constant 0 : index
    %c0_173 = arith.constant 0 : index
    %131 = vector.load %arg8[%c0_172, %c0_173] : memref<256x128xf32, #tpu.memory_space<vmem>>, vector<256x128xf32>
    tpu.vector_store %arg8[%c0_172, %c0_173], %130 {strides = array<i32>} : memref<256x128xf32, #tpu.memory_space<vmem>>, vector<256x128xf32>,
    %c1_174 = arith.constant 1 : index
    %c2_175 = arith.constant 2 : index
    %c0_176 = arith.constant 0 : index
    %c0_177 = arith.constant 0 : index
    %132 = vector.load %arg7[%c1_174, %c2_175, %c0_176, %c0_177] : memref<6x10x10x128xf32, #tpu.memory_space<vmem>>, vector<4x8x8x128xf32>
    %c0_178 = arith.constant 0 : index
    %c0_179 = arith.constant 0 : index
    %133 = vector.load %arg8[%c0_178, %c0_179] : memref<256x128xf32, #tpu.memory_space<vmem>>, vector<256x128xf32>
    %134 = vector.shape_cast %132 : vector<4x8x8x128xf32> to vector<256x128xf32>
    %c15 = arith.constant 15 : index
    %c0_180 = arith.constant 0 : index
    %c0_181 = arith.constant 0 : index
    %135 = vector.load %arg3[%c15, %c0_180, %c0_181] : memref<27x128x128xf32, #tpu.memory_space<vmem>>, vector<1x128x128xf32>
    %136 = vector.shape_cast %135 : vector<1x128x128xf32> to vector<128x128xf32>
    %cst_182 = arith.constant dense<0.000000e+00> : vector<256x128xf32>
    %137 = tpu.matmul %134, %136, %cst_182 {dimension_numbers = #tpu.dot_dimension_numbers<[1], [0], [0], [1], [0, 0, 1, 1], [], []>} : vector<256x128xf32>, vector<128x128xf32>, vector<256x128xf32> -> vector<256x128xf32>
    %138 = arith.addf %133, %137 : vector<256x128xf32>
    %c0_183 = arith.constant 0 : index
    %c0_184 = arith.constant 0 : index
    %139 = vector.load %arg8[%c0_183, %c0_184] : memref<256x128xf32, #tpu.memory_space<vmem>>, vector<256x128xf32>
    tpu.vector_store %arg8[%c0_183, %c0_184], %138 {strides = array<i32>} : memref<256x128xf32, #tpu.memory_space<vmem>>, vector<256x128xf32>,
    %c1_185 = arith.constant 1 : index
    %c2_186 = arith.constant 2 : index
    %c1_187 = arith.constant 1 : index
    %c0_188 = arith.constant 0 : index
    %140 = vector.load %arg7[%c1_185, %c2_186, %c1_187, %c0_188] : memref<6x10x10x128xf32, #tpu.memory_space<vmem>>, vector<4x8x8x128xf32>
    %c0_189 = arith.constant 0 : index
    %c0_190 = arith.constant 0 : index
    %141 = vector.load %arg8[%c0_189, %c0_190] : memref<256x128xf32, #tpu.memory_space<vmem>>, vector<256x128xf32>
    %142 = vector.shape_cast %140 : vector<4x8x8x128xf32> to vector<256x128xf32>
    %c16 = arith.constant 16 : index
    %c0_191 = arith.constant 0 : index
    %c0_192 = arith.constant 0 : index
    %143 = vector.load %arg3[%c16, %c0_191, %c0_192] : memref<27x128x128xf32, #tpu.memory_space<vmem>>, vector<1x128x128xf32>
    %144 = vector.shape_cast %143 : vector<1x128x128xf32> to vector<128x128xf32>
    %cst_193 = arith.constant dense<0.000000e+00> : vector<256x128xf32>
    %145 = tpu.matmul %142, %144, %cst_193 {dimension_numbers = #tpu.dot_dimension_numbers<[1], [0], [0], [1], [0, 0, 1, 1], [], []>} : vector<256x128xf32>, vector<128x128xf32>, vector<256x128xf32> -> vector<256x128xf32>
    %146 = arith.addf %141, %145 : vector<256x128xf32>
    %c0_194 = arith.constant 0 : index
    %c0_195 = arith.constant 0 : index
    %147 = vector.load %arg8[%c0_194, %c0_195] : memref<256x128xf32, #tpu.memory_space<vmem>>, vector<256x128xf32>
    tpu.vector_store %arg8[%c0_194, %c0_195], %146 {strides = array<i32>} : memref<256x128xf32, #tpu.memory_space<vmem>>, vector<256x128xf32>,
    %c1_196 = arith.constant 1 : index
    %c2_197 = arith.constant 2 : index
    %c2_198 = arith.constant 2 : index
    %c0_199 = arith.constant 0 : index
    %148 = vector.load %arg7[%c1_196, %c2_197, %c2_198, %c0_199] : memref<6x10x10x128xf32, #tpu.memory_space<vmem>>, vector<4x8x8x128xf32>
    %c0_200 = arith.constant 0 : index
    %c0_201 = arith.constant 0 : index
    %149 = vector.load %arg8[%c0_200, %c0_201] : memref<256x128xf32, #tpu.memory_space<vmem>>, vector<256x128xf32>
    %150 = vector.shape_cast %148 : vector<4x8x8x128xf32> to vector<256x128xf32>
    %c17 = arith.constant 17 : index
    %c0_202 = arith.constant 0 : index
    %c0_203 = arith.constant 0 : index
    %151 = vector.load %arg3[%c17, %c0_202, %c0_203] : memref<27x128x128xf32, #tpu.memory_space<vmem>>, vector<1x128x128xf32>
    %152 = vector.shape_cast %151 : vector<1x128x128xf32> to vector<128x128xf32>
    %cst_204 = arith.constant dense<0.000000e+00> : vector<256x128xf32>
    %153 = tpu.matmul %150, %152, %cst_204 {dimension_numbers = #tpu.dot_dimension_numbers<[1], [0], [0], [1], [0, 0, 1, 1], [], []>} : vector<256x128xf32>, vector<128x128xf32>, vector<256x128xf32> -> vector<256x128xf32>
    %154 = arith.addf %149, %153 : vector<256x128xf32>
    %c0_205 = arith.constant 0 : index
    %c0_206 = arith.constant 0 : index
    %155 = vector.load %arg8[%c0_205, %c0_206] : memref<256x128xf32, #tpu.memory_space<vmem>>, vector<256x128xf32>
    tpu.vector_store %arg8[%c0_205, %c0_206], %154 {strides = array<i32>} : memref<256x128xf32, #tpu.memory_space<vmem>>, vector<256x128xf32>,
    %c2_207 = arith.constant 2 : index
    %c0_208 = arith.constant 0 : index
    %c0_209 = arith.constant 0 : index
    %c0_210 = arith.constant 0 : index
    %156 = vector.load %arg7[%c2_207, %c0_208, %c0_209, %c0_210] : memref<6x10x10x128xf32, #tpu.memory_space<vmem>>, vector<4x8x8x128xf32>
    %c0_211 = arith.constant 0 : index
    %c0_212 = arith.constant 0 : index
    %157 = vector.load %arg8[%c0_211, %c0_212] : memref<256x128xf32, #tpu.memory_space<vmem>>, vector<256x128xf32>
    %158 = vector.shape_cast %156 : vector<4x8x8x128xf32> to vector<256x128xf32>
    %c18 = arith.constant 18 : index
    %c0_213 = arith.constant 0 : index
    %c0_214 = arith.constant 0 : index
    %159 = vector.load %arg3[%c18, %c0_213, %c0_214] : memref<27x128x128xf32, #tpu.memory_space<vmem>>, vector<1x128x128xf32>
    %160 = vector.shape_cast %159 : vector<1x128x128xf32> to vector<128x128xf32>
    %cst_215 = arith.constant dense<0.000000e+00> : vector<256x128xf32>
    %161 = tpu.matmul %158, %160, %cst_215 {dimension_numbers = #tpu.dot_dimension_numbers<[1], [0], [0], [1], [0, 0, 1, 1], [], []>} : vector<256x128xf32>, vector<128x128xf32>, vector<256x128xf32> -> vector<256x128xf32>
    %162 = arith.addf %157, %161 : vector<256x128xf32>
    %c0_216 = arith.constant 0 : index
    %c0_217 = arith.constant 0 : index
    %163 = vector.load %arg8[%c0_216, %c0_217] : memref<256x128xf32, #tpu.memory_space<vmem>>, vector<256x128xf32>
    tpu.vector_store %arg8[%c0_216, %c0_217], %162 {strides = array<i32>} : memref<256x128xf32, #tpu.memory_space<vmem>>, vector<256x128xf32>,
    %c2_218 = arith.constant 2 : index
    %c0_219 = arith.constant 0 : index
    %c1_220 = arith.constant 1 : index
    %c0_221 = arith.constant 0 : index
    %164 = vector.load %arg7[%c2_218, %c0_219, %c1_220, %c0_221] : memref<6x10x10x128xf32, #tpu.memory_space<vmem>>, vector<4x8x8x128xf32>
    %c0_222 = arith.constant 0 : index
    %c0_223 = arith.constant 0 : index
    %165 = vector.load %arg8[%c0_222, %c0_223] : memref<256x128xf32, #tpu.memory_space<vmem>>, vector<256x128xf32>
    %166 = vector.shape_cast %164 : vector<4x8x8x128xf32> to vector<256x128xf32>
    %c19 = arith.constant 19 : index
    %c0_224 = arith.constant 0 : index
    %c0_225 = arith.constant 0 : index
    %167 = vector.load %arg3[%c19, %c0_224, %c0_225] : memref<27x128x128xf32, #tpu.memory_space<vmem>>, vector<1x128x128xf32>
    %168 = vector.shape_cast %167 : vector<1x128x128xf32> to vector<128x128xf32>
    %cst_226 = arith.constant dense<0.000000e+00> : vector<256x128xf32>
    %169 = tpu.matmul %166, %168, %cst_226 {dimension_numbers = #tpu.dot_dimension_numbers<[1], [0], [0], [1], [0, 0, 1, 1], [], []>} : vector<256x128xf32>, vector<128x128xf32>, vector<256x128xf32> -> vector<256x128xf32>
    %170 = arith.addf %165, %169 : vector<256x128xf32>
    %c0_227 = arith.constant 0 : index
    %c0_228 = arith.constant 0 : index
    %171 = vector.load %arg8[%c0_227, %c0_228] : memref<256x128xf32, #tpu.memory_space<vmem>>, vector<256x128xf32>
    tpu.vector_store %arg8[%c0_227, %c0_228], %170 {strides = array<i32>} : memref<256x128xf32, #tpu.memory_space<vmem>>, vector<256x128xf32>,
    %c2_229 = arith.constant 2 : index
    %c0_230 = arith.constant 0 : index
    %c2_231 = arith.constant 2 : index
    %c0_232 = arith.constant 0 : index
    %172 = vector.load %arg7[%c2_229, %c0_230, %c2_231, %c0_232] : memref<6x10x10x128xf32, #tpu.memory_space<vmem>>, vector<4x8x8x128xf32>
    %c0_233 = arith.constant 0 : index
    %c0_234 = arith.constant 0 : index
    %173 = vector.load %arg8[%c0_233, %c0_234] : memref<256x128xf32, #tpu.memory_space<vmem>>, vector<256x128xf32>
    %174 = vector.shape_cast %172 : vector<4x8x8x128xf32> to vector<256x128xf32>
    %c20 = arith.constant 20 : index
    %c0_235 = arith.constant 0 : index
    %c0_236 = arith.constant 0 : index
    %175 = vector.load %arg3[%c20, %c0_235, %c0_236] : memref<27x128x128xf32, #tpu.memory_space<vmem>>, vector<1x128x128xf32>
    %176 = vector.shape_cast %175 : vector<1x128x128xf32> to vector<128x128xf32>
    %cst_237 = arith.constant dense<0.000000e+00> : vector<256x128xf32>
    %177 = tpu.matmul %174, %176, %cst_237 {dimension_numbers = #tpu.dot_dimension_numbers<[1], [0], [0], [1], [0, 0, 1, 1], [], []>} : vector<256x128xf32>, vector<128x128xf32>, vector<256x128xf32> -> vector<256x128xf32>
    %178 = arith.addf %173, %177 : vector<256x128xf32>
    %c0_238 = arith.constant 0 : index
    %c0_239 = arith.constant 0 : index
    %179 = vector.load %arg8[%c0_238, %c0_239] : memref<256x128xf32, #tpu.memory_space<vmem>>, vector<256x128xf32>
    tpu.vector_store %arg8[%c0_238, %c0_239], %178 {strides = array<i32>} : memref<256x128xf32, #tpu.memory_space<vmem>>, vector<256x128xf32>,
    %c2_240 = arith.constant 2 : index
    %c1_241 = arith.constant 1 : index
    %c0_242 = arith.constant 0 : index
    %c0_243 = arith.constant 0 : index
    %180 = vector.load %arg7[%c2_240, %c1_241, %c0_242, %c0_243] : memref<6x10x10x128xf32, #tpu.memory_space<vmem>>, vector<4x8x8x128xf32>
    %c0_244 = arith.constant 0 : index
    %c0_245 = arith.constant 0 : index
    %181 = vector.load %arg8[%c0_244, %c0_245] : memref<256x128xf32, #tpu.memory_space<vmem>>, vector<256x128xf32>
    %182 = vector.shape_cast %180 : vector<4x8x8x128xf32> to vector<256x128xf32>
    %c21 = arith.constant 21 : index
    %c0_246 = arith.constant 0 : index
    %c0_247 = arith.constant 0 : index
    %183 = vector.load %arg3[%c21, %c0_246, %c0_247] : memref<27x128x128xf32, #tpu.memory_space<vmem>>, vector<1x128x128xf32>
    %184 = vector.shape_cast %183 : vector<1x128x128xf32> to vector<128x128xf32>
    %cst_248 = arith.constant dense<0.000000e+00> : vector<256x128xf32>
    %185 = tpu.matmul %182, %184, %cst_248 {dimension_numbers = #tpu.dot_dimension_numbers<[1], [0], [0], [1], [0, 0, 1, 1], [], []>} : vector<256x128xf32>, vector<128x128xf32>, vector<256x128xf32> -> vector<256x128xf32>
    %186 = arith.addf %181, %185 : vector<256x128xf32>
    %c0_249 = arith.constant 0 : index
    %c0_250 = arith.constant 0 : index
    %187 = vector.load %arg8[%c0_249, %c0_250] : memref<256x128xf32, #tpu.memory_space<vmem>>, vector<256x128xf32>
    tpu.vector_store %arg8[%c0_249, %c0_250], %186 {strides = array<i32>} : memref<256x128xf32, #tpu.memory_space<vmem>>, vector<256x128xf32>,
    %c2_251 = arith.constant 2 : index
    %c1_252 = arith.constant 1 : index
    %c1_253 = arith.constant 1 : index
    %c0_254 = arith.constant 0 : index
    %188 = vector.load %arg7[%c2_251, %c1_252, %c1_253, %c0_254] : memref<6x10x10x128xf32, #tpu.memory_space<vmem>>, vector<4x8x8x128xf32>
    %c0_255 = arith.constant 0 : index
    %c0_256 = arith.constant 0 : index
    %189 = vector.load %arg8[%c0_255, %c0_256] : memref<256x128xf32, #tpu.memory_space<vmem>>, vector<256x128xf32>
    %190 = vector.shape_cast %188 : vector<4x8x8x128xf32> to vector<256x128xf32>
    %c22 = arith.constant 22 : index
    %c0_257 = arith.constant 0 : index
    %c0_258 = arith.constant 0 : index
    %191 = vector.load %arg3[%c22, %c0_257, %c0_258] : memref<27x128x128xf32, #tpu.memory_space<vmem>>, vector<1x128x128xf32>
    %192 = vector.shape_cast %191 : vector<1x128x128xf32> to vector<128x128xf32>
    %cst_259 = arith.constant dense<0.000000e+00> : vector<256x128xf32>
    %193 = tpu.matmul %190, %192, %cst_259 {dimension_numbers = #tpu.dot_dimension_numbers<[1], [0], [0], [1], [0, 0, 1, 1], [], []>} : vector<256x128xf32>, vector<128x128xf32>, vector<256x128xf32> -> vector<256x128xf32>
    %194 = arith.addf %189, %193 : vector<256x128xf32>
    %c0_260 = arith.constant 0 : index
    %c0_261 = arith.constant 0 : index
    %195 = vector.load %arg8[%c0_260, %c0_261] : memref<256x128xf32, #tpu.memory_space<vmem>>, vector<256x128xf32>
    tpu.vector_store %arg8[%c0_260, %c0_261], %194 {strides = array<i32>} : memref<256x128xf32, #tpu.memory_space<vmem>>, vector<256x128xf32>,
    %c2_262 = arith.constant 2 : index
    %c1_263 = arith.constant 1 : index
    %c2_264 = arith.constant 2 : index
    %c0_265 = arith.constant 0 : index
    %196 = vector.load %arg7[%c2_262, %c1_263, %c2_264, %c0_265] : memref<6x10x10x128xf32, #tpu.memory_space<vmem>>, vector<4x8x8x128xf32>
    %c0_266 = arith.constant 0 : index
    %c0_267 = arith.constant 0 : index
    %197 = vector.load %arg8[%c0_266, %c0_267] : memref<256x128xf32, #tpu.memory_space<vmem>>, vector<256x128xf32>
    %198 = vector.shape_cast %196 : vector<4x8x8x128xf32> to vector<256x128xf32>
    %c23 = arith.constant 23 : index
    %c0_268 = arith.constant 0 : index
    %c0_269 = arith.constant 0 : index
    %199 = vector.load %arg3[%c23, %c0_268, %c0_269] : memref<27x128x128xf32, #tpu.memory_space<vmem>>, vector<1x128x128xf32>
    %200 = vector.shape_cast %199 : vector<1x128x128xf32> to vector<128x128xf32>
    %cst_270 = arith.constant dense<0.000000e+00> : vector<256x128xf32>
    %201 = tpu.matmul %198, %200, %cst_270 {dimension_numbers = #tpu.dot_dimension_numbers<[1], [0], [0], [1], [0, 0, 1, 1], [], []>} : vector<256x128xf32>, vector<128x128xf32>, vector<256x128xf32> -> vector<256x128xf32>
    %202 = arith.addf %197, %201 : vector<256x128xf32>
    %c0_271 = arith.constant 0 : index
    %c0_272 = arith.constant 0 : index
    %203 = vector.load %arg8[%c0_271, %c0_272] : memref<256x128xf32, #tpu.memory_space<vmem>>, vector<256x128xf32>
    tpu.vector_store %arg8[%c0_271, %c0_272], %202 {strides = array<i32>} : memref<256x128xf32, #tpu.memory_space<vmem>>, vector<256x128xf32>,
    %c2_273 = arith.constant 2 : index
    %c2_274 = arith.constant 2 : index
    %c0_275 = arith.constant 0 : index
    %c0_276 = arith.constant 0 : index
    %204 = vector.load %arg7[%c2_273, %c2_274, %c0_275, %c0_276] : memref<6x10x10x128xf32, #tpu.memory_space<vmem>>, vector<4x8x8x128xf32>
    %c0_277 = arith.constant 0 : index
    %c0_278 = arith.constant 0 : index
    %205 = vector.load %arg8[%c0_277, %c0_278] : memref<256x128xf32, #tpu.memory_space<vmem>>, vector<256x128xf32>
    %206 = vector.shape_cast %204 : vector<4x8x8x128xf32> to vector<256x128xf32>
    %c24 = arith.constant 24 : index
    %c0_279 = arith.constant 0 : index
    %c0_280 = arith.constant 0 : index
    %207 = vector.load %arg3[%c24, %c0_279, %c0_280] : memref<27x128x128xf32, #tpu.memory_space<vmem>>, vector<1x128x128xf32>
    %208 = vector.shape_cast %207 : vector<1x128x128xf32> to vector<128x128xf32>
    %cst_281 = arith.constant dense<0.000000e+00> : vector<256x128xf32>
    %209 = tpu.matmul %206, %208, %cst_281 {dimension_numbers = #tpu.dot_dimension_numbers<[1], [0], [0], [1], [0, 0, 1, 1], [], []>} : vector<256x128xf32>, vector<128x128xf32>, vector<256x128xf32> -> vector<256x128xf32>
    %210 = arith.addf %205, %209 : vector<256x128xf32>
    %c0_282 = arith.constant 0 : index
    %c0_283 = arith.constant 0 : index
    %211 = vector.load %arg8[%c0_282, %c0_283] : memref<256x128xf32, #tpu.memory_space<vmem>>, vector<256x128xf32>
    tpu.vector_store %arg8[%c0_282, %c0_283], %210 {strides = array<i32>} : memref<256x128xf32, #tpu.memory_space<vmem>>, vector<256x128xf32>,
    %c2_284 = arith.constant 2 : index
    %c2_285 = arith.constant 2 : index
    %c1_286 = arith.constant 1 : index
    %c0_287 = arith.constant 0 : index
    %212 = vector.load %arg7[%c2_284, %c2_285, %c1_286, %c0_287] : memref<6x10x10x128xf32, #tpu.memory_space<vmem>>, vector<4x8x8x128xf32>
    %c0_288 = arith.constant 0 : index
    %c0_289 = arith.constant 0 : index
    %213 = vector.load %arg8[%c0_288, %c0_289] : memref<256x128xf32, #tpu.memory_space<vmem>>, vector<256x128xf32>
    %214 = vector.shape_cast %212 : vector<4x8x8x128xf32> to vector<256x128xf32>
    %c25 = arith.constant 25 : index
    %c0_290 = arith.constant 0 : index
    %c0_291 = arith.constant 0 : index
    %215 = vector.load %arg3[%c25, %c0_290, %c0_291] : memref<27x128x128xf32, #tpu.memory_space<vmem>>, vector<1x128x128xf32>
    %216 = vector.shape_cast %215 : vector<1x128x128xf32> to vector<128x128xf32>
    %cst_292 = arith.constant dense<0.000000e+00> : vector<256x128xf32>
    %217 = tpu.matmul %214, %216, %cst_292 {dimension_numbers = #tpu.dot_dimension_numbers<[1], [0], [0], [1], [0, 0, 1, 1], [], []>} : vector<256x128xf32>, vector<128x128xf32>, vector<256x128xf32> -> vector<256x128xf32>
    %218 = arith.addf %213, %217 : vector<256x128xf32>
    %c0_293 = arith.constant 0 : index
    %c0_294 = arith.constant 0 : index
    %219 = vector.load %arg8[%c0_293, %c0_294] : memref<256x128xf32, #tpu.memory_space<vmem>>, vector<256x128xf32>
    tpu.vector_store %arg8[%c0_293, %c0_294], %218 {strides = array<i32>} : memref<256x128xf32, #tpu.memory_space<vmem>>, vector<256x128xf32>,
    %c2_295 = arith.constant 2 : index
    %c2_296 = arith.constant 2 : index
    %c2_297 = arith.constant 2 : index
    %c0_298 = arith.constant 0 : index
    %220 = vector.load %arg7[%c2_295, %c2_296, %c2_297, %c0_298] : memref<6x10x10x128xf32, #tpu.memory_space<vmem>>, vector<4x8x8x128xf32>
    %c0_299 = arith.constant 0 : index
    %c0_300 = arith.constant 0 : index
    %221 = vector.load %arg8[%c0_299, %c0_300] : memref<256x128xf32, #tpu.memory_space<vmem>>, vector<256x128xf32>
    %222 = vector.shape_cast %220 : vector<4x8x8x128xf32> to vector<256x128xf32>
    %c26 = arith.constant 26 : index
    %c0_301 = arith.constant 0 : index
    %c0_302 = arith.constant 0 : index
    %223 = vector.load %arg3[%c26, %c0_301, %c0_302] : memref<27x128x128xf32, #tpu.memory_space<vmem>>, vector<1x128x128xf32>
    %224 = vector.shape_cast %223 : vector<1x128x128xf32> to vector<128x128xf32>
    %cst_303 = arith.constant dense<0.000000e+00> : vector<256x128xf32>
    %225 = tpu.matmul %222, %224, %cst_303 {dimension_numbers = #tpu.dot_dimension_numbers<[1], [0], [0], [1], [0, 0, 1, 1], [], []>} : vector<256x128xf32>, vector<128x128xf32>, vector<256x128xf32> -> vector<256x128xf32>
    %226 = arith.addf %221, %225 : vector<256x128xf32>
    %c0_304 = arith.constant 0 : index
    %c0_305 = arith.constant 0 : index
    %227 = vector.load %arg8[%c0_304, %c0_305] : memref<256x128xf32, #tpu.memory_space<vmem>>, vector<256x128xf32>
    tpu.vector_store %arg8[%c0_304, %c0_305], %226 {strides = array<i32>} : memref<256x128xf32, #tpu.memory_space<vmem>>, vector<256x128xf32>,
    %c0_306 = arith.constant 0 : index
    %c0_307 = arith.constant 0 : index
    %228 = vector.load %arg8[%c0_306, %c0_307] : memref<256x128xf32, #tpu.memory_space<vmem>>, vector<256x128xf32>
    %c0_308 = arith.constant 0 : index
    %c0_309 = arith.constant 0 : index
    %229 = vector.load %arg4[%c0_308, %c0_309] : memref<1x128xf32, #tpu.memory_space<vmem>>, vector<1x128xf32>
    %230 = vector.broadcast %229 : vector<1x128xf32> to vector<256x128xf32>
    %231 = arith.addf %228, %230 : vector<256x128xf32>
    %cst_310 = arith.constant dense<0.000000e+00> : vector<128xf32>
    %232 = vector.multi_reduction <add>, %231, %cst_310 [0] : vector<256x128xf32> to vector<128xf32>
    %233 = vector.shape_cast %232 : vector<128xf32> to vector<1x128xf32>
    %234 = arith.mulf %231, %231 : vector<256x128xf32>
    %cst_311 = arith.constant dense<0.000000e+00> : vector<128xf32>
    %235 = vector.multi_reduction <add>, %234, %cst_311 [0] : vector<256x128xf32> to vector<128xf32>
    %236 = vector.shape_cast %235 : vector<128xf32> to vector<1x128xf32>
    %237 = tpu.concatenate %233, %236 in 0 : vector<1x128xf32>, vector<1x128xf32> -> vector<2x128xf32>
    %c0_312 = arith.constant 0 : index
    %c0_313 = arith.constant 0 : index
    %c0_314 = arith.constant 0 : index
    %c0_315 = arith.constant 0 : index
    %238 = vector.load %arg6[%c0_312, %c0_313, %c0_314, %c0_315] : memref<1x1x2x128xf32, #tpu.memory_space<vmem>>, vector<1x1x2x128xf32>
    %239 = vector.shape_cast %238 : vector<1x1x2x128xf32> to vector<2x128xf32>
    %240 = vector.shape_cast %237 : vector<2x128xf32> to vector<1x1x2x128xf32>
    tpu.vector_store %arg6[%c0_312, %c0_313, %c0_314, %c0_315], %240 {strides = array<i32>} : memref<1x1x2x128xf32, #tpu.memory_space<vmem>>, vector<1x1x2x128xf32>,
    %241 = vector.shape_cast %231 : vector<256x128xf32> to vector<4x8x8x128xf32>
    %c0_316 = arith.constant 0 : index
    %c0_317 = arith.constant 0 : index
    %c0_318 = arith.constant 0 : index
    %c0_319 = arith.constant 0 : index
    %c0_320 = arith.constant 0 : index
    %242 = vector.load %arg5[%c0_316, %c0_317, %c0_318, %c0_319, %c0_320] : memref<1x4x8x8x128xf32, #tpu.memory_space<vmem>>, vector<1x4x8x8x128xf32>
    %243 = vector.shape_cast %242 : vector<1x4x8x8x128xf32> to vector<4x8x8x128xf32>
    %244 = vector.shape_cast %241 : vector<4x8x8x128xf32> to vector<1x4x8x8x128xf32>
    tpu.vector_store %arg5[%c0_316, %c0_317, %c0_318, %c0_319, %c0_320], %244 {strides = array<i32>} : memref<1x4x8x8x128xf32, #tpu.memory_space<vmem>>, vector<1x4x8x8x128xf32>,
    return
  }
  func.func @transform_1(%arg0: i32, %arg1: i32) -> (i32, i32, i32) {
    %c0_i32 = arith.constant 0 : i32
    %c0_i32_0 = arith.constant 0 : i32
    %c0_i32_1 = arith.constant 0 : i32
    %c0_i32_2 = arith.constant 0 : i32
    return %c0_i32, %c0_i32_0, %c0_i32_1 : i32, i32, i32
  }
  func.func @transform_2(%arg0: i32, %arg1: i32) -> (i32, i32) {
    %c0_i32 = arith.constant 0 : i32
    %c0_i32_0 = arith.constant 0 : i32
    %c0_i32_1 = arith.constant 0 : i32
    return %c0_i32, %c0_i32_0 : i32, i32
  }
  func.func @transform_3(%arg0: i32, %arg1: i32) -> (i32, i32, i32, i32, i32) {
    %c0_i32 = arith.constant 0 : i32
    %c0_i32_0 = arith.constant 0 : i32
    %c0_i32_1 = arith.constant 0 : i32
    %c0_i32_2 = arith.constant 0 : i32
    return %arg0, %arg1, %c0_i32, %c0_i32_0, %c0_i32_1 : i32, i32, i32, i32, i32
  }
  func.func @transform_4(%arg0: i32, %arg1: i32) -> (i32, i32, i32, i32) {
    %c0_i32 = arith.constant 0 : i32
    %c0_i32_0 = arith.constant 0 : i32
    %c0_i32_1 = arith.constant 0 : i32
    return %arg0, %arg1, %c0_i32, %c0_i32_0 : i32, i32, i32, i32
  }
}

module attributes {stable_mosaic.version = 11 : i64} {
  func.func @_bn_relu_kernel(%arg0: i32, %arg1: i32, %arg2: memref<1x4x8x8x128xf32, #tpu.memory_space<vmem>>, %arg3: memref<1x1x1x1x128xf32, #tpu.memory_space<vmem>>, %arg4: memref<1x1x1x1x128xf32, #tpu.memory_space<vmem>>, %arg5: memref<1x4x8x8x128xf32, #tpu.memory_space<vmem>>) attributes {dimension_semantics = [#tpu.dimension_semantics<parallel>, #tpu.dimension_semantics<parallel>], iteration_bounds = array<i64: 2, 2>, scalar_prefetch = 0 : i64, scratch_operands = 0 : i64, tpu.core_type = #tpu.core_type<tc>, window_params = [{transform_indices = @transform_0, window_bounds = array<i64: 1, 4, 8, 8, 128>}, {pipeline_mode = #tpu.pipeline_mode<synchronous>, transform_indices = @transform_1, window_bounds = array<i64: 1, 1, 1, 1, 128>}, {pipeline_mode = #tpu.pipeline_mode<synchronous>, transform_indices = @transform_2, window_bounds = array<i64: 1, 1, 1, 1, 128>}, {transform_indices = @transform_3, window_bounds = array<i64: 1, 4, 8, 8, 128>}]} {
    %c0 = arith.constant 0 : index
    %c0_0 = arith.constant 0 : index
    %c0_1 = arith.constant 0 : index
    %c0_2 = arith.constant 0 : index
    %c0_3 = arith.constant 0 : index
    %0 = vector.load %arg2[%c0, %c0_0, %c0_1, %c0_2, %c0_3] : memref<1x4x8x8x128xf32, #tpu.memory_space<vmem>>, vector<1x4x8x8x128xf32>
    %c0_4 = arith.constant 0 : index
    %c0_5 = arith.constant 0 : index
    %c0_6 = arith.constant 0 : index
    %c0_7 = arith.constant 0 : index
    %c0_8 = arith.constant 0 : index
    %1 = vector.load %arg3[%c0_4, %c0_5, %c0_6, %c0_7, %c0_8] : memref<1x1x1x1x128xf32, #tpu.memory_space<vmem>>, vector<1x1x1x1x128xf32>
    %2 = vector.broadcast %1 : vector<1x1x1x1x128xf32> to vector<1x4x8x8x128xf32>
    %3 = arith.mulf %0, %2 : vector<1x4x8x8x128xf32>
    %c0_9 = arith.constant 0 : index
    %c0_10 = arith.constant 0 : index
    %c0_11 = arith.constant 0 : index
    %c0_12 = arith.constant 0 : index
    %c0_13 = arith.constant 0 : index
    %4 = vector.load %arg4[%c0_9, %c0_10, %c0_11, %c0_12, %c0_13] : memref<1x1x1x1x128xf32, #tpu.memory_space<vmem>>, vector<1x1x1x1x128xf32>
    %5 = vector.broadcast %4 : vector<1x1x1x1x128xf32> to vector<1x4x8x8x128xf32>
    %6 = arith.addf %3, %5 : vector<1x4x8x8x128xf32>
    %cst = arith.constant 0.000000e+00 : f32
    %7 = vector.broadcast %cst : f32 to vector<1x4x8x8x128xf32>
    %8 = arith.maximumf %6, %7 : vector<1x4x8x8x128xf32>
    %c0_14 = arith.constant 0 : index
    %c0_15 = arith.constant 0 : index
    %c0_16 = arith.constant 0 : index
    %c0_17 = arith.constant 0 : index
    %c0_18 = arith.constant 0 : index
    %9 = vector.load %arg5[%c0_14, %c0_15, %c0_16, %c0_17, %c0_18] : memref<1x4x8x8x128xf32, #tpu.memory_space<vmem>>, vector<1x4x8x8x128xf32>
    tpu.vector_store %arg5[%c0_14, %c0_15, %c0_16, %c0_17, %c0_18], %8 {strides = array<i32>} : memref<1x4x8x8x128xf32, #tpu.memory_space<vmem>>, vector<1x4x8x8x128xf32>,
    return
  }
  func.func @transform_0(%arg0: i32, %arg1: i32) -> (i32, i32, i32, i32, i32) {
    %c0_i32 = arith.constant 0 : i32
    %c0_i32_0 = arith.constant 0 : i32
    %c0_i32_1 = arith.constant 0 : i32
    %c0_i32_2 = arith.constant 0 : i32
    return %arg0, %arg1, %c0_i32, %c0_i32_0, %c0_i32_1 : i32, i32, i32, i32, i32
  }
  func.func @transform_1(%arg0: i32, %arg1: i32) -> (i32, i32, i32, i32, i32) {
    %c0_i32 = arith.constant 0 : i32
    %c0_i32_0 = arith.constant 0 : i32
    %c0_i32_1 = arith.constant 0 : i32
    %c0_i32_2 = arith.constant 0 : i32
    %c0_i32_3 = arith.constant 0 : i32
    %c0_i32_4 = arith.constant 0 : i32
    return %c0_i32, %c0_i32_0, %c0_i32_1, %c0_i32_2, %c0_i32_3 : i32, i32, i32, i32, i32
  }
  func.func @transform_2(%arg0: i32, %arg1: i32) -> (i32, i32, i32, i32, i32) {
    %c0_i32 = arith.constant 0 : i32
    %c0_i32_0 = arith.constant 0 : i32
    %c0_i32_1 = arith.constant 0 : i32
    %c0_i32_2 = arith.constant 0 : i32
    %c0_i32_3 = arith.constant 0 : i32
    %c0_i32_4 = arith.constant 0 : i32
    return %c0_i32, %c0_i32_0, %c0_i32_1, %c0_i32_2, %c0_i32_3 : i32, i32, i32, i32, i32
  }
  func.func @transform_3(%arg0: i32, %arg1: i32) -> (i32, i32, i32, i32, i32) {
    %c0_i32 = arith.constant 0 : i32
    %c0_i32_0 = arith.constant 0 : i32
    %c0_i32_1 = arith.constant 0 : i32
    %c0_i32_2 = arith.constant 0 : i32
    return %arg0, %arg1, %c0_i32, %c0_i32_0, %c0_i32_1 : i32, i32, i32, i32, i32
  }
}

</mosaic_0001>

<bundles_post_ra>
// kernel: _lambda_.5
= control target key start
LH: loop header
LB: loop body
LE: loop exit
PB: predicated region body
PF: predicated region fallthrough
CT: control target
= control target key end

     0   :  { %s605_s12 = smov 0   ;;  %s607_s13 = smov 0   ;;  %s798_s0 = inlined_call_operand.vmem [shape: f32[2,8,8,8,128], index: 0, kind: input, shape index: {}]   ;;  %s799_s1 = inlined_call_operand.vmem [shape: f32[1,1,1,1,128], index: 1, kind: input, shape index: {}]   ;;  %s800_s2 = inlined_call_operand.vmem [shape: f32[1,1,1,1,128], index: 2, kind: input, shape index: {}]   ;;  %s801_s3 = inlined_call_operand.vmem [shape: f32[2,8,8,8,128], index: 3, kind: output, shape index: {}]  }
   0x1   :  { %s609_s14 = smov 0   ;;  %s611_s15 = smov 0  }
   0x2   :  { %s613_s16 = smov 0  }
   0x3 LB: > { %s22_s17 = sadd.s32 1, %s575_s14  ;;  %s25_s18 = sadd.s32 1, %s579_s15  ;;  %s583_s16 = sphi %s613_s16, %s13_s16   ;;  %s579_s15 = sphi %s611_s15, %s805_s15   ;;  %s575_s14 = sphi %s609_s14, %s804_s14   ;;  %s571_s13 = sphi %s607_s13, %s803_s13   ;;  %s567_s12 = sphi %s605_s12, %s802_s12  }
   0x4   : > { %p23_p0 = scmp.ge.s32.totalorder %s22_s17, 2  ;;  %p492_p1 = scmp.ge.s32.totalorder %s583_s16, 1 }
   0x5   : > { %p159_p2 = scmp.lt.s32.totalorder %s583_s16, 5 }
   0x6   : > { %s807_s17 = smov (%p23_p0, %s22_s17), 0  ;;  %s809_s18 = smov (!%p23_p0, %s25_s18), %s579_s15 }
   0x7   : > { %p160_p3 = pnand %p492_p1, %p159_p2  ;;  %p27_p4 = scmp.ge.s32.totalorder %s809_s18, 2 }
   0x8   : > { %s493_s19 = sshll.u32 (!%p160_p3), %s567_s12, 2  ;;  %p194_p5 = scmp.lt.s32.totalorder (!%p160_p3), %s571_s13, 1 }
   0x9   : > { %s811_s18 = smov (%p27_p4, %s809_s18), 0  ;;  %163 = sbr.rel (%p160_p3) target bundleno = 49 (0x31), region = 32 }
   0xa   : > { %p196_p6 = scmp.lt.s32.totalorder (!%p160_p3), %s493_s19, 7 }
   0xe   : > { %s813_s13 = smov (!%p194_p5, %s571_s13), 1  ;;  %s815_s19 = smov (!%p196_p6, %s493_s19), 7  ;;  %v638_v0 = vld [vmem:[%s799_s1] ss:$0 sm:$0xff] }
   0xf   : > { %s495_s20 = sshll.u32 %s813_s13, 6  ;;  %s494_s21 = sshll.u32 %s815_s19, 3  ;;  %v648_v1 = vld [vmem:[%s800_s2] ss:$0 sm:$0xff] }
  0x10   : > { %s200_s22 = sadd.s32 %s495_s20, %s494_s21 }
  0x11   : > { %s496_s23 = sshll.u32 %s200_s22, 3 }
  0x12   : > { %s643_s28 = scalar_lea.vmem %s798_s0, %s496_s23  ;;  %s671_s6 = scalar_lea.vmem %s801_s3, %s496_s23 }
  0x13   : > { %v215_v2 = vld [vmem:[%s643_s28] sm:$0xff]  ;;  %v216_v3 = vld [vmem:[%s643_s28 + $0x8] sm:$0xff]  ;;  %v217_v4 = vld [vmem:[%s643_s28 + $0x10] sm:$0xff] }
  0x14   : > { %v254_v5 = vmul.f32 %v638_v0, %v215_v2  ;;  %v255_v6 = vmul.f32 %v638_v0, %v216_v3  ;;  %v256_v7 = vmul.f32 %v638_v0, %v217_v4  ;;  %v218_v8 = vld [vmem:[%s643_s28 + $0x18] sm:$0xff]  ;;  %v219_v9 = vld [vmem:[%s643_s28 + $0x20] sm:$0xff]  ;;  %v220_v10 = vld [vmem:[%s643_s28 + $0x28] sm:$0xff] }
  0x15   : > { %v257_v11 = vmul.f32 %v638_v0, %v218_v8  ;;  %v258_v12 = vmul.f32 %v638_v0, %v219_v9  ;;  %v259_v13 = vmul.f32 %v638_v0, %v220_v10  ;;  %v221_v14 = vld [vmem:[%s643_s28 + $0x30] sm:$0xff]  ;;  %v222_v15 = vld [vmem:[%s643_s28 + $0x38] sm:$0xff]  ;;  %v223_v24 = vld [vmem:[%s643_s28 + $0x40] sm:$0xff] }
  0x16   : > { %v293_v16 = vadd.f32 %v648_v1, %v254_v5  ;;  %v294_v17 = vadd.f32 %v648_v1, %v255_v6  ;;  %v295_v18 = vadd.f32 %v648_v1, %v256_v7  ;;  %v260_v19 = vmul.f32 %v638_v0, %v221_v14  ;;  %v224_v25 = vld [vmem:[%s643_s28 + $0x48] sm:$0xff]  ;;  %v225_v26 = vld [vmem:[%s643_s28 + $0x50] sm:$0xff]  ;;  %v226_v31 = vld [vmem:[%s643_s28 + $0x58] sm:$0xff] }
  0x17   : > { %v296_v20 = vadd.f32 %v648_v1, %v257_v11  ;;  %v297_v21 = vadd.f32 %v648_v1, %v258_v12  ;;  %v298_v22 = vadd.f32 %v648_v1, %v259_v13  ;;  %v261_v23 = vmul.f32 %v638_v0, %v222_v15  ;;  %v227_v32 = vld [vmem:[%s643_s28 + $0x60] sm:$0xff]  ;;  %v228_v33 = vld [vmem:[%s643_s28 + $0x68] sm:$0xff]  ;;  %v229_v38 = vld [vmem:[%s643_s28 + $0x70] sm:$0xff] }
  0x18   : > { %v325_v27 = vmax.f32 %v293_v16, 0.0  ;;  %v326_v28 = vmax.f32 %v294_v17, 0.0  ;;  %v327_v29 = vmax.f32 %v295_v18, 0.0  ;;  %v299_v30 = vadd.f32 %v648_v1, %v260_v19  ;;  %v230_v43 = vld [vmem:[%s643_s28 + $0x78] sm:$0xff]  ;;  %v231_v56 = vld [vmem:[%s643_s28 + $0x80] sm:$0xff]  ;;  %v232_v57 = vld [vmem:[%s643_s28 + $0x88] sm:$0xff] }
  0x19   : > { %v328_v34 = vmax.f32 %v296_v20, 0.0  ;;  %v329_v35 = vmax.f32 %v297_v21, 0.0  ;;  %v330_v36 = vmax.f32 %v298_v22, 0.0  ;;  %v300_v37 = vadd.f32 %v648_v1, %v261_v23  ;;  %v233_v58 = vld [vmem:[%s643_s28 + $0x90] sm:$0xff]  ;;  %v234_v63 = vld [vmem:[%s643_s28 + $0x98] sm:$0xff]  ;;  %v235_v2 = vld [vmem:[%s643_s28 + $0xa0] sm:$0xff] }
  0x1a   : > { %357 = vst [vmem:[%s671_s6] sm:$0xff] %v325_v27  ;;  %358 = vst [vmem:[%s671_s6 + $0x8] sm:$0xff] %v326_v28  ;;  %v331_v39 = vmax.f32 %v299_v30, 0.0  ;;  %v262_v40 = vmul.f32 %v638_v0, %v223_v24  ;;  %v263_v41 = vmul.f32 %v638_v0, %v224_v25  ;;  %v264_v42 = vmul.f32 %v638_v0, %v225_v26  ;;  %v236_v3 = vld [vmem:[%s643_s28 + $0xa8] sm:$0xff]  ;;  %v237_v8 = vld [vmem:[%s643_s28 + $0xb0] sm:$0xff] }
  0x1b   : > { %359 = vst [vmem:[%s671_s6 + $0x10] sm:$0xff] %v327_v29  ;;  %360 = vst [vmem:[%s671_s6 + $0x18] sm:$0xff] %v328_v34  ;;  %v332_v44 = vmax.f32 %v300_v37, 0.0  ;;  %v265_v45 = vmul.f32 %v638_v0, %v226_v31  ;;  %v266_v46 = vmul.f32 %v638_v0, %v227_v32  ;;  %v267_v47 = vmul.f32 %v638_v0, %v228_v33  ;;  %v238_v13 = vld [vmem:[%s643_s28 + $0xb8] sm:$0xff]  ;;  %v239_v26 = vld [vmem:[%s643_s28 + $0xc0] sm:$0xff] }
  0x1c   : > { %361 = vst [vmem:[%s671_s6 + $0x20] sm:$0xff] %v329_v35  ;;  %362 = vst [vmem:[%s671_s6 + $0x28] sm:$0xff] %v330_v36  ;;  %v301_v48 = vadd.f32 %v648_v1, %v262_v40  ;;  %v302_v49 = vadd.f32 %v648_v1, %v263_v41  ;;  %v303_v50 = vadd.f32 %v648_v1, %v264_v42  ;;  %v240_v27 = vld [vmem:[%s643_s28 + $0xc8] sm:$0xff]  ;;  %v241_v28 = vld [vmem:[%s643_s28 + $0xd0] sm:$0xff] }
  0x1d   : > { %363 = vst [vmem:[%s671_s6 + $0x30] sm:$0xff] %v331_v39  ;;  %v268_v51 = vmul.f32 %v638_v0, %v229_v38  ;;  %364 = vst [vmem:[%s671_s6 + $0x38] sm:$0xff] %v332_v44  ;;  %v304_v52 = vadd.f32 %v648_v1, %v265_v45  ;;  %v305_v53 = vadd.f32 %v648_v1, %v266_v46  ;;  %v242_v33 = vld [vmem:[%s643_s28 + $0xd8] sm:$0xff]  ;;  %v243_v34 = vld [vmem:[%s643_s28 + $0xe0] sm:$0xff] }
  0x1e   : > { %v306_v54 = vadd.f32 %v648_v1, %v267_v47  ;;  %v269_v55 = vmul.f32 %v638_v0, %v230_v43  ;;  %v333_v59 = vmax.f32 %v301_v48, 0.0  ;;  %v334_v60 = vmax.f32 %v302_v49, 0.0  ;;  %v244_v35 = vld [vmem:[%s643_s28 + $0xe8] sm:$0xff]  ;;  %v245_v40 = vld [vmem:[%s643_s28 + $0xf0] sm:$0xff]  ;;  %v246_v45 = vld [vmem:[%s643_s28 + $0xf8] sm:$0xff] }
  0x1f   : > { %v335_v61 = vmax.f32 %v303_v50, 0.0  ;;  %v307_v62 = vadd.f32 %v648_v1, %v268_v51  ;;  %v336_v4 = vmax.f32 %v304_v52, 0.0  ;;  %v337_v5 = vmax.f32 %v305_v53, 0.0 }
  0x20   : > { %v338_v6 = vmax.f32 %v306_v54, 0.0  ;;  %v308_v7 = vadd.f32 %v648_v1, %v269_v55  ;;  %365 = vst [vmem:[%s671_s6 + $0x40] sm:$0xff] %v333_v59  ;;  %366 = vst [vmem:[%s671_s6 + $0x48] sm:$0xff] %v334_v60  ;;  %v270_v10 = vmul.f32 %v638_v0, %v231_v56  ;;  %v271_v11 = vmul.f32 %v638_v0, %v232_v57 }
  0x21   : > { %367 = vst [vmem:[%s671_s6 + $0x50] sm:$0xff] %v335_v61  ;;  %v339_v9 = vmax.f32 %v307_v62, 0.0  ;;  %v272_v12 = vmul.f32 %v638_v0, %v233_v58  ;;  %368 = vst [vmem:[%s671_s6 + $0x58] sm:$0xff] %v336_v4  ;;  %v273_v15 = vmul.f32 %v638_v0, %v234_v63  ;;  %v274_v16 = vmul.f32 %v638_v0, %v235_v2 }
  0x22   : > { %369 = vst [vmem:[%s671_s6 + $0x60] sm:$0xff] %v337_v5  ;;  %370 = vst [vmem:[%s671_s6 + $0x68] sm:$0xff] %v338_v6  ;;  %v340_v14 = vmax.f32 %v308_v7, 0.0  ;;  %v275_v17 = vmul.f32 %v638_v0, %v236_v3  ;;  %v309_v18 = vadd.f32 %v648_v1, %v270_v10  ;;  %v310_v19 = vadd.f32 %v648_v1, %v271_v11 }
  0x23   : > { %371 = vst [vmem:[%s671_s6 + $0x70] sm:$0xff] %v339_v9  ;;  %v311_v20 = vadd.f32 %v648_v1, %v272_v12  ;;  %v276_v21 = vmul.f32 %v638_v0, %v237_v8  ;;  %v312_v22 = vadd.f32 %v648_v1, %v273_v15  ;;  %v313_v23 = vadd.f32 %v648_v1, %v274_v16 }
  0x24   : > { %372 = vst [vmem:[%s671_s6 + $0x78] sm:$0xff] %v340_v14  ;;  %v314_v24 = vadd.f32 %v648_v1, %v275_v17  ;;  %v277_v25 = vmul.f32 %v638_v0, %v238_v13  ;;  %v341_v29 = vmax.f32 %v309_v18, 0.0  ;;  %v342_v30 = vmax.f32 %v310_v19, 0.0 }
  0x25   : > { %v343_v31 = vmax.f32 %v311_v20, 0.0  ;;  %v315_v32 = vadd.f32 %v648_v1, %v276_v21  ;;  %v344_v36 = vmax.f32 %v312_v22, 0.0  ;;  %v345_v37 = vmax.f32 %v313_v23, 0.0 }
  0x26   : > { %v346_v38 = vmax.f32 %v314_v24, 0.0  ;;  %v316_v39 = vadd.f32 %v648_v1, %v277_v25  ;;  %373 = vst [vmem:[%s671_s6 + $0x80] sm:$0xff] %v341_v29  ;;  %374 = vst [vmem:[%s671_s6 + $0x88] sm:$0xff] %v342_v30  ;;  %v278_v42 = vmul.f32 %v638_v0, %v239_v26  ;;  %v279_v43 = vmul.f32 %v638_v0, %v240_v27 }
  0x27   : > { %375 = vst [vmem:[%s671_s6 + $0x90] sm:$0xff] %v343_v31  ;;  %v347_v41 = vmax.f32 %v315_v32, 0.0  ;;  %v280_v44 = vmul.f32 %v638_v0, %v241_v28  ;;  %376 = vst [vmem:[%s671_s6 + $0x98] sm:$0xff] %v344_v36  ;;  %v281_v47 = vmul.f32 %v638_v0, %v242_v33  ;;  %v282_v48 = vmul.f32 %v638_v0, %v243_v34 }
  0x28   : > { %377 = vst [vmem:[%s671_s6 + $0xa0] sm:$0xff] %v345_v37  ;;  %378 = vst [vmem:[%s671_s6 + $0xa8] sm:$0xff] %v346_v38  ;;  %v348_v46 = vmax.f32 %v316_v39, 0.0  ;;  %v283_v49 = vmul.f32 %v638_v0, %v244_v35  ;;  %v317_v50 = vadd.f32 %v648_v1, %v278_v42  ;;  %v318_v51 = vadd.f32 %v648_v1, %v279_v43 }
  0x29   : > { %379 = vst [vmem:[%s671_s6 + $0xb0] sm:$0xff] %v347_v41  ;;  %v319_v52 = vadd.f32 %v648_v1, %v280_v44  ;;  %v284_v53 = vmul.f32 %v638_v0, %v245_v40  ;;  %v320_v54 = vadd.f32 %v648_v1, %v281_v47  ;;  %v321_v55 = vadd.f32 %v648_v1, %v282_v48 }
  0x2a   : > { %380 = vst [vmem:[%s671_s6 + $0xb8] sm:$0xff] %v348_v46  ;;  %v322_v56 = vadd.f32 %v648_v1, %v283_v49  ;;  %v285_v57 = vmul.f32 %v638_v0, %v246_v45  ;;  %v349_v58 = vmax.f32 %v317_v50, 0.0  ;;  %v350_v59 = vmax.f32 %v318_v51, 0.0 }
  0x2b   : > { %v351_v60 = vmax.f32 %v319_v52, 0.0  ;;  %v323_v61 = vadd.f32 %v648_v1, %v284_v53  ;;  %v352_v62 = vmax.f32 %v320_v54, 0.0  ;;  %v353_v63 = vmax.f32 %v321_v55, 0.0 }
  0x2c   : > { %v354_v2 = vmax.f32 %v322_v56, 0.0  ;;  %v324_v3 = vadd.f32 %v648_v1, %v285_v57  ;;  %381 = vst [vmem:[%s671_s6 + $0xc0] sm:$0xff] %v349_v58  ;;  %382 = vst [vmem:[%s671_s6 + $0xc8] sm:$0xff] %v350_v59 }
  0x2d   : > { %383 = vst [vmem:[%s671_s6 + $0xd0] sm:$0xff] %v351_v60  ;;  %v355_v4 = vmax.f32 %v323_v61, 0.0  ;;  %384 = vst [vmem:[%s671_s6 + $0xd8] sm:$0xff] %v352_v62 }
  0x2e   : > { %385 = vst [vmem:[%s671_s6 + $0xe0] sm:$0xff] %v353_v63  ;;  %386 = vst [vmem:[%s671_s6 + $0xe8] sm:$0xff] %v354_v2  ;;  %v356_v0 = vmax.f32 %v324_v3, 0.0 }
  0x2f   : > { %387 = vst [vmem:[%s671_s6 + $0xf0] sm:$0xff] %v355_v4 }
  0x30   : > { %388 = vst [vmem:[%s671_s6 + $0xf8] sm:$0xff] %v356_v0 }
  0x31 PF: > { %s13_s16 = sadd.s32 1, %s583_s16   ;;  %s802_s12 = smov %s575_s14 }
  0x32   : > { %p10_p7 = scmp.ge.s32.totalorder %s13_s16, 6   ;;  %s803_s13 = smov %s579_s15 }
  0x33   : > { %s804_s14 = smov %s807_s17  ;;  %s805_s15 = smov %s811_s18 }
  0x34   :  { %12 = sbr.rel (!%p10_p7) target bundleno = 3 (0x3), region = 62 }

// kernel: _lambda_.4
= control target key start
LH: loop header
LB: loop body
LE: loop exit
PB: predicated region body
PF: predicated region fallthrough
CT: control target
= control target key end

     0   :  { %s15095_s15 = smov 0   ;;  %s15097_s16 = smov 0   ;;  %s19247_s0 = inlined_call_operand.vmem [shape: f32[2,10,10,10,128], index: 0, kind: input, shape index: {}]   ;;  %s19248_s1 = inlined_call_operand.vmem [shape: f32[27,128,128], index: 1, kind: input, shape index: {}]   ;;  %s19249_s2 = inlined_call_operand.vmem [shape: f32[1,128], index: 2, kind: input, shape index: {}]   ;;  %s19250_s3 = inlined_call_operand.vmem [shape: f32[2,8,8,8,128], index: 3, kind: output, shape index: {0}]   ;;  %s19251_s4 = inlined_call_operand.vmem [shape: f32[2,2,2,128], index: 4, kind: output, shape index: {1}]  }
   0x1   :  { %s15099_s17 = smov 0   ;;  %s15101_s18 = smov 0  }
   0x2   :  { %s15103_s19 = smov 0  }
   0x3 LB: > { %s24_s20 = sadd.s32 1, %s15060_s17  ;;  %s27_s21 = sadd.s32 1, %s15064_s18  ;;  %s15068_s19 = sphi %s15103_s19, %s15_s19   ;;  %s15064_s18 = sphi %s15101_s18, %s19610_s18   ;;  %s15060_s17 = sphi %s15099_s17, %s19609_s17   ;;  %s15056_s16 = sphi %s15097_s16, %s19608_s16   ;;  %s15052_s15 = sphi %s15095_s15, %s19607_s15  }
   0x4   : > { %p25_p0 = scmp.ge.s32.totalorder %s24_s20, 2  ;;  %p11011_p1 = scmp.ge.s32.totalorder %s15068_s19, 1 }
   0x5   : > { %p147_p2 = scmp.lt.s32.totalorder %s15068_s19, 5 }
   0x6   : > { %s19612_s20 = smov (%p25_p0, %s24_s20), 0  ;;  %s19614_s21 = smov (!%p25_p0, %s27_s21), %s15064_s18 }
   0x7   : > { %p148_p3 = pnand %p11011_p1, %p147_p2  ;;  %p29_p4 = scmp.ge.s32.totalorder %s19614_s21, 2 }
   0x9   : > { %s19616_s21 = smov (%p29_p4, %s19614_s21), 0  ;;  %151 = sbr.rel (%p148_p3) target bundleno = 1228 (0x4cc), region = 28 }
   0xe   : > { %s11012_s22 = sshll.u32 %s15052_s15, 2  ;;  %p180_p5 = scmp.lt.s32.totalorder %s15056_s16, 1 }
   0xf   : > { %p182_p6 = scmp.lt.s32.totalorder %s11012_s22, 7  ;;  %p192_p7 = scmp.lt.s32.totalorder %s15052_s15, 1 }
  0x10   : > { %s181_s23 = scalar_select %p180_p5, %s15056_s16, 1 }
  0x11   : > { %s19618_s22 = smov (!%p182_p6, %s11012_s22), 7  ;;  %s11019_s26 = smul.u32 640, %s15052_s15 }
  0x12   : > { %s11014_s24 = sshll.u32 %s181_s23, 6  ;;  %s11013_s25 = sshll.u32 %s19618_s22, 3 }
  0x13   : > { %s186_s27 = sadd.s32 %s11014_s24, %s11013_s25  ;;  %s200_s28 = smul.u32 1600, %s15056_s16 }
  0x14   : > { %s11015_s29 = sshll.u32 %s186_s27, 3  ;;  %s11016_s30 = sshll.u32 %s181_s23, 1 }
  0x15   : > { %s15138_s7 = scalar_lea.vmem %s19250_s3, %s11015_s29  ;;  %s201_s8 = sadd.s32 %s11019_s26, %s200_s28 }
  0x16   : > { %s19620_s15 = smov (!%p192_p7, %s15052_s15), 1  ;;  %s15144_s11 = scalar_lea.vmem %s19247_s0, %s201_s8 }
  0x17   : > { %s195_s12 = sadd.s32 %s11016_s30, %s19620_s15  ;;  %v359_v0 = vld [vmem:[%s15144_s11] sm:$0xff]  ;;  %v361_v1 = vld [vmem:[%s15144_s11 + $0x10] sm:$0xff]  ;;  %v11020_v60 = vld [vmem:[%s15144_s11 + $0x8] sm:$0x3] }
  0x18   : > { %v363_v2 = vld [vmem:[%s15144_s11 + $0x20] sm:$0xff]  ;;  %s11017_s13 = sshll.u32 %s195_s12, 1  ;;  %360 = vst [vmem:[#allocation2] sm:$0xff] %v359_v0  ;;  %362 = vst [vmem:[#allocation2 + $0x10] sm:$0xff] %v361_v1  ;;  %v365_v3 = vld [vmem:[%s15144_s11 + $0x30] sm:$0xff] }
  0x19   : > { %364 = vst [vmem:[#allocation2 + $0x20] sm:$0xff] %v363_v2  ;;  %v367_v4 = vld [vmem:[%s15144_s11 + $0x40] sm:$0xff]  ;;  %v369_v5 = vld [vmem:[%s15144_s11 + $0x50] sm:$0xff]  ;;  %s15155_s22 = scalar_lea.vmem %s19251_s4, %s11017_s13  ;;  %366 = vst [vmem:[#allocation2 + $0x30] sm:$0xff] %v365_v3 }
  0x1a   : > { %368 = vst [vmem:[#allocation2 + $0x40] sm:$0xff] %v367_v4  ;;  %370 = vst [vmem:[#allocation2 + $0x50] sm:$0xff] %v369_v5  ;;  %v371_v6 = vld [vmem:[%s15144_s11 + $0x60] sm:$0xff]  ;;  %v373_v7 = vld [vmem:[%s15144_s11 + $0x70] sm:$0xff] }
  0x1b   : > { %v375_v8 = vld [vmem:[%s15144_s11 + $0x80] sm:$0xff]  ;;  %372 = vst [vmem:[#allocation2 + $0x60] sm:$0xff] %v371_v6  ;;  %374 = vst [vmem:[#allocation2 + $0x70] sm:$0xff] %v373_v7  ;;  %v377_v9 = vld [vmem:[%s15144_s11 + $0x90] sm:$0xff] }
  0x1c   : > { %376 = vst [vmem:[#allocation2 + $0x80] sm:$0xff] %v375_v8  ;;  %v379_v10 = vld [vmem:[%s15144_s11 + $0xa0] sm:$0xff]  ;;  %v381_v11 = vld [vmem:[%s15144_s11 + $0xb0] sm:$0xff]  ;;  %378 = vst [vmem:[#allocation2 + $0x90] sm:$0xff] %v377_v9 }
  0x1d   : > { %380 = vst [vmem:[#allocation2 + $0xa0] sm:$0xff] %v379_v10  ;;  %382 = vst [vmem:[#allocation2 + $0xb0] sm:$0xff] %v381_v11  ;;  %v383_v12 = vld [vmem:[%s15144_s11 + $0xc0] sm:$0xff]  ;;  %v385_v13 = vld [vmem:[%s15144_s11 + $0xd0] sm:$0xff] }
  0x1e   : > { %v387_v14 = vld [vmem:[%s15144_s11 + $0xe0] sm:$0xff]  ;;  %384 = vst [vmem:[#allocation2 + $0xc0] sm:$0xff] %v383_v12  ;;  %386 = vst [vmem:[#allocation2 + $0xd0] sm:$0xff] %v385_v13  ;;  %v389_v15 = vld [vmem:[%s15144_s11 + $0xf0] sm:$0xff] }
  0x1f   : > { %388 = vst [vmem:[#allocation2 + $0xe0] sm:$0xff] %v387_v14  ;;  %v391_v16 = vld [vmem:[%s15144_s11 + $0x100] sm:$0xff]  ;;  %v393_v17 = vld [vmem:[%s15144_s11 + $0x110] sm:$0xff]  ;;  %390 = vst [vmem:[#allocation2 + $0xf0] sm:$0xff] %v389_v15 }
  0x20   : > { %392 = vst [vmem:[#allocation2 + $0x100] sm:$0xff] %v391_v16  ;;  %394 = vst [vmem:[#allocation2 + $0x110] sm:$0xff] %v393_v17  ;;  %v395_v18 = vld [vmem:[%s15144_s11 + $0x120] sm:$0xff]  ;;  %v397_v19 = vld [vmem:[%s15144_s11 + $0x130] sm:$0xff] }
  0x21   : > { %v399_v20 = vld [vmem:[%s15144_s11 + $0x140] sm:$0xff]  ;;  %396 = vst [vmem:[#allocation2 + $0x120] sm:$0xff] %v395_v18  ;;  %398 = vst [vmem:[#allocation2 + $0x130] sm:$0xff] %v397_v19  ;;  %v401_v21 = vld [vmem:[%s15144_s11 + $0x150] sm:$0xff] }
  0x22   : > { %400 = vst [vmem:[#allocation2 + $0x140] sm:$0xff] %v399_v20  ;;  %v403_v22 = vld [vmem:[%s15144_s11 + $0x160] sm:$0xff]  ;;  %v405_v23 = vld [vmem:[%s15144_s11 + $0x170] sm:$0xff]  ;;  %402 = vst [vmem:[#allocation2 + $0x150] sm:$0xff] %v401_v21 }
  0x23   : > { %404 = vst [vmem:[#allocation2 + $0x160] sm:$0xff] %v403_v22  ;;  %406 = vst [vmem:[#allocation2 + $0x170] sm:$0xff] %v405_v23  ;;  %v407_v24 = vld [vmem:[%s15144_s11 + $0x180] sm:$0xff]  ;;  %v409_v25 = vld [vmem:[%s15144_s11 + $0x190] sm:$0xff] }
  0x24   : > { %v411_v26 = vld [vmem:[%s15144_s11 + $0x1a0] sm:$0xff]  ;;  %408 = vst [vmem:[#allocation2 + $0x180] sm:$0xff] %v407_v24  ;;  %410 = vst [vmem:[#allocation2 + $0x190] sm:$0xff] %v409_v25  ;;  %v413_v27 = vld [vmem:[%s15144_s11 + $0x1b0] sm:$0xff] }
  0x25   : > { %412 = vst [vmem:[#allocation2 + $0x1a0] sm:$0xff] %v411_v26  ;;  %v415_v28 = vld [vmem:[%s15144_s11 + $0x1c0] sm:$0xff]  ;;  %v417_v29 = vld [vmem:[%s15144_s11 + $0x1d0] sm:$0xff]  ;;  %414 = vst [vmem:[#allocation2 + $0x1b0] sm:$0xff] %v413_v27 }
  0x26   : > { %416 = vst [vmem:[#allocation2 + $0x1c0] sm:$0xff] %v415_v28  ;;  %418 = vst [vmem:[#allocation2 + $0x1d0] sm:$0xff] %v417_v29  ;;  %v419_v30 = vld [vmem:[%s15144_s11 + $0x1e0] sm:$0xff]  ;;  %v421_v31 = vld [vmem:[%s15144_s11 + $0x1f0] sm:$0xff] }
  0x27   : > { %v423_v32 = vld [vmem:[%s15144_s11 + $0x200] sm:$0xff]  ;;  %420 = vst [vmem:[#allocation2 + $0x1e0] sm:$0xff] %v419_v30  ;;  %422 = vst [vmem:[#allocation2 + $0x1f0] sm:$0xff] %v421_v31  ;;  %v425_v33 = vld [vmem:[%s15144_s11 + $0x210] sm:$0xff] }
  0x28   : > { %424 = vst [vmem:[#allocation2 + $0x200] sm:$0xff] %v423_v32  ;;  %v427_v34 = vld [vmem:[%s15144_s11 + $0x220] sm:$0xff]  ;;  %v429_v35 = vld [vmem:[%s15144_s11 + $0x230] sm:$0xff]  ;;  %426 = vst [vmem:[#allocation2 + $0x210] sm:$0xff] %v425_v33 }
  0x29   : > { %428 = vst [vmem:[#allocation2 + $0x220] sm:$0xff] %v427_v34  ;;  %430 = vst [vmem:[#allocation2 + $0x230] sm:$0xff] %v429_v35  ;;  %v431_v36 = vld [vmem:[%s15144_s11 + $0x240] sm:$0xff]  ;;  %v433_v37 = vld [vmem:[%s15144_s11 + $0x250] sm:$0xff] }
  0x2a   : > { %v435_v38 = vld [vmem:[%s15144_s11 + $0x260] sm:$0xff]  ;;  %432 = vst [vmem:[#allocation2 + $0x240] sm:$0xff] %v431_v36  ;;  %434 = vst [vmem:[#allocation2 + $0x250] sm:$0xff] %v433_v37  ;;  %v437_v39 = vld [vmem:[%s15144_s11 + $0x270] sm:$0xff] }
  0x2b   : > { %436 = vst [vmem:[#allocation2 + $0x260] sm:$0xff] %v435_v38  ;;  %v439_v40 = vld [vmem:[%s15144_s11 + $0x280] sm:$0xff]  ;;  %v441_v41 = vld [vmem:[%s15144_s11 + $0x290] sm:$0xff]  ;;  %438 = vst [vmem:[#allocation2 + $0x270] sm:$0xff] %v437_v39 }
  0x2c   : > { %440 = vst [vmem:[#allocation2 + $0x280] sm:$0xff] %v439_v40  ;;  %442 = vst [vmem:[#allocation2 + $0x290] sm:$0xff] %v441_v41  ;;  %v443_v42 = vld [vmem:[%s15144_s11 + $0x2a0] sm:$0xff]  ;;  %v445_v43 = vld [vmem:[%s15144_s11 + $0x2b0] sm:$0xff] }
  0x2d   : > { %v447_v44 = vld [vmem:[%s15144_s11 + $0x2c0] sm:$0xff]  ;;  %444 = vst [vmem:[#allocation2 + $0x2a0] sm:$0xff] %v443_v42  ;;  %446 = vst [vmem:[#allocation2 + $0x2b0] sm:$0xff] %v445_v43  ;;  %v449_v45 = vld [vmem:[%s15144_s11 + $0x2d0] sm:$0xff] }
  0x2e   : > { %448 = vst [vmem:[#allocation2 + $0x2c0] sm:$0xff] %v447_v44  ;;  %v451_v46 = vld [vmem:[%s15144_s11 + $0x2e0] sm:$0xff]  ;;  %v453_v47 = vld [vmem:[%s15144_s11 + $0x2f0] sm:$0xff]  ;;  %450 = vst [vmem:[#allocation2 + $0x2d0] sm:$0xff] %v449_v45 }
  0x2f   : > { %452 = vst [vmem:[#allocation2 + $0x2e0] sm:$0xff] %v451_v46  ;;  %454 = vst [vmem:[#allocation2 + $0x2f0] sm:$0xff] %v453_v47  ;;  %v455_v48 = vld [vmem:[%s15144_s11 + $0x300] sm:$0xff]  ;;  %v457_v49 = vld [vmem:[%s15144_s11 + $0x310] sm:$0xff] }
  0x30   : > { %v459_v50 = vld [vmem:[%s15144_s11 + $0x320] sm:$0xff]  ;;  %456 = vst [vmem:[#allocation2 + $0x300] sm:$0xff] %v455_v48  ;;  %458 = vst [vmem:[#allocation2 + $0x310] sm:$0xff] %v457_v49  ;;  %v461_v51 = vld [vmem:[%s15144_s11 + $0x330] sm:$0xff] }
  0x31   : > { %460 = vst [vmem:[#allocation2 + $0x320] sm:$0xff] %v459_v50  ;;  %v463_v52 = vld [vmem:[%s15144_s11 + $0x340] sm:$0xff]  ;;  %v465_v53 = vld [vmem:[%s15144_s11 + $0x350] sm:$0xff]  ;;  %462 = vst [vmem:[#allocation2 + $0x330] sm:$0xff] %v461_v51 }
  0x32   : > { %464 = vst [vmem:[#allocation2 + $0x340] sm:$0xff] %v463_v52  ;;  %466 = vst [vmem:[#allocation2 + $0x350] sm:$0xff] %v465_v53  ;;  %v467_v54 = vld [vmem:[%s15144_s11 + $0x360] sm:$0xff]  ;;  %v469_v55 = vld [vmem:[%s15144_s11 + $0x370] sm:$0xff] }
  0x33   : > { %v471_v56 = vld [vmem:[%s15144_s11 + $0x380] sm:$0xff]  ;;  %468 = vst [vmem:[#allocation2 + $0x360] sm:$0xff] %v467_v54  ;;  %470 = vst [vmem:[#allocation2 + $0x370] sm:$0xff] %v469_v55  ;;  %v473_v57 = vld [vmem:[%s15144_s11 + $0x390] sm:$0xff] }
  0x34   : > { %472 = vst [vmem:[#allocation2 + $0x380] sm:$0xff] %v471_v56  ;;  %v475_v58 = vld [vmem:[%s15144_s11 + $0x3a0] sm:$0xff]  ;;  %v477_v59 = vld [vmem:[%s15144_s11 + $0x3b0] sm:$0xff]  ;;  %474 = vst [vmem:[#allocation2 + $0x390] sm:$0xff] %v473_v57 }
  0x35   : > { %476 = vst [vmem:[#allocation2 + $0x3a0] sm:$0xff] %v475_v58  ;;  %478 = vst [vmem:[#allocation2 + $0x3b0] sm:$0xff] %v477_v59  ;;  %v11021_v61 = vld [vmem:[%s15144_s11 + $0x18] sm:$0x3]  ;;  %v11022_v62 = vld [vmem:[%s15144_s11 + $0x28] sm:$0x3] }
  0x36   : > { %490 = vst [vmem:[#allocation2 + $0x8] sm:$0x3] %v11020_v60  ;;  %492 = vst [vmem:[#allocation2 + $0x18] sm:$0x3] %v11021_v61  ;;  %v11023_v63 = vld [vmem:[%s15144_s11 + $0x38] sm:$0x3] }
  0x37   : > { %494 = vst [vmem:[#allocation2 + $0x28] sm:$0x3] %v11022_v62  ;;  %v11024_v0 = vld [vmem:[%s15144_s11 + $0x48] sm:$0x3]  ;;  %v11025_v1 = vld [vmem:[%s15144_s11 + $0x58] sm:$0x3] }
  0x38   : > { %496 = vst [vmem:[#allocation2 + $0x38] sm:$0x3] %v11023_v63  ;;  %498 = vst [vmem:[#allocation2 + $0x48] sm:$0x3] %v11024_v0  ;;  %v11026_v2 = vld [vmem:[%s15144_s11 + $0x68] sm:$0x3] }
  0x39   : > { %500 = vst [vmem:[#allocation2 + $0x58] sm:$0x3] %v11025_v1  ;;  %v11027_v3 = vld [vmem:[%s15144_s11 + $0x78] sm:$0x3]  ;;  %v11028_v4 = vld [vmem:[%s15144_s11 + $0x88] sm:$0x3] }
  0x3a   : > { %502 = vst [vmem:[#allocation2 + $0x68] sm:$0x3] %v11026_v2  ;;  %504 = vst [vmem:[#allocation2 + $0x78] sm:$0x3] %v11027_v3  ;;  %v11029_v5 = vld [vmem:[%s15144_s11 + $0x98] sm:$0x3] }
  0x3b   : > { %506 = vst [vmem:[#allocation2 + $0x88] sm:$0x3] %v11028_v4  ;;  %v11030_v6 = vld [vmem:[%s15144_s11 + $0xa8] sm:$0x3]  ;;  %v11031_v7 = vld [vmem:[%s15144_s11 + $0xb8] sm:$0x3] }
  0x3c   : > { %508 = vst [vmem:[#allocation2 + $0x98] sm:$0x3] %v11029_v5  ;;  %510 = vst [vmem:[#allocation2 + $0xa8] sm:$0x3] %v11030_v6  ;;  %v11032_v8 = vld [vmem:[%s15144_s11 + $0xc8] sm:$0x3] }
  0x3d   : > { %512 = vst [vmem:[#allocation2 + $0xb8] sm:$0x3] %v11031_v7  ;;  %v11033_v9 = vld [vmem:[%s15144_s11 + $0xd8] sm:$0x3]  ;;  %v11034_v10 = vld [vmem:[%s15144_s11 + $0xe8] sm:$0x3] }
  0x3e   : > { %514 = vst [vmem:[#allocation2 + $0xc8] sm:$0x3] %v11032_v8  ;;  %516 = vst [vmem:[#allocation2 + $0xd8] sm:$0x3] %v11033_v9  ;;  %v11035_v11 = vld [vmem:[%s15144_s11 + $0xf8] sm:$0x3] }
  0x3f   : > { %518 = vst [vmem:[#allocation2 + $0xe8] sm:$0x3] %v11034_v10  ;;  %v11036_v12 = vld [vmem:[%s15144_s11 + $0x108] sm:$0x3]  ;;  %v11037_v13 = vld [vmem:[%s15144_s11 + $0x118] sm:$0x3] }
  0x40   : > { %520 = vst [vmem:[#allocation2 + $0xf8] sm:$0x3] %v11035_v11  ;;  %522 = vst [vmem:[#allocation2 + $0x108] sm:$0x3] %v11036_v12  ;;  %v11038_v14 = vld [vmem:[%s15144_s11 + $0x128] sm:$0x3] }
  0x41   : > { %524 = vst [vmem:[#allocation2 + $0x118] sm:$0x3] %v11037_v13  ;;  %v11039_v15 = vld [vmem:[%s15144_s11 + $0x138] sm:$0x3]  ;;  %v11040_v16 = vld [vmem:[%s15144_s11 + $0x148] sm:$0x3] }
  0x42   : > { %526 = vst [vmem:[#allocation2 + $0x128] sm:$0x3] %v11038_v14  ;;  %528 = vst [vmem:[#allocation2 + $0x138] sm:$0x3] %v11039_v15  ;;  %v11041_v17 = vld [vmem:[%s15144_s11 + $0x158] sm:$0x3] }
  0x43   : > { %530 = vst [vmem:[#allocation2 + $0x148] sm:$0x3] %v11040_v16  ;;  %v11042_v18 = vld [vmem:[%s15144_s11 + $0x168] sm:$0x3]  ;;  %v11043_v19 = vld [vmem:[%s15144_s11 + $0x178] sm:$0x3] }
  0x44   : > { %532 = vst [vmem:[#allocation2 + $0x158] sm:$0x3] %v11041_v17  ;;  %534 = vst [vmem:[#allocation2 + $0x168] sm:$0x3] %v11042_v18  ;;  %v11044_v20 = vld [vmem:[%s15144_s11 + $0x188] sm:$0x3] }
  0x45   : > { %536 = vst [vmem:[#allocation2 + $0x178] sm:$0x3] %v11043_v19  ;;  %v11045_v21 = vld [vmem:[%s15144_s11 + $0x198] sm:$0x3]  ;;  %v11046_v22 = vld [vmem:[%s15144_s11 + $0x1a8] sm:$0x3] }
  0x46   : > { %538 = vst [vmem:[#allocation2 + $0x188] sm:$0x3] %v11044_v20  ;;  %540 = vst [vmem:[#allocation2 + $0x198] sm:$0x3] %v11045_v21  ;;  %v11047_v23 = vld [vmem:[%s15144_s11 + $0x1b8] sm:$0x3] }
  0x47   : > { %542 = vst [vmem:[#allocation2 + $0x1a8] sm:$0x3] %v11046_v22  ;;  %v11048_v24 = vld [vmem:[%s15144_s11 + $0x1c8] sm:$0x3]  ;;  %v11049_v25 = vld [vmem:[%s15144_s11 + $0x1d8] sm:$0x3] }
  0x48   : > { %544 = vst [vmem:[#allocation2 + $0x1b8] sm:$0x3] %v11047_v23  ;;  %546 = vst [vmem:[#allocation2 + $0x1c8] sm:$0x3] %v11048_v24  ;;  %v11050_v26 = vld [vmem:[%s15144_s11 + $0x1e8] sm:$0x3] }
  0x49   : > { %548 = vst [vmem:[#allocation2 + $0x1d8] sm:$0x3] %v11049_v25  ;;  %v11051_v27 = vld [vmem:[%s15144_s11 + $0x1f8] sm:$0x3]  ;;  %v11052_v28 = vld [vmem:[%s15144_s11 + $0x208] sm:$0x3] }
  0x4a   : > { %550 = vst [vmem:[#allocation2 + $0x1e8] sm:$0x3] %v11050_v26  ;;  %552 = vst [vmem:[#allocation2 + $0x1f8] sm:$0x3] %v11051_v27  ;;  %v11053_v29 = vld [vmem:[%s15144_s11 + $0x218] sm:$0x3] }
  0x4b   : > { %554 = vst [vmem:[#allocation2 + $0x208] sm:$0x3] %v11052_v28  ;;  %v11054_v30 = vld [vmem:[%s15144_s11 + $0x228] sm:$0x3]  ;;  %v11055_v31 = vld [vmem:[%s15144_s11 + $0x238] sm:$0x3] }
  0x4c   : > { %556 = vst [vmem:[#allocation2 + $0x218] sm:$0x3] %v11053_v29  ;;  %558 = vst [vmem:[#allocation2 + $0x228] sm:$0x3] %v11054_v30  ;;  %v11056_v32 = vld [vmem:[%s15144_s11 + $0x248] sm:$0x3] }
  0x4d   : > { %560 = vst [vmem:[#allocation2 + $0x238] sm:$0x3] %v11055_v31  ;;  %v11057_v33 = vld [vmem:[%s15144_s11 + $0x258] sm:$0x3]  ;;  %v11058_v34 = vld [vmem:[%s15144_s11 + $0x268] sm:$0x3] }
  0x4e   : > { %562 = vst [vmem:[#allocation2 + $0x248] sm:$0x3] %v11056_v32  ;;  %564 = vst [vmem:[#allocation2 + $0x258] sm:$0x3] %v11057_v33  ;;  %v11059_v35 = vld [vmem:[%s15144_s11 + $0x278] sm:$0x3] }
  0x4f   : > { %566 = vst [vmem:[#allocation2 + $0x268] sm:$0x3] %v11058_v34  ;;  %v11060_v36 = vld [vmem:[%s15144_s11 + $0x288] sm:$0x3]  ;;  %v11061_v37 = vld [vmem:[%s15144_s11 + $0x298] sm:$0x3] }
  0x50   : > { %568 = vst [vmem:[#allocation2 + $0x278] sm:$0x3] %v11059_v35  ;;  %570 = vst [vmem:[#allocation2 + $0x288] sm:$0x3] %v11060_v36  ;;  %v11062_v38 = vld [vmem:[%s15144_s11 + $0x2a8] sm:$0x3] }
  0x51   : > { %572 = vst [vmem:[#allocation2 + $0x298] sm:$0x3] %v11061_v37  ;;  %v11063_v39 = vld [vmem:[%s15144_s11 + $0x2b8] sm:$0x3]  ;;  %v11064_v40 = vld [vmem:[%s15144_s11 + $0x2c8] sm:$0x3] }
  0x52   : > { %574 = vst [vmem:[#allocation2 + $0x2a8] sm:$0x3] %v11062_v38  ;;  %576 = vst [vmem:[#allocation2 + $0x2b8] sm:$0x3] %v11063_v39  ;;  %v11065_v41 = vld [vmem:[%s15144_s11 + $0x2d8] sm:$0x3] }
  0x53   : > { %578 = vst [vmem:[#allocation2 + $0x2c8] sm:$0x3] %v11064_v40  ;;  %v11066_v42 = vld [vmem:[%s15144_s11 + $0x2e8] sm:$0x3]  ;;  %v11067_v43 = vld [vmem:[%s15144_s11 + $0x2f8] sm:$0x3] }
  0x54   : > { %580 = vst [vmem:[#allocation2 + $0x2d8] sm:$0x3] %v11065_v41  ;;  %582 = vst [vmem:[#allocation2 + $0x2e8] sm:$0x3] %v11066_v42  ;;  %v11068_v44 = vld [vmem:[%s15144_s11 + $0x308] sm:$0x3] }
  0x55   : > { %584 = vst [vmem:[#allocation2 + $0x2f8] sm:$0x3] %v11067_v43  ;;  %v11069_v45 = vld [vmem:[%s15144_s11 + $0x318] sm:$0x3]  ;;  %v11070_v46 = vld [vmem:[%s15144_s11 + $0x328] sm:$0x3] }
  0x56   : > { %586 = vst [vmem:[#allocation2 + $0x308] sm:$0x3] %v11068_v44  ;;  %588 = vst [vmem:[#allocation2 + $0x318] sm:$0x3] %v11069_v45  ;;  %v11071_v47 = vld [vmem:[%s15144_s11 + $0x338] sm:$0x3] }
  0x57   : > { %590 = vst [vmem:[#allocation2 + $0x328] sm:$0x3] %v11070_v46  ;;  %v11072_v48 = vld [vmem:[%s15144_s11 + $0x348] sm:$0x3]  ;;  %v11073_v49 = vld [vmem:[%s15144_s11 + $0x358] sm:$0x3] }
  0x58   : > { %592 = vst [vmem:[#allocation2 + $0x338] sm:$0x3] %v11071_v47  ;;  %594 = vst [vmem:[#allocation2 + $0x348] sm:$0x3] %v11072_v48  ;;  %v11074_v50 = vld [vmem:[%s15144_s11 + $0x368] sm:$0x3] }
  0x59   : > { %596 = vst [vmem:[#allocation2 + $0x358] sm:$0x3] %v11073_v49  ;;  %v11075_v51 = vld [vmem:[%s15144_s11 + $0x378] sm:$0x3]  ;;  %v11076_v52 = vld [vmem:[%s15144_s11 + $0x388] sm:$0x3] }
  0x5a   : > { %598 = vst [vmem:[#allocation2 + $0x368] sm:$0x3] %v11074_v50  ;;  %600 = vst [vmem:[#allocation2 + $0x378] sm:$0x3] %v11075_v51  ;;  %v11077_v53 = vld [vmem:[%s15144_s11 + $0x398] sm:$0x3] }
  0x5b   : > { %602 = vst [vmem:[#allocation2 + $0x388] sm:$0x3] %v11076_v52  ;;  %v11078_v54 = vld [vmem:[%s15144_s11 + $0x3a8] sm:$0x3]  ;;  %v11079_v55 = vld [vmem:[%s15144_s11 + $0x3b8] sm:$0x3] }
  0x5c   : > { %604 = vst [vmem:[#allocation2 + $0x398] sm:$0x3] %v11077_v53  ;;  %606 = vst [vmem:[#allocation2 + $0x3a8] sm:$0x3] %v11078_v54 }
  0x5d   : > { %608 = vst [vmem:[#allocation2 + $0x3b8] sm:$0x3] %v11079_v55 }
  0x5e   : > { %612 = vsyncadd [#allocation4], 9600 }
  0x5f   : > { %15048 = dma.done.wait [#allocation4], 9600 }
  0x60   : > { %15049 = vsyncadd [#allocation4], 4294957696  ;;  %v729_v56 = vld [vmem:[%s19248_s1 + $0x78] sm:$0xff]  ;;  %v728_v57 = vld [vmem:[%s19248_s1 + $0x70] sm:$0xff]  ;;  %vm10824_vm0 = vcmask 1040384  }
  0x61   : > { %14956 = vmatprep.subr.mxu1 %v729_v56  ;;  %12796 = vmatprep.subr.mxu0 %v729_v56  ;;  %v727_v58 = vld [vmem:[%s19248_s1 + $0x68] sm:$0xff]  ;;  %v726_v59 = vld [vmem:[%s19248_s1 + $0x60] sm:$0xff]  ;;  %v725_v60 = vld [vmem:[%s19248_s1 + $0x58] sm:$0xff] }
  0x62   : > { %14972 = vmatpush3.msra.mxu1 %v729_v56  ;;  %12797 = vmatpush3.msra.mxu0 %v729_v56  ;;  %v724_v61 = vld [vmem:[%s19248_s1 + $0x50] sm:$0xff]  ;;  %v723_v62 = vld [vmem:[%s19248_s1 + $0x48] sm:$0xff]  ;;  %v722_v63 = vld [vmem:[%s19248_s1 + $0x40] sm:$0xff] }
  0x63   : > { %14957 = vmatprep.subr.mxu1 %v728_v57  ;;  %12798 = vmatprep.subr.mxu0 %v728_v57  ;;  %v721_v0 = vld [vmem:[%s19248_s1 + $0x38] sm:$0xff]  ;;  %v720_v1 = vld [vmem:[%s19248_s1 + $0x30] sm:$0xff]  ;;  %v719_v2 = vld [vmem:[%s19248_s1 + $0x28] sm:$0xff] }
  0x64   : > { %14973 = vmatpush3.msra.mxu1 %v728_v57  ;;  %12799 = vmatpush3.msra.mxu0 %v728_v57  ;;  %v718_v3 = vld [vmem:[%s19248_s1 + $0x20] sm:$0xff]  ;;  %v717_v4 = vld [vmem:[%s19248_s1 + $0x18] sm:$0xff]  ;;  %v716_v5 = vld [vmem:[%s19248_s1 + $0x10] sm:$0xff] }
  0x65   : > { %14958 = vmatprep.subr.mxu1 %v727_v58  ;;  %12800 = vmatprep.subr.mxu0 %v727_v58  ;;  %v715_v6 = vld [vmem:[%s19248_s1 + $0x8] sm:$0xff]  ;;  %v714_v7 = vld [vmem:[%s19248_s1] sm:$0xff]  ;;  %v15319_v10 = vld [vmem:[#allocation2 + $0x150] sm:$0xff] }
  0x66   : > { %14974 = vmatpush3.msra.mxu1 %v727_v58  ;;  %12801 = vmatpush3.msra.mxu0 %v727_v58  ;;  %v666_v8 = vld [vmem:[#allocation2 + $0x140] sm:$0xff]  ;;  %v11095_v11 = vld [vmem:[%s19248_s1 + $0xf8] sm:$0xff]  ;;  %v15324_v12 = vld [vmem:[#allocation2 + $0x10] sm:$0xff] }
  0x67   : > { %14959 = vmatprep.subr.mxu1 %v726_v59  ;;  %12802 = vmatprep.subr.mxu0 %v726_v59  ;;  %v650_v9 = vld [vmem:[#allocation2] sm:$0xff]  ;;  %v11111_v13 = vld [vmem:[%s19248_s1 + $0x178] sm:$0xff]  ;;  %v11094_v14 = vld [vmem:[%s19248_s1 + $0xf0] sm:$0xff] }
  0x68   : > { %14975 = vmatpush3.msra.mxu1 %v726_v59  ;;  %12803 = vmatpush3.msra.mxu0 %v726_v59  ;;  %v15333_v15 = vld [vmem:[#allocation2 + $0x160] sm:$0xff]  ;;  %v11110_v16 = vld [vmem:[%s19248_s1 + $0x170] sm:$0xff]  ;;  %v11093_v19 = vld [vmem:[%s19248_s1 + $0xe8] sm:$0xff] }
  0x69   : > { %14960 = vmatprep.subr.mxu1 %v725_v60  ;;  %12804 = vmatprep.subr.mxu0 %v725_v60  ;;  %v15339_v17 = vld [vmem:[#allocation2 + $0x20] sm:$0xff]  ;;  %v15341_v18 = vld [vmem:[#allocation2 + $0x170] sm:$0xff]  ;;  %v11109_v21 = vld [vmem:[%s19248_s1 + $0x168] sm:$0xff] }
  0x6a   : > { %14976 = vmatpush3.msra.mxu1 %v725_v60  ;;  %12805 = vmatpush3.msra.mxu0 %v725_v60  ;;  %v15347_v20 = vld [vmem:[#allocation2 + $0x30] sm:$0xff]  ;;  %v11092_v22 = vld [vmem:[%s19248_s1 + $0xe0] sm:$0xff]  ;;  %v11091_v27 = vld [vmem:[%s19248_s1 + $0xd8] sm:$0xff] }
  0x6b   : > { %14961 = vmatprep.subr.mxu1 %v724_v61  ;;  %12806 = vmatprep.subr.mxu0 %v724_v61  ;;  %v15357_v23 = vld [vmem:[#allocation2 + $0x180] sm:$0xff]  ;;  %v15365_v26 = vld [vmem:[#allocation2 + $0x190] sm:$0xff]  ;;  %v11107_v29 = vld [vmem:[%s19248_s1 + $0x158] sm:$0xff] }
  0x6c   : > { %14977 = vmatpush3.msra.mxu1 %v724_v61  ;;  %12807 = vmatpush3.msra.mxu0 %v724_v61  ;;  %v11108_v24 = vld [vmem:[%s19248_s1 + $0x160] sm:$0xff]  ;;  %v15371_v28 = vld [vmem:[#allocation2 + $0x50] sm:$0xff]  ;;  %v11089_v35 = vld [vmem:[%s19248_s1 + $0xc8] sm:$0xff] }
  0x6d   : > { %14962 = vmatprep.subr.mxu1 %v723_v62  ;;  %12808 = vmatprep.subr.mxu0 %v723_v62  ;;  %v15363_v25 = vld [vmem:[#allocation2 + $0x40] sm:$0xff]  ;;  %v11090_v30 = vld [vmem:[%s19248_s1 + $0xd0] sm:$0xff]  ;;  %v11105_v37 = vld [vmem:[%s19248_s1 + $0x148] sm:$0xff] }
  0x6e   : > { %14978 = vmatpush3.msra.mxu1 %v723_v62  ;;  %12809 = vmatpush3.msra.mxu0 %v723_v62  ;;  %v15381_v31 = vld [vmem:[#allocation2 + $0x1a0] sm:$0xff]  ;;  %v11106_v32 = vld [vmem:[%s19248_s1 + $0x150] sm:$0xff]  ;;  %v11087_v43 = vld [vmem:[%s19248_s1 + $0xb8] sm:$0xff] }
  0x6f   : > { %14963 = vmatprep.subr.mxu1 %v722_v63  ;;  %12810 = vmatprep.subr.mxu0 %v722_v63  ;;  %v15387_v33 = vld [vmem:[#allocation2 + $0x60] sm:$0xff]  ;;  %v15389_v34 = vld [vmem:[#allocation2 + $0x1b0] sm:$0xff]  ;;  %v11103_v45 = vld [vmem:[%s19248_s1 + $0x138] sm:$0xff] }
  0x70   : > { %14979 = vmatpush3.msra.mxu1 %v722_v63  ;;  %12811 = vmatpush3.msra.mxu0 %v722_v63  ;;  %v15395_v36 = vld [vmem:[#allocation2 + $0x70] sm:$0xff]  ;;  %v11088_v38 = vld [vmem:[%s19248_s1 + $0xc0] sm:$0xff]  ;;  %v11085_v51 = vld [vmem:[%s19248_s1 + $0xa8] sm:$0xff] }
  0x71   : > { %14964 = vmatprep.subr.mxu1 %v721_v0  ;;  %12812 = vmatprep.subr.mxu0 %v721_v0  ;;  %v674_v39 = vld [vmem:[#allocation2 + $0x1e0] sm:$0xff]  ;;  %v15409_v42 = vld [vmem:[#allocation2 + $0x1f0] sm:$0xff]  ;;  %v11101_v53 = vld [vmem:[%s19248_s1 + $0x128] sm:$0xff] }
  0x72   : > { %14980 = vmatpush3.msra.mxu1 %v721_v0  ;;  %12813 = vmatpush3.msra.mxu0 %v721_v0  ;;  %v11104_v40 = vld [vmem:[%s19248_s1 + $0x140] sm:$0xff]  ;;  %v15414_v44 = vld [vmem:[#allocation2 + $0xb0] sm:$0xff]  ;;  %v11083_v59 = vld [vmem:[%s19248_s1 + $0x98] sm:$0xff] }
  0x73   : > { %14965 = vmatprep.subr.mxu1 %v720_v1  ;;  %12814 = vmatprep.subr.mxu0 %v720_v1  ;;  %v658_v41 = vld [vmem:[#allocation2 + $0xa0] sm:$0xff]  ;;  %v11086_v46 = vld [vmem:[%s19248_s1 + $0xb0] sm:$0xff]  ;;  %v11099_v61 = vld [vmem:[%s19248_s1 + $0x118] sm:$0xff] }
  0x74   : > { %14981 = vmatpush3.msra.mxu1 %v720_v1  ;;  %12815 = vmatpush3.msra.mxu0 %v720_v1  ;;  %v15423_v47 = vld [vmem:[#allocation2 + $0x200] sm:$0xff]  ;;  %v11102_v48 = vld [vmem:[%s19248_s1 + $0x130] sm:$0xff] }
  0x75   : > { %14966 = vmatprep.subr.mxu1 %v719_v2  ;;  %12816 = vmatprep.subr.mxu0 %v719_v2  ;;  %v15429_v49 = vld [vmem:[#allocation2 + $0xc0] sm:$0xff]  ;;  %v15431_v50 = vld [vmem:[#allocation2 + $0x210] sm:$0xff] }
  0x76   : > { %14982 = vmatpush3.msra.mxu1 %v719_v2  ;;  %12817 = vmatpush3.msra.mxu0 %v719_v2  ;;  %v15437_v52 = vld [vmem:[#allocation2 + $0xd0] sm:$0xff]  ;;  %v11084_v54 = vld [vmem:[%s19248_s1 + $0xa0] sm:$0xff] }
  0x77   : > { %14967 = vmatprep.subr.mxu1 %v718_v3  ;;  %12818 = vmatprep.subr.mxu0 %v718_v3  ;;  %v15447_v55 = vld [vmem:[#allocation2 + $0x220] sm:$0xff]  ;;  %v15455_v58 = vld [vmem:[#allocation2 + $0x230] sm:$0xff] }
  0x78   : > { %14983 = vmatpush3.msra.mxu1 %v718_v3  ;;  %12819 = vmatpush3.msra.mxu0 %v718_v3  ;;  %v11100_v56 = vld [vmem:[%s19248_s1 + $0x120] sm:$0xff]  ;;  %v15461_v60 = vld [vmem:[#allocation2 + $0xf0] sm:$0xff]  ;;  %v11081_v3 = vld [vmem:[%s19248_s1 + $0x88] sm:$0xff] }
  0x79   : > { %14968 = vmatprep.subr.mxu1 %v717_v4  ;;  %12820 = vmatprep.subr.mxu0 %v717_v4  ;;  %v15453_v57 = vld [vmem:[#allocation2 + $0xe0] sm:$0xff]  ;;  %v11082_v62 = vld [vmem:[%s19248_s1 + $0x90] sm:$0xff] }
  0x7a   : > { %14984 = vmatpush3.msra.mxu1 %v717_v4  ;;  %12821 = vmatpush3.msra.mxu0 %v717_v4  ;;  %v15471_v63 = vld [vmem:[#allocation2 + $0x240] sm:$0xff]  ;;  %v11098_v0 = vld [vmem:[%s19248_s1 + $0x110] sm:$0xff] }
  0x7b   : > { %14969 = vmatprep.subr.mxu1 %v716_v5  ;;  %12822 = vmatprep.subr.mxu0 %v716_v5  ;;  %v15477_v1 = vld [vmem:[#allocation2 + $0x100] sm:$0xff]  ;;  %v15479_v2 = vld [vmem:[#allocation2 + $0x250] sm:$0xff] }
  0x7c   : > { %14985 = vmatpush3.msra.mxu1 %v716_v5  ;;  %12823 = vmatpush3.msra.mxu0 %v716_v5  ;;  %v15485_v4 = vld [vmem:[#allocation2 + $0x110] sm:$0xff]  ;;  %v11097_v5 = vld [vmem:[%s19248_s1 + $0x108] sm:$0xff] }
  0x7d   : > { %14970 = vmatprep.subr.mxu1 %v715_v6  ;;  %12824 = vmatprep.subr.mxu0 %v715_v6 }
  0x7e   : > { %14986 = vmatpush3.msra.mxu1 %v715_v6  ;;  %12825 = vmatpush3.msra.mxu0 %v715_v6  ;;  %v11080_v6 = vld [vmem:[%s19248_s1 + $0x80] sm:$0xff] }
  0x7f   : > { %14971 = vmatprep.subr.mxu1 %v714_v7  ;;  %12826 = vmatprep.subr.mxu0 %v714_v7 }
  0x80   : > { %14987 = vmatpush3.msra.mxu1 %v714_v7  ;;  %12852 = vmatprep.mubr.f32.mxu1 %v666_v8  ;;  %v11096_v8 = vld [vmem:[%s19248_s1 + $0x100] sm:$0xff] }
  0x81   : > { %12827 = vmatpush3.msra.mxu0 %v714_v7  ;;  %12828 = vmatprep.mubr.f32.mxu0 %v650_v9  ;;  %v1019_v7 = vld [vmem:[#allocation2 + $0x1] sm:$0xff]  ;;  %v15499_v9 = vld [vmem:[#allocation2 + $0x11] sm:$0xff] }
  0x82   : > { %12853 = vmatmul.mubr.f32.vlgmr.msra.gmra.mxu1 %v15319_v10  ;;  %12876 = vmatprep.subr.mxu1 %v11095_v11 }
  0x83   : > { %12829 = vmatmul.mubr.f32.vlgmr.msra.gmra.mxu0 %v15324_v12  ;;  %12877 = vmatpush3.msra.mxu1 %v11095_v11  ;;  %v1389_v11 = vld [vmem:[#allocation2 + $0x2] sm:$0xff] }
  0x84   : > { %12956 = vmatprep.subr.mxu0 %v11111_v13  ;;  %12878 = vmatprep.subr.mxu1 %v11094_v14 }
  0x85   : > { %12957 = vmatpush3.msra.mxu0 %v11111_v13  ;;  %12855 = vmatprep.mubr.f32.mxu1 %v15333_v15  ;;  %v11127_v13 = vld [vmem:[%s19248_s1 + $0x1f8] sm:$0xff] }
  0x86   : > { %12879 = vmatpush3.msra.mxu1 %v11094_v14  ;;  %12958 = vmatprep.subr.mxu0 %v11110_v16  ;;  %v15504_v14 = vld [vmem:[#allocation2 + $0x12] sm:$0xff] }
  0x87   : > { %12831 = vmatprep.mubr.f32.mxu0 %v15339_v17  ;;  %12856 = vmatmul.mubr.f32.gmra.mxu1 %v15341_v18 }
  0x88   : > { %12880 = vmatprep.subr.mxu1 %v11093_v19  ;;  %12959 = vmatpush3.msra.mxu0 %v11110_v16  ;;  %v11143_v16 = vld [vmem:[%s19248_s1 + $0x278] sm:$0xff] }
  0x89   : > { %12832 = vmatmul.mubr.f32.gmra.mxu0 %v15347_v20  ;;  %12881 = vmatpush3.msra.mxu1 %v11093_v19  ;;  %v15510_v19 = vld [vmem:[#allocation2 + $0x21] sm:$0xff] }
  0x8a   : > { %12960 = vmatprep.subr.mxu0 %v11109_v21  ;;  %12882 = vmatprep.subr.mxu1 %v11092_v22 }
  0x8b   : > { %12961 = vmatpush3.msra.mxu0 %v11109_v21  ;;  %12858 = vmatprep.mubr.f32.mxu1 %v15357_v23  ;;  %v15512_v21 = vld [vmem:[#allocation2 + $0x31] sm:$0xff] }
  0x8c   : > { %12883 = vmatpush3.msra.mxu1 %v11092_v22  ;;  %12962 = vmatprep.subr.mxu0 %v11108_v24  ;;  %v15515_v22 = vld [vmem:[#allocation2 + $0x22] sm:$0xff] }
  0x8d   : > { %12834 = vmatprep.mubr.f32.mxu0 %v15363_v25  ;;  %12859 = vmatmul.mubr.f32.gmra.mxu1 %v15365_v26  ;;  %19333 = vst [vmem:[#allocation7_spill] sm:$0xff] %v15515_v22 }
  0x8e   : > { %12884 = vmatprep.subr.mxu1 %v11091_v27  ;;  %12963 = vmatpush3.msra.mxu0 %v11108_v24  ;;  %v11126_v24 = vld [vmem:[%s19248_s1 + $0x1f0] sm:$0xff] }
  0x8f   : > { %12835 = vmatmul.mubr.f32.gmra.mxu0 %v15371_v28  ;;  %12885 = vmatpush3.msra.mxu1 %v11091_v27  ;;  %v15521_v27 = vld [vmem:[#allocation2 + $0x32] sm:$0xff] }
  0x90   : > { %12964 = vmatprep.subr.mxu0 %v11107_v29  ;;  %12886 = vmatprep.subr.mxu1 %v11090_v30  ;;  %19334 = vst [vmem:[#allocation8_spill] sm:$0xff] %v15521_v27 }
  0x91   : > { %12965 = vmatpush3.msra.mxu0 %v11107_v29  ;;  %12861 = vmatprep.mubr.f32.mxu1 %v15381_v31  ;;  %v11142_v29 = vld [vmem:[%s19248_s1 + $0x270] sm:$0xff] }
  0x92   : > { %12887 = vmatpush3.msra.mxu1 %v11090_v30  ;;  %12966 = vmatprep.subr.mxu0 %v11106_v32  ;;  %v15527_v30 = vld [vmem:[#allocation2 + $0x41] sm:$0xff] }
  0x93   : > { %12837 = vmatprep.mubr.f32.mxu0 %v15387_v33  ;;  %12862 = vmatmul.mubr.f32.gmra.mxu1 %v15389_v34 }
  0x94   : > { %12888 = vmatprep.subr.mxu1 %v11089_v35  ;;  %12967 = vmatpush3.msra.mxu0 %v11106_v32  ;;  %v15530_v32 = vld [vmem:[#allocation2 + $0x51] sm:$0xff] }
  0x95   : > { %12838 = vmatmul.mubr.f32.gmra.mxu0 %v15395_v36  ;;  %12889 = vmatpush3.msra.mxu1 %v11089_v35  ;;  %v15533_v35 = vld [vmem:[#allocation2 + $0x42] sm:$0xff] }
  0x96   : > { %12968 = vmatprep.subr.mxu0 %v11105_v37  ;;  %12890 = vmatprep.subr.mxu1 %v11088_v38  ;;  %19335 = vst [vmem:[#allocation9_spill] sm:$0xff] %v15533_v35 }
  0x97   : > { %12969 = vmatpush3.msra.mxu0 %v11105_v37  ;;  %12864 = vmatprep.mubr.f32.mxu1 %v674_v39  ;;  %v11125_v37 = vld [vmem:[%s19248_s1 + $0x1e8] sm:$0xff] }
  0x98   : > { %12891 = vmatpush3.msra.mxu1 %v11088_v38  ;;  %12970 = vmatprep.subr.mxu0 %v11104_v40  ;;  %v15539_v38 = vld [vmem:[#allocation2 + $0x52] sm:$0xff]  ;;  %v11141_v39 = vld [vmem:[%s19248_s1 + $0x268] sm:$0xff] }
  0x99   : > { %12840 = vmatprep.mubr.f32.mxu0 %v658_v41  ;;  %12865 = vmatmul.mubr.f32.gmra.mxu1 %v15409_v42  ;;  %19336 = vst [vmem:[#allocation10_spill] sm:$0xff] %v15539_v38  ;;  %v15548_v41 = vld [vmem:[#allocation2 + $0x71] sm:$0xff] }
  0x9a   : > { %12892 = vmatprep.subr.mxu1 %v11087_v43  ;;  %12971 = vmatpush3.msra.mxu0 %v11104_v40  ;;  %v15545_v40 = vld [vmem:[#allocation2 + $0x61] sm:$0xff] }
  0x9b   : > { %12841 = vmatmul.mubr.f32.gmra.mxu0 %v15414_v44  ;;  %12893 = vmatpush3.msra.mxu1 %v11087_v43  ;;  %v15551_v43 = vld [vmem:[#allocation2 + $0x62] sm:$0xff] }
  0x9c   : > { %12972 = vmatprep.subr.mxu0 %v11103_v45  ;;  %12894 = vmatprep.subr.mxu1 %v11086_v46  ;;  %19337 = vst [vmem:[#allocation11_spill] sm:$0xff] %v15551_v43 }
  0x9d   : > { %12973 = vmatpush3.msra.mxu0 %v11103_v45  ;;  %12867 = vmatprep.mubr.f32.mxu1 %v15423_v47  ;;  %v11124_v45 = vld [vmem:[%s19248_s1 + $0x1e0] sm:$0xff] }
  0x9e   : > { %12895 = vmatpush3.msra.mxu1 %v11086_v46  ;;  %12974 = vmatprep.subr.mxu0 %v11102_v48  ;;  %v15557_v46 = vld [vmem:[#allocation2 + $0x72] sm:$0xff] }
  0x9f   : > { %12843 = vmatprep.mubr.f32.mxu0 %v15429_v49  ;;  %12868 = vmatmul.mubr.f32.gmra.mxu1 %v15431_v50  ;;  %19338 = vst [vmem:[#allocation12_spill] sm:$0xff] %v15557_v46 }
  0xa0   : > { %12896 = vmatprep.subr.mxu1 %v11085_v51  ;;  %12975 = vmatpush3.msra.mxu0 %v11102_v48  ;;  %v11140_v48 = vld [vmem:[%s19248_s1 + $0x260] sm:$0xff] }
  0xa1   : > { %12844 = vmatmul.mubr.f32.gmra.mxu0 %v15437_v52  ;;  %12897 = vmatpush3.msra.mxu1 %v11085_v51  ;;  %v1027_v51 = vld [vmem:[#allocation2 + $0xa1] sm:$0xff] }
  0xa2   : > { %12976 = vmatprep.subr.mxu0 %v11101_v53  ;;  %12898 = vmatprep.subr.mxu1 %v11084_v54 }
  0xa3   : > { %12977 = vmatpush3.msra.mxu0 %v11101_v53  ;;  %12870 = vmatprep.mubr.f32.mxu1 %v15447_v55  ;;  %v15564_v53 = vld [vmem:[#allocation2 + $0xb1] sm:$0xff] }
  0xa4   : > { %12899 = vmatpush3.msra.mxu1 %v11084_v54  ;;  %12978 = vmatprep.subr.mxu0 %v11100_v56  ;;  %v1397_v54 = vld [vmem:[#allocation2 + $0xa2] sm:$0xff] }
  0xa5   : > { %12846 = vmatprep.mubr.f32.mxu0 %v15453_v57  ;;  %12871 = vmatmul.mubr.f32.gmra.mxu1 %v15455_v58 }
  0xa6   : > { %12900 = vmatprep.subr.mxu1 %v11083_v59  ;;  %12979 = vmatpush3.msra.mxu0 %v11100_v56  ;;  %v11123_v56 = vld [vmem:[%s19248_s1 + $0x1d8] sm:$0xff] }
  0xa7   : > { %12847 = vmatmul.mubr.f32.gmra.mxu0 %v15461_v60  ;;  %12901 = vmatpush3.msra.mxu1 %v11083_v59  ;;  %v15570_v59 = vld [vmem:[#allocation2 + $0xb2] sm:$0xff] }
  0xa8   : > { %12980 = vmatprep.subr.mxu0 %v11099_v61  ;;  %12902 = vmatprep.subr.mxu1 %v11082_v62  ;;  %19339 = vst [vmem:[#allocation13_spill] sm:$0xff] %v15570_v59 }
  0xa9   : > { %12981 = vmatpush3.msra.mxu0 %v11099_v61  ;;  %12873 = vmatprep.mubr.f32.mxu1 %v15471_v63  ;;  %v11139_v61 = vld [vmem:[%s19248_s1 + $0x258] sm:$0xff] }
  0xaa   : > { %12903 = vmatpush3.msra.mxu1 %v11082_v62  ;;  %12982 = vmatprep.subr.mxu0 %v11098_v0  ;;  %v15576_v62 = vld [vmem:[#allocation2 + $0xc1] sm:$0xff] }
  0xab   : > { %12849 = vmatprep.mubr.f32.mxu0 %v15477_v1  ;;  %12874 = vmatmul.mubr.f32.gmra.mxu1 %v15479_v2 }
  0xac   : > { %12904 = vmatprep.subr.mxu1 %v11081_v3  ;;  %12983 = vmatpush3.msra.mxu0 %v11098_v0  ;;  %v15578_v0 = vld [vmem:[#allocation2 + $0xd1] sm:$0xff] }
  0xad   : > { %12850 = vmatmul.mubr.f32.gmra.mxu0 %v15485_v4  ;;  %12905 = vmatpush3.msra.mxu1 %v11081_v3  ;;  %v15581_v3 = vld [vmem:[#allocation2 + $0xc2] sm:$0xff] }
  0xae   : > { %12984 = vmatprep.subr.mxu0 %v11097_v5  ;;  %12906 = vmatprep.subr.mxu1 %v11080_v6  ;;  %19340 = vst [vmem:[#allocation14_spill] sm:$0xff] %v15581_v3 }
  0xaf   : > { %12985 = vmatpush3.msra.mxu0 %v11097_v5  ;;  %12907 = vmatpush3.msra.mxu1 %v11080_v6  ;;  %v11122_v5 = vld [vmem:[%s19248_s1 + $0x1d0] sm:$0xff] }
  0xb0   : > { %12908 = vmatprep.mubr.f32.mxu1 %v1019_v7  ;;  %12986 = vmatprep.subr.mxu0 %v11096_v8  ;;  %v15587_v6 = vld [vmem:[#allocation2 + $0xd2] sm:$0xff] }
  0xb1   : > { %12909 = vmatmul.mubr.f32.vlgmr.msra.gmra.mxu1 %v15499_v9  ;;  %12987 = vmatpush3.msra.mxu0 %v11096_v8  ;;  %19341 = vst [vmem:[#allocation15_spill] sm:$0xff] %v15587_v6  ;;  %v11138_v7 = vld [vmem:[%s19248_s1 + $0x250] sm:$0xff]  ;;  %v15593_v8 = vld [vmem:[#allocation2 + $0xe1] sm:$0xff] }
  0xb2   : > { %12988 = vmatprep.mubr.f32.mxu0 %v1389_v11  ;;  %13036 = vmatprep.subr.mxu1 %v11127_v13  ;;  %v15596_v11 = vld [vmem:[#allocation2 + $0xf1] sm:$0xff] }
  0xb3   : > { %12989 = vmatmul.mubr.f32.vlgmr.msra.gmra.mxu0 %v15504_v14  ;;  %13037 = vmatpush3.msra.mxu1 %v11127_v13  ;;  %v15599_v13 = vld [vmem:[#allocation2 + $0xe2] sm:$0xff] }
  0xb4   : > { %13116 = vmatprep.subr.mxu0 %v11143_v16  ;;  %12911 = vmatprep.mubr.f32.mxu1 %v15510_v19  ;;  %19342 = vst [vmem:[#allocation16_spill] sm:$0xff] %v15599_v13 }
  0xb5   : > { %13117 = vmatpush3.msra.mxu0 %v11143_v16  ;;  %12912 = vmatmul.mubr.f32.gmra.mxu1 %v15512_v21  ;;  %v11121_v16 = vld [vmem:[%s19248_s1 + $0x1c8] sm:$0xff] }
  0xb6   : > { %12991 = vmatprep.mubr.f32.mxu0 %v15515_v22  ;;  %13038 = vmatprep.subr.mxu1 %v11126_v24  ;;  %v15755_v22 = vld [vmem:[#allocation2 + $0x252] sm:$0xff] }
  0xb7   : > { %12992 = vmatmul.mubr.f32.gmra.mxu0 %v15521_v27  ;;  %13039 = vmatpush3.msra.mxu1 %v11126_v24  ;;  %v15605_v24 = vld [vmem:[#allocation2 + $0xf2] sm:$0xff]  ;;  %v15749_v27 = vld [vmem:[#allocation2 + $0x242] sm:$0xff] }
  0xb8   : > { %13118 = vmatprep.subr.mxu0 %v11142_v29  ;;  %12914 = vmatprep.mubr.f32.mxu1 %v15527_v30  ;;  %19343 = vst [vmem:[#allocation17_spill] sm:$0xff] %v15605_v24 }
  0xb9   : > { %13119 = vmatpush3.msra.mxu0 %v11142_v29  ;;  %12915 = vmatmul.mubr.f32.gmra.mxu1 %v15530_v32  ;;  %v11137_v29 = vld [vmem:[%s19248_s1 + $0x248] sm:$0xff] }
  0xba   : > { %12994 = vmatprep.mubr.f32.mxu0 %v15533_v35  ;;  %13040 = vmatprep.subr.mxu1 %v11125_v37  ;;  %v15737_v35 = vld [vmem:[#allocation2 + $0x232] sm:$0xff] }
  0xbb   : > { %12995 = vmatmul.mubr.f32.gmra.mxu0 %v15539_v38  ;;  %13041 = vmatpush3.msra.mxu1 %v11125_v37  ;;  %v15611_v37 = vld [vmem:[#allocation2 + $0x101] sm:$0xff] }
  0xbc   : > { %13120 = vmatprep.subr.mxu0 %v11141_v39  ;;  %12917 = vmatprep.mubr.f32.mxu1 %v15545_v40  ;;  %v15731_v38 = vld [vmem:[#allocation2 + $0x222] sm:$0xff] }
  0xbd   : > { %13121 = vmatpush3.msra.mxu0 %v11141_v39  ;;  %12918 = vmatmul.mubr.f32.gmra.mxu1 %v15548_v41  ;;  %v15614_v39 = vld [vmem:[#allocation2 + $0x111] sm:$0xff]  ;;  %19356 = vst [vmem:[#allocation30_spill] sm:$0xff] %v15731_v38 }
  0xbe   : > { %12997 = vmatprep.mubr.f32.mxu0 %v15551_v43  ;;  %13042 = vmatprep.subr.mxu1 %v11124_v45  ;;  %v15708_v43 = vld [vmem:[#allocation2 + $0x201] sm:$0xff] }
  0xbf   : > { %12998 = vmatmul.mubr.f32.gmra.mxu0 %v15557_v46  ;;  %13043 = vmatpush3.msra.mxu1 %v11124_v45  ;;  %v15617_v45 = vld [vmem:[#allocation2 + $0x102] sm:$0xff]  ;;  %v15702_v46 = vld [vmem:[#allocation2 + $0x1f2] sm:$0xff] }
  0xc0   : > { %13122 = vmatprep.subr.mxu0 %v11140_v48  ;;  %12920 = vmatprep.mubr.f32.mxu1 %v1027_v51  ;;  %19344 = vst [vmem:[#allocation18_spill] sm:$0xff] %v15617_v45  ;;  %v15623_v51 = vld [vmem:[#allocation2 + $0x112] sm:$0xff]  ;;  %19353 = vst [vmem:[#allocation27_spill] sm:$0xff] %v15702_v46 }
  0xc1   : > { %13123 = vmatpush3.msra.mxu0 %v11140_v48  ;;  %12921 = vmatmul.mubr.f32.gmra.mxu1 %v15564_v53  ;;  %v11120_v48 = vld [vmem:[%s19248_s1 + $0x1c0] sm:$0xff]  ;;  %19345 = vst [vmem:[#allocation19_spill] sm:$0xff] %v15623_v51 }
  0xc2   : > { %13000 = vmatprep.mubr.f32.mxu0 %v1397_v54  ;;  %13044 = vmatprep.subr.mxu1 %v11123_v56  ;;  %v11136_v54 = vld [vmem:[%s19248_s1 + $0x240] sm:$0xff] }
  0xc3   : > { %13001 = vmatmul.mubr.f32.gmra.mxu0 %v15570_v59  ;;  %13045 = vmatpush3.msra.mxu1 %v11123_v56  ;;  %v1035_v56 = vld [vmem:[#allocation2 + $0x141] sm:$0xff] }
  0xc4   : > { %13124 = vmatprep.subr.mxu0 %v11139_v61  ;;  %12923 = vmatprep.mubr.f32.mxu1 %v15576_v62  ;;  %v1413_v59 = vld [vmem:[#allocation2 + $0x1e2] sm:$0xff] }
  0xc5   : > { %13125 = vmatpush3.msra.mxu0 %v11139_v61  ;;  %12924 = vmatmul.mubr.f32.gmra.mxu1 %v15578_v0  ;;  %v15630_v61 = vld [vmem:[#allocation2 + $0x151] sm:$0xff] }
  0xc6   : > { %13003 = vmatprep.mubr.f32.mxu0 %v15581_v3  ;;  %13046 = vmatprep.subr.mxu1 %v11122_v5  ;;  %v15689_v3 = vld [vmem:[#allocation2 + $0x1b2] sm:$0xff] }
  0xc7   : > { %13004 = vmatmul.mubr.f32.gmra.mxu0 %v15587_v6  ;;  %13047 = vmatpush3.msra.mxu1 %v11122_v5  ;;  %v1405_v5 = vld [vmem:[#allocation2 + $0x142] sm:$0xff]  ;;  %19352 = vst [vmem:[#allocation26_spill] sm:$0xff] %v15689_v3 }
  0xc8   : > { %13126 = vmatprep.subr.mxu0 %v11138_v7  ;;  %12926 = vmatprep.mubr.f32.mxu1 %v15593_v8  ;;  %v15683_v6 = vld [vmem:[#allocation2 + $0x1a2] sm:$0xff] }
  0xc9   : > { %13127 = vmatpush3.msra.mxu0 %v11138_v7  ;;  %12927 = vmatmul.mubr.f32.gmra.mxu1 %v15596_v11  ;;  %v11119_v7 = vld [vmem:[%s19248_s1 + $0x1b8] sm:$0xff]  ;;  %19351 = vst [vmem:[#allocation25_spill] sm:$0xff] %v15683_v6 }
  0xca   : > { %13006 = vmatprep.mubr.f32.mxu0 %v15599_v13  ;;  %13048 = vmatprep.subr.mxu1 %v11121_v16  ;;  %v15671_v13 = vld [vmem:[#allocation2 + $0x192] sm:$0xff] }
  0xcb   : > { %13007 = vmatmul.mubr.f32.gmra.mxu0 %v15605_v24  ;;  %13049 = vmatpush3.msra.mxu1 %v11121_v16  ;;  %v15636_v16 = vld [vmem:[#allocation2 + $0x152] sm:$0xff]  ;;  %v15665_v24 = vld [vmem:[#allocation2 + $0x182] sm:$0xff]  ;;  %19350 = vst [vmem:[#allocation24_spill] sm:$0xff] %v15671_v13 }
  0xcc   : > { %13128 = vmatprep.subr.mxu0 %v11137_v29  ;;  %12929 = vmatprep.mubr.f32.mxu1 %v15611_v37  ;;  %19346 = vst [vmem:[#allocation20_spill] sm:$0xff] %v15636_v16  ;;  %19349 = vst [vmem:[#allocation23_spill] sm:$0xff] %v15665_v24 }
  0xcd   : > { %13129 = vmatpush3.msra.mxu0 %v11137_v29  ;;  %12930 = vmatmul.mubr.f32.gmra.mxu1 %v15614_v39  ;;  %v11135_v29 = vld [vmem:[%s19248_s1 + $0x238] sm:$0xff] }
  0xce   : > { %13009 = vmatprep.mubr.f32.mxu0 %v15617_v45  ;;  %13050 = vmatprep.subr.mxu1 %v11120_v48  ;;  %v15642_v45 = vld [vmem:[#allocation2 + $0x161] sm:$0xff] }
  0xcf   : > { %13010 = vmatmul.mubr.f32.gmra.mxu0 %v15623_v51  ;;  %13051 = vmatpush3.msra.mxu1 %v11120_v48  ;;  %v15644_v48 = vld [vmem:[#allocation2 + $0x171] sm:$0xff]  ;;  %v15647_v51 = vld [vmem:[#allocation2 + $0x162] sm:$0xff] }
  0xd0   : > { %13130 = vmatprep.subr.mxu0 %v11136_v54  ;;  %12932 = vmatprep.mubr.f32.mxu1 %v1035_v56  ;;  %19347 = vst [vmem:[#allocation21_spill] sm:$0xff] %v15647_v51  ;;  %v15653_v56 = vld [vmem:[#allocation2 + $0x172] sm:$0xff] }
  0xd1   : > { %13131 = vmatpush3.msra.mxu0 %v11136_v54  ;;  %12933 = vmatmul.mubr.f32.gmra.mxu1 %v15630_v61  ;;  %v11118_v54 = vld [vmem:[%s19248_s1 + $0x1b0] sm:$0xff]  ;;  %19348 = vst [vmem:[#allocation22_spill] sm:$0xff] %v15653_v56 }
  0xd2   : > { %13012 = vmatprep.mubr.f32.mxu0 %v1405_v5  ;;  %13052 = vmatprep.subr.mxu1 %v11119_v7  ;;  %v11134_v5 = vld [vmem:[%s19248_s1 + $0x230] sm:$0xff] }
  0xd3   : > { %13013 = vmatmul.mubr.f32.gmra.mxu0 %v15636_v16  ;;  %13053 = vmatpush3.msra.mxu1 %v11119_v7  ;;  %v15659_v16 = vld [vmem:[#allocation2 + $0x181] sm:$0xff]  ;;  %v15662_v7 = vld [vmem:[#allocation2 + $0x191] sm:$0xff] }
  0xd4   : > { %13132 = vmatprep.subr.mxu0 %v11135_v29  ;;  %12935 = vmatprep.mubr.f32.mxu1 %v15642_v45 }
  0xd5   : > { %13133 = vmatpush3.msra.mxu0 %v11135_v29  ;;  %12936 = vmatmul.mubr.f32.gmra.mxu1 %v15644_v48  ;;  %v11117_v29 = vld [vmem:[%s19248_s1 + $0x1a8] sm:$0xff] }
  0xd6   : > { %13015 = vmatprep.mubr.f32.mxu0 %v15647_v51  ;;  %13054 = vmatprep.subr.mxu1 %v11118_v54  ;;  %v11133_v51 = vld [vmem:[%s19248_s1 + $0x228] sm:$0xff] }
  0xd7   : > { %13016 = vmatmul.mubr.f32.gmra.mxu0 %v15653_v56  ;;  %13055 = vmatpush3.msra.mxu1 %v11118_v54  ;;  %v15677_v56 = vld [vmem:[#allocation2 + $0x1a1] sm:$0xff]  ;;  %v15680_v54 = vld [vmem:[#allocation2 + $0x1b1] sm:$0xff] }
  0xd8   : > { %13134 = vmatprep.subr.mxu0 %v11134_v5  ;;  %12938 = vmatprep.mubr.f32.mxu1 %v15659_v16 }
  0xd9   : > { %13135 = vmatpush3.msra.mxu0 %v11134_v5  ;;  %12939 = vmatmul.mubr.f32.gmra.mxu1 %v15662_v7  ;;  %v11116_v5 = vld [vmem:[%s19248_s1 + $0x1a0] sm:$0xff] }
  0xda   : > { %13018 = vmatprep.mubr.f32.mxu0 %v15665_v24  ;;  %13056 = vmatprep.subr.mxu1 %v11117_v29  ;;  %v11132_v24 = vld [vmem:[%s19248_s1 + $0x220] sm:$0xff] }
  0xdb   : > { %13019 = vmatmul.mubr.f32.gmra.mxu0 %v15671_v13  ;;  %13057 = vmatpush3.msra.mxu1 %v11117_v29  ;;  %v1043_v13 = vld [vmem:[#allocation2 + $0x1e1] sm:$0xff]  ;;  %v15696_v29 = vld [vmem:[#allocation2 + $0x1f1] sm:$0xff] }
  0xdc   : > { %13136 = vmatprep.subr.mxu0 %v11133_v51  ;;  %12941 = vmatprep.mubr.f32.mxu1 %v15677_v56 }
  0xdd   : > { %13137 = vmatpush3.msra.mxu0 %v11133_v51  ;;  %12942 = vmatmul.mubr.f32.gmra.mxu1 %v15680_v54  ;;  %v11115_v51 = vld [vmem:[%s19248_s1 + $0x198] sm:$0xff] }
  0xde   : > { %13021 = vmatprep.mubr.f32.mxu0 %v15683_v6  ;;  %13058 = vmatprep.subr.mxu1 %v11116_v5  ;;  %v11131_v6 = vld [vmem:[%s19248_s1 + $0x218] sm:$0xff] }
  0xdf   : > { %13022 = vmatmul.mubr.f32.gmra.mxu0 %v15689_v3  ;;  %13059 = vmatpush3.msra.mxu1 %v11116_v5  ;;  %v15710_v5 = vld [vmem:[#allocation2 + $0x211] sm:$0xff]  ;;  %v15713_v3 = vld [vmem:[#allocation2 + $0x202] sm:$0xff] }
  0xe0   : > { %13138 = vmatprep.subr.mxu0 %v11132_v24  ;;  %12944 = vmatprep.mubr.f32.mxu1 %v1043_v13  ;;  %19354 = vst [vmem:[#allocation28_spill] sm:$0xff] %v15713_v3  ;;  %v11114_v13 = vld [vmem:[%s19248_s1 + $0x190] sm:$0xff] }
  0xe1   : > { %13139 = vmatpush3.msra.mxu0 %v11132_v24  ;;  %12945 = vmatmul.mubr.f32.gmra.mxu1 %v15696_v29  ;;  %v15719_v24 = vld [vmem:[#allocation2 + $0x212] sm:$0xff] }
  0xe2   : > { %13024 = vmatprep.mubr.f32.mxu0 %v1413_v59  ;;  %13060 = vmatprep.subr.mxu1 %v11115_v51  ;;  %19355 = vst [vmem:[#allocation29_spill] sm:$0xff] %v15719_v24  ;;  %v11130_v59 = vld [vmem:[%s19248_s1 + $0x210] sm:$0xff] }
  0xe3   : > { %13025 = vmatmul.mubr.f32.gmra.mxu0 %v15702_v46  ;;  %13061 = vmatpush3.msra.mxu1 %v11115_v51  ;;  %v15725_v46 = vld [vmem:[#allocation2 + $0x221] sm:$0xff]  ;;  %v15728_v51 = vld [vmem:[#allocation2 + $0x231] sm:$0xff] }
  0xe4   : > { %13140 = vmatprep.subr.mxu0 %v11131_v6  ;;  %12947 = vmatprep.mubr.f32.mxu1 %v15708_v43 }
  0xe5   : > { %13141 = vmatpush3.msra.mxu0 %v11131_v6  ;;  %12948 = vmatmul.mubr.f32.gmra.mxu1 %v15710_v5  ;;  %v11113_v6 = vld [vmem:[%s19248_s1 + $0x188] sm:$0xff] }
  0xe6   : > { %13027 = vmatprep.mubr.f32.mxu0 %v15713_v3  ;;  %13062 = vmatprep.subr.mxu1 %v11114_v13  ;;  %v11129_v3 = vld [vmem:[%s19248_s1 + $0x208] sm:$0xff] }
  0xe7   : > { %13028 = vmatmul.mubr.f32.gmra.mxu0 %v15719_v24  ;;  %13063 = vmatpush3.msra.mxu1 %v11114_v13  ;;  %v15743_v24 = vld [vmem:[#allocation2 + $0x241] sm:$0xff]  ;;  %v15746_v13 = vld [vmem:[#allocation2 + $0x251] sm:$0xff] }
  0xe8   : > { %13142 = vmatprep.subr.mxu0 %v11130_v59  ;;  %12950 = vmatprep.mubr.f32.mxu1 %v15725_v46 }
  0xe9   : > { %13143 = vmatpush3.msra.mxu0 %v11130_v59  ;;  %12951 = vmatmul.mubr.f32.gmra.mxu1 %v15728_v51  ;;  %v11112_v59 = vld [vmem:[%s19248_s1 + $0x180] sm:$0xff] }
  0xea   : > { %13030 = vmatprep.mubr.f32.mxu0 %v15731_v38  ;;  %13064 = vmatprep.subr.mxu1 %v11113_v6  ;;  %v11128_v38 = vld [vmem:[%s19248_s1 + $0x200] sm:$0xff] }
  0xeb   : > { %13031 = vmatmul.mubr.f32.gmra.mxu0 %v15737_v35  ;;  %13065 = vmatpush3.msra.mxu1 %v11113_v6  ;;  %v11159_v6 = vld [vmem:[%s19248_s1 + $0x2f8] sm:$0xff] }
  0xec   : > { %13144 = vmatprep.subr.mxu0 %v11129_v3  ;;  %12953 = vmatprep.mubr.f32.mxu1 %v15743_v24 }
  0xed   : > { %13145 = vmatpush3.msra.mxu0 %v11129_v3  ;;  %12954 = vmatmul.mubr.f32.gmra.mxu1 %v15746_v13  ;;  %v11175_v3 = vld [vmem:[%s19248_s1 + $0x378] sm:$0xff] }
  0xee   : > { %13033 = vmatprep.mubr.f32.mxu0 %v15749_v27  ;;  %13066 = vmatprep.subr.mxu1 %v11112_v59 }
  0xef   : > { %13034 = vmatmul.mubr.f32.gmra.mxu0 %v15755_v22  ;;  %13067 = vmatpush3.msra.mxu1 %v11112_v59  ;;  %v11158_v59 = vld [vmem:[%s19248_s1 + $0x2f0] sm:$0xff] }
  0xf0   : > { %13146 = vmatprep.subr.mxu0 %v11128_v38  ;;  %13068 = vmatprep.mubr.f32.mxu1 %v15324_v12  ;;  %v11174_v12 = vld [vmem:[%s19248_s1 + $0x370] sm:$0xff] }
  0xf1   : > { %13147 = vmatpush3.msra.mxu0 %v11128_v38  ;;  %13069 = vmatmul.mubr.f32.vlgmr.msra.gmra.mxu1 %v15339_v17  ;;  %v11157_v17 = vld [vmem:[%s19248_s1 + $0x2e8] sm:$0xff]  ;;  %v11150_v38 = vld [vmem:[%s19248_s1 + $0x2b0] sm:$0xff] }
  0xf2   : > { %13148 = vmatprep.mubr.f32.mxu0 %v15499_v9  ;;  %13196 = vmatprep.subr.mxu1 %v11159_v6  ;;  %v11156_v9 = vld [vmem:[%s19248_s1 + $0x2e0] sm:$0xff] }
  0xf3   : > { %13149 = vmatmul.mubr.f32.vlgmr.msra.gmra.mxu0 %v15510_v19  ;;  %13197 = vmatpush3.msra.mxu1 %v11159_v6  ;;  %v11155_v19 = vld [vmem:[%s19248_s1 + $0x2d8] sm:$0xff]  ;;  %v11204_v6 = vld [vmem:[%s19248_s1 + $0x460] sm:$0xff] }
  0xf4   : > { %13276 = vmatprep.subr.mxu0 %v11175_v3  ;;  %13071 = vmatprep.mubr.f32.mxu1 %v15347_v20  ;;  %v11173_v20 = vld [vmem:[%s19248_s1 + $0x368] sm:$0xff] }
  0xf5   : > { %13277 = vmatpush3.msra.mxu0 %v11175_v3  ;;  %13072 = vmatmul.mubr.f32.gmra.mxu1 %v15363_v25  ;;  %v15792_v25 = vld [vmem:[#allocation2 + $0x80] sm:$0xff] }
  0xf6   : > { %13151 = vmatprep.mubr.f32.mxu0 %v15512_v21  ;;  %13198 = vmatprep.subr.mxu1 %v11158_v59  ;;  %v11154_v21 = vld [vmem:[%s19248_s1 + $0x2d0] sm:$0xff]  ;;  %v2879_v3 = vld [vmem:[#allocation2 + $0xc0] sm:$0xff] }
  0xf7   : > { %13152 = vmatmul.mubr.f32.gmra.mxu0 %v15527_v30  ;;  %13199 = vmatpush3.msra.mxu1 %v11158_v59  ;;  %v11152_v30 = vld [vmem:[%s19248_s1 + $0x2c0] sm:$0xff]  ;;  %v11187_v59 = vld [vmem:[%s19248_s1 + $0x3d8] sm:$0xff] }
  0xf8   : > { %13278 = vmatprep.subr.mxu0 %v11174_v12  ;;  %13074 = vmatprep.mubr.f32.mxu1 %v15371_v28  ;;  %v15799_v28 = vld [vmem:[#allocation2 + $0x81] sm:$0xff] }
  0xf9   : > { %13279 = vmatpush3.msra.mxu0 %v11174_v12  ;;  %13075 = vmatmul.mubr.f32.gmra.mxu1 %v15387_v33  ;;  %v11172_v33 = vld [vmem:[%s19248_s1 + $0x360] sm:$0xff]  ;;  %v19363_v12 = vld [vmem:[#allocation13_spill] sm:$0xff] }
  0xfa   : > { %13154 = vmatprep.mubr.f32.mxu0 %v15530_v32  ;;  %13200 = vmatprep.subr.mxu1 %v11157_v17  ;;  %v11151_v32 = vld [vmem:[%s19248_s1 + $0x2b8] sm:$0xff] }
  0xfb   : > { %13155 = vmatmul.mubr.f32.gmra.mxu0 %v15545_v40  ;;  %13201 = vmatpush3.msra.mxu1 %v11157_v17  ;;  %v11148_v40 = vld [vmem:[%s19248_s1 + $0x2a0] sm:$0xff]  ;;  %v2880_v17 = vld [vmem:[#allocation2 + $0xd0] sm:$0xff] }
  0xfc   : > { %13280 = vmatprep.subr.mxu0 %v11173_v20  ;;  %13077 = vmatprep.mubr.f32.mxu1 %v15395_v36  ;;  %v11171_v36 = vld [vmem:[%s19248_s1 + $0x358] sm:$0xff] }
  0xfd   : > { %13281 = vmatpush3.msra.mxu0 %v11173_v20  ;;  %13078 = vmatmul.mubr.f32.gmra.mxu1 %v15792_v25  ;;  %v19364_v20 = vld [vmem:[#allocation14_spill] sm:$0xff] }
  0xfe   : > { %13157 = vmatprep.mubr.f32.mxu0 %v15548_v41  ;;  %13202 = vmatprep.subr.mxu1 %v11156_v9  ;;  %v11147_v41 = vld [vmem:[%s19248_s1 + $0x298] sm:$0xff] }
  0xff   : > { %13158 = vmatmul.mubr.f32.gmra.mxu0 %v15799_v28  ;;  %13203 = vmatpush3.msra.mxu1 %v11156_v9  ;;  %v11203_v9 = vld [vmem:[%s19248_s1 + $0x458] sm:$0xff] }
 0x100   : > { %13282 = vmatprep.subr.mxu0 %v11172_v33  ;;  %13080 = vmatprep.mubr.f32.mxu1 %v15414_v44  ;;  %v11170_v44 = vld [vmem:[%s19248_s1 + $0x350] sm:$0xff] }
 0x101   : > { %13283 = vmatpush3.msra.mxu0 %v11172_v33  ;;  %13081 = vmatmul.mubr.f32.gmra.mxu1 %v15429_v49  ;;  %v11153_v49 = vld [vmem:[%s19248_s1 + $0x2c8] sm:$0xff]  ;;  %v2881_v33 = vld [vmem:[#allocation2 + $0xe0] sm:$0xff] }
 0x102   : > { %13160 = vmatprep.mubr.f32.mxu0 %v15564_v53  ;;  %13204 = vmatprep.subr.mxu1 %v11155_v19  ;;  %v11146_v53 = vld [vmem:[%s19248_s1 + $0x290] sm:$0xff] }
 0x103   : > { %13161 = vmatmul.mubr.f32.gmra.mxu0 %v15576_v62  ;;  %13205 = vmatpush3.msra.mxu1 %v11155_v19  ;;  %v11191_v62 = vld [vmem:[%s19248_s1 + $0x3f8] sm:$0xff]  ;;  %v11186_v19 = vld [vmem:[%s19248_s1 + $0x3d0] sm:$0xff] }
 0x104   : > { %13284 = vmatprep.subr.mxu0 %v11171_v36  ;;  %13083 = vmatprep.mubr.f32.mxu1 %v15437_v52  ;;  %v11169_v52 = vld [vmem:[%s19248_s1 + $0x348] sm:$0xff] }
 0x105   : > { %13285 = vmatpush3.msra.mxu0 %v11171_v36  ;;  %13084 = vmatmul.mubr.f32.gmra.mxu1 %v15453_v57  ;;  %v15836_v57 = vld [vmem:[#allocation2 + $0x120] sm:$0xff] }
 0x106   : > { %13163 = vmatprep.mubr.f32.mxu0 %v15578_v0  ;;  %13206 = vmatprep.subr.mxu1 %v11154_v21  ;;  %v19357_v0 = vld [vmem:[#allocation7_spill] sm:$0xff] }
 0x107   : > { %13164 = vmatmul.mubr.f32.gmra.mxu0 %v15593_v8  ;;  %13207 = vmatpush3.msra.mxu1 %v11154_v21  ;;  %v11207_v8 = vld [vmem:[%s19248_s1 + $0x478] sm:$0xff]  ;;  %v19365_v21 = vld [vmem:[#allocation15_spill] sm:$0xff] }
 0x108   : > { %13286 = vmatprep.subr.mxu0 %v11170_v44  ;;  %13086 = vmatprep.mubr.f32.mxu1 %v15461_v60  ;;  %v2145_v60 = vld [vmem:[#allocation2 + $0x121] sm:$0xff] }
 0x109   : > { %13287 = vmatpush3.msra.mxu0 %v11170_v44  ;;  %13087 = vmatmul.mubr.f32.gmra.mxu1 %v15477_v1  ;;  %v11168_v1 = vld [vmem:[%s19248_s1 + $0x340] sm:$0xff]  ;;  %v2882_v44 = vld [vmem:[#allocation2 + $0xf0] sm:$0xff] }
 0x10a   : > { %13166 = vmatprep.mubr.f32.mxu0 %v15596_v11  ;;  %13208 = vmatprep.subr.mxu1 %v11153_v49  ;;  %v2873_v11 = vld [vmem:[#allocation2 + $0x40] sm:$0xff] }
 0x10b   : > { %13167 = vmatmul.mubr.f32.gmra.mxu0 %v15611_v37  ;;  %13209 = vmatpush3.msra.mxu1 %v11153_v49  ;;  %v11190_v37 = vld [vmem:[%s19248_s1 + $0x3f0] sm:$0xff] }
 0x10c   : > { %13288 = vmatprep.subr.mxu0 %v11169_v52  ;;  %13089 = vmatprep.mubr.f32.mxu1 %v15485_v4  ;;  %v11167_v4 = vld [vmem:[%s19248_s1 + $0x338] sm:$0xff] }
 0x10d   : > { %13289 = vmatpush3.msra.mxu0 %v11169_v52  ;;  %13090 = vmatmul.mubr.f32.gmra.mxu1 %v15836_v57  ;;  %v19366_v52 = vld [vmem:[#allocation16_spill] sm:$0xff] }
 0x10e   : > { %13169 = vmatprep.mubr.f32.mxu0 %v15614_v39  ;;  %13210 = vmatprep.subr.mxu1 %v11152_v30  ;;  %v19358_v39 = vld [vmem:[#allocation8_spill] sm:$0xff] }
 0x10f   : > { %13170 = vmatmul.mubr.f32.gmra.mxu0 %v2145_v60  ;;  %13211 = vmatpush3.msra.mxu1 %v11152_v30  ;;  %v11202_v30 = vld [vmem:[%s19248_s1 + $0x450] sm:$0xff] }
 0x110   : > { %13290 = vmatprep.subr.mxu0 %v11168_v1  ;;  %13092 = vmatprep.mubr.f32.mxu1 %v15319_v10  ;;  %v11166_v10 = vld [vmem:[%s19248_s1 + $0x330] sm:$0xff] }
 0x111   : > { %13291 = vmatpush3.msra.mxu0 %v11168_v1  ;;  %13093 = vmatmul.mubr.f32.gmra.mxu1 %v15333_v15  ;;  %v11149_v15 = vld [vmem:[%s19248_s1 + $0x2a8] sm:$0xff]  ;;  %v2883_v1 = vld [vmem:[#allocation2 + $0x100] sm:$0xff] }
 0x112   : > { %13172 = vmatprep.mubr.f32.mxu0 %v15630_v61  ;;  %13212 = vmatprep.subr.mxu1 %v11151_v32  ;;  %v11206_v61 = vld [vmem:[%s19248_s1 + $0x470] sm:$0xff] }
 0x113   : > { %13173 = vmatmul.mubr.f32.gmra.mxu0 %v15642_v45  ;;  %13213 = vmatpush3.msra.mxu1 %v11151_v32  ;;  %v19359_v45 = vld [vmem:[#allocation9_spill] sm:$0xff]  ;;  %v11185_v32 = vld [vmem:[%s19248_s1 + $0x3c8] sm:$0xff] }
 0x114   : > { %13292 = vmatprep.subr.mxu0 %v11167_v4  ;;  %13095 = vmatprep.mubr.f32.mxu1 %v15341_v18  ;;  %v11165_v18 = vld [vmem:[%s19248_s1 + $0x328] sm:$0xff] }
 0x115   : > { %13293 = vmatpush3.msra.mxu0 %v11167_v4  ;;  %13096 = vmatmul.mubr.f32.gmra.mxu1 %v15357_v23  ;;  %v15877_v23 = vld [vmem:[#allocation2 + $0x1c0] sm:$0xff] }
 0x116   : > { %13175 = vmatprep.mubr.f32.mxu0 %v15644_v48  ;;  %13214 = vmatprep.subr.mxu1 %v11150_v38  ;;  %v11189_v48 = vld [vmem:[%s19248_s1 + $0x3e8] sm:$0xff] }
 0x117   : > { %13176 = vmatmul.mubr.f32.gmra.mxu0 %v15659_v16  ;;  %13215 = vmatpush3.msra.mxu1 %v11150_v38  ;;  %v2875_v16 = vld [vmem:[#allocation2 + $0x60] sm:$0xff]  ;;  %v19367_v38 = vld [vmem:[#allocation17_spill] sm:$0xff] }
 0x118   : > { %13294 = vmatprep.subr.mxu0 %v11166_v10  ;;  %13098 = vmatprep.mubr.f32.mxu1 %v15365_v26  ;;  %v2153_v26 = vld [vmem:[#allocation2 + $0x1c1] sm:$0xff] }
 0x119   : > { %13295 = vmatpush3.msra.mxu0 %v11166_v10  ;;  %13099 = vmatmul.mubr.f32.gmra.mxu1 %v15381_v31  ;;  %v11164_v31 = vld [vmem:[%s19248_s1 + $0x320] sm:$0xff]  ;;  %v2884_v10 = vld [vmem:[#allocation2 + $0x110] sm:$0xff] }
 0x11a   : > { %13178 = vmatprep.mubr.f32.mxu0 %v15662_v7  ;;  %13216 = vmatprep.subr.mxu1 %v11149_v15  ;;  %v2876_v7 = vld [vmem:[#allocation2 + $0x70] sm:$0xff] }
 0x11b   : > { %13179 = vmatmul.mubr.f32.gmra.mxu0 %v15677_v56  ;;  %13217 = vmatpush3.msra.mxu1 %v11149_v15  ;;  %v19360_v56 = vld [vmem:[#allocation10_spill] sm:$0xff] }
 0x11c   : > { %13296 = vmatprep.subr.mxu0 %v11165_v18  ;;  %13101 = vmatprep.mubr.f32.mxu1 %v15389_v34  ;;  %v11163_v34 = vld [vmem:[%s19248_s1 + $0x318] sm:$0xff] }
 0x11d   : > { %13297 = vmatpush3.msra.mxu0 %v11165_v18  ;;  %13102 = vmatmul.mubr.f32.gmra.mxu1 %v15877_v23  ;;  %v19368_v15 = vld [vmem:[#allocation18_spill] sm:$0xff]  ;;  %v11201_v18 = vld [vmem:[%s19248_s1 + $0x448] sm:$0xff] }
 0x11e   : > { %13181 = vmatprep.mubr.f32.mxu0 %v15680_v54  ;;  %13218 = vmatprep.subr.mxu1 %v11148_v40  ;;  %v19361_v54 = vld [vmem:[#allocation11_spill] sm:$0xff] }
 0x11f   : > { %13182 = vmatmul.mubr.f32.gmra.mxu0 %v2153_v26  ;;  %13219 = vmatpush3.msra.mxu1 %v11148_v40 }
 0x120   : > { %13298 = vmatprep.subr.mxu0 %v11164_v31  ;;  %13104 = vmatprep.mubr.f32.mxu1 %v15409_v42  ;;  %v11162_v42 = vld [vmem:[%s19248_s1 + $0x310] sm:$0xff] }
 0x121   : > { %13299 = vmatpush3.msra.mxu0 %v11164_v31  ;;  %13105 = vmatmul.mubr.f32.gmra.mxu1 %v15423_v47  ;;  %v11145_v47 = vld [vmem:[%s19248_s1 + $0x288] sm:$0xff] }
 0x122   : > { %13184 = vmatprep.mubr.f32.mxu0 %v15696_v29  ;;  %13220 = vmatprep.subr.mxu1 %v11147_v41  ;;  %v11205_v29 = vld [vmem:[%s19248_s1 + $0x468] sm:$0xff] }
 0x123   : > { %13185 = vmatmul.mubr.f32.gmra.mxu0 %v15708_v43  ;;  %13221 = vmatpush3.msra.mxu1 %v11147_v41  ;;  %v11144_v43 = vld [vmem:[%s19248_s1 + $0x280] sm:$0xff] }
 0x124   : > { %13300 = vmatprep.subr.mxu0 %v11163_v34  ;;  %13107 = vmatprep.mubr.f32.mxu1 %v15431_v50  ;;  %v11161_v50 = vld [vmem:[%s19248_s1 + $0x308] sm:$0xff]  ;;  %v11184_v41 = vld [vmem:[%s19248_s1 + $0x3c0] sm:$0xff] }
 0x125   : > { %13301 = vmatpush3.msra.mxu0 %v11163_v34  ;;  %13108 = vmatmul.mubr.f32.gmra.mxu1 %v15447_v55  ;;  %v15918_v55 = vld [vmem:[#allocation2 + $0x260] sm:$0xff] }
 0x126   : > { %13187 = vmatprep.mubr.f32.mxu0 %v15710_v5  ;;  %13222 = vmatprep.subr.mxu1 %v11146_v53  ;;  %v15954_v5 = vld [vmem:[#allocation2 + $0x82] sm:$0xff] }
 0x127   : > { %13188 = vmatmul.mubr.f32.gmra.mxu0 %v15725_v46  ;;  %13223 = vmatpush3.msra.mxu1 %v11146_v53  ;;  %v2871_v46 = vld [vmem:[#allocation2 + $0x20] sm:$0xff] }
 0x128   : > { %13302 = vmatprep.subr.mxu0 %v11162_v42  ;;  %13110 = vmatprep.mubr.f32.mxu1 %v15455_v58  ;;  %v2161_v58 = vld [vmem:[#allocation2 + $0x261] sm:$0xff] }
 0x129   : > { %13303 = vmatpush3.msra.mxu0 %v11162_v42  ;;  %13111 = vmatmul.mubr.f32.gmra.mxu1 %v15471_v63  ;;  %v11160_v63 = vld [vmem:[%s19248_s1 + $0x300] sm:$0xff]  ;;  %v2886_v42 = vld [vmem:[#allocation2 + $0x130] sm:$0xff] }
 0x12a   : > { %13190 = vmatprep.mubr.f32.mxu0 %v15728_v51  ;;  %13224 = vmatprep.subr.mxu1 %v11145_v47  ;;  %v19362_v51 = vld [vmem:[#allocation12_spill] sm:$0xff]  ;;  %v19369_v53 = vld [vmem:[#allocation19_spill] sm:$0xff] }
 0x12b   : > { %13191 = vmatmul.mubr.f32.gmra.mxu0 %v15743_v24  ;;  %13225 = vmatpush3.msra.mxu1 %v11145_v47  ;;  %v11188_v24 = vld [vmem:[%s19248_s1 + $0x3e0] sm:$0xff] }
 0x12c   : > { %13304 = vmatprep.subr.mxu0 %v11161_v50  ;;  %13113 = vmatprep.mubr.f32.mxu1 %v15479_v2  ;;  %v2872_v2 = vld [vmem:[#allocation2 + $0x30] sm:$0xff]  ;;  %v16003_v31 = vld [vmem:[#allocation2 + $0x122] sm:$0xff] }
 0x12d   : > { %13305 = vmatpush3.msra.mxu0 %v11161_v50  ;;  %13114 = vmatmul.mubr.f32.gmra.mxu1 %v15918_v55  ;;  %v11200_v47 = vld [vmem:[%s19248_s1 + $0x440] sm:$0xff] }
 0x12e   : > { %13193 = vmatprep.mubr.f32.mxu0 %v15746_v13  ;;  %13226 = vmatprep.subr.mxu1 %v11144_v43  ;;  %v2878_v13 = vld [vmem:[#allocation2 + $0x90] sm:$0xff] }
 0x12f   : > { %13194 = vmatmul.mubr.f32.gmra.mxu0 %v2161_v58  ;;  %13227 = vmatpush3.msra.mxu1 %v11144_v43  ;;  %v2887_v43 = vld [vmem:[#allocation2 + $0x160] sm:$0xff]  ;;  %v11183_v58 = vld [vmem:[%s19248_s1 + $0x3b8] sm:$0xff] }
 0x130   : > { %13306 = vmatprep.subr.mxu0 %v11160_v63  ;;  %13228 = vmatprep.mubr.f32.mxu1 %v15504_v14  ;;  %v2874_v14 = vld [vmem:[#allocation2 + $0x50] sm:$0xff] }
 0x131   : > { %13307 = vmatpush3.msra.mxu0 %v11160_v63  ;;  %13229 = vmatmul.mubr.f32.vlgmr.msra.gmra.mxu1 %v19357_v0  ;;  %v19371_v0 = vld [vmem:[#allocation21_spill] sm:$0xff] }
 0x132   : > { %13308 = vmatprep.mubr.f32.mxu0 %v2871_v46  ;;  %13356 = vmatprep.subr.mxu1 %v11191_v62 }
 0x133   : > { %13309 = vmatmul.mubr.f32.vlgmr.msra.gmra.mxu0 %v2872_v2  ;;  %13357 = vmatpush3.msra.mxu1 %v11191_v62  ;;  %v19370_v62 = vld [vmem:[#allocation20_spill] sm:$0xff]  ;;  %v2888_v2 = vld [vmem:[#allocation2 + $0x170] sm:$0xff] }
 0x134   : > { %13436 = vmatprep.subr.mxu0 %v11207_v8  ;;  %13231 = vmatprep.mubr.f32.mxu1 %v19358_v39 }
 0x135   : > { %13437 = vmatpush3.msra.mxu0 %v11207_v8  ;;  %13232 = vmatmul.mubr.f32.gmra.mxu1 %v19359_v45  ;;  %v2890_v45 = vld [vmem:[#allocation2 + $0x190] sm:$0xff] }
 0x136   : > { %13311 = vmatprep.mubr.f32.mxu0 %v2873_v11  ;;  %13358 = vmatprep.subr.mxu1 %v11190_v37  ;;  %v2889_v11 = vld [vmem:[#allocation2 + $0x180] sm:$0xff] }
 0x137   : > { %13312 = vmatmul.mubr.f32.gmra.mxu0 %v2874_v14  ;;  %13359 = vmatpush3.msra.mxu1 %v11190_v37  ;;  %v11182_v37 = vld [vmem:[%s19248_s1 + $0x3b0] sm:$0xff]  ;;  %v19372_v14 = vld [vmem:[#allocation22_spill] sm:$0xff] }
 0x138   : > { %13438 = vmatprep.subr.mxu0 %v11206_v61  ;;  %13234 = vmatprep.mubr.f32.mxu1 %v19360_v56 }
 0x139   : > { %13439 = vmatpush3.msra.mxu0 %v11206_v61  ;;  %13235 = vmatmul.mubr.f32.gmra.mxu1 %v19361_v54  ;;  %v19373_v61 = vld [vmem:[#allocation23_spill] sm:$0xff]  ;;  %v11181_v54 = vld [vmem:[%s19248_s1 + $0x3a8] sm:$0xff] }
 0x13a   : > { %13314 = vmatprep.mubr.f32.mxu0 %v2875_v16  ;;  %13360 = vmatprep.subr.mxu1 %v11189_v48  ;;  %v11198_v16 = vld [vmem:[%s19248_s1 + $0x430] sm:$0xff] }
 0x13b   : > { %13315 = vmatmul.mubr.f32.gmra.mxu0 %v2876_v7  ;;  %13361 = vmatpush3.msra.mxu1 %v11189_v48  ;;  %v2891_v7 = vld [vmem:[#allocation2 + $0x1a0] sm:$0xff] }
 0x13c   : > { %13440 = vmatprep.subr.mxu0 %v11205_v29  ;;  %13237 = vmatprep.mubr.f32.mxu1 %v19362_v51  ;;  %v2892_v51 = vld [vmem:[#allocation2 + $0x1b0] sm:$0xff] }
 0x13d   : > { %13441 = vmatpush3.msra.mxu0 %v11205_v29  ;;  %13238 = vmatmul.mubr.f32.gmra.mxu1 %v15954_v5 }
 0x13e   : > { %13317 = vmatprep.mubr.f32.mxu0 %v15792_v25  ;;  %13362 = vmatprep.subr.mxu1 %v11188_v24 }
 0x13f   : > { %13318 = vmatmul.mubr.f32.gmra.mxu0 %v2878_v13  ;;  %13363 = vmatpush3.msra.mxu1 %v11188_v24  ;;  %v19374_v24 = vld [vmem:[#allocation24_spill] sm:$0xff]  ;;  %v19375_v13 = vld [vmem:[#allocation25_spill] sm:$0xff] }
 0x140   : > { %13442 = vmatprep.subr.mxu0 %v11204_v6  ;;  %13240 = vmatprep.mubr.f32.mxu1 %v19363_v12  ;;  %v11180_v12 = vld [vmem:[%s19248_s1 + $0x3a0] sm:$0xff] }
 0x141   : > { %13443 = vmatpush3.msra.mxu0 %v11204_v6  ;;  %13241 = vmatmul.mubr.f32.gmra.mxu1 %v19364_v20  ;;  %v11197_v6 = vld [vmem:[%s19248_s1 + $0x428] sm:$0xff] }
 0x142   : > { %13320 = vmatprep.mubr.f32.mxu0 %v2879_v3  ;;  %13364 = vmatprep.subr.mxu1 %v11187_v59  ;;  %v15973_v25 = vpop.f32.mrf.mxu1 }
 0x143   : > { %13321 = vmatmul.mubr.f32.gmra.mxu0 %v2880_v17  ;;  %13365 = vmatpush3.msra.mxu1 %v11187_v59  ;;  %v15978_v36 = vpop.f32.mrf.mxu0  ;;  %v16058_v59 = vld [vmem:[#allocation2 + $0x1c2] sm:$0xff] }
 0x144   : > { %13444 = vmatprep.subr.mxu0 %v11203_v9  ;;  %13243 = vmatprep.mubr.f32.mxu1 %v19365_v21  ;;  %v15981_v49 = vpop.f32.mrf.mxu1 }
 0x145   : > { %13445 = vmatpush3.msra.mxu0 %v11203_v9  ;;  %13244 = vmatmul.mubr.f32.gmra.mxu1 %v19366_v52  ;;  %v15987_v60 = vpop.f32.mrf.mxu0  ;;  %v19376_v9 = vld [vmem:[#allocation26_spill] sm:$0xff] }
 0x146   : > { %13323 = vmatprep.mubr.f32.mxu0 %v2881_v33  ;;  %13366 = vmatprep.subr.mxu1 %v11186_v19  ;;  %v2894_v33 = vld [vmem:[#allocation2 + $0x1d0] sm:$0xff]  ;;  %v11179_v52 = vld [vmem:[%s19248_s1 + $0x398] sm:$0xff] }
 0x147   : > { %13324 = vmatmul.mubr.f32.gmra.mxu0 %v2882_v44  ;;  %13367 = vmatpush3.msra.mxu1 %v11186_v19  ;;  %v15992_v4 = vpop.f32.mrf.mxu1  ;;  %v11196_v19 = vld [vmem:[%s19248_s1 + $0x420] sm:$0xff] }
 0x148   : > { %13446 = vmatprep.subr.mxu0 %v11202_v30  ;;  %13246 = vmatprep.mubr.f32.mxu1 %v19367_v38  ;;  %v2895_v44 = vld [vmem:[#allocation2 + $0x200] sm:$0xff]  ;;  %v19378_v38 = vld [vmem:[#allocation28_spill] sm:$0xff] }
 0x149   : > { %13447 = vmatpush3.msra.mxu0 %v11202_v30  ;;  %13247 = vmatmul.mubr.f32.gmra.mxu1 %v19368_v15  ;;  %v15999_v40 = vpop.f32.mrf.mxu0  ;;  %v16001_v26 = vpop.f32.mrf.mxu1 }
 0x14a   : > { %13326 = vmatprep.mubr.f32.mxu0 %v2883_v1  ;;  %13368 = vmatprep.subr.mxu1 %v11185_v32  ;;  %v19377_v1 = vld [vmem:[#allocation27_spill] sm:$0xff] }
 0x14b   : > { %13327 = vmatmul.mubr.f32.gmra.mxu0 %v2884_v10  ;;  %13369 = vmatpush3.msra.mxu1 %v11185_v32  ;;  %v16008_v34 = vpop.f32.mrf.mxu0  ;;  %v2896_v32 = vld [vmem:[#allocation2 + $0x210] sm:$0xff] }
 0x14c   : > { %13448 = vmatprep.subr.mxu0 %v11201_v18  ;;  %13249 = vmatprep.mubr.f32.mxu1 %v19369_v53 }
 0x14d   : > { %13449 = vmatpush3.msra.mxu0 %v11201_v18  ;;  %13250 = vmatmul.mubr.f32.gmra.mxu1 %v16003_v31  ;;  %v16015_v50 = vpop.f32.mrf.mxu1  ;;  %v2897_v18 = vld [vmem:[#allocation2 + $0x220] sm:$0xff] }
 0x14e   : > { %13329 = vmatprep.mubr.f32.mxu0 %v15836_v57  ;;  %13370 = vmatprep.subr.mxu1 %v11184_v41  ;;  %v11199_v57 = vld [vmem:[%s19248_s1 + $0x438] sm:$0xff] }
 0x14f   : > { %13330 = vmatmul.mubr.f32.gmra.mxu0 %v2886_v42  ;;  %13371 = vmatpush3.msra.mxu1 %v11184_v41  ;;  %v16021_v63 = vpop.f32.mrf.mxu0  ;;  %v16023_v46 = vpop.f32.mrf.mxu1  ;;  %v11178_v41 = vld [vmem:[%s19248_s1 + $0x390] sm:$0xff] }
 0x150   : > { %13450 = vmatprep.subr.mxu0 %v11200_v47  ;;  %13252 = vmatprep.mubr.f32.mxu1 %v19370_v62  ;;  %v19379_v42 = vld [vmem:[#allocation29_spill] sm:$0xff] }
 0x151   : > { %13451 = vmatpush3.msra.mxu0 %v11200_v47  ;;  %13253 = vmatmul.mubr.f32.gmra.mxu1 %v19371_v0  ;;  %v16030_v8 = vpop.f32.mrf.mxu0  ;;  %v2898_v47 = vld [vmem:[#allocation2 + $0x230] sm:$0xff]  ;;  %v11177_v0 = vld [vmem:[%s19248_s1 + $0x388] sm:$0xff] }
 0x152   : > { %13332 = vmatprep.mubr.f32.mxu0 %v2887_v43  ;;  %13372 = vmatprep.subr.mxu1 %v11183_v58  ;;  %v19380_v43 = vld [vmem:[#allocation30_spill] sm:$0xff] }
 0x153   : > { %13333 = vmatmul.mubr.f32.gmra.mxu0 %v2888_v2  ;;  %13373 = vmatpush3.msra.mxu1 %v11183_v58  ;;  %v16035_v39 = vpop.f32.mrf.mxu1  ;;  %v11194_v58 = vld [vmem:[%s19248_s1 + $0x410] sm:$0xff]  ;;  %v2899_v2 = vld [vmem:[#allocation2 + $0x240] sm:$0xff] }
 0x154   : > { %13452 = vmatprep.subr.mxu0 %v11199_v57  ;;  %13255 = vmatprep.mubr.f32.mxu1 %v19372_v14  ;;  %v11193_v14 = vld [vmem:[%s19248_s1 + $0x408] sm:$0xff] }
 0x155   : > { %13453 = vmatpush3.msra.mxu0 %v11199_v57  ;;  %13256 = vmatmul.mubr.f32.gmra.mxu1 %v19373_v61  ;;  %v16042_v48 = vpop.f32.mrf.mxu0  ;;  %v16044_v56 = vpop.f32.mrf.mxu1  ;;  %v16115_v61 = vld [vmem:[#allocation2 + $0x262] sm:$0xff] }
 0x156   : > { %13335 = vmatprep.mubr.f32.mxu0 %v2889_v11  ;;  %13374 = vmatprep.subr.mxu1 %v11182_v37 }
 0x157   : > { %13336 = vmatmul.mubr.f32.gmra.mxu0 %v2890_v45  ;;  %13375 = vmatpush3.msra.mxu1 %v11182_v37  ;;  %v16049_v29 = vpop.f32.mrf.mxu0  ;;  %v2900_v37 = vld [vmem:[#allocation2 + $0x250] sm:$0xff] }
 0x158   : > { %13454 = vmatprep.subr.mxu0 %v11198_v16  ;;  %13258 = vmatprep.mubr.f32.mxu1 %v19374_v24  ;;  %v11192_v24 = vld [vmem:[%s19248_s1 + $0x400] sm:$0xff] }
 0x159   : > { %13455 = vmatpush3.msra.mxu0 %v11198_v16  ;;  %13259 = vmatmul.mubr.f32.gmra.mxu1 %v19375_v13  ;;  %v16056_v3 = vpop.f32.mrf.mxu1  ;;  %v3242_v13 = vld [vmem:[#allocation2 + $0x31] sm:$0xff] }
 0x15a   : > { %13338 = vmatprep.mubr.f32.mxu0 %v2891_v7  ;;  %13376 = vmatprep.subr.mxu1 %v11181_v54 }
 0x15b   : > { %13339 = vmatmul.mubr.f32.gmra.mxu0 %v2892_v51  ;;  %13377 = vmatpush3.msra.mxu1 %v11181_v54  ;;  %v16063_v17 = vpop.f32.mrf.mxu0  ;;  %v16065_v20 = vpop.f32.mrf.mxu1  ;;  %v3241_v51 = vld [vmem:[#allocation2 + $0x21] sm:$0xff] }
 0x15c   : > { %13456 = vmatprep.subr.mxu0 %v11197_v6  ;;  %13261 = vmatprep.mubr.f32.mxu1 %v19376_v9  ;;  %v3612_v9 = vld [vmem:[#allocation2 + $0x32] sm:$0xff] }
 0x15d   : > { %13457 = vmatpush3.msra.mxu0 %v11197_v6  ;;  %13262 = vmatmul.mubr.f32.gmra.mxu1 %v16058_v59  ;;  %v16072_v21 = vpop.f32.mrf.mxu0  ;;  %v3611_v6 = vld [vmem:[#allocation2 + $0x22] sm:$0xff] }
 0x15e   : > { %13341 = vmatprep.mubr.f32.mxu0 %v15877_v23  ;;  %13378 = vmatprep.subr.mxu1 %v11180_v12  ;;  %v11195_v23 = vld [vmem:[%s19248_s1 + $0x418] sm:$0xff] }
 0x15f   : > { %13342 = vmatmul.mubr.f32.gmra.mxu0 %v2894_v33  ;;  %13379 = vmatpush3.msra.mxu1 %v11180_v12  ;;  %v16078_v30 = vpop.f32.mrf.mxu1  ;;  %v11223_v12 = vld [vmem:[%s19248_s1 + $0x4f8] sm:$0xff] }
 0x160   : > { %13458 = vmatprep.subr.mxu0 %v11196_v19  ;;  %13264 = vmatprep.mubr.f32.mxu1 %v19377_v1 }
 0x161   : > { %13459 = vmatpush3.msra.mxu0 %v11196_v19  ;;  %13265 = vmatmul.mubr.f32.gmra.mxu1 %v19378_v38  ;;  %v16085_v10 = vpop.f32.mrf.mxu0  ;;  %v16087_v15 = vpop.f32.mrf.mxu1  ;;  %v3243_v19 = vld [vmem:[#allocation2 + $0x41] sm:$0xff] }
 0x162   : > { %13344 = vmatprep.mubr.f32.mxu0 %v2895_v44  ;;  %13380 = vmatprep.subr.mxu1 %v11179_v52  ;;  %v3613_v38 = vld [vmem:[#allocation2 + $0x42] sm:$0xff] }
 0x163   : > { %13345 = vmatmul.mubr.f32.gmra.mxu0 %v2896_v32  ;;  %13381 = vmatpush3.msra.mxu1 %v11179_v52  ;;  %v16092_v53 = vpop.f32.mrf.mxu0  ;;  %v3244_v52 = vld [vmem:[#allocation2 + $0x51] sm:$0xff] }
 0x164   : > { %13460 = vmatprep.subr.mxu0 %v11195_v23  ;;  %13267 = vmatprep.mubr.f32.mxu1 %v19379_v42  ;;  %v3614_v42 = vld [vmem:[#allocation2 + $0x52] sm:$0xff] }
 0x165   : > { %13461 = vmatpush3.msra.mxu0 %v11195_v23  ;;  %13268 = vmatmul.mubr.f32.gmra.mxu1 %v19380_v43  ;;  %v16099_v62 = vpop.f32.mrf.mxu1  ;;  %v11222_v23 = vld [vmem:[%s19248_s1 + $0x4f0] sm:$0xff] }
 0x166   : > { %13347 = vmatprep.mubr.f32.mxu0 %v2897_v18  ;;  %13382 = vmatprep.subr.mxu1 %v11178_v41  ;;  %v11238_v43 = vld [vmem:[%s19248_s1 + $0x570] sm:$0xff] }
 0x167   : > { %13348 = vmatmul.mubr.f32.gmra.mxu0 %v2898_v47  ;;  %13383 = vmatpush3.msra.mxu1 %v11178_v41  ;;  %v16104_v57 = vpop.f32.mrf.mxu0  ;;  %v16106_v11 = vpop.f32.mrf.mxu1 }
 0x168   : > { %13462 = vmatprep.subr.mxu0 %v11194_v58  ;;  %13270 = vmatprep.mubr.f32.mxu1 %v15737_v35  ;;  %v11176_v35 = vld [vmem:[%s19248_s1 + $0x380] sm:$0xff] }
 0x169   : > { %13463 = vmatpush3.msra.mxu0 %v11194_v58  ;;  %13271 = vmatmul.mubr.f32.gmra.mxu1 %v15749_v27  ;;  %v16113_v45 = vpop.f32.mrf.mxu0  ;;  %v2902_v27 = vld [vmem:[#allocation2 + $0x270] sm:$0xff]  ;;  %v3245_v58 = vld [vmem:[#allocation2 + $0x61] sm:$0xff] }
 0x16a   : > { %13350 = vmatprep.mubr.f32.mxu0 %v2899_v2  ;;  %13384 = vmatprep.subr.mxu1 %v11177_v0 }
 0x16b   : > { %13351 = vmatmul.mubr.f32.gmra.mxu0 %v2900_v37  ;;  %13385 = vmatpush3.msra.mxu1 %v11177_v0  ;;  %v16117_v16 = vpop.f32.mrf.mxu1  ;;  %v3246_v37 = vld [vmem:[#allocation2 + $0x71] sm:$0xff] }
 0x16c   : > { %13464 = vmatprep.subr.mxu0 %v11193_v14  ;;  %13273 = vmatprep.mubr.f32.mxu1 %v15755_v22 }
 0x16d   : > { %13465 = vmatpush3.msra.mxu0 %v11193_v14  ;;  %13274 = vmatmul.mubr.f32.gmra.mxu1 %v16115_v61  ;;  %v16124_v7 = vpop.f32.mrf.mxu0  ;;  %v16126_v54 = vpop.f32.mrf.mxu1 }
 0x16e   : > { %13353 = vmatprep.mubr.f32.mxu0 %v15918_v55  ;;  %13386 = vmatprep.subr.mxu1 %v11176_v35  ;;  %v11239_v55 = vld [vmem:[%s19248_s1 + $0x578] sm:$0xff] }
 0x16f   : > { %13354 = vmatmul.mubr.f32.gmra.mxu0 %v2902_v27  ;;  %13387 = vmatpush3.msra.mxu1 %v11176_v35  ;;  %v16132_v22 = vpop.f32.mrf.mxu0  ;;  %v3615_v35 = vld [vmem:[#allocation2 + $0x62] sm:$0xff] }
 0x170   : > { %13466 = vmatprep.subr.mxu0 %v11192_v24  ;;  %13388 = vmatprep.mubr.f32.mxu1 %v3241_v51  ;;  %v11221_v27 = vld [vmem:[%s19248_s1 + $0x4e8] sm:$0xff] }
 0x171   : > { %13467 = vmatpush3.msra.mxu0 %v11192_v24  ;;  %v12910_v33 = vpop.f32.mrf.mxu1  ;;  %13389 = vmatmul.mubr.f32.vlgmr.msra.gmra.mxu1 %v3242_v13  ;;  %v3616_v13 = vld [vmem:[#allocation2 + $0x72] sm:$0xff] }
 0x172   : > { %v1326_v44 = vadd.f32 %v12910_v33, %v15978_v36  ;;  %13468 = vmatprep.mubr.f32.mxu0 %v3611_v6  ;;  %13516 = vmatprep.subr.mxu1 %v11223_v12 }
 0x173   : > { %v12990_v1 = vpop.f32.mrf.mxu0  ;;  %13469 = vmatmul.mubr.f32.vlgmr.msra.gmra.mxu0 %v3612_v9  ;;  %13517 = vmatpush3.msra.mxu1 %v11223_v12  ;;  %v1166_v32 = vpop.f32.mrf.mxu1  ;;  %v11237_v12 = vld [vmem:[%s19248_s1 + $0x568] sm:$0xff] }
 0x174   : > { %v16144_v18 = vadd.f32 %v12990_v1, %v1326_v44  ;;  %v1325_v41 = vadd.f32 %v1166_v32, %v15987_v60  ;;  %13596 = vmatprep.subr.mxu0 %v11239_v55  ;;  %13391 = vmatprep.mubr.f32.mxu1 %v3243_v19  ;;  %v11220_v44 = vld [vmem:[%s19248_s1 + $0x4e0] sm:$0xff]  ;;  %v3618_v32 = vld [vmem:[#allocation2 + $0x92] sm:$0xff] }
 0x175   : > { %v1536_v36 = vpop.f32.mrf.mxu0  ;;  %13597 = vmatpush3.msra.mxu0 %v11239_v55  ;;  %v12913_v47 = vpop.f32.mrf.mxu1  ;;  %13392 = vmatmul.mubr.f32.gmra.mxu1 %v3244_v52  ;;  %v3248_v55 = vld [vmem:[#allocation2 + $0x91] sm:$0xff] }
 0x176   : > { %v16150_v2 = vadd.f32 %v1536_v36, %v1325_v41  ;;  %v1328_v0 = vadd.f32 %v12913_v47, %v15999_v40  ;;  %13471 = vmatprep.mubr.f32.mxu0 %v3613_v38  ;;  %13518 = vmatprep.subr.mxu1 %v11222_v23  ;;  %v16175_v41 = vld [vmem:[#allocation2 + $0xc1] sm:$0xff] }
 0x177   : > { %v12993_v60 = vpop.f32.mrf.mxu0  ;;  %13472 = vmatmul.mubr.f32.gmra.mxu0 %v3614_v42  ;;  %13519 = vmatpush3.msra.mxu1 %v11222_v23  ;;  %v1176_v14 = vpop.f32.mrf.mxu1  ;;  %v11236_v23 = vld [vmem:[%s19248_s1 + $0x560] sm:$0xff] }
 0x178   : > { %v16156_v24 = vadd.f32 %v12993_v60, %v1328_v0  ;;  %v1327_v51 = vadd.f32 %v1176_v14, %v16008_v34  ;;  %13598 = vmatprep.subr.mxu0 %v11238_v43  ;;  %13394 = vmatprep.mubr.f32.mxu1 %v3245_v58  ;;  %v11219_v58 = vld [vmem:[%s19248_s1 + $0x4d8] sm:$0xff] }
 0x179   : > { %v1546_v40 = vpop.f32.mrf.mxu0  ;;  %13599 = vmatpush3.msra.mxu0 %v11238_v43  ;;  %v12916_v6 = vpop.f32.mrf.mxu1  ;;  %13395 = vmatmul.mubr.f32.gmra.mxu1 %v3246_v37  ;;  %v3619_v43 = vld [vmem:[#allocation2 + $0xc2] sm:$0xff]  ;;  %v11235_v14 = vld [vmem:[%s19248_s1 + $0x558] sm:$0xff] }
 0x17a   : > { %v16162_v9 = vadd.f32 %v1546_v40, %v1327_v51  ;;  %v1330_v33 = vadd.f32 %v12916_v6, %v16021_v63  ;;  %13474 = vmatprep.mubr.f32.mxu0 %v3615_v35  ;;  %13520 = vmatprep.subr.mxu1 %v11221_v27  ;;  %v16194_v35 = vld [vmem:[#allocation2 + $0xe1] sm:$0xff] }
 0x17b   : > { %v12996_v19 = vpop.f32.mrf.mxu0  ;;  %13475 = vmatmul.mubr.f32.gmra.mxu0 %v3616_v13  ;;  %13521 = vmatpush3.msra.mxu1 %v11221_v27  ;;  %v1186_v34 = vpop.f32.mrf.mxu1  ;;  %v3621_v6 = vld [vmem:[#allocation2 + $0xe2] sm:$0xff] }
 0x17c   : > { %v16168_v52 = vadd.f32 %v12996_v19, %v1330_v33  ;;  %v1329_v1 = vadd.f32 %v1186_v34, %v16030_v8  ;;  %13600 = vmatprep.subr.mxu0 %v11237_v12  ;;  %13397 = vmatprep.mubr.f32.mxu1 %v15799_v28  ;;  %v16181_v8 = vld [vmem:[#allocation2 + $0xd1] sm:$0xff] }
 0x17d   : > { %v1556_v63 = vpop.f32.mrf.mxu0  ;;  %13601 = vmatpush3.msra.mxu0 %v11237_v12  ;;  %v12919_v38 = vpop.f32.mrf.mxu1  ;;  %13398 = vmatmul.mubr.f32.gmra.mxu1 %v3248_v55  ;;  %v11218_v12 = vld [vmem:[%s19248_s1 + $0x4d0] sm:$0xff] }
 0x17e   : > { %v16177_v42 = vadd.f32 %v1556_v63, %v1329_v1  ;;  %v1332_v36 = vadd.f32 %v12919_v38, %v16042_v48  ;;  %13477 = vmatprep.mubr.f32.mxu0 %v15954_v5  ;;  %13522 = vmatprep.subr.mxu1 %v11220_v44  ;;  %v3620_v5 = vld [vmem:[#allocation2 + $0xd2] sm:$0xff]  ;;  %v16212_v1 = vld [vmem:[#allocation2 + $0x101] sm:$0xff] }
 0x17f   : > { %v12999_v28 = vpop.f32.mrf.mxu0  ;;  %13478 = vmatmul.mubr.f32.gmra.mxu0 %v3618_v32  ;;  %13523 = vmatpush3.msra.mxu1 %v11220_v44  ;;  %v1196_v47 = vpop.f32.mrf.mxu1  ;;  %v11234_v44 = vld [vmem:[%s19248_s1 + $0x550] sm:$0xff] }
 0x180   : > { %v16186_v0 = vadd.f32 %v12999_v28, %v1332_v36  ;;  %v1331_v37 = vadd.f32 %v1196_v47, %v16049_v29  ;;  %13602 = vmatprep.subr.mxu0 %v11236_v23  ;;  %13400 = vmatprep.mubr.f32.mxu1 %v16175_v41  ;;  %v16199_v29 = vld [vmem:[#allocation2 + $0xf1] sm:$0xff]  ;;  %v3623_v36 = vld [vmem:[#allocation2 + $0x102] sm:$0xff] }
 0x181   : > { %v1566_v48 = vpop.f32.mrf.mxu0  ;;  %13603 = vmatpush3.msra.mxu0 %v11236_v23  ;;  %v12922_v60 = vpop.f32.mrf.mxu1  ;;  %13401 = vmatmul.mubr.f32.gmra.mxu1 %v16181_v8  ;;  %v11217_v28 = vld [vmem:[%s19248_s1 + $0x4c8] sm:$0xff] }
 0x182   : > { %v16196_v27 = vadd.f32 %v1566_v48, %v1331_v37  ;;  %v1334_v51 = vadd.f32 %v12922_v60, %v16063_v17  ;;  %13480 = vmatprep.mubr.f32.mxu0 %v3619_v43  ;;  %13524 = vmatprep.subr.mxu1 %v11219_v58  ;;  %v3622_v17 = vld [vmem:[#allocation2 + $0xf2] sm:$0xff]  ;;  %v3255_v48 = vld [vmem:[#allocation2 + $0x121] sm:$0xff] }
 0x183   : > { %v13002_v13 = vpop.f32.mrf.mxu0  ;;  %13481 = vmatmul.mubr.f32.gmra.mxu0 %v3620_v5  ;;  %13525 = vmatpush3.msra.mxu1 %v11219_v58  ;;  %v1206_v40 = vpop.f32.mrf.mxu1  ;;  %v11233_v5 = vld [vmem:[%s19248_s1 + $0x548] sm:$0xff] }
 0x184   : > { %v16204_v33 = vadd.f32 %v13002_v13, %v1334_v51  ;;  %v1333_v55 = vadd.f32 %v1206_v40, %v16072_v21  ;;  %13604 = vmatprep.subr.mxu0 %v11235_v14  ;;  %13403 = vmatprep.mubr.f32.mxu1 %v16194_v35  ;;  %v16217_v21 = vld [vmem:[#allocation2 + $0x111] sm:$0xff]  ;;  %v11216_v40 = vld [vmem:[%s19248_s1 + $0x4c0] sm:$0xff] }
 0x185   : > { %v1576_v19 = vpop.f32.mrf.mxu0  ;;  %13605 = vmatpush3.msra.mxu0 %v11235_v14  ;;  %v12925_v34 = vpop.f32.mrf.mxu1  ;;  %13404 = vmatmul.mubr.f32.gmra.mxu1 %v16199_v29 }
 0x186   : > { %v16214_v32 = vadd.f32 %v1576_v19, %v1333_v55  ;;  %v1336_v63 = vadd.f32 %v12925_v34, %v16085_v10  ;;  %13483 = vmatprep.mubr.f32.mxu0 %v3621_v6  ;;  %13526 = vmatprep.subr.mxu1 %v11218_v12  ;;  %v3624_v10 = vld [vmem:[#allocation2 + $0x112] sm:$0xff]  ;;  %v11232_v19 = vld [vmem:[%s19248_s1 + $0x540] sm:$0xff] }
 0x187   : > { %v13005_v38 = vpop.f32.mrf.mxu0  ;;  %13484 = vmatmul.mubr.f32.gmra.mxu0 %v3622_v17  ;;  %13527 = vmatpush3.msra.mxu1 %v11218_v12  ;;  %v1216_v23 = vpop.f32.mrf.mxu1  ;;  %v3626_v55 = vld [vmem:[#allocation2 + $0x132] sm:$0xff]  ;;  %v16242_v34 = vld [vmem:[#allocation2 + $0x161] sm:$0xff] }
 0x188   : > { %v16222_v47 = vadd.f32 %v13005_v38, %v1336_v63  ;;  %v1335_v43 = vadd.f32 %v1216_v23, %v16092_v53  ;;  %13606 = vmatprep.subr.mxu0 %v11234_v44  ;;  %13406 = vmatprep.mubr.f32.mxu1 %v16212_v1  ;;  %v3256_v53 = vld [vmem:[#allocation2 + $0x131] sm:$0xff] }
 0x189   : > { %v1586_v58 = vpop.f32.mrf.mxu0  ;;  %13607 = vmatpush3.msra.mxu0 %v11234_v44  ;;  %v12928_v37 = vpop.f32.mrf.mxu1  ;;  %13407 = vmatmul.mubr.f32.gmra.mxu1 %v16217_v21 }
 0x18a   : > { %v16230_v60 = vadd.f32 %v1586_v58, %v1335_v43  ;;  %v1338_v14 = vadd.f32 %v12928_v37, %v16104_v57  ;;  %13486 = vmatprep.mubr.f32.mxu0 %v3623_v36  ;;  %13528 = vmatprep.subr.mxu1 %v11217_v28  ;;  %v3627_v36 = vld [vmem:[#allocation2 + $0x162] sm:$0xff]  ;;  %v11231_v37 = vld [vmem:[%s19248_s1 + $0x538] sm:$0xff] }
 0x18b   : > { %v13008_v51 = vpop.f32.mrf.mxu0  ;;  %13487 = vmatmul.mubr.f32.gmra.mxu0 %v3624_v10  ;;  %13529 = vmatpush3.msra.mxu1 %v11217_v28  ;;  %v1226_v13 = vpop.f32.mrf.mxu1  ;;  %v11215_v28 = vld [vmem:[%s19248_s1 + $0x4b8] sm:$0xff] }
 0x18c   : > { %v16236_v6 = vadd.f32 %v13008_v51, %v1338_v14  ;;  %v1337_v12 = vadd.f32 %v1226_v13, %v16113_v45  ;;  %13608 = vmatprep.subr.mxu0 %v11233_v5  ;;  %13409 = vmatprep.mubr.f32.mxu1 %v3255_v48  ;;  %v16248_v45 = vld [vmem:[#allocation2 + $0x171] sm:$0xff]  ;;  %v3629_v13 = vld [vmem:[#allocation2 + $0x182] sm:$0xff] }
 0x18d   : > { %v1596_v17 = vpop.f32.mrf.mxu0  ;;  %13609 = vmatpush3.msra.mxu0 %v11233_v5  ;;  %v12931_v57 = vpop.f32.mrf.mxu1  ;;  %13410 = vmatmul.mubr.f32.gmra.mxu1 %v3256_v53  ;;  %v16261_v5 = vld [vmem:[#allocation2 + $0x181] sm:$0xff] }
 0x18e   : > { %v16244_v44 = vadd.f32 %v1596_v17, %v1337_v12  ;;  %v1340_v63 = vadd.f32 %v12931_v57, %v16124_v7  ;;  %13489 = vmatprep.mubr.f32.mxu0 %v16003_v31  ;;  %13530 = vmatprep.subr.mxu1 %v11216_v40  ;;  %v3628_v31 = vld [vmem:[#allocation2 + $0x172] sm:$0xff] }
 0x18f   : > { %v13011_v38 = vpop.f32.mrf.mxu0  ;;  %13490 = vmatmul.mubr.f32.gmra.mxu0 %v3626_v55  ;;  %13531 = vmatpush3.msra.mxu1 %v11216_v40  ;;  %v1236_v23 = vpop.f32.mrf.mxu1  ;;  %v11214_v40 = vld [vmem:[%s19248_s1 + $0x4b0] sm:$0xff] }
 0x190   : > { %v16253_v43 = vadd.f32 %v13011_v38, %v1340_v63  ;;  %v1339_v10 = vadd.f32 %v1236_v23, %v16132_v22  ;;  %13610 = vmatprep.subr.mxu0 %v11232_v19  ;;  %13412 = vmatprep.mubr.f32.mxu1 %v16242_v34  ;;  %v16266_v22 = vld [vmem:[#allocation2 + $0x191] sm:$0xff]  ;;  %v16279_v63 = vld [vmem:[#allocation2 + $0x1a1] sm:$0xff] }
 0x191   : > { %v1606_v7 = vpop.f32.mrf.mxu0  ;;  %13611 = vmatpush3.msra.mxu0 %v11232_v19  ;;  %v12934_v58 = vpop.f32.mrf.mxu1  ;;  %13413 = vmatmul.mubr.f32.gmra.mxu1 %v16248_v45  ;;  %v11230_v19 = vld [vmem:[%s19248_s1 + $0x530] sm:$0xff] }
 0x192   : > { %v16263_v48 = vadd.f32 %v1606_v7, %v1339_v10  ;;  %v1342_v14 = vadd.f32 %v12934_v58, %v15973_v25  ;;  %13492 = vmatprep.mubr.f32.mxu0 %v3627_v36  ;;  %13532 = vmatprep.subr.mxu1 %v11215_v28  ;;  %v3630_v25 = vld [vmem:[#allocation2 + $0x192] sm:$0xff]  ;;  %v3631_v10 = vld [vmem:[#allocation2 + $0x1a2] sm:$0xff] }
 0x193   : > { %v13014_v53 = vpop.f32.mrf.mxu0  ;;  %13493 = vmatmul.mubr.f32.gmra.mxu0 %v3628_v31  ;;  %13533 = vmatpush3.msra.mxu1 %v11215_v28  ;;  %v1246_v51 = vpop.f32.mrf.mxu1  ;;  %v11213_v31 = vld [vmem:[%s19248_s1 + $0x4a8] sm:$0xff] }
 0x194   : > { %v16271_v12 = vadd.f32 %v13014_v53, %v1342_v14  ;;  %v1341_v55 = vadd.f32 %v1246_v51, %v15981_v49  ;;  %13612 = vmatprep.subr.mxu0 %v11231_v37  ;;  %13415 = vmatprep.mubr.f32.mxu1 %v16261_v5  ;;  %v16284_v49 = vld [vmem:[#allocation2 + $0x1b1] sm:$0xff]  ;;  %v11229_v53 = vld [vmem:[%s19248_s1 + $0x528] sm:$0xff] }
 0x195   : > { %v1616_v17 = vpop.f32.mrf.mxu0  ;;  %13613 = vmatpush3.msra.mxu0 %v11231_v37  ;;  %v12937_v57 = vpop.f32.mrf.mxu1  ;;  %13416 = vmatmul.mubr.f32.gmra.mxu1 %v16266_v22  ;;  %v3263_v51 = vld [vmem:[#allocation2 + $0x1c1] sm:$0xff] }
 0x196   : > { %v16281_v38 = vadd.f32 %v1616_v17, %v1341_v55  ;;  %v1344_v23 = vadd.f32 %v12937_v57, %v15992_v4  ;;  %13495 = vmatprep.mubr.f32.mxu0 %v3629_v13  ;;  %13534 = vmatprep.subr.mxu1 %v11214_v40  ;;  %v3632_v4 = vld [vmem:[#allocation2 + $0x1b2] sm:$0xff]  ;;  %v11212_v17 = vld [vmem:[%s19248_s1 + $0x4a0] sm:$0xff] }
 0x197   : > { %v13017_v36 = vpop.f32.mrf.mxu0  ;;  %13496 = vmatmul.mubr.f32.gmra.mxu0 %v3630_v25  ;;  %13535 = vmatpush3.msra.mxu1 %v11214_v40  ;;  %v1256_v28 = vpop.f32.mrf.mxu1 }
 0x198   : > { %v16289_v7 = vadd.f32 %v13017_v36, %v1344_v23  ;;  %v1343_v58 = vadd.f32 %v1256_v28, %v16001_v26  ;;  %13614 = vmatprep.subr.mxu0 %v11230_v19  ;;  %13418 = vmatprep.mubr.f32.mxu1 %v16279_v63  ;;  %v3264_v26 = vld [vmem:[#allocation2 + $0x1d1] sm:$0xff]  ;;  %v11228_v28 = vld [vmem:[%s19248_s1 + $0x520] sm:$0xff] }
 0x199   : > { %v1626_v37 = vpop.f32.mrf.mxu0  ;;  %13615 = vmatpush3.msra.mxu0 %v11230_v19  ;;  %v12940_v14 = vpop.f32.mrf.mxu1  ;;  %13419 = vmatmul.mubr.f32.gmra.mxu1 %v16284_v49  ;;  %v3634_v23 = vld [vmem:[#allocation2 + $0x1d2] sm:$0xff] }
 0x19a   : > { %v16297_v13 = vadd.f32 %v1626_v37, %v1343_v58  ;;  %v1346_v40 = vadd.f32 %v12940_v14, %v16015_v50  ;;  %13498 = vmatprep.mubr.f32.mxu0 %v3631_v10  ;;  %13536 = vmatprep.subr.mxu1 %v11213_v31  ;;  %v16309_v10 = vld [vmem:[#allocation2 + $0x201] sm:$0xff] }
 0x19b   : > { %v13020_v55 = vpop.f32.mrf.mxu0  ;;  %13499 = vmatmul.mubr.f32.gmra.mxu0 %v3632_v4  ;;  %13537 = vmatpush3.msra.mxu1 %v11213_v31  ;;  %v1266_v25 = vpop.f32.mrf.mxu1  ;;  %v3635_v14 = vld [vmem:[#allocation2 + $0x202] sm:$0xff] }
 0x19c   : > { %v16303_v57 = vadd.f32 %v13020_v55, %v1346_v40  ;;  %v1345_v19 = vadd.f32 %v1266_v25, %v16023_v46  ;;  %13616 = vmatprep.subr.mxu0 %v11229_v53  ;;  %13421 = vmatprep.mubr.f32.mxu1 %v3263_v51  ;;  %v16315_v46 = vld [vmem:[#allocation2 + $0x211] sm:$0xff]  ;;  %v16328_v25 = vld [vmem:[#allocation2 + $0x221] sm:$0xff] }
 0x19d   : > { %v1636_v36 = vpop.f32.mrf.mxu0  ;;  %13617 = vmatpush3.msra.mxu0 %v11229_v53  ;;  %v12943_v50 = vpop.f32.mrf.mxu1  ;;  %13422 = vmatmul.mubr.f32.gmra.mxu1 %v3264_v26  ;;  %v11211_v53 = vld [vmem:[%s19248_s1 + $0x498] sm:$0xff] }
 0x19e   : > { %v16311_v31 = vadd.f32 %v1636_v36, %v1345_v19  ;;  %v1348_v58 = vadd.f32 %v12943_v50, %v16035_v39  ;;  %13501 = vmatprep.mubr.f32.mxu0 %v16058_v59  ;;  %13538 = vmatprep.subr.mxu1 %v11212_v17  ;;  %v3636_v39 = vld [vmem:[#allocation2 + $0x212] sm:$0xff]  ;;  %v3637_v50 = vld [vmem:[#allocation2 + $0x222] sm:$0xff] }
 0x19f   : > { %v13023_v4 = vpop.f32.mrf.mxu0  ;;  %13502 = vmatmul.mubr.f32.gmra.mxu0 %v3634_v23  ;;  %13539 = vmatpush3.msra.mxu1 %v11212_v17  ;;  %v1276_v37 = vpop.f32.mrf.mxu1  ;;  %v11227_v55 = vld [vmem:[%s19248_s1 + $0x518] sm:$0xff] }
 0x1a0   : > { %v16320_v51 = vadd.f32 %v13023_v4, %v1348_v58  ;;  %v1347_v40 = vadd.f32 %v1276_v37, %v16044_v56  ;;  %13618 = vmatprep.subr.mxu0 %v11228_v28  ;;  %13424 = vmatprep.mubr.f32.mxu1 %v16309_v10  ;;  %v16333_v56 = vld [vmem:[#allocation2 + $0x231] sm:$0xff] }
 0x1a1   : > { %v1646_v59 = vpop.f32.mrf.mxu0  ;;  %13619 = vmatpush3.msra.mxu0 %v11228_v28  ;;  %v12946_v26 = vpop.f32.mrf.mxu1  ;;  %13425 = vmatmul.mubr.f32.gmra.mxu1 %v16315_v46  ;;  %v11210_v28 = vld [vmem:[%s19248_s1 + $0x490] sm:$0xff] }
 0x1a2   : > { %v16330_v17 = vadd.f32 %v1646_v59, %v1347_v40  ;;  %v1350_v19 = vadd.f32 %v12946_v26, %v16056_v3  ;;  %13504 = vmatprep.mubr.f32.mxu0 %v3635_v14  ;;  %13540 = vmatprep.subr.mxu1 %v11211_v53  ;;  %v3638_v3 = vld [vmem:[#allocation2 + $0x232] sm:$0xff]  ;;  %v16346_v40 = vld [vmem:[#allocation2 + $0x241] sm:$0xff] }
 0x1a3   : > { %v13026_v23 = vpop.f32.mrf.mxu0  ;;  %13505 = vmatmul.mubr.f32.gmra.mxu0 %v3636_v39  ;;  %13541 = vmatpush3.msra.mxu1 %v11211_v53  ;;  %v1286_v36 = vpop.f32.mrf.mxu1  ;;  %v11226_v53 = vld [vmem:[%s19248_s1 + $0x510] sm:$0xff] }
 0x1a4   : > { %v16338_v58 = vadd.f32 %v13026_v23, %v1350_v19  ;;  %v1349_v4 = vadd.f32 %v1286_v36, %v16065_v20  ;;  %13620 = vmatprep.subr.mxu0 %v11227_v55  ;;  %13427 = vmatprep.mubr.f32.mxu1 %v16328_v25  ;;  %v16351_v20 = vld [vmem:[#allocation2 + $0x251] sm:$0xff]  ;;  %v3639_v19 = vld [vmem:[#allocation2 + $0x242] sm:$0xff] }
 0x1a5   : > { %v1656_v37 = vpop.f32.mrf.mxu0  ;;  %13621 = vmatpush3.msra.mxu0 %v11227_v55  ;;  %v12949_v14 = vpop.f32.mrf.mxu1  ;;  %13428 = vmatmul.mubr.f32.gmra.mxu1 %v16333_v56  ;;  %v11209_v23 = vld [vmem:[%s19248_s1 + $0x488] sm:$0xff] }
 0x1a6   : > { %v16348_v39 = vadd.f32 %v1656_v37, %v1349_v4  ;;  %v1352_v59 = vadd.f32 %v12949_v14, %v16078_v30  ;;  %13507 = vmatprep.mubr.f32.mxu0 %v3637_v50  ;;  %13542 = vmatprep.subr.mxu1 %v11210_v28  ;;  %v3640_v30 = vld [vmem:[#allocation2 + $0x252] sm:$0xff] }
 0x1a7   : > { %v13029_v26 = vpop.f32.mrf.mxu0  ;;  %13508 = vmatmul.mubr.f32.gmra.mxu0 %v3638_v3  ;;  %13543 = vmatpush3.msra.mxu1 %v11210_v28  ;;  %v1296_v55 = vpop.f32.mrf.mxu1  ;;  %v11225_v28 = vld [vmem:[%s19248_s1 + $0x508] sm:$0xff] }
 0x1a8   : > { %19381 = vst [vmem:[#allocation7_spill] sm:$0xff] %v16348_v39  ;;  %v16356_v36 = vadd.f32 %v13029_v26, %v1352_v59  ;;  %v1351_v4 = vadd.f32 %v1296_v55, %v16087_v15  ;;  %13622 = vmatprep.subr.mxu0 %v11226_v53  ;;  %13430 = vmatprep.mubr.f32.mxu1 %v16346_v40  ;;  %v3271_v3 = vld [vmem:[#allocation2 + $0x261] sm:$0xff]  ;;  %v3272_v15 = vld [vmem:[#allocation2 + $0x271] sm:$0xff] }
 0x1a9   : > { %v1666_v50 = vpop.f32.mrf.mxu0  ;;  %13623 = vmatpush3.msra.mxu0 %v11226_v53  ;;  %v12952_v37 = vpop.f32.mrf.mxu1  ;;  %13431 = vmatmul.mubr.f32.gmra.mxu1 %v16351_v20  ;;  %v11208_v53 = vld [vmem:[%s19248_s1 + $0x480] sm:$0xff] }
 0x1aa   : > { %19382 = vst [vmem:[#allocation8_spill] sm:$0xff] %v16356_v36  ;;  %v16364_v14 = vadd.f32 %v1666_v50, %v1351_v4  ;;  %v1354_v59 = vadd.f32 %v12952_v37, %v16099_v62  ;;  %13510 = vmatprep.mubr.f32.mxu0 %v3639_v19  ;;  %13544 = vmatprep.subr.mxu1 %v11209_v23  ;;  %v3642_v4 = vld [vmem:[#allocation2 + $0x272] sm:$0xff]  ;;  %v11224_v19 = vld [vmem:[%s19248_s1 + $0x500] sm:$0xff] }
 0x1ab   : > { %v13032_v26 = vpop.f32.mrf.mxu0  ;;  %13511 = vmatmul.mubr.f32.gmra.mxu0 %v3640_v30  ;;  %13545 = vmatpush3.msra.mxu1 %v11209_v23  ;;  %v1306_v55 = vpop.f32.mrf.mxu1  ;;  %v3982_v23 = vld [vmem:[#allocation2 + $0xa0] sm:$0xff] }
 0x1ac   : > { %v16370_v36 = vadd.f32 %v13032_v26, %v1354_v59  ;;  %v1353_v39 = vadd.f32 %v1306_v55, %v16106_v11  ;;  %13624 = vmatprep.subr.mxu0 %v11225_v28  ;;  %13433 = vmatprep.mubr.f32.mxu1 %v3271_v3  ;;  %v16380_v11 = vld [vmem:[#allocation2 + $0xb0] sm:$0xff]  ;;  %v4352_v59 = vld [vmem:[#allocation2 + $0xa1] sm:$0xff] }
 0x1ad   : > { %v1676_v50 = vpop.f32.mrf.mxu0  ;;  %13625 = vmatpush3.msra.mxu0 %v11225_v28  ;;  %v12955_v62 = vpop.f32.mrf.mxu1  ;;  %13434 = vmatmul.mubr.f32.gmra.mxu1 %v3272_v15  ;;  %v11255_v15 = vld [vmem:[%s19248_s1 + $0x5f8] sm:$0xff] }
 0x1ae   : > { %v16376_v30 = vadd.f32 %v1676_v50, %v1353_v39  ;;  %v1356_v37 = vadd.f32 %v12955_v62, %v16117_v16  ;;  %13513 = vmatprep.mubr.f32.mxu0 %v16115_v61  ;;  %13546 = vmatprep.subr.mxu1 %v11208_v53  ;;  %v4353_v16 = vld [vmem:[#allocation2 + $0xb1] sm:$0xff] }
 0x1af   : > { %v13035_v3 = vpop.f32.mrf.mxu0  ;;  %13514 = vmatmul.mubr.f32.gmra.mxu0 %v3642_v4  ;;  %13547 = vmatpush3.msra.mxu1 %v11208_v53  ;;  %v1316_v28 = vpop.f32.mrf.mxu1  ;;  %v11271_v53 = vld [vmem:[%s19248_s1 + $0x678] sm:$0xff]  ;;  %v16392_v4 = vld [vmem:[#allocation2 + $0xc0] sm:$0xff] }
 0x1b0   : > { %v16385_v26 = vadd.f32 %v13035_v3, %v1356_v37  ;;  %v1355_v39 = vadd.f32 %v1316_v28, %v16126_v54  ;;  %13626 = vmatprep.subr.mxu0 %v11224_v19  ;;  %13548 = vmatprep.mubr.f32.mxu1 %v3982_v23  ;;  %v16397_v54 = vld [vmem:[#allocation2 + $0xd0] sm:$0xff] }
 0x1b1   : > { %v1686_v61 = vpop.f32.mrf.mxu0  ;;  %13627 = vmatpush3.msra.mxu0 %v11224_v19  ;;  %v13070_v55 = vpop.f32.mrf.mxu1  ;;  %13549 = vmatmul.mubr.f32.vlgmr.msra.gmra.mxu1 %v16380_v11  ;;  %v11254_v37 = vld [vmem:[%s19248_s1 + $0x5f0] sm:$0xff] }
 0x1b2   : > { %v16394_v50 = vadd.f32 %v1686_v61, %v1355_v39  ;;  %v2067_v62 = vadd.f32 %v13070_v55, %v16144_v18  ;;  %13628 = vmatprep.mubr.f32.mxu0 %v4352_v59  ;;  %13676 = vmatprep.subr.mxu1 %v11255_v15  ;;  %v16410_v39 = vld [vmem:[#allocation2 + $0xe0] sm:$0xff] }
 0x1b3   : > { %v13150_v23 = vpop.f32.mrf.mxu0  ;;  %13629 = vmatmul.mubr.f32.vlgmr.msra.gmra.mxu0 %v4353_v16  ;;  %13677 = vmatpush3.msra.mxu1 %v11255_v15  ;;  %v1907_v19 = vpop.f32.mrf.mxu1  ;;  %v11270_v15 = vld [vmem:[%s19248_s1 + $0x670] sm:$0xff] }
 0x1b4   : > { %v16402_v3 = vadd.f32 %v13150_v23, %v2067_v62  ;;  %v2066_v28 = vadd.f32 %v1907_v19, %v16150_v2  ;;  %13756 = vmatprep.subr.mxu0 %v11271_v53  ;;  %13551 = vmatprep.mubr.f32.mxu1 %v16392_v4  ;;  %v16416_v2 = vld [vmem:[#allocation2 + $0xf0] sm:$0xff]  ;;  %v11253_v62 = vld [vmem:[%s19248_s1 + $0x5e8] sm:$0xff] }
 0x1b5   : > { %v2277_v18 = vpop.f32.mrf.mxu0  ;;  %13757 = vmatpush3.msra.mxu0 %v11271_v53  ;;  %v13073_v59 = vpop.f32.mrf.mxu1  ;;  %13552 = vmatmul.mubr.f32.gmra.mxu1 %v16397_v54 }
 0x1b6   : > { %v16412_v16 = vadd.f32 %v2277_v18, %v2066_v28  ;;  %v2069_v61 = vadd.f32 %v13073_v59, %v16156_v24  ;;  %13631 = vmatprep.mubr.f32.mxu0 %v16175_v41  ;;  %13678 = vmatprep.subr.mxu1 %v11254_v37 }
 0x1b7   : > { %v13153_v55 = vpop.f32.mrf.mxu0  ;;  %13632 = vmatmul.mubr.f32.gmra.mxu0 %v16181_v8  ;;  %13679 = vmatpush3.msra.mxu1 %v11254_v37  ;;  %v1917_v53 = vpop.f32.mrf.mxu1  ;;  %v11269_v8 = vld [vmem:[%s19248_s1 + $0x668] sm:$0xff]  ;;  %v16430_v37 = vld [vmem:[#allocation2 + $0x100] sm:$0xff] }
 0x1b8   : > { %v16422_v23 = vadd.f32 %v13153_v55, %v2069_v61  ;;  %v2068_v19 = vadd.f32 %v1917_v53, %v16162_v9  ;;  %13758 = vmatprep.subr.mxu0 %v11270_v15  ;;  %13554 = vmatprep.mubr.f32.mxu1 %v16410_v39  ;;  %v16436_v9 = vld [vmem:[#allocation2 + $0x110] sm:$0xff]  ;;  %v11252_v61 = vld [vmem:[%s19248_s1 + $0x5e0] sm:$0xff] }
 0x1b9   : > { %v2287_v24 = vpop.f32.mrf.mxu0  ;;  %13759 = vmatpush3.msra.mxu0 %v11270_v15  ;;  %v13076_v41 = vpop.f32.mrf.mxu1  ;;  %13555 = vmatmul.mubr.f32.gmra.mxu1 %v16416_v2 }
 0x1ba   : > { %v16432_v28 = vadd.f32 %v2287_v24, %v2068_v19  ;;  %v2071_v18 = vadd.f32 %v13076_v41, %v16168_v52  ;;  %13634 = vmatprep.mubr.f32.mxu0 %v16194_v35  ;;  %13680 = vmatprep.subr.mxu1 %v11253_v62 }
 0x1bb   : > { %v13156_v59 = vpop.f32.mrf.mxu0  ;;  %13635 = vmatmul.mubr.f32.gmra.mxu0 %v16199_v29  ;;  %13681 = vmatpush3.msra.mxu1 %v11253_v62  ;;  %v1927_v15 = vpop.f32.mrf.mxu1  ;;  %v11268_v29 = vld [vmem:[%s19248_s1 + $0x660] sm:$0xff] }
 0x1bc   : > { %v16442_v55 = vadd.f32 %v13156_v59, %v2071_v18  ;;  %v2070_v53 = vadd.f32 %v1927_v15, %v16177_v42  ;;  %13760 = vmatprep.subr.mxu0 %v11269_v8  ;;  %13557 = vmatprep.mubr.f32.mxu1 %v16430_v37  ;;  %v3990_v62 = vld [vmem:[#allocation2 + $0x140] sm:$0xff]  ;;  %v16454_v42 = vld [vmem:[#allocation2 + $0x150] sm:$0xff]  ;;  %v11251_v59 = vld [vmem:[%s19248_s1 + $0x5d8] sm:$0xff] }
 0x1bd   : > { %v2297_v52 = vpop.f32.mrf.mxu0  ;;  %13761 = vmatpush3.msra.mxu0 %v11269_v8  ;;  %v13079_v35 = vpop.f32.mrf.mxu1  ;;  %13558 = vmatmul.mubr.f32.gmra.mxu1 %v16436_v9  ;;  %19383 = vst [vmem:[#allocation9_spill] sm:$0xff] %v16454_v42  ;;  %v4360_v18 = vld [vmem:[#allocation2 + $0x141] sm:$0xff] }
 0x1be   : > { %v16450_v19 = vadd.f32 %v2297_v52, %v2070_v53  ;;  %v2073_v24 = vadd.f32 %v13079_v35, %v16186_v0  ;;  %13637 = vmatprep.mubr.f32.mxu0 %v16212_v1  ;;  %13682 = vmatprep.subr.mxu1 %v11252_v61  ;;  %v4361_v0 = vld [vmem:[#allocation2 + $0x151] sm:$0xff] }
 0x1bf   : > { %v13159_v41 = vpop.f32.mrf.mxu0  ;;  %13638 = vmatmul.mubr.f32.gmra.mxu0 %v16217_v21  ;;  %13683 = vmatpush3.msra.mxu1 %v11252_v61  ;;  %v1937_v8 = vpop.f32.mrf.mxu1  ;;  %v11267_v21 = vld [vmem:[%s19248_s1 + $0x658] sm:$0xff]  ;;  %v16467_v61 = vld [vmem:[#allocation2 + $0x160] sm:$0xff] }
 0x1c0   : > { %v16460_v15 = vadd.f32 %v13159_v41, %v2073_v24  ;;  %v2072_v53 = vadd.f32 %v1937_v8, %v16196_v27  ;;  %13762 = vmatprep.subr.mxu0 %v11268_v29  ;;  %13560 = vmatprep.mubr.f32.mxu1 %v3990_v62  ;;  %v16472_v27 = vld [vmem:[#allocation2 + $0x170] sm:$0xff] }
 0x1c1   : > { %v2307_v1 = vpop.f32.mrf.mxu0  ;;  %13763 = vmatpush3.msra.mxu0 %v11268_v29  ;;  %v13082_v52 = vpop.f32.mrf.mxu1  ;;  %13561 = vmatmul.mubr.f32.gmra.mxu1 %v16454_v42  ;;  %v11250_v41 = vld [vmem:[%s19248_s1 + $0x5d0] sm:$0xff] }
 0x1c2   : > { %v16469_v35 = vadd.f32 %v2307_v1, %v2072_v53  ;;  %v2075_v24 = vadd.f32 %v13082_v52, %v16204_v33  ;;  %13640 = vmatprep.mubr.f32.mxu0 %v4360_v18  ;;  %13684 = vmatprep.subr.mxu1 %v11251_v59  ;;  %v16485_v53 = vld [vmem:[#allocation2 + $0x180] sm:$0xff] }
 0x1c3   : > { %v13162_v62 = vpop.f32.mrf.mxu0  ;;  %13641 = vmatmul.mubr.f32.gmra.mxu0 %v4361_v0  ;;  %13685 = vmatpush3.msra.mxu1 %v11251_v59  ;;  %v1947_v29 = vpop.f32.mrf.mxu1  ;;  %v11266_v59 = vld [vmem:[%s19248_s1 + $0x650] sm:$0xff] }
 0x1c4   : > { %v16477_v8 = vadd.f32 %v13162_v62, %v2075_v24  ;;  %v2074_v42 = vadd.f32 %v1947_v29, %v16214_v32  ;;  %13764 = vmatprep.subr.mxu0 %v11267_v21  ;;  %13563 = vmatprep.mubr.f32.mxu1 %v16467_v61  ;;  %v16491_v32 = vld [vmem:[#allocation2 + $0x190] sm:$0xff]  ;;  %v11249_v24 = vld [vmem:[%s19248_s1 + $0x5c8] sm:$0xff]  ;;  %v16505_v29 = vld [vmem:[#allocation2 + $0x1a0] sm:$0xff] }
 0x1c5   : > { %v2317_v33 = vpop.f32.mrf.mxu0  ;;  %13765 = vmatpush3.msra.mxu0 %v11267_v21  ;;  %v13085_v18 = vpop.f32.mrf.mxu1  ;;  %13564 = vmatmul.mubr.f32.gmra.mxu1 %v16472_v27 }
 0x1c6   : > { %v16487_v0 = vadd.f32 %v2317_v33, %v2074_v42  ;;  %v2077_v1 = vadd.f32 %v13085_v18, %v16222_v47  ;;  %13643 = vmatprep.mubr.f32.mxu0 %v16242_v34  ;;  %13686 = vmatprep.subr.mxu1 %v11250_v41 }
 0x1c7   : > { %v13165_v52 = vpop.f32.mrf.mxu0  ;;  %13644 = vmatmul.mubr.f32.gmra.mxu0 %v16248_v45  ;;  %13687 = vmatpush3.msra.mxu1 %v11250_v41  ;;  %v1957_v21 = vpop.f32.mrf.mxu1  ;;  %v11265_v45 = vld [vmem:[%s19248_s1 + $0x648] sm:$0xff] }
 0x1c8   : > { %v16497_v62 = vadd.f32 %v13165_v52, %v2077_v1  ;;  %v2076_v42 = vadd.f32 %v1957_v21, %v16230_v60  ;;  %13766 = vmatprep.subr.mxu0 %v11266_v59  ;;  %13566 = vmatprep.mubr.f32.mxu1 %v16485_v53  ;;  %v16511_v60 = vld [vmem:[#allocation2 + $0x1b0] sm:$0xff]  ;;  %v11248_v1 = vld [vmem:[%s19248_s1 + $0x5c0] sm:$0xff] }
 0x1c9   : > { %v2327_v47 = vpop.f32.mrf.mxu0  ;;  %13767 = vmatpush3.msra.mxu0 %v11266_v59  ;;  %v13088_v34 = vpop.f32.mrf.mxu1  ;;  %13567 = vmatmul.mubr.f32.gmra.mxu1 %v16491_v32 }
 0x1ca   : > { %v16507_v41 = vadd.f32 %v2327_v47, %v2076_v42  ;;  %v2079_v33 = vadd.f32 %v13088_v34, %v16236_v6  ;;  %13646 = vmatprep.mubr.f32.mxu0 %v16261_v5  ;;  %13688 = vmatprep.subr.mxu1 %v11249_v24 }
 0x1cb   : > { %v13168_v18 = vpop.f32.mrf.mxu0  ;;  %13647 = vmatmul.mubr.f32.gmra.mxu0 %v16266_v22  ;;  %13689 = vmatpush3.msra.mxu1 %v11249_v24  ;;  %v1967_v59 = vpop.f32.mrf.mxu1  ;;  %v11264_v22 = vld [vmem:[%s19248_s1 + $0x640] sm:$0xff] }
 0x1cc   : > { %v16517_v52 = vadd.f32 %v13168_v18, %v2079_v33  ;;  %v2078_v21 = vadd.f32 %v1967_v59, %v16244_v44  ;;  %13768 = vmatprep.subr.mxu0 %v11265_v45  ;;  %13569 = vmatprep.mubr.f32.mxu1 %v16505_v29  ;;  %v3998_v24 = vld [vmem:[#allocation2 + $0x1e0] sm:$0xff]  ;;  %v16529_v44 = vld [vmem:[#allocation2 + $0x1f0] sm:$0xff]  ;;  %v11247_v18 = vld [vmem:[%s19248_s1 + $0x5b8] sm:$0xff] }
 0x1cd   : > { %v2337_v6 = vpop.f32.mrf.mxu0  ;;  %13769 = vmatpush3.msra.mxu0 %v11265_v45  ;;  %v13091_v5 = vpop.f32.mrf.mxu1  ;;  %13570 = vmatmul.mubr.f32.gmra.mxu1 %v16511_v60  ;;  %19384 = vst [vmem:[#allocation10_spill] sm:$0xff] %v16529_v44  ;;  %v4368_v33 = vld [vmem:[#allocation2 + $0x1e1] sm:$0xff] }
 0x1ce   : > { %v16525_v42 = vadd.f32 %v2337_v6, %v2078_v21  ;;  %v2081_v47 = vadd.f32 %v13091_v5, %v16253_v43  ;;  %13649 = vmatprep.mubr.f32.mxu0 %v16279_v63  ;;  %13690 = vmatprep.subr.mxu1 %v11248_v1  ;;  %v4369_v43 = vld [vmem:[#allocation2 + $0x1f1] sm:$0xff] }
 0x1cf   : > { %v13171_v34 = vpop.f32.mrf.mxu0  ;;  %13650 = vmatmul.mubr.f32.gmra.mxu0 %v16284_v49  ;;  %13691 = vmatpush3.msra.mxu1 %v11248_v1  ;;  %v1977_v45 = vpop.f32.mrf.mxu1  ;;  %v11263_v49 = vld [vmem:[%s19248_s1 + $0x638] sm:$0xff]  ;;  %v16542_v1 = vld [vmem:[#allocation2 + $0x200] sm:$0xff] }
 0x1d0   : > { %v16535_v59 = vadd.f32 %v13171_v34, %v2081_v47  ;;  %v2080_v21 = vadd.f32 %v1977_v45, %v16263_v48  ;;  %13770 = vmatprep.subr.mxu0 %v11264_v22  ;;  %13572 = vmatprep.mubr.f32.mxu1 %v3998_v24  ;;  %v16547_v48 = vld [vmem:[#allocation2 + $0x210] sm:$0xff] }
 0x1d1   : > { %v2347_v63 = vpop.f32.mrf.mxu0  ;;  %13771 = vmatpush3.msra.mxu0 %v11264_v22  ;;  %v13094_v6 = vpop.f32.mrf.mxu1  ;;  %13573 = vmatmul.mubr.f32.gmra.mxu1 %v16529_v44  ;;  %v11246_v34 = vld [vmem:[%s19248_s1 + $0x5b0] sm:$0xff] }
 0x1d2   : > { %v16544_v5 = vadd.f32 %v2347_v63, %v2080_v21  ;;  %v2083_v47 = vadd.f32 %v13094_v6, %v16271_v12  ;;  %13652 = vmatprep.mubr.f32.mxu0 %v4368_v33  ;;  %13692 = vmatprep.subr.mxu1 %v11247_v18  ;;  %v16560_v21 = vld [vmem:[#allocation2 + $0x220] sm:$0xff] }
 0x1d3   : > { %v13174_v24 = vpop.f32.mrf.mxu0  ;;  %13653 = vmatmul.mubr.f32.gmra.mxu0 %v4369_v43  ;;  %13693 = vmatpush3.msra.mxu1 %v11247_v18  ;;  %v1987_v22 = vpop.f32.mrf.mxu1  ;;  %v11262_v18 = vld [vmem:[%s19248_s1 + $0x630] sm:$0xff] }
 0x1d4   : > { %v16552_v45 = vadd.f32 %v13174_v24, %v2083_v47  ;;  %v2082_v44 = vadd.f32 %v1987_v22, %v16281_v38  ;;  %13772 = vmatprep.subr.mxu0 %v11263_v49  ;;  %13575 = vmatprep.mubr.f32.mxu1 %v16542_v1  ;;  %v16566_v38 = vld [vmem:[#allocation2 + $0x230] sm:$0xff]  ;;  %v11245_v47 = vld [vmem:[%s19248_s1 + $0x5a8] sm:$0xff]  ;;  %v16580_v22 = vld [vmem:[#allocation2 + $0x240] sm:$0xff] }
 0x1d5   : > { %v2357_v12 = vpop.f32.mrf.mxu0  ;;  %13773 = vmatpush3.msra.mxu0 %v11263_v49  ;;  %v13097_v33 = vpop.f32.mrf.mxu1  ;;  %13576 = vmatmul.mubr.f32.gmra.mxu1 %v16547_v48 }
 0x1d6   : > { %v16562_v43 = vadd.f32 %v2357_v12, %v2082_v44  ;;  %v2085_v63 = vadd.f32 %v13097_v33, %v16289_v7  ;;  %13655 = vmatprep.mubr.f32.mxu0 %v16309_v10  ;;  %13694 = vmatprep.subr.mxu1 %v11246_v34 }
 0x1d7   : > { %v13177_v6 = vpop.f32.mrf.mxu0  ;;  %13656 = vmatmul.mubr.f32.gmra.mxu0 %v16315_v46  ;;  %13695 = vmatpush3.msra.mxu1 %v11246_v34  ;;  %v1997_v49 = vpop.f32.mrf.mxu1  ;;  %v11261_v46 = vld [vmem:[%s19248_s1 + $0x628] sm:$0xff] }
 0x1d8   : > { %v16572_v24 = vadd.f32 %v13177_v6, %v2085_v63  ;;  %v2084_v44 = vadd.f32 %v1997_v49, %v16297_v13  ;;  %13774 = vmatprep.subr.mxu0 %v11262_v18  ;;  %13578 = vmatprep.mubr.f32.mxu1 %v16560_v21  ;;  %v16586_v13 = vld [vmem:[#allocation2 + $0x250] sm:$0xff]  ;;  %v11244_v63 = vld [vmem:[%s19248_s1 + $0x5a0] sm:$0xff] }
 0x1d9   : > { %v2367_v7 = vpop.f32.mrf.mxu0  ;;  %13775 = vmatpush3.msra.mxu0 %v11262_v18  ;;  %v13100_v10 = vpop.f32.mrf.mxu1  ;;  %13579 = vmatmul.mubr.f32.gmra.mxu1 %v16566_v38  ;;  %19385 = vst [vmem:[#allocation11_spill] sm:$0xff] %v16586_v13 }
 0x1da   : > { %v16582_v34 = vadd.f32 %v2367_v7, %v2084_v44  ;;  %v2087_v12 = vadd.f32 %v13100_v10, %v16303_v57  ;;  %13658 = vmatprep.mubr.f32.mxu0 %v16328_v25  ;;  %13696 = vmatprep.subr.mxu1 %v11245_v47 }
 0x1db   : > { %v13180_v33 = vpop.f32.mrf.mxu0  ;;  %13659 = vmatmul.mubr.f32.gmra.mxu0 %v16333_v56  ;;  %13697 = vmatpush3.msra.mxu1 %v11245_v47  ;;  %v2007_v18 = vpop.f32.mrf.mxu1  ;;  %v11260_v56 = vld [vmem:[%s19248_s1 + $0x620] sm:$0xff] }
 0x1dc   : > { %v16592_v6 = vadd.f32 %v13180_v33, %v2087_v12  ;;  %v2086_v49 = vadd.f32 %v2007_v18, %v16311_v31  ;;  %13776 = vmatprep.subr.mxu0 %v11261_v46  ;;  %13581 = vmatprep.mubr.f32.mxu1 %v16580_v22  ;;  %v4006_v47 = vld [vmem:[#allocation2 + $0x280] sm:$0xff]  ;;  %v16604_v31 = vld [vmem:[#allocation2 + $0x290] sm:$0xff]  ;;  %v11243_v33 = vld [vmem:[%s19248_s1 + $0x598] sm:$0xff] }
 0x1dd   : > { %v2377_v57 = vpop.f32.mrf.mxu0  ;;  %13777 = vmatpush3.msra.mxu0 %v11261_v46  ;;  %v13103_v25 = vpop.f32.mrf.mxu1  ;;  %13582 = vmatmul.mubr.f32.gmra.mxu1 %v16586_v13  ;;  %19386 = vst [vmem:[#allocation12_spill] sm:$0xff] %v16604_v31  ;;  %v4376_v12 = vld [vmem:[#allocation2 + $0x281] sm:$0xff] }
 0x1de   : > { %v16600_v44 = vadd.f32 %v2377_v57, %v2086_v49  ;;  %v2089_v7 = vadd.f32 %v13103_v25, %v16320_v51  ;;  %13661 = vmatprep.mubr.f32.mxu0 %v16346_v40  ;;  %13698 = vmatprep.subr.mxu1 %v11244_v63  ;;  %v4377_v51 = vld [vmem:[#allocation2 + $0x291] sm:$0xff]  ;;  %v19390_v13 = vld [vmem:[#allocation7_spill] sm:$0xff] }
 0x1df   : > { %v13183_v10 = vpop.f32.mrf.mxu0  ;;  %13662 = vmatmul.mubr.f32.gmra.mxu0 %v16351_v20  ;;  %13699 = vmatpush3.msra.mxu1 %v11244_v63  ;;  %v2017_v46 = vpop.f32.mrf.mxu1  ;;  %v11259_v20 = vld [vmem:[%s19248_s1 + $0x618] sm:$0xff]  ;;  %v16617_v63 = vld [vmem:[#allocation2 + $0x2a0] sm:$0xff] }
 0x1e0   : > { %v16610_v18 = vadd.f32 %v13183_v10, %v2089_v7  ;;  %v2088_v49 = vadd.f32 %v2017_v46, %v16330_v17  ;;  %13778 = vmatprep.subr.mxu0 %v11260_v56  ;;  %13584 = vmatprep.mubr.f32.mxu1 %v4006_v47  ;;  %19387 = vst [vmem:[#allocation13_spill] sm:$0xff] %v16617_v63  ;;  %v16622_v17 = vld [vmem:[#allocation2 + $0x2b0] sm:$0xff]  ;;  %v4378_v10 = vld [vmem:[#allocation2 + $0x2a1] sm:$0xff] }
 0x1e1   : > { %v2387_v40 = vpop.f32.mrf.mxu0  ;;  %13779 = vmatpush3.msra.mxu0 %v11260_v56  ;;  %v13106_v57 = vpop.f32.mrf.mxu1  ;;  %13585 = vmatmul.mubr.f32.gmra.mxu1 %v16604_v31  ;;  %19388 = vst [vmem:[#allocation14_spill] sm:$0xff] %v16622_v17  ;;  %v11242_v46 = vld [vmem:[%s19248_s1 + $0x590] sm:$0xff] }
 0x1e2   : > { %v16619_v25 = vadd.f32 %v2387_v40, %v2088_v49  ;;  %v2091_v7 = vadd.f32 %v13106_v57, %v16338_v58  ;;  %13664 = vmatprep.mubr.f32.mxu0 %v4376_v12  ;;  %13700 = vmatprep.subr.mxu1 %v11243_v33  ;;  %v4379_v58 = vld [vmem:[#allocation2 + $0x2b1] sm:$0xff] }
 0x1e3   : > { %v13186_v47 = vpop.f32.mrf.mxu0  ;;  %13665 = vmatmul.mubr.f32.gmra.mxu0 %v4377_v51  ;;  %13701 = vmatpush3.msra.mxu1 %v11243_v33  ;;  %v2027_v56 = vpop.f32.mrf.mxu1  ;;  %v11258_v33 = vld [vmem:[%s19248_s1 + $0x610] sm:$0xff]  ;;  %v16635_v51 = vld [vmem:[#allocation2 + $0x2c0] sm:$0xff] }
 0x1e4   : > { %v16627_v31 = vadd.f32 %v13186_v47, %v2091_v7  ;;  %v2090_v49 = vadd.f32 %v2027_v56, %v19390_v13  ;;  %13780 = vmatprep.subr.mxu0 %v11259_v20  ;;  %13587 = vmatprep.mubr.f32.mxu1 %v16617_v63  ;;  %19391 = vst [vmem:[#allocation16_spill] sm:$0xff] %v16635_v51  ;;  %v19392_v7 = vld [vmem:[#allocation8_spill] sm:$0xff]  ;;  %v16640_v13 = vld [vmem:[#allocation2 + $0x2d0] sm:$0xff] }
 0x1e5   : > { %v2397_v12 = vpop.f32.mrf.mxu0  ;;  %13781 = vmatpush3.msra.mxu0 %v11259_v20  ;;  %v13109_v40 = vpop.f32.mrf.mxu1  ;;  %13588 = vmatmul.mubr.f32.gmra.mxu1 %v16622_v17  ;;  %19393 = vst [vmem:[#allocation17_spill] sm:$0xff] %v16640_v13  ;;  %v4380_v63 = vld [vmem:[#allocation2 + $0x2c1] sm:$0xff] }
 0x1e6   : > { %19389 = vst [vmem:[#allocation15_spill] sm:$0xff] %v16627_v31  ;;  %v16637_v57 = vadd.f32 %v2397_v12, %v2090_v49  ;;  %v2093_v47 = vadd.f32 %v13109_v40, %v19392_v7  ;;  %13667 = vmatprep.mubr.f32.mxu0 %v4378_v10  ;;  %13702 = vmatprep.subr.mxu1 %v11242_v46  ;;  %v11241_v17 = vld [vmem:[%s19248_s1 + $0x588] sm:$0xff]  ;;  %v4381_v10 = vld [vmem:[#allocation2 + $0x2d1] sm:$0xff] }
 0x1e7   : > { %v13189_v56 = vpop.f32.mrf.mxu0  ;;  %13668 = vmatmul.mubr.f32.gmra.mxu0 %v4379_v58  ;;  %13703 = vmatpush3.msra.mxu1 %v11242_v46  ;;  %v2037_v20 = vpop.f32.mrf.mxu1  ;;  %v11257_v46 = vld [vmem:[%s19248_s1 + $0x608] sm:$0xff]  ;;  %v16653_v58 = vld [vmem:[#allocation2 + $0x2e0] sm:$0xff] }
 0x1e8   : > { %v16645_v31 = vadd.f32 %v13189_v56, %v2093_v47  ;;  %v2092_v49 = vadd.f32 %v2037_v20, %v16364_v14  ;;  %13782 = vmatprep.subr.mxu0 %v11258_v33  ;;  %13590 = vmatprep.mubr.f32.mxu1 %v16635_v51  ;;  %19394 = vst [vmem:[#allocation18_spill] sm:$0xff] %v16653_v58  ;;  %v16658_v14 = vld [vmem:[#allocation2 + $0x2f0] sm:$0xff]  ;;  %v4382_v20 = vld [vmem:[#allocation2 + $0x2e1] sm:$0xff] }
 0x1e9   : > { %v2407_v12 = vpop.f32.mrf.mxu0  ;;  %13783 = vmatpush3.msra.mxu0 %v11258_v33  ;;  %v13112_v40 = vpop.f32.mrf.mxu1  ;;  %13591 = vmatmul.mubr.f32.gmra.mxu1 %v16640_v13  ;;  %19395 = vst [vmem:[#allocation19_spill] sm:$0xff] %v16658_v14  ;;  %v11240_v13 = vld [vmem:[%s19248_s1 + $0x580] sm:$0xff] }
 0x1ea   : > { %v16655_v7 = vadd.f32 %v2407_v12, %v2092_v49  ;;  %v2095_v47 = vadd.f32 %v13112_v40, %v16370_v36  ;;  %13670 = vmatprep.mubr.f32.mxu0 %v4380_v63  ;;  %13704 = vmatprep.subr.mxu1 %v11241_v17  ;;  %v4383_v36 = vld [vmem:[#allocation2 + $0x2f1] sm:$0xff] }
 0x1eb   : > { %v13192_v56 = vpop.f32.mrf.mxu0  ;;  %13671 = vmatmul.mubr.f32.gmra.mxu0 %v4381_v10  ;;  %13705 = vmatpush3.msra.mxu1 %v11241_v17  ;;  %v2047_v33 = vpop.f32.mrf.mxu1  ;;  %v11256_v17 = vld [vmem:[%s19248_s1 + $0x600] sm:$0xff] }
 0x1ec   : > { %v16663_v51 = vadd.f32 %v13192_v56, %v2095_v47  ;;  %v2094_v49 = vadd.f32 %v2047_v33, %v16376_v30  ;;  %13784 = vmatprep.subr.mxu0 %v11257_v46  ;;  %13593 = vmatprep.mubr.f32.mxu1 %v16653_v58  ;;  %v4722_v10 = vld [vmem:[#allocation2 + $0xa2] sm:$0xff]  ;;  %v16674_v30 = vld [vmem:[#allocation2 + $0xb2] sm:$0xff] }
 0x1ed   : > { %v2417_v63 = vpop.f32.mrf.mxu0  ;;  %13785 = vmatpush3.msra.mxu0 %v11257_v46  ;;  %v13115_v12 = vpop.f32.mrf.mxu1  ;;  %13594 = vmatmul.mubr.f32.gmra.mxu1 %v16658_v14  ;;  %v11287_v33 = vld [vmem:[%s19248_s1 + $0x6f8] sm:$0xff] }
 0x1ee   : > { %v16671_v40 = vadd.f32 %v2417_v63, %v2094_v49  ;;  %v2097_v47 = vadd.f32 %v13115_v12, %v16385_v26  ;;  %13673 = vmatprep.mubr.f32.mxu0 %v4382_v20  ;;  %13706 = vmatprep.subr.mxu1 %v11240_v13  ;;  %v16686_v20 = vld [vmem:[#allocation2 + $0xc2] sm:$0xff] }
 0x1ef   : > { %v13195_v56 = vpop.f32.mrf.mxu0  ;;  %13674 = vmatmul.mubr.f32.gmra.mxu0 %v4383_v36  ;;  %13707 = vmatpush3.msra.mxu1 %v11240_v13  ;;  %v2057_v46 = vpop.f32.mrf.mxu1  ;;  %v11303_v13 = vld [vmem:[%s19248_s1 + $0x778] sm:$0xff] }
 0x1f0   : > { %v16679_v14 = vadd.f32 %v13195_v56, %v2097_v47  ;;  %v2096_v58 = vadd.f32 %v2057_v46, %v16394_v50  ;;  %13786 = vmatprep.subr.mxu0 %v11256_v17  ;;  %13708 = vmatprep.mubr.f32.mxu1 %v4722_v10  ;;  %v16692_v50 = vld [vmem:[#allocation2 + $0xd2] sm:$0xff]  ;;  %v16706_v56 = vld [vmem:[#allocation2 + $0xe2] sm:$0xff] }
 0x1f1   : > { %v2427_v49 = vpop.f32.mrf.mxu0  ;;  %13787 = vmatpush3.msra.mxu0 %v11256_v17  ;;  %v13230_v26 = vpop.f32.mrf.mxu1  ;;  %13709 = vmatmul.mubr.f32.vlgmr.msra.gmra.mxu1 %v16674_v30  ;;  %v11286_v10 = vld [vmem:[%s19248_s1 + $0x6f0] sm:$0xff] }
 0x1f2   : > { %v16688_v36 = vadd.f32 %v2427_v49, %v2096_v58  ;;  %v2807_v63 = vadd.f32 %v13230_v26, %v16402_v3  ;;  %13788 = vmatprep.mubr.f32.mxu0 %v16380_v11  ;;  %13836 = vmatprep.subr.mxu1 %v11287_v33 }
 0x1f3   : > { %v13310_v12 = vpop.f32.mrf.mxu0  ;;  %13789 = vmatmul.mubr.f32.vlgmr.msra.gmra.mxu0 %v16392_v4  ;;  %13837 = vmatpush3.msra.mxu1 %v11287_v33  ;;  %v2647_v17 = vpop.f32.mrf.mxu1  ;;  %v11302_v4 = vld [vmem:[%s19248_s1 + $0x770] sm:$0xff] }
 0x1f4   : > { %v16698_v47 = vadd.f32 %v13310_v12, %v2807_v63  ;;  %v2806_v58 = vadd.f32 %v2647_v17, %v16412_v16  ;;  %13916 = vmatprep.subr.mxu0 %v11303_v13  ;;  %13711 = vmatprep.mubr.f32.mxu1 %v16686_v20  ;;  %v16712_v16 = vld [vmem:[#allocation2 + $0xf2] sm:$0xff]  ;;  %v16726_v17 = vld [vmem:[#allocation2 + $0x102] sm:$0xff] }
 0x1f5   : > { %v3018_v11 = vpop.f32.mrf.mxu0  ;;  %13917 = vmatpush3.msra.mxu0 %v11303_v13  ;;  %v13233_v3 = vpop.f32.mrf.mxu1  ;;  %13712 = vmatmul.mubr.f32.gmra.mxu1 %v16692_v50  ;;  %v11285_v13 = vld [vmem:[%s19248_s1 + $0x6e8] sm:$0xff] }
 0x1f6   : > { %v16708_v46 = vadd.f32 %v3018_v11, %v2806_v58  ;;  %v2809_v33 = vadd.f32 %v13233_v3, %v16422_v23  ;;  %13791 = vmatprep.mubr.f32.mxu0 %v16397_v54  ;;  %13838 = vmatprep.subr.mxu1 %v11286_v10 }
 0x1f7   : > { %v13313_v49 = vpop.f32.mrf.mxu0  ;;  %13792 = vmatmul.mubr.f32.gmra.mxu0 %v16410_v39  ;;  %13839 = vmatpush3.msra.mxu1 %v11286_v10  ;;  %v2657_v26 = vpop.f32.mrf.mxu1  ;;  %v11301_v39 = vld [vmem:[%s19248_s1 + $0x768] sm:$0xff] }
 0x1f8   : > { %v16718_v63 = vadd.f32 %v13313_v49, %v2809_v33  ;;  %v2808_v12 = vadd.f32 %v2657_v26, %v16432_v28  ;;  %13918 = vmatprep.subr.mxu0 %v11302_v4  ;;  %13714 = vmatprep.mubr.f32.mxu1 %v16706_v56  ;;  %v16732_v28 = vld [vmem:[#allocation2 + $0x112] sm:$0xff] }
 0x1f9   : > { %v3028_v54 = vpop.f32.mrf.mxu0  ;;  %13919 = vmatpush3.msra.mxu0 %v11302_v4  ;;  %v13236_v23 = vpop.f32.mrf.mxu1  ;;  %13715 = vmatmul.mubr.f32.gmra.mxu1 %v16712_v16  ;;  %v11284_v4 = vld [vmem:[%s19248_s1 + $0x6e0] sm:$0xff] }
 0x1fa   : > { %v16728_v10 = vadd.f32 %v3028_v54, %v2808_v12  ;;  %v2811_v58 = vadd.f32 %v13236_v23, %v16442_v55  ;;  %13794 = vmatprep.mubr.f32.mxu0 %v16416_v2  ;;  %13840 = vmatprep.subr.mxu1 %v11285_v13  ;;  %v5100_v2 = vld [vmem:[#allocation2 + $0x120] sm:$0xff] }
 0x1fb   : > { %v13316_v11 = vpop.f32.mrf.mxu0  ;;  %13795 = vmatmul.mubr.f32.gmra.mxu0 %v16430_v37  ;;  %13841 = vmatpush3.msra.mxu1 %v11285_v13  ;;  %v2667_v3 = vpop.f32.mrf.mxu1  ;;  %v11300_v37 = vld [vmem:[%s19248_s1 + $0x760] sm:$0xff] }
 0x1fc   : > { %v16738_v33 = vadd.f32 %v13316_v11, %v2811_v58  ;;  %v2810_v49 = vadd.f32 %v2667_v3, %v16450_v19  ;;  %13920 = vmatprep.subr.mxu0 %v11301_v39  ;;  %13717 = vmatprep.mubr.f32.mxu1 %v16726_v17  ;;  %v4730_v13 = vld [vmem:[#allocation2 + $0x142] sm:$0xff]  ;;  %v16750_v19 = vld [vmem:[#allocation2 + $0x152] sm:$0xff] }
 0x1fd   : > { %v3038_v55 = vpop.f32.mrf.mxu0  ;;  %13921 = vmatpush3.msra.mxu0 %v11301_v39  ;;  %v13239_v26 = vpop.f32.mrf.mxu1  ;;  %13718 = vmatmul.mubr.f32.gmra.mxu1 %v16732_v28  ;;  %v11283_v58 = vld [vmem:[%s19248_s1 + $0x6d8] sm:$0xff] }
 0x1fe   : > { %v16746_v12 = vadd.f32 %v3038_v55, %v2810_v49  ;;  %v2813_v54 = vadd.f32 %v13239_v26, %v16460_v15  ;;  %13797 = vmatprep.mubr.f32.mxu0 %v16436_v9  ;;  %13842 = vmatprep.subr.mxu1 %v11284_v4  ;;  %v16762_v49 = vld [vmem:[#allocation2 + $0x162] sm:$0xff]  ;;  %v19396_v26 = vld [vmem:[#allocation9_spill] sm:$0xff] }
 0x1ff   : > { %v13319_v23 = vpop.f32.mrf.mxu0  ;;  %13798 = vmatmul.mubr.f32.gmra.mxu0 %v5100_v2  ;;  %13843 = vmatpush3.msra.mxu1 %v11284_v4  ;;  %v2677_v39 = vpop.f32.mrf.mxu1  ;;  %v11299_v4 = vld [vmem:[%s19248_s1 + $0x758] sm:$0xff] }
 0x200   : > { %v16755_v11 = vadd.f32 %v13319_v23, %v2813_v54  ;;  %v2812_v3 = vadd.f32 %v2677_v39, %v16469_v35  ;;  %13922 = vmatprep.subr.mxu0 %v11300_v37  ;;  %13720 = vmatprep.mubr.f32.mxu1 %v4730_v13  ;;  %v16768_v35 = vld [vmem:[#allocation2 + $0x172] sm:$0xff] }
 0x201   : > { %v3048_v15 = vpop.f32.mrf.mxu0  ;;  %13923 = vmatpush3.msra.mxu0 %v11300_v37  ;;  %v13242_v9 = vpop.f32.mrf.mxu1  ;;  %13721 = vmatmul.mubr.f32.gmra.mxu1 %v16750_v19  ;;  %v11282_v54 = vld [vmem:[%s19248_s1 + $0x6d0] sm:$0xff] }
 0x202   : > { %v16764_v2 = vadd.f32 %v3048_v15, %v2812_v3  ;;  %v2815_v55 = vadd.f32 %v13242_v9, %v16477_v8  ;;  %13800 = vmatprep.mubr.f32.mxu0 %v19396_v26  ;;  %13844 = vmatprep.subr.mxu1 %v11283_v58  ;;  %v11281_v26 = vld [vmem:[%s19248_s1 + $0x6c8] sm:$0xff] }
 0x203   : > { %v13322_v13 = vpop.f32.mrf.mxu0  ;;  %13801 = vmatmul.mubr.f32.gmra.mxu0 %v16467_v61  ;;  %13845 = vmatpush3.msra.mxu1 %v11283_v58  ;;  %v2687_v37 = vpop.f32.mrf.mxu1  ;;  %v11298_v61 = vld [vmem:[%s19248_s1 + $0x750] sm:$0xff]  ;;  %v16782_v58 = vld [vmem:[#allocation2 + $0x182] sm:$0xff] }
 0x204   : > { %v16774_v23 = vadd.f32 %v13322_v13, %v2815_v55  ;;  %v2814_v39 = vadd.f32 %v2687_v37, %v16487_v0  ;;  %13924 = vmatprep.subr.mxu0 %v11299_v4  ;;  %13723 = vmatprep.mubr.f32.mxu1 %v16762_v49  ;;  %v16788_v0 = vld [vmem:[#allocation2 + $0x192] sm:$0xff] }
 0x205   : > { %v3058_v8 = vpop.f32.mrf.mxu0  ;;  %13925 = vmatpush3.msra.mxu0 %v11299_v4  ;;  %v13245_v3 = vpop.f32.mrf.mxu1  ;;  %13724 = vmatmul.mubr.f32.gmra.mxu1 %v16768_v35 }
 0x206   : > { %v16784_v15 = vadd.f32 %v3058_v8, %v2814_v39  ;;  %v2817_v9 = vadd.f32 %v13245_v3, %v16497_v62  ;;  %13803 = vmatprep.mubr.f32.mxu0 %v16472_v27  ;;  %13846 = vmatprep.subr.mxu1 %v11282_v54 }
 0x207   : > { %v13325_v55 = vpop.f32.mrf.mxu0  ;;  %13804 = vmatmul.mubr.f32.gmra.mxu0 %v16485_v53  ;;  %13847 = vmatpush3.msra.mxu1 %v11282_v54  ;;  %v2697_v4 = vpop.f32.mrf.mxu1  ;;  %v11297_v53 = vld [vmem:[%s19248_s1 + $0x748] sm:$0xff] }
 0x208   : > { %v16794_v13 = vadd.f32 %v13325_v55, %v2817_v9  ;;  %v2816_v37 = vadd.f32 %v2697_v4, %v16507_v41  ;;  %13926 = vmatprep.subr.mxu0 %v11298_v61  ;;  %13726 = vmatprep.mubr.f32.mxu1 %v16782_v58  ;;  %v16802_v54 = vld [vmem:[#allocation2 + $0x1a2] sm:$0xff]  ;;  %v16808_v41 = vld [vmem:[#allocation2 + $0x1b2] sm:$0xff] }
 0x209   : > { %v3068_v27 = vpop.f32.mrf.mxu0  ;;  %13927 = vmatpush3.msra.mxu0 %v11298_v61  ;;  %v13248_v62 = vpop.f32.mrf.mxu1  ;;  %13727 = vmatmul.mubr.f32.gmra.mxu1 %v16788_v0  ;;  %v11280_v9 = vld [vmem:[%s19248_s1 + $0x6c0] sm:$0xff] }
 0x20a   : > { %v16804_v39 = vadd.f32 %v3068_v27, %v2816_v37  ;;  %v2819_v8 = vadd.f32 %v13248_v62, %v16517_v52  ;;  %13806 = vmatprep.mubr.f32.mxu0 %v16491_v32  ;;  %13848 = vmatprep.subr.mxu1 %v11281_v26  ;;  %v5108_v32 = vld [vmem:[#allocation2 + $0x1c0] sm:$0xff] }
 0x20b   : > { %v13328_v3 = vpop.f32.mrf.mxu0  ;;  %13807 = vmatmul.mubr.f32.gmra.mxu0 %v16505_v29  ;;  %13849 = vmatpush3.msra.mxu1 %v11281_v26  ;;  %v2707_v61 = vpop.f32.mrf.mxu1  ;;  %v11296_v29 = vld [vmem:[%s19248_s1 + $0x740] sm:$0xff] }
 0x20c   : > { %v16814_v55 = vadd.f32 %v13328_v3, %v2819_v8  ;;  %v2818_v4 = vadd.f32 %v2707_v61, %v16525_v42  ;;  %13928 = vmatprep.subr.mxu0 %v11297_v53  ;;  %13729 = vmatprep.mubr.f32.mxu1 %v16802_v54  ;;  %v4738_v26 = vld [vmem:[#allocation2 + $0x1e2] sm:$0xff]  ;;  %v16826_v42 = vld [vmem:[#allocation2 + $0x1f2] sm:$0xff] }
 0x20d   : > { %v3078_v52 = vpop.f32.mrf.mxu0  ;;  %13929 = vmatpush3.msra.mxu0 %v11297_v53  ;;  %v13251_v37 = vpop.f32.mrf.mxu1  ;;  %13730 = vmatmul.mubr.f32.gmra.mxu1 %v16808_v41  ;;  %v11279_v3 = vld [vmem:[%s19248_s1 + $0x6b8] sm:$0xff] }
 0x20e   : > { %v16822_v27 = vadd.f32 %v3078_v52, %v2818_v4  ;;  %v2821_v62 = vadd.f32 %v13251_v37, %v16535_v59  ;;  %13809 = vmatprep.mubr.f32.mxu0 %v16511_v60  ;;  %13850 = vmatprep.subr.mxu1 %v11280_v9 }
 0x20f   : > { %v13331_v8 = vpop.f32.mrf.mxu0  ;;  %13810 = vmatmul.mubr.f32.gmra.mxu0 %v5108_v32  ;;  %13851 = vmatpush3.msra.mxu1 %v11280_v9  ;;  %v2717_v53 = vpop.f32.mrf.mxu1  ;;  %v11295_v9 = vld [vmem:[%s19248_s1 + $0x738] sm:$0xff]  ;;  %v16838_v32 = vld [vmem:[#allocation2 + $0x202] sm:$0xff] }
 0x210   : > { %v16831_v61 = vadd.f32 %v13331_v8, %v2821_v62  ;;  %v2820_v4 = vadd.f32 %v2717_v53, %v16544_v5  ;;  %13930 = vmatprep.subr.mxu0 %v11296_v29  ;;  %13732 = vmatprep.mubr.f32.mxu1 %v4738_v26  ;;  %v19397_v62 = vld [vmem:[#allocation10_spill] sm:$0xff]  ;;  %v11278_v8 = vld [vmem:[%s19248_s1 + $0x6b0] sm:$0xff] }
 0x211   : > { %v3088_v59 = vpop.f32.mrf.mxu0  ;;  %13931 = vmatpush3.msra.mxu0 %v11296_v29  ;;  %v13254_v60 = vpop.f32.mrf.mxu1  ;;  %13733 = vmatmul.mubr.f32.gmra.mxu1 %v16826_v42  ;;  %v16844_v5 = vld [vmem:[#allocation2 + $0x212] sm:$0xff] }
 0x212   : > { %v16840_v52 = vadd.f32 %v3088_v59, %v2820_v4  ;;  %v2823_v37 = vadd.f32 %v13254_v60, %v16552_v45  ;;  %13812 = vmatprep.mubr.f32.mxu0 %v19397_v62  ;;  %13852 = vmatprep.subr.mxu1 %v11279_v3 }
 0x213   : > { %v13334_v26 = vpop.f32.mrf.mxu0  ;;  %13813 = vmatmul.mubr.f32.gmra.mxu0 %v16542_v1  ;;  %13853 = vmatpush3.msra.mxu1 %v11279_v3  ;;  %v2727_v29 = vpop.f32.mrf.mxu1  ;;  %v11294_v1 = vld [vmem:[%s19248_s1 + $0x730] sm:$0xff]  ;;  %v16858_v3 = vld [vmem:[#allocation2 + $0x222] sm:$0xff] }
 0x214   : > { %v16850_v53 = vadd.f32 %v13334_v26, %v2823_v37  ;;  %v2822_v4 = vadd.f32 %v2727_v29, %v16562_v43  ;;  %13932 = vmatprep.subr.mxu0 %v11295_v9  ;;  %13735 = vmatprep.mubr.f32.mxu1 %v16838_v32  ;;  %v16864_v43 = vld [vmem:[#allocation2 + $0x232] sm:$0xff]  ;;  %v11277_v26 = vld [vmem:[%s19248_s1 + $0x6a8] sm:$0xff] }
 0x215   : > { %v3098_v45 = vpop.f32.mrf.mxu0  ;;  %13933 = vmatpush3.msra.mxu0 %v11295_v9  ;;  %v13257_v59 = vpop.f32.mrf.mxu1  ;;  %13736 = vmatmul.mubr.f32.gmra.mxu1 %v16844_v5 }
 0x216   : > { %v16860_v60 = vadd.f32 %v3098_v45, %v2822_v4  ;;  %v2825_v37 = vadd.f32 %v13257_v59, %v16572_v24  ;;  %13815 = vmatprep.mubr.f32.mxu0 %v16547_v48  ;;  %13854 = vmatprep.subr.mxu1 %v11278_v8 }
 0x217   : > { %v13337_v62 = vpop.f32.mrf.mxu0  ;;  %13816 = vmatmul.mubr.f32.gmra.mxu0 %v16560_v21  ;;  %13855 = vmatpush3.msra.mxu1 %v11278_v8  ;;  %v2737_v9 = vpop.f32.mrf.mxu1  ;;  %v11293_v21 = vld [vmem:[%s19248_s1 + $0x728] sm:$0xff] }
 0x218   : > { %v16870_v29 = vadd.f32 %v13337_v62, %v2825_v37  ;;  %v2824_v4 = vadd.f32 %v2737_v9, %v16582_v34  ;;  %13934 = vmatprep.subr.mxu0 %v11294_v1  ;;  %13738 = vmatprep.mubr.f32.mxu1 %v16858_v3  ;;  %v16878_v8 = vld [vmem:[#allocation2 + $0x242] sm:$0xff]  ;;  %v16884_v34 = vld [vmem:[#allocation2 + $0x252] sm:$0xff] }
 0x219   : > { %v3108_v48 = vpop.f32.mrf.mxu0  ;;  %13935 = vmatpush3.msra.mxu0 %v11294_v1  ;;  %v13260_v24 = vpop.f32.mrf.mxu1  ;;  %13739 = vmatmul.mubr.f32.gmra.mxu1 %v16864_v43  ;;  %19398 = vst [vmem:[#allocation20_spill] sm:$0xff] %v16878_v8  ;;  %19399 = vst [vmem:[#allocation21_spill] sm:$0xff] %v16884_v34  ;;  %v11276_v62 = vld [vmem:[%s19248_s1 + $0x6a0] sm:$0xff] }
 0x21a   : > { %v16880_v45 = vadd.f32 %v3108_v48, %v2824_v4  ;;  %v2827_v59 = vadd.f32 %v13260_v24, %v16592_v6  ;;  %13818 = vmatprep.mubr.f32.mxu0 %v16566_v38  ;;  %13856 = vmatprep.subr.mxu1 %v11277_v26  ;;  %v5116_v38 = vld [vmem:[#allocation2 + $0x260] sm:$0xff] }
 0x21b   : > { %v13340_v37 = vpop.f32.mrf.mxu0  ;;  %13819 = vmatmul.mubr.f32.gmra.mxu0 %v16580_v22  ;;  %13857 = vmatpush3.msra.mxu1 %v11277_v26  ;;  %v2747_v1 = vpop.f32.mrf.mxu1  ;;  %v11292_v22 = vld [vmem:[%s19248_s1 + $0x720] sm:$0xff] }
 0x21c   : > { %v16890_v9 = vadd.f32 %v13340_v37, %v2827_v59  ;;  %v2826_v4 = vadd.f32 %v2747_v1, %v16600_v44  ;;  %13936 = vmatprep.subr.mxu0 %v11293_v21  ;;  %13741 = vmatprep.mubr.f32.mxu1 %v16878_v8  ;;  %v4746_v26 = vld [vmem:[#allocation2 + $0x282] sm:$0xff]  ;;  %v16902_v44 = vld [vmem:[#allocation2 + $0x292] sm:$0xff] }
 0x21d   : > { %v3118_v6 = vpop.f32.mrf.mxu0  ;;  %13937 = vmatpush3.msra.mxu0 %v11293_v21  ;;  %v13263_v48 = vpop.f32.mrf.mxu1  ;;  %13742 = vmatmul.mubr.f32.gmra.mxu1 %v16884_v34  ;;  %v19400_v37 = vld [vmem:[#allocation11_spill] sm:$0xff]  ;;  %19401 = vst [vmem:[#allocation22_spill] sm:$0xff] %v16902_v44  ;;  %v11275_v34 = vld [vmem:[%s19248_s1 + $0x698] sm:$0xff] }
 0x21e   : > { %v16898_v24 = vadd.f32 %v3118_v6, %v2826_v4  ;;  %v2829_v59 = vadd.f32 %v13263_v48, %v16610_v18  ;;  %13821 = vmatprep.mubr.f32.mxu0 %v19400_v37  ;;  %13858 = vmatprep.subr.mxu1 %v11276_v62  ;;  %v19404_v37 = vld [vmem:[#allocation15_spill] sm:$0xff] }
 0x21f   : > { %v13343_v1 = vpop.f32.mrf.mxu0  ;;  %13822 = vmatmul.mubr.f32.gmra.mxu0 %v5116_v38  ;;  %13859 = vmatpush3.msra.mxu1 %v11276_v62  ;;  %v2757_v21 = vpop.f32.mrf.mxu1  ;;  %v11291_v62 = vld [vmem:[%s19248_s1 + $0x718] sm:$0xff]  ;;  %v16914_v38 = vld [vmem:[#allocation2 + $0x2a2] sm:$0xff] }
 0x220   : > { %v16907_v8 = vadd.f32 %v13343_v1, %v2829_v59  ;;  %v2828_v4 = vadd.f32 %v2757_v21, %v16619_v25  ;;  %13938 = vmatprep.subr.mxu0 %v11292_v22  ;;  %13744 = vmatprep.mubr.f32.mxu1 %v4746_v26  ;;  %19403 = vst [vmem:[#allocation24_spill] sm:$0xff] %v16914_v38  ;;  %v19405_v1 = vld [vmem:[#allocation12_spill] sm:$0xff]  ;;  %v16920_v25 = vld [vmem:[#allocation2 + $0x2b2] sm:$0xff] }
 0x221   : > { %v3128_v18 = vpop.f32.mrf.mxu0  ;;  %13939 = vmatpush3.msra.mxu0 %v11292_v22  ;;  %v13266_v6 = vpop.f32.mrf.mxu1  ;;  %13745 = vmatmul.mubr.f32.gmra.mxu1 %v16902_v44  ;;  %19406 = vst [vmem:[#allocation25_spill] sm:$0xff] %v16920_v25  ;;  %v19407_v22 = vld [vmem:[#allocation13_spill] sm:$0xff] }
 0x222   : > { %19402 = vst [vmem:[#allocation23_spill] sm:$0xff] %v16907_v8  ;;  %v16916_v48 = vadd.f32 %v3128_v18, %v2828_v4  ;;  %v2831_v59 = vadd.f32 %v13266_v6, %v19404_v37  ;;  %13824 = vmatprep.mubr.f32.mxu0 %v19405_v1  ;;  %13860 = vmatprep.subr.mxu1 %v11275_v34  ;;  %v11274_v44 = vld [vmem:[%s19248_s1 + $0x690] sm:$0xff]  ;;  %v16934_v37 = vld [vmem:[#allocation2 + $0x2c2] sm:$0xff] }
 0x223   : > { %v13346_v26 = vpop.f32.mrf.mxu0  ;;  %13825 = vmatmul.mubr.f32.gmra.mxu0 %v19407_v22  ;;  %13861 = vmatpush3.msra.mxu1 %v11275_v34  ;;  %v2767_v21 = vpop.f32.mrf.mxu1  ;;  %v11290_v34 = vld [vmem:[%s19248_s1 + $0x710] sm:$0xff]  ;;  %19408 = vst [vmem:[#allocation26_spill] sm:$0xff] %v16934_v37 }
 0x224   : > { %v16926_v8 = vadd.f32 %v13346_v26, %v2831_v59  ;;  %v2830_v4 = vadd.f32 %v2767_v21, %v16637_v57  ;;  %13940 = vmatprep.subr.mxu0 %v11291_v62  ;;  %13747 = vmatprep.mubr.f32.mxu1 %v16914_v38  ;;  %v19409_v26 = vld [vmem:[#allocation14_spill] sm:$0xff] }
 0x225   : > { %v3138_v18 = vpop.f32.mrf.mxu0  ;;  %13941 = vmatpush3.msra.mxu0 %v11291_v62  ;;  %v13269_v6 = vpop.f32.mrf.mxu1  ;;  %13748 = vmatmul.mubr.f32.gmra.mxu1 %v16920_v25  ;;  %v16940_v57 = vld [vmem:[#allocation2 + $0x2d2] sm:$0xff]  ;;  %v19411_v62 = vld [vmem:[#allocation16_spill] sm:$0xff] }
 0x226   : > { %v16936_v1 = vadd.f32 %v3138_v18, %v2830_v4  ;;  %v2833_v59 = vadd.f32 %v13269_v6, %v16645_v31  ;;  %13827 = vmatprep.mubr.f32.mxu0 %v19409_v26  ;;  %13862 = vmatprep.subr.mxu1 %v11274_v44  ;;  %19410 = vst [vmem:[#allocation27_spill] sm:$0xff] %v16940_v57  ;;  %v11273_v25 = vld [vmem:[%s19248_s1 + $0x688] sm:$0xff] }
 0x227   : > { %v13349_v22 = vpop.f32.mrf.mxu0  ;;  %13828 = vmatmul.mubr.f32.gmra.mxu0 %v19411_v62  ;;  %13863 = vmatpush3.msra.mxu1 %v11274_v44  ;;  %v2777_v21 = vpop.f32.mrf.mxu1  ;;  %v11289_v44 = vld [vmem:[%s19248_s1 + $0x708] sm:$0xff] }
 0x228   : > { %v16946_v38 = vadd.f32 %v13349_v22, %v2833_v59  ;;  %v2832_v4 = vadd.f32 %v2777_v21, %v16655_v7  ;;  %13942 = vmatprep.subr.mxu0 %v11290_v34  ;;  %13750 = vmatprep.mubr.f32.mxu1 %v16934_v37  ;;  %v16954_v6 = vld [vmem:[#allocation2 + $0x2e2] sm:$0xff]  ;;  %v19413_v22 = vld [vmem:[#allocation17_spill] sm:$0xff] }
 0x229   : > { %v3148_v31 = vpop.f32.mrf.mxu0  ;;  %13943 = vmatpush3.msra.mxu0 %v11290_v34  ;;  %v13272_v18 = vpop.f32.mrf.mxu1  ;;  %13751 = vmatmul.mubr.f32.gmra.mxu1 %v16940_v57  ;;  %19412 = vst [vmem:[#allocation28_spill] sm:$0xff] %v16954_v6  ;;  %v16960_v7 = vld [vmem:[#allocation2 + $0x2f2] sm:$0xff]  ;;  %v11272_v57 = vld [vmem:[%s19248_s1 + $0x680] sm:$0xff] }
 0x22a   : > { %v16956_v26 = vadd.f32 %v3148_v31, %v2832_v4  ;;  %v2835_v59 = vadd.f32 %v13272_v18, %v16663_v51  ;;  %13830 = vmatprep.mubr.f32.mxu0 %v19413_v22  ;;  %13864 = vmatprep.subr.mxu1 %v11273_v25  ;;  %19414 = vst [vmem:[#allocation29_spill] sm:$0xff] %v16960_v7  ;;  %v19415_v34 = vld [vmem:[#allocation18_spill] sm:$0xff]  ;;  %v5124_v51 = vld [vmem:[#allocation2 + $0x300] sm:$0xff] }
 0x22b   : > { %v13352_v62 = vpop.f32.mrf.mxu0  ;;  %13831 = vmatmul.mubr.f32.gmra.mxu0 %v19415_v34  ;;  %13865 = vmatpush3.msra.mxu1 %v11273_v25  ;;  %v2787_v21 = vpop.f32.mrf.mxu1  ;;  %v11288_v25 = vld [vmem:[%s19248_s1 + $0x700] sm:$0xff]  ;;  %v5463_v22 = vld [vmem:[#allocation2 + $0xb1] sm:$0xff] }
 0x22c   : > { %v16966_v37 = vadd.f32 %v13352_v62, %v2835_v59  ;;  %v2834_v4 = vadd.f32 %v2787_v21, %v16671_v40  ;;  %13944 = vmatprep.subr.mxu0 %v11289_v44  ;;  %13753 = vmatprep.mubr.f32.mxu1 %v16954_v6  ;;  %v19416_v62 = vld [vmem:[#allocation19_spill] sm:$0xff] }
 0x22d   : > { %v3158_v31 = vpop.f32.mrf.mxu0  ;;  %13945 = vmatpush3.msra.mxu0 %v11289_v44  ;;  %v13275_v18 = vpop.f32.mrf.mxu1  ;;  %13754 = vmatmul.mubr.f32.gmra.mxu1 %v16960_v7  ;;  %v16978_v40 = vld [vmem:[#allocation2 + $0xc1] sm:$0xff]  ;;  %v11319_v7 = vld [vmem:[%s19248_s1 + $0x7f8] sm:$0xff] }
 0x22e   : > { %v16974_v34 = vadd.f32 %v3158_v31, %v2834_v4  ;;  %v2837_v59 = vadd.f32 %v13275_v18, %v16679_v14  ;;  %13833 = vmatprep.mubr.f32.mxu0 %v19416_v62  ;;  %13866 = vmatprep.subr.mxu1 %v11272_v57  ;;  %v11318_v62 = vld [vmem:[%s19248_s1 + $0x7f0] sm:$0xff] }
 0x22f   : > { %v13355_v21 = vpop.f32.mrf.mxu0  ;;  %13834 = vmatmul.mubr.f32.gmra.mxu0 %v5124_v51  ;;  %13867 = vmatpush3.msra.mxu1 %v11272_v57  ;;  %v2797_v44 = vpop.f32.mrf.mxu1  ;;  %v11335_v57 = vld [vmem:[%s19248_s1 + $0x878] sm:$0xff] }
 0x230   : > { %v16983_v6 = vadd.f32 %v13355_v21, %v2837_v59  ;;  %v2836_v4 = vadd.f32 %v2797_v44, %v16688_v36  ;;  %13946 = vmatprep.subr.mxu0 %v11288_v25  ;;  %13868 = vmatprep.mubr.f32.mxu1 %v5463_v22  ;;  %v16990_v51 = vld [vmem:[#allocation2 + $0xd1] sm:$0xff]  ;;  %v16996_v36 = vld [vmem:[#allocation2 + $0xe1] sm:$0xff] }
 0x231   : > { %v3168_v14 = vpop.f32.mrf.mxu0  ;;  %13947 = vmatpush3.msra.mxu0 %v11288_v25  ;;  %v13390_v31 = vpop.f32.mrf.mxu1  ;;  %13869 = vmatmul.mubr.f32.vlgmr.msra.gmra.mxu1 %v16978_v40 }
 0x232   : > { %v16992_v18 = vadd.f32 %v3168_v14, %v2836_v4  ;;  %v3548_v59 = vadd.f32 %v13390_v31, %v16698_v47  ;;  %13948 = vmatprep.mubr.f32.mxu0 %v16674_v30  ;;  %13996 = vmatprep.subr.mxu1 %v11319_v7 }
 0x233   : > { %v13470_v22 = vpop.f32.mrf.mxu0  ;;  %13949 = vmatmul.mubr.f32.vlgmr.msra.gmra.mxu0 %v16686_v20  ;;  %13997 = vmatpush3.msra.mxu1 %v11319_v7  ;;  %v3388_v25 = vpop.f32.mrf.mxu1  ;;  %v11334_v20 = vld [vmem:[%s19248_s1 + $0x870] sm:$0xff] }
 0x234   : > { %v17002_v21 = vadd.f32 %v13470_v22, %v3548_v59  ;;  %v3547_v44 = vadd.f32 %v3388_v25, %v16708_v46  ;;  %14076 = vmatprep.subr.mxu0 %v11335_v57  ;;  %13871 = vmatprep.mubr.f32.mxu1 %v16990_v51  ;;  %v17010_v7 = vld [vmem:[#allocation2 + $0xf1] sm:$0xff]  ;;  %v17016_v46 = vld [vmem:[#allocation2 + $0x101] sm:$0xff] }
 0x235   : > { %v3758_v30 = vpop.f32.mrf.mxu0  ;;  %14077 = vmatpush3.msra.mxu0 %v11335_v57  ;;  %v13393_v47 = vpop.f32.mrf.mxu1  ;;  %13872 = vmatmul.mubr.f32.gmra.mxu1 %v16996_v36  ;;  %v11317_v59 = vld [vmem:[%s19248_s1 + $0x7e8] sm:$0xff] }
 0x236   : > { %v17012_v4 = vadd.f32 %v3758_v30, %v3547_v44  ;;  %v3550_v14 = vadd.f32 %v13393_v47, %v16718_v63  ;;  %13951 = vmatprep.mubr.f32.mxu0 %v16692_v50  ;;  %13998 = vmatprep.subr.mxu1 %v11318_v62 }
 0x237   : > { %v13473_v31 = vpop.f32.mrf.mxu0  ;;  %13952 = vmatmul.mubr.f32.gmra.mxu0 %v16706_v56  ;;  %13999 = vmatpush3.msra.mxu1 %v11318_v62  ;;  %v3398_v57 = vpop.f32.mrf.mxu1  ;;  %v11333_v56 = vld [vmem:[%s19248_s1 + $0x868] sm:$0xff]  ;;  %v17030_v62 = vld [vmem:[#allocation2 + $0x111] sm:$0xff] }
 0x238   : > { %v17022_v22 = vadd.f32 %v13473_v31, %v3550_v14  ;;  %v3549_v25 = vadd.f32 %v3398_v57, %v16728_v10  ;;  %14078 = vmatprep.subr.mxu0 %v11334_v20  ;;  %13874 = vmatprep.mubr.f32.mxu1 %v17010_v7  ;;  %v17036_v10 = vld [vmem:[#allocation2 + $0x121] sm:$0xff] }
 0x239   : > { %v3768_v50 = vpop.f32.mrf.mxu0  ;;  %14079 = vmatpush3.msra.mxu0 %v11334_v20  ;;  %v13396_v63 = vpop.f32.mrf.mxu1  ;;  %13875 = vmatmul.mubr.f32.gmra.mxu1 %v17016_v46  ;;  %v11316_v14 = vld [vmem:[%s19248_s1 + $0x7e0] sm:$0xff] }
 0x23a   : > { %v17032_v44 = vadd.f32 %v3768_v50, %v3549_v25  ;;  %v3552_v30 = vadd.f32 %v13396_v63, %v16738_v33  ;;  %13954 = vmatprep.mubr.f32.mxu0 %v16712_v16  ;;  %14000 = vmatprep.subr.mxu1 %v11317_v59  ;;  %v5840_v16 = vld [vmem:[#allocation2 + $0x122] sm:$0xff] }
 0x23b   : > { %v13476_v47 = vpop.f32.mrf.mxu0  ;;  %13955 = vmatmul.mubr.f32.gmra.mxu0 %v16726_v17  ;;  %14001 = vmatpush3.msra.mxu1 %v11317_v59  ;;  %v3408_v20 = vpop.f32.mrf.mxu1  ;;  %v11332_v17 = vld [vmem:[%s19248_s1 + $0x860] sm:$0xff]  ;;  %v5471_v59 = vld [vmem:[#allocation2 + $0x151] sm:$0xff] }
 0x23c   : > { %v17042_v31 = vadd.f32 %v13476_v47, %v3552_v30  ;;  %v3551_v57 = vadd.f32 %v3408_v20, %v16746_v12  ;;  %14080 = vmatprep.subr.mxu0 %v11333_v56  ;;  %13877 = vmatprep.mubr.f32.mxu1 %v17030_v62  ;;  %v17054_v12 = vld [vmem:[#allocation2 + $0x161] sm:$0xff]  ;;  %v11315_v47 = vld [vmem:[%s19248_s1 + $0x7d8] sm:$0xff] }
 0x23d   : > { %v3778_v33 = vpop.f32.mrf.mxu0  ;;  %14081 = vmatpush3.msra.mxu0 %v11333_v56  ;;  %v13399_v25 = vpop.f32.mrf.mxu1  ;;  %13878 = vmatmul.mubr.f32.gmra.mxu1 %v17036_v10 }
 0x23e   : > { %v17050_v50 = vadd.f32 %v3778_v33, %v3551_v57  ;;  %v3554_v63 = vadd.f32 %v13399_v25, %v16755_v11  ;;  %13957 = vmatprep.mubr.f32.mxu0 %v16732_v28  ;;  %14002 = vmatprep.subr.mxu1 %v11316_v14 }
 0x23f   : > { %v13479_v30 = vpop.f32.mrf.mxu0  ;;  %13958 = vmatmul.mubr.f32.gmra.mxu0 %v5840_v16  ;;  %14003 = vmatpush3.msra.mxu1 %v11316_v14  ;;  %v3418_v56 = vpop.f32.mrf.mxu1  ;;  %v11331_v14 = vld [vmem:[%s19248_s1 + $0x858] sm:$0xff] }
 0x240   : > { %v17059_v20 = vadd.f32 %v13479_v30, %v3554_v63  ;;  %v3553_v57 = vadd.f32 %v3418_v56, %v16764_v2  ;;  %14082 = vmatprep.subr.mxu0 %v11332_v17  ;;  %13880 = vmatprep.mubr.f32.mxu1 %v5471_v59  ;;  %v17066_v16 = vld [vmem:[#allocation2 + $0x171] sm:$0xff]  ;;  %v17072_v2 = vld [vmem:[#allocation2 + $0x181] sm:$0xff] }
 0x241   : > { %v3788_v11 = vpop.f32.mrf.mxu0  ;;  %14083 = vmatpush3.msra.mxu0 %v11332_v17  ;;  %v13402_v28 = vpop.f32.mrf.mxu1  ;;  %13881 = vmatmul.mubr.f32.gmra.mxu1 %v17054_v12  ;;  %v11314_v63 = vld [vmem:[%s19248_s1 + $0x7d0] sm:$0xff] }
 0x242   : > { %v17068_v33 = vadd.f32 %v3788_v11, %v3553_v57  ;;  %v3556_v25 = vadd.f32 %v13402_v28, %v16774_v23  ;;  %13960 = vmatprep.mubr.f32.mxu0 %v16750_v19  ;;  %14004 = vmatprep.subr.mxu1 %v11315_v47 }
 0x243   : > { %v13482_v59 = vpop.f32.mrf.mxu0  ;;  %13961 = vmatmul.mubr.f32.gmra.mxu0 %v16762_v49  ;;  %14005 = vmatpush3.msra.mxu1 %v11315_v47  ;;  %v3428_v17 = vpop.f32.mrf.mxu1  ;;  %v11330_v49 = vld [vmem:[%s19248_s1 + $0x850] sm:$0xff] }
 0x244   : > { %v17078_v30 = vadd.f32 %v13482_v59, %v3556_v25  ;;  %v3555_v56 = vadd.f32 %v3428_v17, %v16784_v15  ;;  %14084 = vmatprep.subr.mxu0 %v11331_v14  ;;  %13883 = vmatprep.mubr.f32.mxu1 %v17066_v16  ;;  %v17086_v47 = vld [vmem:[#allocation2 + $0x191] sm:$0xff]  ;;  %v17092_v15 = vld [vmem:[#allocation2 + $0x1a1] sm:$0xff] }
 0x245   : > { %v3798_v19 = vpop.f32.mrf.mxu0  ;;  %14085 = vmatpush3.msra.mxu0 %v11331_v14  ;;  %v13405_v23 = vpop.f32.mrf.mxu1  ;;  %13884 = vmatmul.mubr.f32.gmra.mxu1 %v17072_v2  ;;  %v11313_v25 = vld [vmem:[%s19248_s1 + $0x7c8] sm:$0xff] }
 0x246   : > { %v17088_v57 = vadd.f32 %v3798_v19, %v3555_v56  ;;  %v3558_v11 = vadd.f32 %v13405_v23, %v16794_v13  ;;  %13963 = vmatprep.mubr.f32.mxu0 %v16768_v35  ;;  %14006 = vmatprep.subr.mxu1 %v11314_v63 }
 0x247   : > { %v13485_v28 = vpop.f32.mrf.mxu0  ;;  %13964 = vmatmul.mubr.f32.gmra.mxu0 %v16782_v58  ;;  %14007 = vmatpush3.msra.mxu1 %v11314_v63  ;;  %v3438_v14 = vpop.f32.mrf.mxu1  ;;  %v11329_v58 = vld [vmem:[%s19248_s1 + $0x848] sm:$0xff]  ;;  %v17106_v63 = vld [vmem:[#allocation2 + $0x1b1] sm:$0xff] }
 0x248   : > { %v17098_v59 = vadd.f32 %v13485_v28, %v3558_v11  ;;  %v3557_v17 = vadd.f32 %v3438_v14, %v16804_v39  ;;  %14086 = vmatprep.subr.mxu0 %v11330_v49  ;;  %13886 = vmatprep.mubr.f32.mxu1 %v17086_v47  ;;  %v17112_v39 = vld [vmem:[#allocation2 + $0x1c1] sm:$0xff] }
 0x249   : > { %v3808_v35 = vpop.f32.mrf.mxu0  ;;  %14087 = vmatpush3.msra.mxu0 %v11330_v49  ;;  %v13408_v13 = vpop.f32.mrf.mxu1  ;;  %13887 = vmatmul.mubr.f32.gmra.mxu1 %v17092_v15  ;;  %v11312_v11 = vld [vmem:[%s19248_s1 + $0x7c0] sm:$0xff] }
 0x24a   : > { %v17108_v56 = vadd.f32 %v3808_v35, %v3557_v17  ;;  %v3560_v19 = vadd.f32 %v13408_v13, %v16814_v55  ;;  %13966 = vmatprep.mubr.f32.mxu0 %v16788_v0  ;;  %14008 = vmatprep.subr.mxu1 %v11313_v25  ;;  %v5848_v0 = vld [vmem:[#allocation2 + $0x1c2] sm:$0xff] }
 0x24b   : > { %v13488_v23 = vpop.f32.mrf.mxu0  ;;  %13967 = vmatmul.mubr.f32.gmra.mxu0 %v16802_v54  ;;  %14009 = vmatpush3.msra.mxu1 %v11313_v25  ;;  %v3448_v49 = vpop.f32.mrf.mxu1  ;;  %v11328_v54 = vld [vmem:[%s19248_s1 + $0x840] sm:$0xff]  ;;  %v5479_v25 = vld [vmem:[#allocation2 + $0x1f1] sm:$0xff] }
 0x24c   : > { %v17118_v28 = vadd.f32 %v13488_v23, %v3560_v19  ;;  %v3559_v14 = vadd.f32 %v3448_v49, %v16822_v27  ;;  %14088 = vmatprep.subr.mxu0 %v11329_v58  ;;  %13889 = vmatprep.mubr.f32.mxu1 %v17106_v63  ;;  %v17130_v27 = vld [vmem:[#allocation2 + $0x201] sm:$0xff]  ;;  %v11311_v23 = vld [vmem:[%s19248_s1 + $0x7b8] sm:$0xff] }
 0x24d   : > { %v3818_v55 = vpop.f32.mrf.mxu0  ;;  %14089 = vmatpush3.msra.mxu0 %v11329_v58  ;;  %v13411_v17 = vpop.f32.mrf.mxu1  ;;  %13890 = vmatmul.mubr.f32.gmra.mxu1 %v17112_v39 }
 0x24e   : > { %v17126_v35 = vadd.f32 %v3818_v55, %v3559_v14  ;;  %v3562_v13 = vadd.f32 %v13411_v17, %v16831_v61  ;;  %13969 = vmatprep.mubr.f32.mxu0 %v16808_v41  ;;  %14010 = vmatprep.subr.mxu1 %v11312_v11 }
 0x24f   : > { %v13491_v19 = vpop.f32.mrf.mxu0  ;;  %13970 = vmatmul.mubr.f32.gmra.mxu0 %v5848_v0  ;;  %14011 = vmatpush3.msra.mxu1 %v11312_v11  ;;  %v3458_v58 = vpop.f32.mrf.mxu1  ;;  %v11327_v11 = vld [vmem:[%s19248_s1 + $0x838] sm:$0xff] }
 0x250   : > { %v17135_v49 = vadd.f32 %v13491_v19, %v3562_v13  ;;  %v3561_v14 = vadd.f32 %v3458_v58, %v16840_v52  ;;  %14090 = vmatprep.subr.mxu0 %v11328_v54  ;;  %13892 = vmatprep.mubr.f32.mxu1 %v5479_v25  ;;  %v17142_v0 = vld [vmem:[#allocation2 + $0x211] sm:$0xff]  ;;  %v17148_v52 = vld [vmem:[#allocation2 + $0x221] sm:$0xff] }
 0x251   : > { %v3828_v61 = vpop.f32.mrf.mxu0  ;;  %14091 = vmatpush3.msra.mxu0 %v11328_v54  ;;  %v13414_v41 = vpop.f32.mrf.mxu1  ;;  %13893 = vmatmul.mubr.f32.gmra.mxu1 %v17130_v27  ;;  %v11310_v13 = vld [vmem:[%s19248_s1 + $0x7b0] sm:$0xff] }
 0x252   : > { %v17144_v55 = vadd.f32 %v3828_v61, %v3561_v14  ;;  %v3564_v17 = vadd.f32 %v13414_v41, %v16850_v53  ;;  %13972 = vmatprep.mubr.f32.mxu0 %v16826_v42  ;;  %14012 = vmatprep.subr.mxu1 %v11311_v23 }
 0x253   : > { %v13494_v25 = vpop.f32.mrf.mxu0  ;;  %13973 = vmatmul.mubr.f32.gmra.mxu0 %v16838_v32  ;;  %14013 = vmatpush3.msra.mxu1 %v11311_v23  ;;  %v3468_v54 = vpop.f32.mrf.mxu1  ;;  %v11326_v32 = vld [vmem:[%s19248_s1 + $0x830] sm:$0xff] }
 0x254   : > { %v17154_v19 = vadd.f32 %v13494_v25, %v3564_v17  ;;  %v3563_v58 = vadd.f32 %v3468_v54, %v16860_v60  ;;  %14092 = vmatprep.subr.mxu0 %v11327_v11  ;;  %13895 = vmatprep.mubr.f32.mxu1 %v17142_v0  ;;  %v17162_v23 = vld [vmem:[#allocation2 + $0x231] sm:$0xff]  ;;  %v17168_v60 = vld [vmem:[#allocation2 + $0x241] sm:$0xff] }
 0x255   : > { %v3838_v42 = vpop.f32.mrf.mxu0  ;;  %14093 = vmatpush3.msra.mxu0 %v11327_v11  ;;  %v13417_v53 = vpop.f32.mrf.mxu1  ;;  %13896 = vmatmul.mubr.f32.gmra.mxu1 %v17148_v52  ;;  %19417 = vst [vmem:[#allocation30_spill] sm:$0xff] %v17168_v60  ;;  %v11309_v17 = vld [vmem:[%s19248_s1 + $0x7a8] sm:$0xff] }
 0x256   : > { %v17164_v14 = vadd.f32 %v3838_v42, %v3563_v58  ;;  %v3566_v61 = vadd.f32 %v13417_v53, %v16870_v29  ;;  %13975 = vmatprep.mubr.f32.mxu0 %v16844_v5  ;;  %14014 = vmatprep.subr.mxu1 %v11310_v13 }
 0x257   : > { %v13497_v41 = vpop.f32.mrf.mxu0  ;;  %13976 = vmatmul.mubr.f32.gmra.mxu0 %v16858_v3  ;;  %14015 = vmatpush3.msra.mxu1 %v11310_v13  ;;  %v3478_v11 = vpop.f32.mrf.mxu1  ;;  %v11325_v3 = vld [vmem:[%s19248_s1 + $0x828] sm:$0xff]  ;;  %v17182_v13 = vld [vmem:[#allocation2 + $0x251] sm:$0xff] }
 0x258   : > { %v17174_v25 = vadd.f32 %v13497_v41, %v3566_v61  ;;  %v3565_v54 = vadd.f32 %v3478_v11, %v16880_v45  ;;  %14094 = vmatprep.subr.mxu0 %v11326_v32  ;;  %13898 = vmatprep.mubr.f32.mxu1 %v17162_v23  ;;  %19418 = vst [vmem:[#allocation7_spill] sm:$0xff] %v17182_v13  ;;  %v17188_v45 = vld [vmem:[#allocation2 + $0x261] sm:$0xff] }
 0x259   : > { %v3848_v5 = vpop.f32.mrf.mxu0  ;;  %14095 = vmatpush3.msra.mxu0 %v11326_v32  ;;  %v13420_v29 = vpop.f32.mrf.mxu1  ;;  %13899 = vmatmul.mubr.f32.gmra.mxu1 %v17168_v60  ;;  %19419 = vst [vmem:[#allocation8_spill] sm:$0xff] %v17188_v45  ;;  %v19420_v32 = vld [vmem:[#allocation20_spill] sm:$0xff]  ;;  %v11308_v41 = vld [vmem:[%s19248_s1 + $0x7a0] sm:$0xff]  ;;  %v19422_v60 = vld [vmem:[#allocation21_spill] sm:$0xff] }
 0x25a   : > { %v17184_v58 = vadd.f32 %v3848_v5, %v3565_v54  ;;  %v3568_v42 = vadd.f32 %v13420_v29, %v16890_v9  ;;  %13978 = vmatprep.mubr.f32.mxu0 %v16864_v43  ;;  %14016 = vmatprep.subr.mxu1 %v11309_v17  ;;  %v5856_v43 = vld [vmem:[#allocation2 + $0x262] sm:$0xff]  ;;  %v5487_v29 = vld [vmem:[#allocation2 + $0x291] sm:$0xff] }
 0x25b   : > { %v13500_v53 = vpop.f32.mrf.mxu0  ;;  %13979 = vmatmul.mubr.f32.gmra.mxu0 %v19420_v32  ;;  %14017 = vmatpush3.msra.mxu1 %v11309_v17  ;;  %v3488_v61 = vpop.f32.mrf.mxu1  ;;  %v11324_v17 = vld [vmem:[%s19248_s1 + $0x820] sm:$0xff] }
 0x25c   : > { %v17194_v11 = vadd.f32 %v13500_v53, %v3568_v42  ;;  %v3567_v54 = vadd.f32 %v3488_v61, %v16898_v24  ;;  %14096 = vmatprep.subr.mxu0 %v11325_v3  ;;  %13901 = vmatprep.mubr.f32.mxu1 %v17182_v13  ;;  %v19421_v42 = vld [vmem:[#allocation23_spill] sm:$0xff] }
 0x25d   : > { %v3858_v9 = vpop.f32.mrf.mxu0  ;;  %14097 = vmatpush3.msra.mxu0 %v11325_v3  ;;  %v13423_v5 = vpop.f32.mrf.mxu1  ;;  %13902 = vmatmul.mubr.f32.gmra.mxu1 %v17188_v45  ;;  %v17206_v24 = vld [vmem:[#allocation2 + $0x2a1] sm:$0xff]  ;;  %v11307_v45 = vld [vmem:[%s19248_s1 + $0x798] sm:$0xff] }
 0x25e   : > { %v17202_v32 = vadd.f32 %v3858_v9, %v3567_v54  ;;  %v3570_v53 = vadd.f32 %v13423_v5, %v19421_v42  ;;  %13981 = vmatprep.mubr.f32.mxu0 %v19422_v60  ;;  %14018 = vmatprep.subr.mxu1 %v11308_v41  ;;  %19423 = vst [vmem:[#allocation9_spill] sm:$0xff] %v17206_v24 }
 0x25f   : > { %v13503_v61 = vpop.f32.mrf.mxu0  ;;  %13982 = vmatmul.mubr.f32.gmra.mxu0 %v5856_v43  ;;  %14019 = vmatpush3.msra.mxu1 %v11308_v41  ;;  %v3498_v3 = vpop.f32.mrf.mxu1  ;;  %v11323_v41 = vld [vmem:[%s19248_s1 + $0x818] sm:$0xff] }
 0x260   : > { %v17211_v13 = vadd.f32 %v13503_v61, %v3570_v53  ;;  %v3569_v54 = vadd.f32 %v3498_v3, %v16916_v48  ;;  %14098 = vmatprep.subr.mxu0 %v11324_v17  ;;  %13904 = vmatprep.mubr.f32.mxu1 %v5487_v29  ;;  %v17218_v43 = vld [vmem:[#allocation2 + $0x2b1] sm:$0xff]  ;;  %v17224_v48 = vld [vmem:[#allocation2 + $0x2c1] sm:$0xff] }
 0x261   : > { %v3868_v9 = vpop.f32.mrf.mxu0  ;;  %14099 = vmatpush3.msra.mxu0 %v11324_v17  ;;  %v13426_v60 = vpop.f32.mrf.mxu1  ;;  %13905 = vmatmul.mubr.f32.gmra.mxu1 %v17206_v24  ;;  %19424 = vst [vmem:[#allocation10_spill] sm:$0xff] %v17218_v43  ;;  %v19425_v53 = vld [vmem:[#allocation22_spill] sm:$0xff]  ;;  %19426 = vst [vmem:[#allocation11_spill] sm:$0xff] %v17224_v48  ;;  %v19427_v17 = vld [vmem:[#allocation24_spill] sm:$0xff] }
 0x262   : > { %v17220_v5 = vadd.f32 %v3868_v9, %v3569_v54  ;;  %v3572_v42 = vadd.f32 %v13426_v60, %v16926_v8  ;;  %13984 = vmatprep.mubr.f32.mxu0 %v19425_v53  ;;  %14020 = vmatprep.subr.mxu1 %v11307_v45  ;;  %v11306_v3 = vld [vmem:[%s19248_s1 + $0x790] sm:$0xff] }
 0x263   : > { %v13506_v29 = vpop.f32.mrf.mxu0  ;;  %13985 = vmatmul.mubr.f32.gmra.mxu0 %v19427_v17  ;;  %14021 = vmatpush3.msra.mxu1 %v11307_v45  ;;  %v3508_v61 = vpop.f32.mrf.mxu1  ;;  %v11322_v45 = vld [vmem:[%s19248_s1 + $0x810] sm:$0xff] }
 0x264   : > { %v17230_v24 = vadd.f32 %v13506_v29, %v3572_v42  ;;  %v3571_v54 = vadd.f32 %v3508_v61, %v16936_v1  ;;  %14100 = vmatprep.subr.mxu0 %v11323_v41  ;;  %13907 = vmatprep.mubr.f32.mxu1 %v17218_v43  ;;  %v17238_v60 = vld [vmem:[#allocation2 + $0x2d1] sm:$0xff]  ;;  %v17244_v1 = vld [vmem:[#allocation2 + $0x2e1] sm:$0xff] }
 0x265   : > { %v3878_v8 = vpop.f32.mrf.mxu0  ;;  %14101 = vmatpush3.msra.mxu0 %v11323_v41  ;;  %v13429_v9 = vpop.f32.mrf.mxu1  ;;  %13908 = vmatmul.mubr.f32.gmra.mxu1 %v17224_v48  ;;  %19428 = vst [vmem:[#allocation15_spill] sm:$0xff] %v17238_v60  ;;  %v19429_v29 = vld [vmem:[#allocation25_spill] sm:$0xff]  ;;  %19430 = vst [vmem:[#allocation12_spill] sm:$0xff] %v17244_v1  ;;  %v19431_v41 = vld [vmem:[#allocation26_spill] sm:$0xff] }
 0x266   : > { %v17240_v53 = vadd.f32 %v3878_v8, %v3571_v54  ;;  %v3574_v42 = vadd.f32 %v13429_v9, %v16946_v38  ;;  %13987 = vmatprep.mubr.f32.mxu0 %v19429_v29  ;;  %14022 = vmatprep.subr.mxu1 %v11306_v3  ;;  %v11305_v48 = vld [vmem:[%s19248_s1 + $0x788] sm:$0xff]  ;;  %v17258_v9 = vld [vmem:[#allocation2 + $0x2f1] sm:$0xff] }
 0x267   : > { %v13509_v17 = vpop.f32.mrf.mxu0  ;;  %13988 = vmatmul.mubr.f32.gmra.mxu0 %v19431_v41  ;;  %14023 = vmatpush3.msra.mxu1 %v11306_v3  ;;  %v3518_v61 = vpop.f32.mrf.mxu1  ;;  %v11321_v3 = vld [vmem:[%s19248_s1 + $0x808] sm:$0xff]  ;;  %19432 = vst [vmem:[#allocation13_spill] sm:$0xff] %v17258_v9 }
 0x268   : > { %v17250_v43 = vadd.f32 %v13509_v17, %v3574_v42  ;;  %v3573_v54 = vadd.f32 %v3518_v61, %v16956_v26  ;;  %14102 = vmatprep.subr.mxu0 %v11322_v45  ;;  %13910 = vmatprep.mubr.f32.mxu1 %v17238_v60  ;;  %v19433_v17 = vld [vmem:[#allocation27_spill] sm:$0xff] }
 0x269   : > { %v3888_v38 = vpop.f32.mrf.mxu0  ;;  %14103 = vmatpush3.msra.mxu0 %v11322_v45  ;;  %v13432_v8 = vpop.f32.mrf.mxu1  ;;  %13911 = vmatmul.mubr.f32.gmra.mxu1 %v17244_v1  ;;  %v17264_v26 = vld [vmem:[#allocation2 + $0x301] sm:$0xff] }
 0x26a   : > { %v17260_v29 = vadd.f32 %v3888_v38, %v3573_v54  ;;  %v3576_v42 = vadd.f32 %v13432_v8, %v16966_v37  ;;  %13990 = vmatprep.mubr.f32.mxu0 %v19433_v17  ;;  %14024 = vmatprep.subr.mxu1 %v11305_v48  ;;  %19434 = vst [vmem:[#allocation14_spill] sm:$0xff] %v17264_v26  ;;  %v19435_v45 = vld [vmem:[#allocation28_spill] sm:$0xff]  ;;  %v11304_v1 = vld [vmem:[%s19248_s1 + $0x780] sm:$0xff] }
 0x26b   : > { %v13512_v41 = vpop.f32.mrf.mxu0  ;;  %13991 = vmatmul.mubr.f32.gmra.mxu0 %v19435_v45  ;;  %14025 = vmatpush3.msra.mxu1 %v11305_v48  ;;  %v3528_v61 = vpop.f32.mrf.mxu1  ;;  %v5864_v37 = vld [vmem:[#allocation2 + $0x302] sm:$0xff] }
 0x26c   : > { %v17270_v60 = vadd.f32 %v13512_v41, %v3576_v42  ;;  %v3575_v54 = vadd.f32 %v3528_v61, %v16974_v34  ;;  %14104 = vmatprep.subr.mxu0 %v11321_v3  ;;  %13913 = vmatprep.mubr.f32.mxu1 %v17258_v9  ;;  %v11320_v48 = vld [vmem:[%s19248_s1 + $0x800] sm:$0xff]  ;;  %v19437_v41 = vld [vmem:[#allocation29_spill] sm:$0xff] }
 0x26d   : > { %v3898_v38 = vpop.f32.mrf.mxu0  ;;  %14105 = vmatpush3.msra.mxu0 %v11321_v3  ;;  %v13435_v8 = vpop.f32.mrf.mxu1  ;;  %13914 = vmatmul.mubr.f32.gmra.mxu1 %v17264_v26  ;;  %v6204_v17 = vld [vmem:[#allocation2 + $0xc0] sm:$0xff]  ;;  %v6205_v34 = vld [vmem:[#allocation2 + $0xd0] sm:$0xff]  ;;  %v11351_v26 = vld [vmem:[%s19248_s1 + $0x8f8] sm:$0xff] }
 0x26e   : > { %19436 = vst [vmem:[#allocation16_spill] sm:$0xff] %v17270_v60  ;;  %v17278_v45 = vadd.f32 %v3898_v38, %v3575_v54  ;;  %v3578_v42 = vadd.f32 %v13435_v8, %v16983_v6  ;;  %13993 = vmatprep.mubr.f32.mxu0 %v19437_v41  ;;  %14026 = vmatprep.subr.mxu1 %v11304_v1 }
 0x26f   : > { %v13515_v61 = vpop.f32.mrf.mxu0  ;;  %13994 = vmatmul.mubr.f32.gmra.mxu0 %v5864_v37  ;;  %14027 = vmatpush3.msra.mxu1 %v11304_v1  ;;  %v3538_v3 = vpop.f32.mrf.mxu1  ;;  %v11367_v37 = vld [vmem:[%s19248_s1 + $0x978] sm:$0xff]  ;;  %v6206_v1 = vld [vmem:[#allocation2 + $0xe0] sm:$0xff] }
 0x270   : > { %v17285_v9 = vadd.f32 %v13515_v61, %v3578_v42  ;;  %v3577_v60 = vadd.f32 %v3538_v3, %v16992_v18  ;;  %14106 = vmatprep.subr.mxu0 %v11320_v48  ;;  %14028 = vmatprep.mubr.f32.mxu1 %v6204_v17  ;;  %v6207_v42 = vld [vmem:[#allocation2 + $0xf0] sm:$0xff] }
 0x271   : > { %v3908_v54 = vpop.f32.mrf.mxu0  ;;  %14107 = vmatpush3.msra.mxu0 %v11320_v48  ;;  %v13550_v6 = vpop.f32.mrf.mxu1  ;;  %14029 = vmatmul.mubr.f32.vlgmr.msra.gmra.mxu1 %v6205_v34  ;;  %v11350_v17 = vld [vmem:[%s19248_s1 + $0x8f0] sm:$0xff] }
 0x272   : > { %v17291_v38 = vadd.f32 %v3908_v54, %v3577_v60  ;;  %v4289_v8 = vadd.f32 %v13550_v6, %v17002_v21  ;;  %14108 = vmatprep.mubr.f32.mxu0 %v16978_v40  ;;  %14156 = vmatprep.subr.mxu1 %v11351_v26  ;;  %v6209_v3 = vld [vmem:[#allocation2 + $0x110] sm:$0xff]  ;;  %v11349_v6 = vld [vmem:[%s19248_s1 + $0x8e8] sm:$0xff] }
 0x273   : > { %v13630_v18 = vpop.f32.mrf.mxu0  ;;  %14109 = vmatmul.mubr.f32.vlgmr.msra.gmra.mxu0 %v16990_v51  ;;  %14157 = vmatpush3.msra.mxu1 %v11351_v26  ;;  %v4129_v48 = vpop.f32.mrf.mxu1  ;;  %v11366_v51 = vld [vmem:[%s19248_s1 + $0x970] sm:$0xff]  ;;  %v6208_v26 = vld [vmem:[#allocation2 + $0x100] sm:$0xff] }
 0x274   : > { %v17299_v41 = vadd.f32 %v13630_v18, %v4289_v8  ;;  %v4288_v60 = vadd.f32 %v4129_v48, %v17012_v4  ;;  %14236 = vmatprep.subr.mxu0 %v11367_v37  ;;  %14031 = vmatprep.mubr.f32.mxu1 %v6206_v1  ;;  %v6210_v8 = vld [vmem:[#allocation2 + $0x120] sm:$0xff]  ;;  %v6211_v48 = vld [vmem:[#allocation2 + $0x130] sm:$0xff] }
 0x275   : > { %v4499_v21 = vpop.f32.mrf.mxu0  ;;  %14237 = vmatpush3.msra.mxu0 %v11367_v37  ;;  %v13553_v40 = vpop.f32.mrf.mxu1  ;;  %14032 = vmatmul.mubr.f32.gmra.mxu1 %v6207_v42 }
 0x276   : > { %v17305_v34 = vadd.f32 %v4499_v21, %v4288_v60  ;;  %v4291_v61 = vadd.f32 %v13553_v40, %v17022_v22  ;;  %14111 = vmatprep.mubr.f32.mxu0 %v16996_v36  ;;  %14158 = vmatprep.subr.mxu1 %v11350_v17  ;;  %v11348_v60 = vld [vmem:[%s19248_s1 + $0x8e0] sm:$0xff] }
 0x277   : > { %v13633_v4 = vpop.f32.mrf.mxu0  ;;  %14112 = vmatmul.mubr.f32.gmra.mxu0 %v17010_v7  ;;  %14159 = vmatpush3.msra.mxu1 %v11350_v17  ;;  %v4139_v54 = vpop.f32.mrf.mxu1  ;;  %v11365_v7 = vld [vmem:[%s19248_s1 + $0x968] sm:$0xff] }
 0x278   : > { %v17313_v37 = vadd.f32 %v13633_v4, %v4291_v61  ;;  %v4290_v1 = vadd.f32 %v4139_v54, %v17032_v44  ;;  %14238 = vmatprep.subr.mxu0 %v11366_v51  ;;  %14034 = vmatprep.mubr.f32.mxu1 %v6208_v26  ;;  %v17333_v26 = vld [vmem:[#allocation2 + $0x160] sm:$0xff] }
 0x279   : > { %v4509_v22 = vpop.f32.mrf.mxu0  ;;  %14239 = vmatpush3.msra.mxu0 %v11366_v51  ;;  %v13556_v36 = vpop.f32.mrf.mxu1  ;;  %14035 = vmatmul.mubr.f32.gmra.mxu1 %v6209_v3 }
 0x27a   : > { %v17319_v42 = vadd.f32 %v4509_v22, %v4290_v1  ;;  %v4293_v18 = vadd.f32 %v13556_v36, %v17042_v31  ;;  %14114 = vmatprep.mubr.f32.mxu0 %v17016_v46  ;;  %14160 = vmatprep.subr.mxu1 %v11349_v6  ;;  %v6581_v31 = vld [vmem:[#allocation2 + $0x131] sm:$0xff] }
 0x27b   : > { %v13636_v44 = vpop.f32.mrf.mxu0  ;;  %14115 = vmatmul.mubr.f32.gmra.mxu0 %v17030_v62  ;;  %14161 = vmatpush3.msra.mxu1 %v11349_v6  ;;  %v4149_v17 = vpop.f32.mrf.mxu1  ;;  %v11364_v62 = vld [vmem:[%s19248_s1 + $0x960] sm:$0xff]  ;;  %v11347_v6 = vld [vmem:[%s19248_s1 + $0x8d8] sm:$0xff] }
 0x27c   : > { %v17327_v21 = vadd.f32 %v13636_v44, %v4293_v18  ;;  %v4292_v40 = vadd.f32 %v4149_v17, %v17050_v50  ;;  %14240 = vmatprep.subr.mxu0 %v11365_v7  ;;  %14037 = vmatprep.mubr.f32.mxu1 %v6210_v8  ;;  %v17339_v50 = vld [vmem:[#allocation2 + $0x170] sm:$0xff]  ;;  %v11363_v36 = vld [vmem:[%s19248_s1 + $0x958] sm:$0xff] }
 0x27d   : > { %v4519_v51 = vpop.f32.mrf.mxu0  ;;  %14241 = vmatpush3.msra.mxu0 %v11365_v7  ;;  %v13559_v46 = vpop.f32.mrf.mxu1  ;;  %14038 = vmatmul.mubr.f32.gmra.mxu1 %v6211_v48  ;;  %v17352_v7 = vld [vmem:[#allocation2 + $0x180] sm:$0xff]  ;;  %v11346_v17 = vld [vmem:[%s19248_s1 + $0x8d0] sm:$0xff] }
 0x27e   : > { %v17335_v61 = vadd.f32 %v4519_v51, %v4292_v40  ;;  %v4295_v3 = vadd.f32 %v13559_v46, %v17059_v20  ;;  %14117 = vmatprep.mubr.f32.mxu0 %v17036_v10  ;;  %14162 = vmatprep.subr.mxu1 %v11348_v60 }
 0x27f   : > { %v13639_v4 = vpop.f32.mrf.mxu0  ;;  %14118 = vmatmul.mubr.f32.gmra.mxu0 %v6581_v31  ;;  %14163 = vmatpush3.msra.mxu1 %v11348_v60  ;;  %v4159_v54 = vpop.f32.mrf.mxu1  ;;  %v17372_v31 = vld [vmem:[#allocation2 + $0x1a0] sm:$0xff] }
 0x280   : > { %v17344_v1 = vadd.f32 %v13639_v4, %v4295_v3  ;;  %v4294_v22 = vadd.f32 %v4159_v54, %v17068_v33  ;;  %14242 = vmatprep.subr.mxu0 %v11364_v62  ;;  %14040 = vmatprep.mubr.f32.mxu1 %v17333_v26  ;;  %v17358_v33 = vld [vmem:[#allocation2 + $0x190] sm:$0xff]  ;;  %v11345_v4 = vld [vmem:[%s19248_s1 + $0x8c8] sm:$0xff] }
 0x281   : > { %v4529_v20 = vpop.f32.mrf.mxu0  ;;  %14243 = vmatpush3.msra.mxu0 %v11364_v62  ;;  %v13562_v10 = vpop.f32.mrf.mxu1  ;;  %14041 = vmatmul.mubr.f32.gmra.mxu1 %v17339_v50 }
 0x282   : > { %v17354_v8 = vadd.f32 %v4529_v20, %v4294_v22  ;;  %v4297_v18 = vadd.f32 %v13562_v10, %v17078_v30  ;;  %14120 = vmatprep.mubr.f32.mxu0 %v17054_v12  ;;  %14164 = vmatprep.subr.mxu1 %v11347_v6  ;;  %v6218_v22 = vld [vmem:[#allocation2 + $0x1c0] sm:$0xff] }
 0x283   : > { %v13642_v48 = vpop.f32.mrf.mxu0  ;;  %14121 = vmatmul.mubr.f32.gmra.mxu0 %v17066_v16  ;;  %14165 = vmatpush3.msra.mxu1 %v11347_v6  ;;  %v4169_v44 = vpop.f32.mrf.mxu1  ;;  %v11362_v16 = vld [vmem:[%s19248_s1 + $0x950] sm:$0xff] }
 0x284   : > { %v17364_v60 = vadd.f32 %v13642_v48, %v4297_v18  ;;  %v4296_v40 = vadd.f32 %v4169_v44, %v17088_v57  ;;  %14244 = vmatprep.subr.mxu0 %v11363_v36  ;;  %14043 = vmatprep.mubr.f32.mxu1 %v17352_v7  ;;  %v17378_v57 = vld [vmem:[#allocation2 + $0x1b0] sm:$0xff]  ;;  %v11344_v48 = vld [vmem:[%s19248_s1 + $0x8c0] sm:$0xff] }
 0x285   : > { %v4539_v12 = vpop.f32.mrf.mxu0  ;;  %14245 = vmatpush3.msra.mxu0 %v11363_v36  ;;  %v13565_v30 = vpop.f32.mrf.mxu1  ;;  %14044 = vmatmul.mubr.f32.gmra.mxu1 %v17358_v33 }
 0x286   : > { %v17374_v51 = vadd.f32 %v4539_v12, %v4296_v40  ;;  %v4299_v46 = vadd.f32 %v13565_v30, %v17098_v59  ;;  %14123 = vmatprep.mubr.f32.mxu0 %v17072_v2  ;;  %14166 = vmatprep.subr.mxu1 %v11346_v17  ;;  %v17406_v12 = vld [vmem:[#allocation2 + $0x200] sm:$0xff] }
 0x287   : > { %v13645_v62 = vpop.f32.mrf.mxu0  ;;  %14124 = vmatmul.mubr.f32.gmra.mxu0 %v17086_v47  ;;  %14167 = vmatpush3.msra.mxu1 %v11346_v17  ;;  %v4179_v3 = vpop.f32.mrf.mxu1  ;;  %v11361_v47 = vld [vmem:[%s19248_s1 + $0x948] sm:$0xff] }
 0x288   : > { %v17384_v54 = vadd.f32 %v13645_v62, %v4299_v46  ;;  %v4298_v6 = vadd.f32 %v4179_v3, %v17108_v56  ;;  %14246 = vmatprep.subr.mxu0 %v11362_v16  ;;  %14046 = vmatprep.mubr.f32.mxu1 %v17372_v31  ;;  %v6219_v56 = vld [vmem:[#allocation2 + $0x1d0] sm:$0xff]  ;;  %v11343_v3 = vld [vmem:[%s19248_s1 + $0x8b8] sm:$0xff] }
 0x289   : > { %v4549_v2 = vpop.f32.mrf.mxu0  ;;  %14247 = vmatpush3.msra.mxu0 %v11362_v16  ;;  %v13568_v59 = vpop.f32.mrf.mxu1  ;;  %14047 = vmatmul.mubr.f32.gmra.mxu1 %v17378_v57 }
 0x28a   : > { %v17392_v20 = vadd.f32 %v4549_v2, %v4298_v6  ;;  %v4301_v10 = vadd.f32 %v13568_v59, %v17118_v28  ;;  %14126 = vmatprep.mubr.f32.mxu0 %v17092_v15  ;;  %14168 = vmatprep.subr.mxu1 %v11345_v4  ;;  %v6589_v28 = vld [vmem:[#allocation2 + $0x1d1] sm:$0xff]  ;;  %v17425_v59 = vld [vmem:[#allocation2 + $0x220] sm:$0xff] }
 0x28b   : > { %v13648_v36 = vpop.f32.mrf.mxu0  ;;  %14127 = vmatmul.mubr.f32.gmra.mxu0 %v17106_v63  ;;  %14169 = vmatpush3.msra.mxu1 %v11345_v4  ;;  %v4189_v18 = vpop.f32.mrf.mxu1  ;;  %v11360_v63 = vld [vmem:[%s19248_s1 + $0x940] sm:$0xff]  ;;  %v11359_v2 = vld [vmem:[%s19248_s1 + $0x938] sm:$0xff] }
 0x28c   : > { %v17400_v44 = vadd.f32 %v13648_v36, %v4301_v10  ;;  %v4300_v17 = vadd.f32 %v4189_v18, %v17126_v35  ;;  %14248 = vmatprep.subr.mxu0 %v11361_v47  ;;  %14049 = vmatprep.mubr.f32.mxu1 %v6218_v22  ;;  %v17412_v35 = vld [vmem:[#allocation2 + $0x210] sm:$0xff] }
 0x28d   : > { %v4559_v40 = vpop.f32.mrf.mxu0  ;;  %14249 = vmatpush3.msra.mxu0 %v11361_v47  ;;  %v13571_v15 = vpop.f32.mrf.mxu1  ;;  %14050 = vmatmul.mubr.f32.gmra.mxu1 %v6219_v56  ;;  %v11342_v36 = vld [vmem:[%s19248_s1 + $0x8b0] sm:$0xff] }
 0x28e   : > { %v17408_v30 = vadd.f32 %v4559_v40, %v4300_v17  ;;  %v4303_v16 = vadd.f32 %v13571_v15, %v17135_v49  ;;  %14129 = vmatprep.mubr.f32.mxu0 %v17112_v39  ;;  %14170 = vmatprep.subr.mxu1 %v11344_v48  ;;  %v17445_v17 = vld [vmem:[#allocation2 + $0x240] sm:$0xff] }
 0x28f   : > { %v13651_v46 = vpop.f32.mrf.mxu0  ;;  %14130 = vmatmul.mubr.f32.gmra.mxu0 %v6589_v28  ;;  %14171 = vmatpush3.msra.mxu1 %v11344_v48  ;;  %v4199_v62 = vpop.f32.mrf.mxu1 }
 0x290   : > { %v17417_v4 = vadd.f32 %v13651_v46, %v4303_v16  ;;  %v4302_v6 = vadd.f32 %v4199_v62, %v17144_v55  ;;  %14250 = vmatprep.subr.mxu0 %v11360_v63  ;;  %14052 = vmatprep.mubr.f32.mxu1 %v17406_v12  ;;  %v17431_v55 = vld [vmem:[#allocation2 + $0x230] sm:$0xff]  ;;  %v11341_v16 = vld [vmem:[%s19248_s1 + $0x8a8] sm:$0xff] }
 0x291   : > { %v4569_v49 = vpop.f32.mrf.mxu0  ;;  %14251 = vmatpush3.msra.mxu0 %v11360_v63  ;;  %v13574_v39 = vpop.f32.mrf.mxu1  ;;  %14053 = vmatmul.mubr.f32.gmra.mxu1 %v17412_v35 }
 0x292   : > { %v17427_v47 = vadd.f32 %v4569_v49, %v4302_v6  ;;  %v4305_v22 = vadd.f32 %v13574_v39, %v17154_v19  ;;  %14132 = vmatprep.mubr.f32.mxu0 %v17130_v27  ;;  %14172 = vmatprep.subr.mxu1 %v11343_v3  ;;  %v19438_v39 = vld [vmem:[#allocation30_spill] sm:$0xff] }
 0x293   : > { %v13654_v10 = vpop.f32.mrf.mxu0  ;;  %14133 = vmatmul.mubr.f32.gmra.mxu0 %v17142_v0  ;;  %14173 = vmatpush3.msra.mxu1 %v11343_v3  ;;  %v4209_v56 = vpop.f32.mrf.mxu1  ;;  %v11358_v0 = vld [vmem:[%s19248_s1 + $0x930] sm:$0xff]  ;;  %v6226_v3 = vld [vmem:[#allocation2 + $0x260] sm:$0xff] }
 0x294   : > { %v17437_v18 = vadd.f32 %v13654_v10, %v4305_v22  ;;  %v4304_v48 = vadd.f32 %v4209_v56, %v17164_v14  ;;  %14252 = vmatprep.subr.mxu0 %v11359_v2  ;;  %14055 = vmatprep.mubr.f32.mxu1 %v17425_v59  ;;  %v17451_v14 = vld [vmem:[#allocation2 + $0x250] sm:$0xff]  ;;  %v19439_v22 = vld [vmem:[#allocation7_spill] sm:$0xff] }
 0x295   : > { %v4579_v27 = vpop.f32.mrf.mxu0  ;;  %14253 = vmatpush3.msra.mxu0 %v11359_v2  ;;  %v13577_v19 = vpop.f32.mrf.mxu1  ;;  %14056 = vmatmul.mubr.f32.gmra.mxu1 %v17431_v55  ;;  %v11340_v56 = vld [vmem:[%s19248_s1 + $0x8a0] sm:$0xff] }
 0x296   : > { %v17447_v28 = vadd.f32 %v4579_v27, %v4304_v48  ;;  %v4307_v40 = vadd.f32 %v13577_v19, %v17174_v25  ;;  %14135 = vmatprep.mubr.f32.mxu0 %v17148_v52  ;;  %14174 = vmatprep.subr.mxu1 %v11342_v36 }
 0x297   : > { %v13657_v15 = vpop.f32.mrf.mxu0  ;;  %14136 = vmatmul.mubr.f32.gmra.mxu0 %v17162_v23  ;;  %14175 = vmatpush3.msra.mxu1 %v11342_v36  ;;  %v4219_v63 = vpop.f32.mrf.mxu1  ;;  %v11357_v23 = vld [vmem:[%s19248_s1 + $0x928] sm:$0xff] }
 0x298   : > { %v17457_v46 = vadd.f32 %v13657_v15, %v4307_v40  ;;  %v4306_v62 = vadd.f32 %v4219_v63, %v17184_v58  ;;  %14254 = vmatprep.subr.mxu0 %v11358_v0  ;;  %14058 = vmatprep.mubr.f32.mxu1 %v17445_v17  ;;  %v6227_v58 = vld [vmem:[#allocation2 + $0x270] sm:$0xff]  ;;  %v17479_v40 = vld [vmem:[#allocation2 + $0x2a0] sm:$0xff] }
 0x299   : > { %v4589_v52 = vpop.f32.mrf.mxu0  ;;  %14255 = vmatpush3.msra.mxu0 %v11358_v0  ;;  %v13580_v25 = vpop.f32.mrf.mxu1  ;;  %14059 = vmatmul.mubr.f32.gmra.mxu1 %v17451_v14  ;;  %v11356_v0 = vld [vmem:[%s19248_s1 + $0x920] sm:$0xff] }
 0x29a   : > { %v17465_v6 = vadd.f32 %v4589_v52, %v4306_v62  ;;  %v4309_v49 = vadd.f32 %v13580_v25, %v17194_v11  ;;  %14138 = vmatprep.mubr.f32.mxu0 %v19438_v39  ;;  %14176 = vmatprep.subr.mxu1 %v11341_v16  ;;  %v6597_v11 = vld [vmem:[#allocation2 + $0x271] sm:$0xff] }
 0x29b   : > { %v13660_v2 = vpop.f32.mrf.mxu0  ;;  %14139 = vmatmul.mubr.f32.gmra.mxu0 %v19439_v22  ;;  %14177 = vmatpush3.msra.mxu1 %v11341_v16  ;;  %v4229_v10 = vpop.f32.mrf.mxu1  ;;  %v19440_v16 = vld [vmem:[#allocation8_spill] sm:$0xff]  ;;  %v11339_v25 = vld [vmem:[%s19248_s1 + $0x898] sm:$0xff] }
 0x29c   : > { %v17473_v36 = vadd.f32 %v13660_v2, %v4309_v49  ;;  %v4308_v48 = vadd.f32 %v4229_v10, %v17202_v32  ;;  %14256 = vmatprep.subr.mxu0 %v11357_v23  ;;  %14061 = vmatprep.mubr.f32.mxu1 %v6226_v3  ;;  %v17485_v32 = vld [vmem:[#allocation2 + $0x2b0] sm:$0xff]  ;;  %v11355_v39 = vld [vmem:[%s19248_s1 + $0x918] sm:$0xff] }
 0x29d   : > { %v4599_v27 = vpop.f32.mrf.mxu0  ;;  %14257 = vmatpush3.msra.mxu0 %v11357_v23  ;;  %v13583_v19 = vpop.f32.mrf.mxu1  ;;  %14062 = vmatmul.mubr.f32.gmra.mxu1 %v6227_v58  ;;  %v17498_v58 = vld [vmem:[#allocation2 + $0x2c0] sm:$0xff]  ;;  %v19441_v10 = vld [vmem:[#allocation9_spill] sm:$0xff] }
 0x29e   : > { %v17481_v15 = vadd.f32 %v4599_v27, %v4308_v48  ;;  %v4311_v63 = vadd.f32 %v13583_v19, %v17211_v13  ;;  %14141 = vmatprep.mubr.f32.mxu0 %v19440_v16  ;;  %14178 = vmatprep.subr.mxu1 %v11340_v56  ;;  %v19442_v48 = vld [vmem:[#allocation10_spill] sm:$0xff]  ;;  %v11338_v27 = vld [vmem:[%s19248_s1 + $0x890] sm:$0xff] }
 0x29f   : > { %v13663_v62 = vpop.f32.mrf.mxu0  ;;  %14142 = vmatmul.mubr.f32.gmra.mxu0 %v6597_v11  ;;  %14179 = vmatpush3.msra.mxu1 %v11340_v56  ;;  %v4239_v52 = vpop.f32.mrf.mxu1  ;;  %v11354_v16 = vld [vmem:[%s19248_s1 + $0x910] sm:$0xff] }
 0x2a0   : > { %v17490_v23 = vadd.f32 %v13663_v62, %v4311_v63  ;;  %v4310_v3 = vadd.f32 %v4239_v52, %v17220_v5  ;;  %14258 = vmatprep.subr.mxu0 %v11356_v0  ;;  %14064 = vmatprep.mubr.f32.mxu1 %v17479_v40  ;;  %v17504_v5 = vld [vmem:[#allocation2 + $0x2d0] sm:$0xff]  ;;  %v17518_v62 = vld [vmem:[#allocation2 + $0x2e0] sm:$0xff] }
 0x2a1   : > { %v4609_v13 = vpop.f32.mrf.mxu0  ;;  %14259 = vmatpush3.msra.mxu0 %v11356_v0  ;;  %v13586_v49 = vpop.f32.mrf.mxu1  ;;  %14065 = vmatmul.mubr.f32.gmra.mxu1 %v17485_v32 }
 0x2a2   : > { %v17500_v2 = vadd.f32 %v4609_v13, %v4310_v3  ;;  %v4313_v22 = vadd.f32 %v13586_v49, %v17230_v24  ;;  %14144 = vmatprep.mubr.f32.mxu0 %v19441_v10  ;;  %14180 = vmatprep.subr.mxu1 %v11339_v25  ;;  %v19443_v3 = vld [vmem:[#allocation11_spill] sm:$0xff] }
 0x2a3   : > { %v13666_v56 = vpop.f32.mrf.mxu0  ;;  %14145 = vmatmul.mubr.f32.gmra.mxu0 %v19442_v48  ;;  %14181 = vmatpush3.msra.mxu1 %v11339_v25  ;;  %v4249_v11 = vpop.f32.mrf.mxu1  ;;  %v19444_v49 = vld [vmem:[#allocation15_spill] sm:$0xff] }
 0x2a4   : > { %v17510_v19 = vadd.f32 %v13666_v56, %v4313_v22  ;;  %v4312_v0 = vadd.f32 %v4249_v11, %v17240_v53  ;;  %14260 = vmatprep.subr.mxu0 %v11355_v39  ;;  %14067 = vmatprep.mubr.f32.mxu1 %v17498_v58  ;;  %v17524_v53 = vld [vmem:[#allocation2 + $0x2f0] sm:$0xff]  ;;  %v11337_v22 = vld [vmem:[%s19248_s1 + $0x888] sm:$0xff] }
 0x2a5   : > { %v4619_v24 = vpop.f32.mrf.mxu0  ;;  %14261 = vmatpush3.msra.mxu0 %v11355_v39  ;;  %v13589_v63 = vpop.f32.mrf.mxu1  ;;  %14068 = vmatmul.mubr.f32.gmra.mxu1 %v17504_v5  ;;  %v11353_v11 = vld [vmem:[%s19248_s1 + $0x908] sm:$0xff] }
 0x2a6   : > { %v17520_v52 = vadd.f32 %v4619_v24, %v4312_v0  ;;  %v4315_v25 = vadd.f32 %v13589_v63, %v17250_v43  ;;  %14147 = vmatprep.mubr.f32.mxu0 %v19443_v3  ;;  %14182 = vmatprep.subr.mxu1 %v11338_v27  ;;  %v19446_v24 = vld [vmem:[#allocation16_spill] sm:$0xff] }
 0x2a7   : > { %v13669_v13 = vpop.f32.mrf.mxu0  ;;  %14148 = vmatmul.mubr.f32.gmra.mxu0 %v19444_v49  ;;  %14183 = vmatpush3.msra.mxu1 %v11338_v27  ;;  %v4259_v39 = vpop.f32.mrf.mxu1  ;;  %v6234_v27 = vld [vmem:[#allocation2 + $0x300] sm:$0xff] }
 0x2a8   : > { %v17530_v10 = vadd.f32 %v13669_v13, %v4315_v25  ;;  %v4314_v56 = vadd.f32 %v4259_v39, %v17260_v29  ;;  %14262 = vmatprep.subr.mxu0 %v11354_v16  ;;  %14070 = vmatprep.mubr.f32.mxu1 %v17518_v62  ;;  %v19447_v25 = vld [vmem:[#allocation12_spill] sm:$0xff]  ;;  %v6235_v29 = vld [vmem:[#allocation2 + $0x310] sm:$0xff]  ;;  %v11336_v49 = vld [vmem:[%s19248_s1 + $0x880] sm:$0xff] }
 0x2a9   : > { %v4629_v43 = vpop.f32.mrf.mxu0  ;;  %14263 = vmatpush3.msra.mxu0 %v11354_v16  ;;  %v13592_v48 = vpop.f32.mrf.mxu1  ;;  %14071 = vmatmul.mubr.f32.gmra.mxu1 %v17524_v53  ;;  %v19448_v13 = vld [vmem:[#allocation13_spill] sm:$0xff] }
 0x2aa   : > { %v17538_v0 = vadd.f32 %v4629_v43, %v4314_v56  ;;  %v4317_v63 = vadd.f32 %v13592_v48, %v19446_v24  ;;  %14150 = vmatprep.mubr.f32.mxu0 %v19447_v25  ;;  %14184 = vmatprep.subr.mxu1 %v11337_v22  ;;  %v6605_v43 = vld [vmem:[#allocation2 + $0x311] sm:$0xff]  ;;  %v6944_v25 = vld [vmem:[#allocation2 + $0xc2] sm:$0xff] }
 0x2ab   : > { %v13672_v3 = vpop.f32.mrf.mxu0  ;;  %14151 = vmatmul.mubr.f32.gmra.mxu0 %v19448_v13  ;;  %14185 = vmatpush3.msra.mxu1 %v11337_v22  ;;  %v4269_v16 = vpop.f32.mrf.mxu1  ;;  %v11352_v22 = vld [vmem:[%s19248_s1 + $0x900] sm:$0xff] }
 0x2ac   : > { %19445 = vst [vmem:[#allocation17_spill] sm:$0xff] %v17538_v0  ;;  %v17546_v39 = vadd.f32 %v13672_v3, %v4317_v63  ;;  %v4316_v56 = vadd.f32 %v4269_v16, %v17278_v45  ;;  %14264 = vmatprep.subr.mxu0 %v11353_v11  ;;  %14073 = vmatprep.mubr.f32.mxu1 %v6234_v27  ;;  %v19450_v63 = vld [vmem:[#allocation14_spill] sm:$0xff] }
 0x2ad   : > { %v4639_v48 = vpop.f32.mrf.mxu0  ;;  %14265 = vmatpush3.msra.mxu0 %v11353_v11  ;;  %v13595_v24 = vpop.f32.mrf.mxu1  ;;  %14074 = vmatmul.mubr.f32.gmra.mxu1 %v6235_v29  ;;  %v6945_v45 = vld [vmem:[#allocation2 + $0xd2] sm:$0xff]  ;;  %v7315_v11 = vld [vmem:[#allocation2 + $0x140] sm:$0xff] }
 0x2ae   : > { %v17552_v13 = vadd.f32 %v4639_v48, %v4316_v56  ;;  %v4319_v0 = vadd.f32 %v13595_v24, %v17285_v9  ;;  %14153 = vmatprep.mubr.f32.mxu0 %v19450_v63  ;;  %14186 = vmatprep.subr.mxu1 %v11336_v49  ;;  %v11383_v29 = vld [vmem:[%s19248_s1 + $0x9f8] sm:$0xff]  ;;  %v7316_v9 = vld [vmem:[#allocation2 + $0x150] sm:$0xff] }
 0x2af   : > { %v13675_v3 = vpop.f32.mrf.mxu0  ;;  %14154 = vmatmul.mubr.f32.gmra.mxu0 %v6605_v43  ;;  %14187 = vmatpush3.msra.mxu1 %v11336_v49  ;;  %v4279_v27 = vpop.f32.mrf.mxu1  ;;  %v11399_v49 = vld [vmem:[%s19248_s1 + $0xa78] sm:$0xff]  ;;  %v6946_v43 = vld [vmem:[#allocation2 + $0xe2] sm:$0xff] }
 0x2b0   : > { %19449 = vst [vmem:[#allocation18_spill] sm:$0xff] %v17552_v13  ;;  %v17559_v16 = vadd.f32 %v13675_v3, %v4319_v0  ;;  %v4318_v56 = vadd.f32 %v4279_v27, %v17291_v38  ;;  %14266 = vmatprep.subr.mxu0 %v11352_v22  ;;  %14188 = vmatprep.mubr.f32.mxu1 %v6944_v25  ;;  %v6947_v0 = vld [vmem:[#allocation2 + $0xf2] sm:$0xff] }
 0x2b1   : > { %v4649_v48 = vpop.f32.mrf.mxu0  ;;  %14267 = vmatpush3.msra.mxu0 %v11352_v22  ;;  %v13710_v24 = vpop.f32.mrf.mxu1  ;;  %14189 = vmatmul.mubr.f32.vlgmr.msra.gmra.mxu1 %v6945_v45  ;;  %v11382_v22 = vld [vmem:[%s19248_s1 + $0x9f0] sm:$0xff] }
 0x2b2   : > { %v17565_v63 = vadd.f32 %v4649_v48, %v4318_v56  ;;  %v5029_v13 = vadd.f32 %v13710_v24, %v17299_v41  ;;  %14268 = vmatprep.mubr.f32.mxu0 %v7315_v11  ;;  %14316 = vmatprep.subr.mxu1 %v11383_v29  ;;  %v11398_v11 = vld [vmem:[%s19248_s1 + $0xa70] sm:$0xff]  ;;  %v11381_v24 = vld [vmem:[%s19248_s1 + $0x9e8] sm:$0xff] }
 0x2b3   : > { %v13790_v38 = vpop.f32.mrf.mxu0  ;;  %14269 = vmatmul.mubr.f32.vlgmr.msra.gmra.mxu0 %v7316_v9  ;;  %14317 = vmatpush3.msra.mxu1 %v11383_v29  ;;  %v4869_v25 = vpop.f32.mrf.mxu1  ;;  %v6948_v29 = vld [vmem:[#allocation2 + $0x102] sm:$0xff] }
 0x2b4   : > { %v17571_v45 = vadd.f32 %v13790_v38, %v5029_v13  ;;  %v5028_v3 = vadd.f32 %v4869_v25, %v17305_v34  ;;  %14396 = vmatprep.subr.mxu0 %v11399_v49  ;;  %14191 = vmatprep.mubr.f32.mxu1 %v6946_v43  ;;  %v6949_v13 = vld [vmem:[#allocation2 + $0x112] sm:$0xff] }
 0x2b5   : > { %v5240_v27 = vpop.f32.mrf.mxu0  ;;  %14397 = vmatpush3.msra.mxu0 %v11399_v49  ;;  %v13713_v41 = vpop.f32.mrf.mxu1  ;;  %14192 = vmatmul.mubr.f32.gmra.mxu1 %v6947_v0  ;;  %v6950_v0 = vld [vmem:[#allocation2 + $0x122] sm:$0xff] }
 0x2b6   : > { %v17577_v56 = vadd.f32 %v5240_v27, %v5028_v3  ;;  %v5031_v9 = vadd.f32 %v13713_v41, %v17313_v37  ;;  %14271 = vmatprep.mubr.f32.mxu0 %v17333_v26  ;;  %14318 = vmatprep.subr.mxu1 %v11382_v22  ;;  %v11380_v27 = vld [vmem:[%s19248_s1 + $0x9e0] sm:$0xff] }
 0x2b7   : > { %v13793_v34 = vpop.f32.mrf.mxu0  ;;  %14272 = vmatmul.mubr.f32.gmra.mxu0 %v17339_v50  ;;  %14319 = vmatpush3.msra.mxu1 %v11382_v22  ;;  %v4879_v48 = vpop.f32.mrf.mxu1  ;;  %v11397_v50 = vld [vmem:[%s19248_s1 + $0xa68] sm:$0xff]  ;;  %v6951_v22 = vld [vmem:[#allocation2 + $0x132] sm:$0xff] }
 0x2b8   : > { %v17585_v49 = vadd.f32 %v13793_v34, %v5031_v9  ;;  %v5030_v43 = vadd.f32 %v4879_v48, %v17319_v42  ;;  %14398 = vmatprep.subr.mxu0 %v11398_v11  ;;  %14194 = vmatprep.mubr.f32.mxu1 %v6948_v29  ;;  %v17605_v29 = vld [vmem:[#allocation2 + $0x162] sm:$0xff] }
 0x2b9   : > { %v5250_v37 = vpop.f32.mrf.mxu0  ;;  %14399 = vmatpush3.msra.mxu0 %v11398_v11  ;;  %v13716_v26 = vpop.f32.mrf.mxu1  ;;  %14195 = vmatmul.mubr.f32.gmra.mxu1 %v6949_v13 }
 0x2ba   : > { %v17591_v38 = vadd.f32 %v5250_v37, %v5030_v43  ;;  %v5033_v25 = vadd.f32 %v13716_v26, %v17327_v21  ;;  %14274 = vmatprep.mubr.f32.mxu0 %v17352_v7  ;;  %14320 = vmatprep.subr.mxu1 %v11381_v24  ;;  %v11379_v43 = vld [vmem:[%s19248_s1 + $0x9d8] sm:$0xff] }
 0x2bb   : > { %v13796_v42 = vpop.f32.mrf.mxu0  ;;  %14275 = vmatmul.mubr.f32.gmra.mxu0 %v17358_v33  ;;  %14321 = vmatpush3.msra.mxu1 %v11381_v24  ;;  %v4889_v3 = vpop.f32.mrf.mxu1  ;;  %v11396_v33 = vld [vmem:[%s19248_s1 + $0xa60] sm:$0xff] }
 0x2bc   : > { %v17599_v41 = vadd.f32 %v13796_v42, %v5033_v25  ;;  %v5032_v11 = vadd.f32 %v4889_v3, %v17335_v61  ;;  %14400 = vmatprep.subr.mxu0 %v11397_v50  ;;  %14197 = vmatprep.mubr.f32.mxu1 %v6950_v0  ;;  %v17611_v61 = vld [vmem:[#allocation2 + $0x172] sm:$0xff]  ;;  %v7323_v24 = vld [vmem:[#allocation2 + $0x1e0] sm:$0xff] }
 0x2bd   : > { %v5260_v21 = vpop.f32.mrf.mxu0  ;;  %14401 = vmatpush3.msra.mxu0 %v11397_v50  ;;  %v13719_v7 = vpop.f32.mrf.mxu1  ;;  %14198 = vmatmul.mubr.f32.gmra.mxu1 %v6951_v22  ;;  %v17625_v0 = vld [vmem:[#allocation2 + $0x182] sm:$0xff] }
 0x2be   : > { %v17607_v9 = vadd.f32 %v5260_v21, %v5032_v11  ;;  %v5035_v13 = vadd.f32 %v13719_v7, %v17344_v1  ;;  %14277 = vmatprep.mubr.f32.mxu0 %v17372_v31  ;;  %14322 = vmatprep.subr.mxu1 %v11380_v27  ;;  %v7324_v1 = vld [vmem:[#allocation2 + $0x1f0] sm:$0xff] }
 0x2bf   : > { %v13799_v34 = vpop.f32.mrf.mxu0  ;;  %14278 = vmatmul.mubr.f32.gmra.mxu0 %v17378_v57  ;;  %14323 = vmatpush3.msra.mxu1 %v11380_v27  ;;  %v4899_v48 = vpop.f32.mrf.mxu1  ;;  %v11395_v57 = vld [vmem:[%s19248_s1 + $0xa58] sm:$0xff]  ;;  %v11378_v27 = vld [vmem:[%s19248_s1 + $0x9d0] sm:$0xff] }
 0x2c0   : > { %v17617_v37 = vadd.f32 %v13799_v34, %v5035_v13  ;;  %v5034_v26 = vadd.f32 %v4899_v48, %v17354_v8  ;;  %14402 = vmatprep.subr.mxu0 %v11396_v33  ;;  %14200 = vmatprep.mubr.f32.mxu1 %v17605_v29  ;;  %v17630_v8 = vld [vmem:[#allocation2 + $0x192] sm:$0xff]  ;;  %v17643_v13 = vld [vmem:[#allocation2 + $0x1a2] sm:$0xff] }
 0x2c1   : > { %v5270_v31 = vpop.f32.mrf.mxu0  ;;  %14403 = vmatpush3.msra.mxu0 %v11396_v33  ;;  %v13722_v50 = vpop.f32.mrf.mxu1  ;;  %14201 = vmatmul.mubr.f32.gmra.mxu1 %v17611_v61  ;;  %v11394_v33 = vld [vmem:[%s19248_s1 + $0xa50] sm:$0xff] }
 0x2c2   : > { %v17627_v25 = vadd.f32 %v5270_v31, %v5034_v26  ;;  %v5037_v22 = vadd.f32 %v13722_v50, %v17364_v60  ;;  %14280 = vmatprep.mubr.f32.mxu0 %v7323_v24  ;;  %14324 = vmatprep.subr.mxu1 %v11379_v43  ;;  %v11377_v26 = vld [vmem:[%s19248_s1 + $0x9c8] sm:$0xff] }
 0x2c3   : > { %v13802_v42 = vpop.f32.mrf.mxu0  ;;  %14281 = vmatmul.mubr.f32.gmra.mxu0 %v7324_v1  ;;  %14325 = vmatpush3.msra.mxu1 %v11379_v43  ;;  %v4909_v3 = vpop.f32.mrf.mxu1  ;;  %v6958_v50 = vld [vmem:[#allocation2 + $0x1c2] sm:$0xff] }
 0x2c4   : > { %v17635_v11 = vadd.f32 %v13802_v42, %v5037_v22  ;;  %v5036_v21 = vadd.f32 %v4909_v3, %v17374_v51  ;;  %14404 = vmatprep.subr.mxu0 %v11395_v57  ;;  %14203 = vmatprep.mubr.f32.mxu1 %v17625_v0  ;;  %v17649_v51 = vld [vmem:[#allocation2 + $0x1b2] sm:$0xff] }
 0x2c5   : > { %v5280_v60 = vpop.f32.mrf.mxu0  ;;  %14405 = vmatpush3.msra.mxu0 %v11395_v57  ;;  %v13725_v7 = vpop.f32.mrf.mxu1  ;;  %14204 = vmatmul.mubr.f32.gmra.mxu1 %v17630_v8 }
 0x2c6   : > { %v17645_v34 = vadd.f32 %v5280_v60, %v5036_v21  ;;  %v5039_v48 = vadd.f32 %v13725_v7, %v17384_v54  ;;  %14283 = vmatprep.mubr.f32.mxu0 %v17406_v12  ;;  %14326 = vmatprep.subr.mxu1 %v11378_v27  ;;  %v17677_v7 = vld [vmem:[#allocation2 + $0x202] sm:$0xff] }
 0x2c7   : > { %v13805_v24 = vpop.f32.mrf.mxu0  ;;  %14284 = vmatmul.mubr.f32.gmra.mxu0 %v17412_v35  ;;  %14327 = vmatpush3.msra.mxu1 %v11378_v27  ;;  %v4919_v43 = vpop.f32.mrf.mxu1  ;;  %v11393_v35 = vld [vmem:[%s19248_s1 + $0xa48] sm:$0xff]  ;;  %v11376_v27 = vld [vmem:[%s19248_s1 + $0x9c0] sm:$0xff] }
 0x2c8   : > { %v17655_v1 = vadd.f32 %v13805_v24, %v5039_v48  ;;  %v5038_v31 = vadd.f32 %v4919_v43, %v17392_v20  ;;  %14406 = vmatprep.subr.mxu0 %v11394_v33  ;;  %14206 = vmatprep.mubr.f32.mxu1 %v17643_v13  ;;  %v6959_v20 = vld [vmem:[#allocation2 + $0x1d2] sm:$0xff] }
 0x2c9   : > { %v5290_v54 = vpop.f32.mrf.mxu0  ;;  %14407 = vmatpush3.msra.mxu0 %v11394_v33  ;;  %v13728_v12 = vpop.f32.mrf.mxu1  ;;  %14207 = vmatmul.mubr.f32.gmra.mxu1 %v17649_v51 }
 0x2ca   : > { %v17663_v57 = vadd.f32 %v5290_v54, %v5038_v31  ;;  %v5041_v22 = vadd.f32 %v13728_v12, %v17400_v44  ;;  %14286 = vmatprep.mubr.f32.mxu0 %v17425_v59  ;;  %14328 = vmatprep.subr.mxu1 %v11377_v26  ;;  %v11375_v31 = vld [vmem:[%s19248_s1 + $0x9b8] sm:$0xff] }
 0x2cb   : > { %v13808_v42 = vpop.f32.mrf.mxu0  ;;  %14287 = vmatmul.mubr.f32.gmra.mxu0 %v17431_v55  ;;  %14329 = vmatpush3.msra.mxu1 %v11377_v26  ;;  %v4929_v3 = vpop.f32.mrf.mxu1  ;;  %v11392_v55 = vld [vmem:[%s19248_s1 + $0xa40] sm:$0xff] }
 0x2cc   : > { %v17671_v21 = vadd.f32 %v13808_v42, %v5041_v22  ;;  %v5040_v60 = vadd.f32 %v4929_v3, %v17408_v30  ;;  %14408 = vmatprep.subr.mxu0 %v11393_v35  ;;  %14209 = vmatprep.mubr.f32.mxu1 %v6958_v50  ;;  %v17683_v30 = vld [vmem:[#allocation2 + $0x212] sm:$0xff]  ;;  %v7331_v26 = vld [vmem:[#allocation2 + $0x280] sm:$0xff] }
 0x2cd   : > { %v5300_v44 = vpop.f32.mrf.mxu0  ;;  %14409 = vmatpush3.msra.mxu0 %v11393_v35  ;;  %v13731_v59 = vpop.f32.mrf.mxu1  ;;  %14210 = vmatmul.mubr.f32.gmra.mxu1 %v6959_v20  ;;  %v17697_v50 = vld [vmem:[#allocation2 + $0x222] sm:$0xff] }
 0x2ce   : > { %v17679_v33 = vadd.f32 %v5300_v44, %v5040_v60  ;;  %v5043_v48 = vadd.f32 %v13731_v59, %v17417_v4  ;;  %14289 = vmatprep.mubr.f32.mxu0 %v17445_v17  ;;  %14330 = vmatprep.subr.mxu1 %v11376_v27  ;;  %v7332_v4 = vld [vmem:[#allocation2 + $0x290] sm:$0xff] }
 0x2cf   : > { %v13811_v24 = vpop.f32.mrf.mxu0  ;;  %14290 = vmatmul.mubr.f32.gmra.mxu0 %v17451_v14  ;;  %14331 = vmatpush3.msra.mxu1 %v11376_v27  ;;  %v4939_v43 = vpop.f32.mrf.mxu1  ;;  %v11391_v14 = vld [vmem:[%s19248_s1 + $0xa38] sm:$0xff]  ;;  %v11374_v27 = vld [vmem:[%s19248_s1 + $0x9b0] sm:$0xff] }
 0x2d0   : > { %v17689_v54 = vadd.f32 %v13811_v24, %v5043_v48  ;;  %v5042_v12 = vadd.f32 %v4939_v43, %v17427_v47  ;;  %14410 = vmatprep.subr.mxu0 %v11392_v55  ;;  %14212 = vmatprep.mubr.f32.mxu1 %v17677_v7  ;;  %v17702_v47 = vld [vmem:[#allocation2 + $0x232] sm:$0xff]  ;;  %v17715_v48 = vld [vmem:[#allocation2 + $0x242] sm:$0xff] }
 0x2d1   : > { %v5310_v17 = vpop.f32.mrf.mxu0  ;;  %14411 = vmatpush3.msra.mxu0 %v11392_v55  ;;  %v13734_v35 = vpop.f32.mrf.mxu1  ;;  %14213 = vmatmul.mubr.f32.gmra.mxu1 %v17683_v30  ;;  %v11390_v55 = vld [vmem:[%s19248_s1 + $0xa30] sm:$0xff] }
 0x2d2   : > { %v17699_v22 = vadd.f32 %v5310_v17, %v5042_v12  ;;  %v5045_v20 = vadd.f32 %v13734_v35, %v17437_v18  ;;  %14292 = vmatprep.mubr.f32.mxu0 %v7331_v26  ;;  %14332 = vmatprep.subr.mxu1 %v11375_v31  ;;  %v11373_v12 = vld [vmem:[%s19248_s1 + $0x9a8] sm:$0xff] }
 0x2d3   : > { %v13814_v42 = vpop.f32.mrf.mxu0  ;;  %14293 = vmatmul.mubr.f32.gmra.mxu0 %v7332_v4  ;;  %14333 = vmatpush3.msra.mxu1 %v11375_v31  ;;  %v4949_v3 = vpop.f32.mrf.mxu1  ;;  %v6966_v35 = vld [vmem:[#allocation2 + $0x262] sm:$0xff] }
 0x2d4   : > { %v17707_v60 = vadd.f32 %v13814_v42, %v5045_v20  ;;  %v5044_v44 = vadd.f32 %v4949_v3, %v17447_v28  ;;  %14412 = vmatprep.subr.mxu0 %v11391_v14  ;;  %14215 = vmatprep.mubr.f32.mxu1 %v17697_v50  ;;  %v17721_v28 = vld [vmem:[#allocation2 + $0x252] sm:$0xff] }
 0x2d5   : > { %v5320_v18 = vpop.f32.mrf.mxu0  ;;  %14413 = vmatpush3.msra.mxu0 %v11391_v14  ;;  %v13737_v59 = vpop.f32.mrf.mxu1  ;;  %14216 = vmatmul.mubr.f32.gmra.mxu1 %v17702_v47 }
 0x2d6   : > { %v17717_v24 = vadd.f32 %v5320_v18, %v5044_v44  ;;  %v5047_v43 = vadd.f32 %v13737_v59, %v17457_v46  ;;  %14295 = vmatprep.mubr.f32.mxu0 %v17479_v40  ;;  %14334 = vmatprep.subr.mxu1 %v11374_v27  ;;  %v17749_v59 = vld [vmem:[#allocation2 + $0x2a2] sm:$0xff] }
 0x2d7   : > { %v13817_v26 = vpop.f32.mrf.mxu0  ;;  %14296 = vmatmul.mubr.f32.gmra.mxu0 %v17485_v32  ;;  %14335 = vmatpush3.msra.mxu1 %v11374_v27  ;;  %v4959_v31 = vpop.f32.mrf.mxu1  ;;  %v11389_v32 = vld [vmem:[%s19248_s1 + $0xa28] sm:$0xff]  ;;  %v11372_v27 = vld [vmem:[%s19248_s1 + $0x9a0] sm:$0xff] }
 0x2d8   : > { %v17727_v4 = vadd.f32 %v13817_v26, %v5047_v43  ;;  %v5046_v17 = vadd.f32 %v4959_v31, %v17465_v6  ;;  %14414 = vmatprep.subr.mxu0 %v11390_v55  ;;  %14218 = vmatprep.mubr.f32.mxu1 %v17715_v48  ;;  %v6967_v6 = vld [vmem:[#allocation2 + $0x272] sm:$0xff] }
 0x2d9   : > { %v5330_v46 = vpop.f32.mrf.mxu0  ;;  %14415 = vmatpush3.msra.mxu0 %v11390_v55  ;;  %v13740_v40 = vpop.f32.mrf.mxu1  ;;  %14219 = vmatmul.mubr.f32.gmra.mxu1 %v17721_v28 }
 0x2da   : > { %v17735_v14 = vadd.f32 %v5330_v46, %v5046_v17  ;;  %v5049_v20 = vadd.f32 %v13740_v40, %v17473_v36  ;;  %14298 = vmatprep.mubr.f32.mxu0 %v17498_v58  ;;  %14336 = vmatprep.subr.mxu1 %v11373_v12  ;;  %v11371_v17 = vld [vmem:[%s19248_s1 + $0x998] sm:$0xff] }
 0x2db   : > { %v13820_v42 = vpop.f32.mrf.mxu0  ;;  %14299 = vmatmul.mubr.f32.gmra.mxu0 %v17504_v5  ;;  %14337 = vmatpush3.msra.mxu1 %v11373_v12  ;;  %v4969_v3 = vpop.f32.mrf.mxu1  ;;  %v11388_v5 = vld [vmem:[%s19248_s1 + $0xa20] sm:$0xff] }
 0x2dc   : > { %v17743_v44 = vadd.f32 %v13820_v42, %v5049_v20  ;;  %v5048_v18 = vadd.f32 %v4969_v3, %v17481_v15  ;;  %14416 = vmatprep.subr.mxu0 %v11389_v32  ;;  %14221 = vmatprep.mubr.f32.mxu1 %v6966_v35  ;;  %v17755_v15 = vld [vmem:[#allocation2 + $0x2b2] sm:$0xff]  ;;  %v7339_v12 = vld [vmem:[#allocation2 + $0x320] sm:$0xff] }
 0x2dd   : > { %v5340_v36 = vpop.f32.mrf.mxu0  ;;  %14417 = vmatpush3.msra.mxu0 %v11389_v32  ;;  %v13743_v58 = vpop.f32.mrf.mxu1  ;;  %14222 = vmatmul.mubr.f32.gmra.mxu1 %v6967_v6  ;;  %v17769_v35 = vld [vmem:[#allocation2 + $0x2c2] sm:$0xff] }
 0x2de   : > { %v17751_v55 = vadd.f32 %v5340_v36, %v5048_v18  ;;  %v5051_v43 = vadd.f32 %v13743_v58, %v17490_v23  ;;  %14301 = vmatprep.mubr.f32.mxu0 %v17518_v62  ;;  %14338 = vmatprep.subr.mxu1 %v11372_v27  ;;  %v7340_v23 = vld [vmem:[#allocation2 + $0x330] sm:$0xff] }
 0x2df   : > { %v13823_v26 = vpop.f32.mrf.mxu0  ;;  %14302 = vmatmul.mubr.f32.gmra.mxu0 %v17524_v53  ;;  %14339 = vmatpush3.msra.mxu1 %v11372_v27  ;;  %v4979_v31 = vpop.f32.mrf.mxu1  ;;  %v11387_v53 = vld [vmem:[%s19248_s1 + $0xa18] sm:$0xff]  ;;  %v7341_v27 = vld [vmem:[#allocation2 + $0x340] sm:$0xff]  ;;  %v11370_v18 = vld [vmem:[%s19248_s1 + $0x990] sm:$0xff] }
 0x2e0   : > { %v17761_v46 = vadd.f32 %v13823_v26, %v5051_v43  ;;  %v5050_v40 = vadd.f32 %v4979_v31, %v17500_v2  ;;  %14418 = vmatprep.subr.mxu0 %v11388_v5  ;;  %14224 = vmatprep.mubr.f32.mxu1 %v17749_v59  ;;  %v17774_v2 = vld [vmem:[#allocation2 + $0x2d2] sm:$0xff]  ;;  %v17787_v31 = vld [vmem:[#allocation2 + $0x2e2] sm:$0xff] }
 0x2e1   : > { %v5350_v62 = vpop.f32.mrf.mxu0  ;;  %14419 = vmatpush3.msra.mxu0 %v11388_v5  ;;  %v13746_v32 = vpop.f32.mrf.mxu1  ;;  %14225 = vmatmul.mubr.f32.gmra.mxu1 %v17755_v15  ;;  %v11386_v26 = vld [vmem:[%s19248_s1 + $0xa10] sm:$0xff] }
 0x2e2   : > { %v17771_v20 = vadd.f32 %v5350_v62, %v5050_v40  ;;  %v5053_v6 = vadd.f32 %v13746_v32, %v17510_v19  ;;  %14304 = vmatprep.mubr.f32.mxu0 %v7339_v12  ;;  %14340 = vmatprep.subr.mxu1 %v11371_v17  ;;  %v7342_v19 = vld [vmem:[#allocation2 + $0x350] sm:$0xff]  ;;  %v7343_v62 = vld [vmem:[#allocation2 + $0x360] sm:$0xff]  ;;  %v11369_v32 = vld [vmem:[%s19248_s1 + $0x988] sm:$0xff] }
 0x2e3   : > { %v13826_v42 = vpop.f32.mrf.mxu0  ;;  %14305 = vmatmul.mubr.f32.gmra.mxu0 %v7340_v23  ;;  %14341 = vmatpush3.msra.mxu1 %v11371_v17  ;;  %v4989_v3 = vpop.f32.mrf.mxu1 }
 0x2e4   : > { %v17779_v36 = vadd.f32 %v13826_v42, %v5053_v6  ;;  %v5052_v58 = vadd.f32 %v4989_v3, %v17520_v52  ;;  %14420 = vmatprep.subr.mxu0 %v11387_v53  ;;  %14227 = vmatprep.mubr.f32.mxu1 %v17769_v35  ;;  %v17792_v52 = vld [vmem:[#allocation2 + $0x2f2] sm:$0xff] }
 0x2e5   : > { %v5360_v5 = vpop.f32.mrf.mxu0  ;;  %14421 = vmatpush3.msra.mxu0 %v11387_v53  ;;  %v13749_v43 = vpop.f32.mrf.mxu1  ;;  %14228 = vmatmul.mubr.f32.gmra.mxu1 %v17774_v2  ;;  %v19453_v6 = vld [vmem:[#allocation17_spill] sm:$0xff] }
 0x2e6   : > { %v17789_v12 = vadd.f32 %v5360_v5, %v5052_v58  ;;  %v5055_v17 = vadd.f32 %v13749_v43, %v17530_v10  ;;  %14307 = vmatprep.mubr.f32.mxu0 %v7341_v27  ;;  %14342 = vmatprep.subr.mxu1 %v11370_v18  ;;  %v7344_v10 = vld [vmem:[#allocation2 + $0x370] sm:$0xff]  ;;  %v6974_v58 = vld [vmem:[#allocation2 + $0x302] sm:$0xff] }
 0x2e7   : > { %v13829_v40 = vpop.f32.mrf.mxu0  ;;  %14308 = vmatmul.mubr.f32.gmra.mxu0 %v7342_v19  ;;  %14343 = vmatpush3.msra.mxu1 %v11370_v18  ;;  %v4999_v23 = vpop.f32.mrf.mxu1  ;;  %v11385_v18 = vld [vmem:[%s19248_s1 + $0xa08] sm:$0xff]  ;;  %v6975_v43 = vld [vmem:[#allocation2 + $0x312] sm:$0xff] }
 0x2e8   : > { %19451 = vst [vmem:[#allocation19_spill] sm:$0xff] %v17789_v12  ;;  %v17797_v53 = vadd.f32 %v13829_v40, %v5055_v17  ;;  %v5054_v42 = vadd.f32 %v4999_v23, %v19453_v6  ;;  %14422 = vmatprep.subr.mxu0 %v11386_v26  ;;  %14230 = vmatprep.mubr.f32.mxu1 %v17787_v31  ;;  %v11368_v23 = vld [vmem:[%s19248_s1 + $0x980] sm:$0xff] }
 0x2e9   : > { %v5370_v3 = vpop.f32.mrf.mxu0  ;;  %14423 = vmatpush3.msra.mxu0 %v11386_v26  ;;  %v13752_v27 = vpop.f32.mrf.mxu1  ;;  %14231 = vmatmul.mubr.f32.gmra.mxu1 %v17792_v52  ;;  %v7345_v26 = vld [vmem:[#allocation2 + $0x380] sm:$0xff] }
 0x2ea   : > { %19452 = vst [vmem:[#allocation20_spill] sm:$0xff] %v17797_v53  ;;  %v17805_v19 = vadd.f32 %v5370_v3, %v5054_v42  ;;  %v5057_v5 = vadd.f32 %v13752_v27, %v17546_v39  ;;  %14310 = vmatprep.mubr.f32.mxu0 %v7343_v62  ;;  %14344 = vmatprep.subr.mxu1 %v11369_v32  ;;  %v19454_v53 = vld [vmem:[#allocation18_spill] sm:$0xff]  ;;  %v7346_v42 = vld [vmem:[#allocation2 + $0x390] sm:$0xff] }
 0x2eb   : > { %v13832_v17 = vpop.f32.mrf.mxu0  ;;  %14311 = vmatmul.mubr.f32.gmra.mxu0 %v7344_v10  ;;  %14345 = vmatpush3.msra.mxu1 %v11369_v32  ;;  %v5009_v40 = vpop.f32.mrf.mxu1  ;;  %v11384_v32 = vld [vmem:[%s19248_s1 + $0xa00] sm:$0xff] }
 0x2ec   : > { %v17811_v6 = vadd.f32 %v13832_v17, %v5057_v5  ;;  %v5056_v12 = vadd.f32 %v5009_v40, %v19454_v53  ;;  %14424 = vmatprep.subr.mxu0 %v11385_v18  ;;  %14233 = vmatprep.mubr.f32.mxu1 %v6974_v58  ;;  %v7685_v10 = vld [vmem:[#allocation2 + $0x141] sm:$0xff]  ;;  %v17820_v5 = vld [vmem:[#allocation2 + $0x151] sm:$0xff] }
 0x2ed   : > { %v5380_v39 = vpop.f32.mrf.mxu0  ;;  %14425 = vmatpush3.msra.mxu0 %v11385_v18  ;;  %v13755_v62 = vpop.f32.mrf.mxu1  ;;  %14234 = vmatmul.mubr.f32.gmra.mxu1 %v6975_v43  ;;  %v8055_v18 = vld [vmem:[#allocation2 + $0x142] sm:$0xff]  ;;  %v11415_v43 = vld [vmem:[%s19248_s1 + $0xaf8] sm:$0xff] }
 0x2ee   : > { %v17817_v3 = vadd.f32 %v5380_v39, %v5056_v12  ;;  %v5059_v27 = vadd.f32 %v13755_v62, %v17559_v16  ;;  %14313 = vmatprep.mubr.f32.mxu0 %v7345_v26  ;;  %14346 = vmatprep.subr.mxu1 %v11368_v23  ;;  %v8056_v16 = vld [vmem:[#allocation2 + $0x152] sm:$0xff] }
 0x2ef   : > { %v13835_v53 = vpop.f32.mrf.mxu0  ;;  %14314 = vmatmul.mubr.f32.gmra.mxu0 %v7346_v42  ;;  %14347 = vmatpush3.msra.mxu1 %v11368_v23  ;;  %v5019_v58 = vpop.f32.mrf.mxu1  ;;  %v11431_v23 = vld [vmem:[%s19248_s1 + $0xb78] sm:$0xff]  ;;  %v17832_v42 = vld [vmem:[#allocation2 + $0x161] sm:$0xff] }
 0x2f0   : > { %v17825_v17 = vadd.f32 %v13835_v53, %v5059_v27  ;;  %v5058_v12 = vadd.f32 %v5019_v58, %v17565_v63  ;;  %14426 = vmatprep.subr.mxu0 %v11384_v32  ;;  %14348 = vmatprep.mubr.f32.mxu1 %v7685_v10  ;;  %v17837_v63 = vld [vmem:[#allocation2 + $0x171] sm:$0xff] }
 0x2f1   : > { %v5390_v40 = vpop.f32.mrf.mxu0  ;;  %14427 = vmatpush3.msra.mxu0 %v11384_v32  ;;  %v13870_v26 = vpop.f32.mrf.mxu1  ;;  %14349 = vmatmul.mubr.f32.vlgmr.msra.gmra.mxu1 %v17820_v5  ;;  %v11414_v27 = vld [vmem:[%s19248_s1 + $0xaf0] sm:$0xff] }
 0x2f2   : > { %v17834_v39 = vadd.f32 %v5390_v40, %v5058_v12  ;;  %v5770_v62 = vadd.f32 %v13870_v26, %v17571_v45  ;;  %14428 = vmatprep.mubr.f32.mxu0 %v8055_v18  ;;  %14476 = vmatprep.subr.mxu1 %v11415_v43  ;;  %v17850_v12 = vld [vmem:[#allocation2 + $0x181] sm:$0xff] }
 0x2f3   : > { %v13950_v10 = vpop.f32.mrf.mxu0  ;;  %14429 = vmatmul.mubr.f32.vlgmr.msra.gmra.mxu0 %v8056_v16  ;;  %14477 = vmatpush3.msra.mxu1 %v11415_v43  ;;  %v5610_v32 = vpop.f32.mrf.mxu1  ;;  %v11430_v43 = vld [vmem:[%s19248_s1 + $0xb70] sm:$0xff] }
 0x2f4   : > { %v17842_v53 = vadd.f32 %v13950_v10, %v5770_v62  ;;  %v5769_v58 = vadd.f32 %v5610_v32, %v17577_v56  ;;  %14556 = vmatprep.subr.mxu0 %v11431_v23  ;;  %14351 = vmatprep.mubr.f32.mxu1 %v17832_v42  ;;  %v17856_v56 = vld [vmem:[#allocation2 + $0x191] sm:$0xff]  ;;  %v11413_v62 = vld [vmem:[%s19248_s1 + $0xae8] sm:$0xff] }
 0x2f5   : > { %v5980_v45 = vpop.f32.mrf.mxu0  ;;  %14557 = vmatpush3.msra.mxu0 %v11431_v23  ;;  %v13873_v18 = vpop.f32.mrf.mxu1  ;;  %14352 = vmatmul.mubr.f32.gmra.mxu1 %v17837_v63 }
 0x2f6   : > { %v17852_v16 = vadd.f32 %v5980_v45, %v5769_v58  ;;  %v5772_v40 = vadd.f32 %v13873_v18, %v17585_v49  ;;  %14431 = vmatprep.mubr.f32.mxu0 %v17605_v29  ;;  %14478 = vmatprep.subr.mxu1 %v11414_v27 }
 0x2f7   : > { %v13953_v26 = vpop.f32.mrf.mxu0  ;;  %14432 = vmatmul.mubr.f32.gmra.mxu0 %v17611_v61  ;;  %14479 = vmatpush3.msra.mxu1 %v11414_v27  ;;  %v5620_v23 = vpop.f32.mrf.mxu1  ;;  %v11429_v61 = vld [vmem:[%s19248_s1 + $0xb68] sm:$0xff] }
 0x2f8   : > { %v17862_v10 = vadd.f32 %v13953_v26, %v5772_v40  ;;  %v5771_v32 = vadd.f32 %v5620_v23, %v17591_v38  ;;  %14558 = vmatprep.subr.mxu0 %v11430_v43  ;;  %14354 = vmatprep.mubr.f32.mxu1 %v17850_v12  ;;  %v17870_v27 = vld [vmem:[#allocation2 + $0x1a1] sm:$0xff]  ;;  %v17876_v38 = vld [vmem:[#allocation2 + $0x1b1] sm:$0xff] }
 0x2f9   : > { %v5990_v49 = vpop.f32.mrf.mxu0  ;;  %14559 = vmatpush3.msra.mxu0 %v11430_v43  ;;  %v13876_v29 = vpop.f32.mrf.mxu1  ;;  %14355 = vmatmul.mubr.f32.gmra.mxu1 %v17856_v56  ;;  %v11412_v40 = vld [vmem:[%s19248_s1 + $0xae0] sm:$0xff] }
 0x2fa   : > { %v17872_v58 = vadd.f32 %v5990_v49, %v5771_v32  ;;  %v5774_v45 = vadd.f32 %v13876_v29, %v17599_v41  ;;  %14434 = vmatprep.mubr.f32.mxu0 %v17625_v0  ;;  %14480 = vmatprep.subr.mxu1 %v11413_v62 }
 0x2fb   : > { %v13956_v18 = vpop.f32.mrf.mxu0  ;;  %14435 = vmatmul.mubr.f32.gmra.mxu0 %v17630_v8  ;;  %14481 = vmatpush3.msra.mxu1 %v11413_v62  ;;  %v5630_v43 = vpop.f32.mrf.mxu1  ;;  %v11428_v8 = vld [vmem:[%s19248_s1 + $0xb60] sm:$0xff] }
 0x2fc   : > { %v17882_v26 = vadd.f32 %v13956_v18, %v5774_v45  ;;  %v5773_v23 = vadd.f32 %v5630_v43, %v17607_v9  ;;  %14560 = vmatprep.subr.mxu0 %v11429_v61  ;;  %14357 = vmatprep.mubr.f32.mxu1 %v17870_v27  ;;  %v7693_v62 = vld [vmem:[#allocation2 + $0x1e1] sm:$0xff]  ;;  %v17894_v9 = vld [vmem:[#allocation2 + $0x1f1] sm:$0xff] }
 0x2fd   : > { %v6000_v41 = vpop.f32.mrf.mxu0  ;;  %14561 = vmatpush3.msra.mxu0 %v11429_v61  ;;  %v13879_v0 = vpop.f32.mrf.mxu1  ;;  %14358 = vmatmul.mubr.f32.gmra.mxu1 %v17876_v38  ;;  %19455 = vst [vmem:[#allocation23_spill] sm:$0xff] %v17894_v9  ;;  %v8063_v45 = vld [vmem:[#allocation2 + $0x1e2] sm:$0xff]  ;;  %v11411_v18 = vld [vmem:[%s19248_s1 + $0xad8] sm:$0xff] }
 0x2fe   : > { %v17890_v32 = vadd.f32 %v6000_v41, %v5773_v23  ;;  %v5776_v49 = vadd.f32 %v13879_v0, %v17617_v37  ;;  %14437 = vmatprep.mubr.f32.mxu0 %v17643_v13  ;;  %14482 = vmatprep.subr.mxu1 %v11412_v40  ;;  %v8064_v37 = vld [vmem:[#allocation2 + $0x1f2] sm:$0xff] }
 0x2ff   : > { %v13959_v29 = vpop.f32.mrf.mxu0  ;;  %14438 = vmatmul.mubr.f32.gmra.mxu0 %v17649_v51  ;;  %14483 = vmatpush3.msra.mxu1 %v11412_v40  ;;  %v5640_v61 = vpop.f32.mrf.mxu1  ;;  %v11427_v51 = vld [vmem:[%s19248_s1 + $0xb58] sm:$0xff]  ;;  %v17907_v40 = vld [vmem:[#allocation2 + $0x201] sm:$0xff] }
 0x300   : > { %v17900_v43 = vadd.f32 %v13959_v29, %v5776_v49  ;;  %v5775_v23 = vadd.f32 %v5640_v61, %v17627_v25  ;;  %14562 = vmatprep.subr.mxu0 %v11428_v8  ;;  %14360 = vmatprep.mubr.f32.mxu1 %v7693_v62  ;;  %v17912_v25 = vld [vmem:[#allocation2 + $0x211] sm:$0xff] }
 0x301   : > { %v6010_v13 = vpop.f32.mrf.mxu0  ;;  %14563 = vmatpush3.msra.mxu0 %v11428_v8  ;;  %v13882_v41 = vpop.f32.mrf.mxu1  ;;  %14361 = vmatmul.mubr.f32.gmra.mxu1 %v17894_v9  ;;  %v11410_v29 = vld [vmem:[%s19248_s1 + $0xad0] sm:$0xff] }
 0x302   : > { %v17909_v0 = vadd.f32 %v6010_v13, %v5775_v23  ;;  %v5778_v49 = vadd.f32 %v13882_v41, %v17635_v11  ;;  %14440 = vmatprep.mubr.f32.mxu0 %v8063_v45  ;;  %14484 = vmatprep.subr.mxu1 %v11411_v18  ;;  %v17925_v23 = vld [vmem:[#allocation2 + $0x221] sm:$0xff] }
 0x303   : > { %v13962_v62 = vpop.f32.mrf.mxu0  ;;  %14441 = vmatmul.mubr.f32.gmra.mxu0 %v8064_v37  ;;  %14485 = vmatpush3.msra.mxu1 %v11411_v18  ;;  %v5650_v8 = vpop.f32.mrf.mxu1  ;;  %v11426_v18 = vld [vmem:[%s19248_s1 + $0xb50] sm:$0xff] }
 0x304   : > { %v17917_v61 = vadd.f32 %v13962_v62, %v5778_v49  ;;  %v5777_v9 = vadd.f32 %v5650_v8, %v17645_v34  ;;  %14564 = vmatprep.subr.mxu0 %v11427_v51  ;;  %14363 = vmatprep.mubr.f32.mxu1 %v17907_v40  ;;  %v17931_v34 = vld [vmem:[#allocation2 + $0x231] sm:$0xff]  ;;  %v11409_v49 = vld [vmem:[%s19248_s1 + $0xac8] sm:$0xff] }
 0x305   : > { %v6020_v11 = vpop.f32.mrf.mxu0  ;;  %14565 = vmatpush3.msra.mxu0 %v11427_v51  ;;  %v13885_v45 = vpop.f32.mrf.mxu1  ;;  %14364 = vmatmul.mubr.f32.gmra.mxu1 %v17912_v25  ;;  %v17945_v8 = vld [vmem:[#allocation2 + $0x241] sm:$0xff] }
 0x306   : > { %v17927_v37 = vadd.f32 %v6020_v11, %v5777_v9  ;;  %v5780_v13 = vadd.f32 %v13885_v45, %v17655_v1  ;;  %14443 = vmatprep.mubr.f32.mxu0 %v17677_v7  ;;  %14486 = vmatprep.subr.mxu1 %v11410_v29 }
 0x307   : > { %v13965_v41 = vpop.f32.mrf.mxu0  ;;  %14444 = vmatmul.mubr.f32.gmra.mxu0 %v17683_v30  ;;  %14487 = vmatpush3.msra.mxu1 %v11410_v29  ;;  %v5660_v51 = vpop.f32.mrf.mxu1  ;;  %v11425_v30 = vld [vmem:[%s19248_s1 + $0xb48] sm:$0xff] }
 0x308   : > { %v17937_v62 = vadd.f32 %v13965_v41, %v5780_v13  ;;  %v5779_v9 = vadd.f32 %v5660_v51, %v17663_v57  ;;  %14566 = vmatprep.subr.mxu0 %v11426_v18  ;;  %14366 = vmatprep.mubr.f32.mxu1 %v17925_v23  ;;  %v17951_v57 = vld [vmem:[#allocation2 + $0x251] sm:$0xff]  ;;  %v11408_v13 = vld [vmem:[%s19248_s1 + $0xac0] sm:$0xff] }
 0x309   : > { %v6030_v1 = vpop.f32.mrf.mxu0  ;;  %14567 = vmatpush3.msra.mxu0 %v11426_v18  ;;  %v13888_v7 = vpop.f32.mrf.mxu1  ;;  %14367 = vmatmul.mubr.f32.gmra.mxu1 %v17931_v34 }
 0x30a   : > { %v17947_v29 = vadd.f32 %v6030_v1, %v5779_v9  ;;  %v5782_v11 = vadd.f32 %v13888_v7, %v17671_v21  ;;  %14446 = vmatprep.mubr.f32.mxu0 %v17697_v50  ;;  %14488 = vmatprep.subr.mxu1 %v11409_v49 }
 0x30b   : > { %v13968_v45 = vpop.f32.mrf.mxu0  ;;  %14447 = vmatmul.mubr.f32.gmra.mxu0 %v17702_v47  ;;  %14489 = vmatpush3.msra.mxu1 %v11409_v49  ;;  %v5670_v18 = vpop.f32.mrf.mxu1  ;;  %v11424_v47 = vld [vmem:[%s19248_s1 + $0xb40] sm:$0xff] }
 0x30c   : > { %v17957_v41 = vadd.f32 %v13968_v45, %v5782_v11  ;;  %v5781_v51 = vadd.f32 %v5670_v18, %v17679_v33  ;;  %14568 = vmatprep.subr.mxu0 %v11425_v30  ;;  %14369 = vmatprep.mubr.f32.mxu1 %v17945_v8  ;;  %v7701_v49 = vld [vmem:[#allocation2 + $0x281] sm:$0xff]  ;;  %v17969_v33 = vld [vmem:[#allocation2 + $0x291] sm:$0xff] }
 0x30d   : > { %v6040_v21 = vpop.f32.mrf.mxu0  ;;  %14569 = vmatpush3.msra.mxu0 %v11425_v30  ;;  %v13891_v50 = vpop.f32.mrf.mxu1  ;;  %14370 = vmatmul.mubr.f32.gmra.mxu1 %v17951_v57  ;;  %19456 = vst [vmem:[#allocation21_spill] sm:$0xff] %v17969_v33  ;;  %v8071_v11 = vld [vmem:[#allocation2 + $0x282] sm:$0xff]  ;;  %v11407_v45 = vld [vmem:[%s19248_s1 + $0xab8] sm:$0xff] }
 0x30e   : > { %v17965_v9 = vadd.f32 %v6040_v21, %v5781_v51  ;;  %v5784_v1 = vadd.f32 %v13891_v50, %v17689_v54  ;;  %14449 = vmatprep.mubr.f32.mxu0 %v17715_v48  ;;  %14490 = vmatprep.subr.mxu1 %v11408_v13  ;;  %v8072_v54 = vld [vmem:[#allocation2 + $0x292] sm:$0xff] }
 0x30f   : > { %v13971_v7 = vpop.f32.mrf.mxu0  ;;  %14450 = vmatmul.mubr.f32.gmra.mxu0 %v17721_v28  ;;  %14491 = vmatpush3.msra.mxu1 %v11408_v13  ;;  %v5680_v30 = vpop.f32.mrf.mxu1  ;;  %v11423_v28 = vld [vmem:[%s19248_s1 + $0xb38] sm:$0xff]  ;;  %v17982_v13 = vld [vmem:[#allocation2 + $0x2a1] sm:$0xff] }
 0x310   : > { %v17975_v18 = vadd.f32 %v13971_v7, %v5784_v1  ;;  %v5783_v51 = vadd.f32 %v5680_v30, %v17699_v22  ;;  %14570 = vmatprep.subr.mxu0 %v11424_v47  ;;  %14372 = vmatprep.mubr.f32.mxu1 %v7701_v49  ;;  %v17987_v22 = vld [vmem:[#allocation2 + $0x2b1] sm:$0xff] }
 0x311   : > { %v6050_v48 = vpop.f32.mrf.mxu0  ;;  %14571 = vmatpush3.msra.mxu0 %v11424_v47  ;;  %v13894_v21 = vpop.f32.mrf.mxu1  ;;  %14373 = vmatmul.mubr.f32.gmra.mxu1 %v17969_v33  ;;  %v11406_v7 = vld [vmem:[%s19248_s1 + $0xab0] sm:$0xff] }
 0x312   : > { %v17984_v50 = vadd.f32 %v6050_v48, %v5783_v51  ;;  %v5786_v1 = vadd.f32 %v13894_v21, %v17707_v60  ;;  %14452 = vmatprep.mubr.f32.mxu0 %v8071_v11  ;;  %14492 = vmatprep.subr.mxu1 %v11407_v45  ;;  %v18000_v51 = vld [vmem:[#allocation2 + $0x2c1] sm:$0xff] }
 0x313   : > { %v13974_v49 = vpop.f32.mrf.mxu0  ;;  %14453 = vmatmul.mubr.f32.gmra.mxu0 %v8072_v54  ;;  %14493 = vmatpush3.msra.mxu1 %v11407_v45  ;;  %v5690_v47 = vpop.f32.mrf.mxu1  ;;  %v11422_v45 = vld [vmem:[%s19248_s1 + $0xb30] sm:$0xff] }
 0x314   : > { %v17992_v30 = vadd.f32 %v13974_v49, %v5786_v1  ;;  %v5785_v33 = vadd.f32 %v5690_v47, %v17717_v24  ;;  %14572 = vmatprep.subr.mxu0 %v11423_v28  ;;  %14375 = vmatprep.mubr.f32.mxu1 %v17982_v13  ;;  %v18006_v24 = vld [vmem:[#allocation2 + $0x2d1] sm:$0xff]  ;;  %v11405_v1 = vld [vmem:[%s19248_s1 + $0xaa8] sm:$0xff] }
 0x315   : > { %v6060_v60 = vpop.f32.mrf.mxu0  ;;  %14573 = vmatpush3.msra.mxu0 %v11423_v28  ;;  %v13897_v11 = vpop.f32.mrf.mxu1  ;;  %14376 = vmatmul.mubr.f32.gmra.mxu1 %v17987_v22  ;;  %v18020_v47 = vld [vmem:[#allocation2 + $0x2e1] sm:$0xff] }
 0x316   : > { %v18002_v54 = vadd.f32 %v6060_v60, %v5785_v33  ;;  %v5788_v48 = vadd.f32 %v13897_v11, %v17727_v4  ;;  %14455 = vmatprep.mubr.f32.mxu0 %v17749_v59  ;;  %14494 = vmatprep.subr.mxu1 %v11406_v7 }
 0x317   : > { %v13977_v21 = vpop.f32.mrf.mxu0  ;;  %14456 = vmatmul.mubr.f32.gmra.mxu0 %v17755_v15  ;;  %14495 = vmatpush3.msra.mxu1 %v11406_v7  ;;  %v5700_v28 = vpop.f32.mrf.mxu1  ;;  %v11421_v15 = vld [vmem:[%s19248_s1 + $0xb28] sm:$0xff] }
 0x318   : > { %v18012_v49 = vadd.f32 %v13977_v21, %v5788_v48  ;;  %v5787_v33 = vadd.f32 %v5700_v28, %v17735_v14  ;;  %14574 = vmatprep.subr.mxu0 %v11422_v45  ;;  %14378 = vmatprep.mubr.f32.mxu1 %v18000_v51  ;;  %v18026_v14 = vld [vmem:[#allocation2 + $0x2f1] sm:$0xff]  ;;  %v11404_v48 = vld [vmem:[%s19248_s1 + $0xaa0] sm:$0xff] }
 0x319   : > { %v6070_v4 = vpop.f32.mrf.mxu0  ;;  %14575 = vmatpush3.msra.mxu0 %v11422_v45  ;;  %v13900_v59 = vpop.f32.mrf.mxu1  ;;  %14379 = vmatmul.mubr.f32.gmra.mxu1 %v18006_v24  ;;  %19457 = vst [vmem:[#allocation22_spill] sm:$0xff] %v18026_v14 }
 0x31a   : > { %v18022_v7 = vadd.f32 %v6070_v4, %v5787_v33  ;;  %v5790_v60 = vadd.f32 %v13900_v59, %v17743_v44  ;;  %14458 = vmatprep.mubr.f32.mxu0 %v17769_v35  ;;  %14496 = vmatprep.subr.mxu1 %v11405_v1 }
 0x31b   : > { %v13980_v11 = vpop.f32.mrf.mxu0  ;;  %14459 = vmatmul.mubr.f32.gmra.mxu0 %v17774_v2  ;;  %14497 = vmatpush3.msra.mxu1 %v11405_v1  ;;  %v5710_v45 = vpop.f32.mrf.mxu1  ;;  %v11420_v2 = vld [vmem:[%s19248_s1 + $0xb20] sm:$0xff] }
 0x31c   : > { %v18032_v21 = vadd.f32 %v13980_v11, %v5790_v60  ;;  %v5789_v28 = vadd.f32 %v5710_v45, %v17751_v55  ;;  %14576 = vmatprep.subr.mxu0 %v11421_v15  ;;  %14381 = vmatprep.mubr.f32.mxu1 %v18020_v47  ;;  %v7709_v1 = vld [vmem:[#allocation2 + $0x321] sm:$0xff]  ;;  %v18044_v55 = vld [vmem:[#allocation2 + $0x331] sm:$0xff] }
 0x31d   : > { %v6080_v44 = vpop.f32.mrf.mxu0  ;;  %14577 = vmatpush3.msra.mxu0 %v11421_v15  ;;  %v13903_v35 = vpop.f32.mrf.mxu1  ;;  %14382 = vmatmul.mubr.f32.gmra.mxu1 %v18026_v14  ;;  %19458 = vst [vmem:[#allocation24_spill] sm:$0xff] %v18044_v55  ;;  %v8079_v60 = vld [vmem:[#allocation2 + $0x322] sm:$0xff]  ;;  %v11403_v11 = vld [vmem:[%s19248_s1 + $0xa98] sm:$0xff] }
 0x31e   : > { %v18040_v33 = vadd.f32 %v6080_v44, %v5789_v28  ;;  %v5792_v4 = vadd.f32 %v13903_v35, %v17761_v46  ;;  %14461 = vmatprep.mubr.f32.mxu0 %v17787_v31  ;;  %14498 = vmatprep.subr.mxu1 %v11404_v48  ;;  %v8080_v46 = vld [vmem:[#allocation2 + $0x332] sm:$0xff]  ;;  %v19462_v14 = vld [vmem:[#allocation19_spill] sm:$0xff] }
 0x31f   : > { %v13983_v59 = vpop.f32.mrf.mxu0  ;;  %14462 = vmatmul.mubr.f32.gmra.mxu0 %v17792_v52  ;;  %14499 = vmatpush3.msra.mxu1 %v11404_v48  ;;  %v5720_v15 = vpop.f32.mrf.mxu1  ;;  %v11419_v52 = vld [vmem:[%s19248_s1 + $0xb18] sm:$0xff]  ;;  %v18057_v48 = vld [vmem:[#allocation2 + $0x341] sm:$0xff] }
 0x320   : > { %v18050_v45 = vadd.f32 %v13983_v59, %v5792_v4  ;;  %v5791_v28 = vadd.f32 %v5720_v15, %v17771_v20  ;;  %14578 = vmatprep.subr.mxu0 %v11420_v2  ;;  %14384 = vmatprep.mubr.f32.mxu1 %v7709_v1  ;;  %19459 = vst [vmem:[#allocation25_spill] sm:$0xff] %v18057_v48  ;;  %v18062_v20 = vld [vmem:[#allocation2 + $0x351] sm:$0xff]  ;;  %v8081_v59 = vld [vmem:[#allocation2 + $0x342] sm:$0xff] }
 0x321   : > { %v6090_v31 = vpop.f32.mrf.mxu0  ;;  %14579 = vmatpush3.msra.mxu0 %v11420_v2  ;;  %v13906_v44 = vpop.f32.mrf.mxu1  ;;  %14385 = vmatmul.mubr.f32.gmra.mxu1 %v18044_v55  ;;  %19460 = vst [vmem:[#allocation26_spill] sm:$0xff] %v18062_v20  ;;  %v11402_v15 = vld [vmem:[%s19248_s1 + $0xa90] sm:$0xff] }
 0x322   : > { %v18059_v35 = vadd.f32 %v6090_v31, %v5791_v28  ;;  %v5794_v4 = vadd.f32 %v13906_v44, %v17779_v36  ;;  %14464 = vmatprep.mubr.f32.mxu0 %v8079_v60  ;;  %14500 = vmatprep.subr.mxu1 %v11403_v11  ;;  %v8082_v36 = vld [vmem:[#allocation2 + $0x352] sm:$0xff] }
 0x323   : > { %v13986_v1 = vpop.f32.mrf.mxu0  ;;  %14465 = vmatmul.mubr.f32.gmra.mxu0 %v8080_v46  ;;  %14501 = vmatpush3.msra.mxu1 %v11403_v11  ;;  %v5730_v2 = vpop.f32.mrf.mxu1  ;;  %v11418_v11 = vld [vmem:[%s19248_s1 + $0xb10] sm:$0xff]  ;;  %v18075_v46 = vld [vmem:[#allocation2 + $0x361] sm:$0xff] }
 0x324   : > { %v18067_v55 = vadd.f32 %v13986_v1, %v5794_v4  ;;  %v5793_v28 = vadd.f32 %v5730_v2, %v19462_v14  ;;  %14580 = vmatprep.subr.mxu0 %v11419_v52  ;;  %14387 = vmatprep.mubr.f32.mxu1 %v18057_v48  ;;  %19463 = vst [vmem:[#allocation28_spill] sm:$0xff] %v18075_v46  ;;  %v19464_v4 = vld [vmem:[#allocation20_spill] sm:$0xff]  ;;  %v18080_v14 = vld [vmem:[#allocation2 + $0x371] sm:$0xff] }
 0x325   : > { %v6100_v60 = vpop.f32.mrf.mxu0  ;;  %14581 = vmatpush3.msra.mxu0 %v11419_v52  ;;  %v13909_v31 = vpop.f32.mrf.mxu1  ;;  %14388 = vmatmul.mubr.f32.gmra.mxu1 %v18062_v20  ;;  %19465 = vst [vmem:[#allocation29_spill] sm:$0xff] %v18080_v14  ;;  %v8083_v48 = vld [vmem:[#allocation2 + $0x362] sm:$0xff] }
 0x326   : > { %19461 = vst [vmem:[#allocation27_spill] sm:$0xff] %v18067_v55  ;;  %v18077_v44 = vadd.f32 %v6100_v60, %v5793_v28  ;;  %v5796_v1 = vadd.f32 %v13909_v31, %v19464_v4  ;;  %14467 = vmatprep.mubr.f32.mxu0 %v8081_v59  ;;  %14502 = vmatprep.subr.mxu1 %v11402_v15  ;;  %v11401_v20 = vld [vmem:[%s19248_s1 + $0xa88] sm:$0xff]  ;;  %v8084_v59 = vld [vmem:[#allocation2 + $0x372] sm:$0xff] }
 0x327   : > { %v13989_v2 = vpop.f32.mrf.mxu0  ;;  %14468 = vmatmul.mubr.f32.gmra.mxu0 %v8082_v36  ;;  %14503 = vmatpush3.msra.mxu1 %v11402_v15  ;;  %v5740_v52 = vpop.f32.mrf.mxu1  ;;  %v11417_v15 = vld [vmem:[%s19248_s1 + $0xb08] sm:$0xff] }
 0x328   : > { %v18085_v55 = vadd.f32 %v13989_v2, %v5796_v1  ;;  %v5795_v28 = vadd.f32 %v5740_v52, %v17805_v19  ;;  %14582 = vmatprep.subr.mxu0 %v11418_v11  ;;  %14390 = vmatprep.mubr.f32.mxu1 %v18075_v46  ;;  %v18093_v36 = vld [vmem:[#allocation2 + $0x381] sm:$0xff]  ;;  %v18098_v19 = vld [vmem:[#allocation2 + $0x391] sm:$0xff] }
 0x329   : > { %v6110_v60 = vpop.f32.mrf.mxu0  ;;  %14583 = vmatpush3.msra.mxu0 %v11418_v11  ;;  %v13912_v31 = vpop.f32.mrf.mxu1  ;;  %14391 = vmatmul.mubr.f32.gmra.mxu1 %v18080_v14  ;;  %19466 = vst [vmem:[#allocation30_spill] sm:$0xff] %v18093_v36  ;;  %19467 = vst [vmem:[#allocation7_spill] sm:$0xff] %v18098_v19  ;;  %v8085_v52 = vld [vmem:[#allocation2 + $0x382] sm:$0xff] }
 0x32a   : > { %v18095_v4 = vadd.f32 %v6110_v60, %v5795_v28  ;;  %v5798_v1 = vadd.f32 %v13912_v31, %v17811_v6  ;;  %14470 = vmatprep.mubr.f32.mxu0 %v8083_v48  ;;  %14504 = vmatprep.subr.mxu1 %v11401_v20  ;;  %v11400_v14 = vld [vmem:[%s19248_s1 + $0xa80] sm:$0xff]  ;;  %v8086_v6 = vld [vmem:[#allocation2 + $0x392] sm:$0xff] }
 0x32b   : > { %v13992_v2 = vpop.f32.mrf.mxu0  ;;  %14471 = vmatmul.mubr.f32.gmra.mxu0 %v8084_v59  ;;  %14505 = vmatpush3.msra.mxu1 %v11401_v20  ;;  %v5750_v11 = vpop.f32.mrf.mxu1  ;;  %v11416_v20 = vld [vmem:[%s19248_s1 + $0xb00] sm:$0xff]  ;;  %v8426_v59 = vld [vmem:[#allocation2 + $0x150] sm:$0xff] }
 0x32c   : > { %v18103_v46 = vadd.f32 %v13992_v2, %v5798_v1  ;;  %v5797_v28 = vadd.f32 %v5750_v11, %v17817_v3  ;;  %14584 = vmatprep.subr.mxu0 %v11417_v15  ;;  %14393 = vmatprep.mubr.f32.mxu1 %v18093_v36  ;;  %v18114_v3 = vld [vmem:[#allocation2 + $0x160] sm:$0xff]  ;;  %v11447_v11 = vld [vmem:[%s19248_s1 + $0xbf8] sm:$0xff] }
 0x32d   : > { %v6120_v48 = vpop.f32.mrf.mxu0  ;;  %14585 = vmatpush3.msra.mxu0 %v11417_v15  ;;  %v13915_v60 = vpop.f32.mrf.mxu1  ;;  %14394 = vmatmul.mubr.f32.gmra.mxu1 %v18098_v19 }
 0x32e   : > { %v18111_v31 = vadd.f32 %v6120_v48, %v5797_v28  ;;  %v5800_v1 = vadd.f32 %v13915_v60, %v17825_v17  ;;  %14473 = vmatprep.mubr.f32.mxu0 %v8085_v52  ;;  %14506 = vmatprep.subr.mxu1 %v11400_v14  ;;  %v18126_v52 = vld [vmem:[#allocation2 + $0x170] sm:$0xff] }
 0x32f   : > { %v13995_v2 = vpop.f32.mrf.mxu0  ;;  %14474 = vmatmul.mubr.f32.gmra.mxu0 %v8086_v6  ;;  %14507 = vmatpush3.msra.mxu1 %v11400_v14  ;;  %v5760_v15 = vpop.f32.mrf.mxu1  ;;  %v11463_v14 = vld [vmem:[%s19248_s1 + $0xc78] sm:$0xff] }
 0x330   : > { %v18119_v19 = vadd.f32 %v13995_v2, %v5800_v1  ;;  %v5799_v36 = vadd.f32 %v5760_v15, %v17834_v39  ;;  %14586 = vmatprep.subr.mxu0 %v11416_v20  ;;  %14508 = vmatprep.mubr.f32.mxu1 %v8426_v59  ;;  %v18132_v39 = vld [vmem:[#allocation2 + $0x180] sm:$0xff]  ;;  %v11446_v59 = vld [vmem:[%s19248_s1 + $0xbf0] sm:$0xff] }
 0x331   : > { %v6130_v28 = vpop.f32.mrf.mxu0  ;;  %14587 = vmatpush3.msra.mxu0 %v11416_v20  ;;  %v14030_v17 = vpop.f32.mrf.mxu1  ;;  %14509 = vmatmul.mubr.f32.vlgmr.msra.gmra.mxu1 %v18114_v3  ;;  %v18146_v2 = vld [vmem:[#allocation2 + $0x190] sm:$0xff] }
 0x332   : > { %v18128_v6 = vadd.f32 %v6130_v28, %v5799_v36  ;;  %v6511_v48 = vadd.f32 %v14030_v17, %v17842_v53  ;;  %14588 = vmatprep.mubr.f32.mxu0 %v17820_v5  ;;  %14636 = vmatprep.subr.mxu1 %v11447_v11 }
 0x333   : > { %v14110_v60 = vpop.f32.mrf.mxu0  ;;  %14589 = vmatmul.mubr.f32.vlgmr.msra.gmra.mxu0 %v17832_v42  ;;  %14637 = vmatpush3.msra.mxu1 %v11447_v11  ;;  %v6351_v20 = vpop.f32.mrf.mxu1  ;;  %v11462_v42 = vld [vmem:[%s19248_s1 + $0xc70] sm:$0xff] }
 0x334   : > { %v18138_v1 = vadd.f32 %v14110_v60, %v6511_v48  ;;  %v6510_v36 = vadd.f32 %v6351_v20, %v17852_v16  ;;  %14716 = vmatprep.subr.mxu0 %v11463_v14  ;;  %14511 = vmatprep.mubr.f32.mxu1 %v18126_v52  ;;  %v18152_v16 = vld [vmem:[#allocation2 + $0x1a0] sm:$0xff]  ;;  %v18166_v20 = vld [vmem:[#allocation2 + $0x1b0] sm:$0xff] }
 0x335   : > { %v6721_v5 = vpop.f32.mrf.mxu0  ;;  %14717 = vmatpush3.msra.mxu0 %v11463_v14  ;;  %v14033_v53 = vpop.f32.mrf.mxu1  ;;  %14512 = vmatmul.mubr.f32.gmra.mxu1 %v18132_v39  ;;  %v11445_v14 = vld [vmem:[%s19248_s1 + $0xbe8] sm:$0xff] }
 0x336   : > { %v18148_v15 = vadd.f32 %v6721_v5, %v6510_v36  ;;  %v6513_v11 = vadd.f32 %v14033_v53, %v17862_v10  ;;  %14591 = vmatprep.mubr.f32.mxu0 %v17837_v63  ;;  %14638 = vmatprep.subr.mxu1 %v11446_v59 }
 0x337   : > { %v14113_v28 = vpop.f32.mrf.mxu0  ;;  %14592 = vmatmul.mubr.f32.gmra.mxu0 %v17850_v12  ;;  %14639 = vmatpush3.msra.mxu1 %v11446_v59  ;;  %v6361_v17 = vpop.f32.mrf.mxu1  ;;  %v11461_v12 = vld [vmem:[%s19248_s1 + $0xc68] sm:$0xff] }
 0x338   : > { %v18158_v48 = vadd.f32 %v14113_v28, %v6513_v11  ;;  %v6512_v60 = vadd.f32 %v6361_v17, %v17872_v58  ;;  %14718 = vmatprep.subr.mxu0 %v11462_v42  ;;  %14514 = vmatprep.mubr.f32.mxu1 %v18146_v2  ;;  %v18172_v58 = vld [vmem:[#allocation2 + $0x1c0] sm:$0xff] }
 0x339   : > { %v6731_v63 = vpop.f32.mrf.mxu0  ;;  %14719 = vmatpush3.msra.mxu0 %v11462_v42  ;;  %v14036_v10 = vpop.f32.mrf.mxu1  ;;  %14515 = vmatmul.mubr.f32.gmra.mxu1 %v18152_v16  ;;  %v11444_v42 = vld [vmem:[%s19248_s1 + $0xbe0] sm:$0xff] }
 0x33a   : > { %v18168_v59 = vadd.f32 %v6731_v63, %v6512_v60  ;;  %v6515_v36 = vadd.f32 %v14036_v10, %v17882_v26  ;;  %14594 = vmatprep.mubr.f32.mxu0 %v17856_v56  ;;  %14640 = vmatprep.subr.mxu1 %v11445_v14  ;;  %v8803_v56 = vld [vmem:[#allocation2 + $0x1c1] sm:$0xff] }
 0x33b   : > { %v14116_v5 = vpop.f32.mrf.mxu0  ;;  %14595 = vmatmul.mubr.f32.gmra.mxu0 %v17870_v27  ;;  %14641 = vmatpush3.msra.mxu1 %v11445_v14  ;;  %v6371_v53 = vpop.f32.mrf.mxu1  ;;  %v11460_v27 = vld [vmem:[%s19248_s1 + $0xc60] sm:$0xff]  ;;  %v8434_v14 = vld [vmem:[#allocation2 + $0x1f0] sm:$0xff] }
 0x33c   : > { %v18178_v11 = vadd.f32 %v14116_v5, %v6515_v36  ;;  %v6514_v28 = vadd.f32 %v6371_v53, %v17890_v32  ;;  %14720 = vmatprep.subr.mxu0 %v11461_v12  ;;  %14517 = vmatprep.mubr.f32.mxu1 %v18166_v20  ;;  %v18190_v32 = vld [vmem:[#allocation2 + $0x200] sm:$0xff]  ;;  %v11443_v36 = vld [vmem:[%s19248_s1 + $0xbd8] sm:$0xff] }
 0x33d   : > { %v6741_v26 = vpop.f32.mrf.mxu0  ;;  %14721 = vmatpush3.msra.mxu0 %v11461_v12  ;;  %v14039_v17 = vpop.f32.mrf.mxu1  ;;  %14518 = vmatmul.mubr.f32.gmra.mxu1 %v18172_v58 }
 0x33e   : > { %v18186_v60 = vadd.f32 %v6741_v26, %v6514_v28  ;;  %v6517_v63 = vadd.f32 %v14039_v17, %v17900_v43  ;;  %14597 = vmatprep.mubr.f32.mxu0 %v17876_v38  ;;  %14642 = vmatprep.subr.mxu1 %v11444_v42  ;;  %v18202_v28 = vld [vmem:[#allocation2 + $0x210] sm:$0xff]  ;;  %v19468_v17 = vld [vmem:[#allocation23_spill] sm:$0xff] }
 0x33f   : > { %v14119_v10 = vpop.f32.mrf.mxu0  ;;  %14598 = vmatmul.mubr.f32.gmra.mxu0 %v8803_v56  ;;  %14643 = vmatpush3.msra.mxu1 %v11444_v42  ;;  %v6381_v12 = vpop.f32.mrf.mxu1  ;;  %v11459_v42 = vld [vmem:[%s19248_s1 + $0xc58] sm:$0xff] }
 0x340   : > { %v18195_v5 = vadd.f32 %v14119_v10, %v6517_v63  ;;  %v6516_v53 = vadd.f32 %v6381_v12, %v17909_v0  ;;  %14722 = vmatprep.subr.mxu0 %v11460_v27  ;;  %14520 = vmatprep.mubr.f32.mxu1 %v8434_v14  ;;  %v18208_v0 = vld [vmem:[#allocation2 + $0x220] sm:$0xff]  ;;  %v11442_v63 = vld [vmem:[%s19248_s1 + $0xbd0] sm:$0xff] }
 0x341   : > { %v6751_v43 = vpop.f32.mrf.mxu0  ;;  %14723 = vmatpush3.msra.mxu0 %v11460_v27  ;;  %v14042_v38 = vpop.f32.mrf.mxu1  ;;  %14521 = vmatmul.mubr.f32.gmra.mxu1 %v18190_v32 }
 0x342   : > { %v18204_v56 = vadd.f32 %v6751_v43, %v6516_v53  ;;  %v6519_v26 = vadd.f32 %v14042_v38, %v17917_v61  ;;  %14600 = vmatprep.mubr.f32.mxu0 %v19468_v17  ;;  %14644 = vmatprep.subr.mxu1 %v11443_v36  ;;  %v11441_v17 = vld [vmem:[%s19248_s1 + $0xbc8] sm:$0xff] }
 0x343   : > { %v14122_v14 = vpop.f32.mrf.mxu0  ;;  %14601 = vmatmul.mubr.f32.gmra.mxu0 %v17907_v40  ;;  %14645 = vmatpush3.msra.mxu1 %v11443_v36  ;;  %v6391_v27 = vpop.f32.mrf.mxu1  ;;  %v11458_v40 = vld [vmem:[%s19248_s1 + $0xc50] sm:$0xff] }
 0x344   : > { %v18214_v10 = vadd.f32 %v14122_v14, %v6519_v26  ;;  %v6518_v12 = vadd.f32 %v6391_v27, %v17927_v37  ;;  %14724 = vmatprep.subr.mxu0 %v11459_v42  ;;  %14523 = vmatprep.mubr.f32.mxu1 %v18202_v28  ;;  %v18222_v36 = vld [vmem:[#allocation2 + $0x230] sm:$0xff]  ;;  %v18228_v37 = vld [vmem:[#allocation2 + $0x240] sm:$0xff] }
 0x345   : > { %v6761_v61 = vpop.f32.mrf.mxu0  ;;  %14725 = vmatpush3.msra.mxu0 %v11459_v42  ;;  %v14045_v53 = vpop.f32.mrf.mxu1  ;;  %14524 = vmatmul.mubr.f32.gmra.mxu1 %v18208_v0 }
 0x346   : > { %v18224_v43 = vadd.f32 %v6761_v61, %v6518_v12  ;;  %v6521_v38 = vadd.f32 %v14045_v53, %v17937_v62  ;;  %14603 = vmatprep.mubr.f32.mxu0 %v17912_v25  ;;  %14646 = vmatprep.subr.mxu1 %v11442_v63 }
 0x347   : > { %v14125_v26 = vpop.f32.mrf.mxu0  ;;  %14604 = vmatmul.mubr.f32.gmra.mxu0 %v17925_v23  ;;  %14647 = vmatpush3.msra.mxu1 %v11442_v63  ;;  %v6401_v42 = vpop.f32.mrf.mxu1  ;;  %v11457_v23 = vld [vmem:[%s19248_s1 + $0xc48] sm:$0xff]  ;;  %v18242_v63 = vld [vmem:[#allocation2 + $0x250] sm:$0xff] }
 0x348   : > { %v18234_v14 = vadd.f32 %v14125_v26, %v6521_v38  ;;  %v6520_v27 = vadd.f32 %v6401_v42, %v17947_v29  ;;  %14726 = vmatprep.subr.mxu0 %v11458_v40  ;;  %14526 = vmatprep.mubr.f32.mxu1 %v18222_v36  ;;  %v18248_v29 = vld [vmem:[#allocation2 + $0x260] sm:$0xff] }
 0x349   : > { %v6771_v25 = vpop.f32.mrf.mxu0  ;;  %14727 = vmatpush3.msra.mxu0 %v11458_v40  ;;  %v14048_v62 = vpop.f32.mrf.mxu1  ;;  %14527 = vmatmul.mubr.f32.gmra.mxu1 %v18228_v37  ;;  %v11440_v38 = vld [vmem:[%s19248_s1 + $0xbc0] sm:$0xff] }
 0x34a   : > { %v18244_v12 = vadd.f32 %v6771_v25, %v6520_v27  ;;  %v6523_v61 = vadd.f32 %v14048_v62, %v17957_v41  ;;  %14606 = vmatprep.mubr.f32.mxu0 %v17931_v34  ;;  %14648 = vmatprep.subr.mxu1 %v11441_v17  ;;  %v8811_v34 = vld [vmem:[#allocation2 + $0x261] sm:$0xff] }
 0x34b   : > { %v14128_v53 = vpop.f32.mrf.mxu0  ;;  %14607 = vmatmul.mubr.f32.gmra.mxu0 %v17945_v8  ;;  %14649 = vmatpush3.msra.mxu1 %v11441_v17  ;;  %v6411_v40 = vpop.f32.mrf.mxu1  ;;  %v11456_v8 = vld [vmem:[%s19248_s1 + $0xc40] sm:$0xff]  ;;  %v8442_v17 = vld [vmem:[#allocation2 + $0x290] sm:$0xff] }
 0x34c   : > { %v18254_v26 = vadd.f32 %v14128_v53, %v6523_v61  ;;  %v6522_v42 = vadd.f32 %v6411_v40, %v17965_v9  ;;  %14728 = vmatprep.subr.mxu0 %v11457_v23  ;;  %14529 = vmatprep.mubr.f32.mxu1 %v18242_v63  ;;  %v18266_v9 = vld [vmem:[#allocation2 + $0x2a0] sm:$0xff]  ;;  %v11439_v53 = vld [vmem:[%s19248_s1 + $0xbb8] sm:$0xff] }
 0x34d   : > { %v6781_v41 = vpop.f32.mrf.mxu0  ;;  %14729 = vmatpush3.msra.mxu0 %v11457_v23  ;;  %v14051_v27 = vpop.f32.mrf.mxu1  ;;  %14530 = vmatmul.mubr.f32.gmra.mxu1 %v18248_v29 }
 0x34e   : > { %v18262_v25 = vadd.f32 %v6781_v41, %v6522_v42  ;;  %v6525_v62 = vadd.f32 %v14051_v27, %v17975_v18  ;;  %14609 = vmatprep.mubr.f32.mxu0 %v17951_v57  ;;  %14650 = vmatprep.subr.mxu1 %v11440_v38 }
 0x34f   : > { %v14131_v61 = vpop.f32.mrf.mxu0  ;;  %14610 = vmatmul.mubr.f32.gmra.mxu0 %v8811_v34  ;;  %14651 = vmatpush3.msra.mxu1 %v11440_v38  ;;  %v6421_v23 = vpop.f32.mrf.mxu1  ;;  %v11455_v38 = vld [vmem:[%s19248_s1 + $0xc38] sm:$0xff]  ;;  %v18278_v34 = vld [vmem:[#allocation2 + $0x2b0] sm:$0xff] }
 0x350   : > { %v18271_v40 = vadd.f32 %v14131_v61, %v6525_v62  ;;  %v6524_v42 = vadd.f32 %v6421_v23, %v17984_v50  ;;  %14730 = vmatprep.subr.mxu0 %v11456_v8  ;;  %14532 = vmatprep.mubr.f32.mxu1 %v8442_v17  ;;  %v19469_v62 = vld [vmem:[#allocation21_spill] sm:$0xff]  ;;  %v18284_v50 = vld [vmem:[#allocation2 + $0x2c0] sm:$0xff] }
 0x351   : > { %v6791_v18 = vpop.f32.mrf.mxu0  ;;  %14731 = vmatpush3.msra.mxu0 %v11456_v8  ;;  %v14054_v57 = vpop.f32.mrf.mxu1  ;;  %14533 = vmatmul.mubr.f32.gmra.mxu1 %v18266_v9  ;;  %v11438_v61 = vld [vmem:[%s19248_s1 + $0xbb0] sm:$0xff] }
 0x352   : > { %v18280_v41 = vadd.f32 %v6791_v18, %v6524_v42  ;;  %v6527_v27 = vadd.f32 %v14054_v57, %v17992_v30  ;;  %14612 = vmatprep.mubr.f32.mxu0 %v19469_v62  ;;  %14652 = vmatprep.subr.mxu1 %v11439_v53 }
 0x353   : > { %v14134_v17 = vpop.f32.mrf.mxu0  ;;  %14613 = vmatmul.mubr.f32.gmra.mxu0 %v17982_v13  ;;  %14653 = vmatpush3.msra.mxu1 %v11439_v53  ;;  %v6431_v8 = vpop.f32.mrf.mxu1  ;;  %v11454_v13 = vld [vmem:[%s19248_s1 + $0xc30] sm:$0xff] }
 0x354   : > { %v18290_v23 = vadd.f32 %v14134_v17, %v6527_v27  ;;  %v6526_v42 = vadd.f32 %v6431_v8, %v18002_v54  ;;  %14732 = vmatprep.subr.mxu0 %v11455_v38  ;;  %14535 = vmatprep.mubr.f32.mxu1 %v18278_v34  ;;  %v18298_v53 = vld [vmem:[#allocation2 + $0x2d0] sm:$0xff]  ;;  %v18304_v54 = vld [vmem:[#allocation2 + $0x2e0] sm:$0xff]  ;;  %v11437_v17 = vld [vmem:[%s19248_s1 + $0xba8] sm:$0xff] }
 0x355   : > { %v6801_v30 = vpop.f32.mrf.mxu0  ;;  %14733 = vmatpush3.msra.mxu0 %v11455_v38  ;;  %v14057_v18 = vpop.f32.mrf.mxu1  ;;  %14536 = vmatmul.mubr.f32.gmra.mxu1 %v18284_v50 }
 0x356   : > { %v18300_v57 = vadd.f32 %v6801_v30, %v6526_v42  ;;  %v6529_v27 = vadd.f32 %v14057_v18, %v18012_v49  ;;  %14615 = vmatprep.mubr.f32.mxu0 %v17987_v22  ;;  %14654 = vmatprep.subr.mxu1 %v11438_v61 }
 0x357   : > { %v14137_v62 = vpop.f32.mrf.mxu0  ;;  %14616 = vmatmul.mubr.f32.gmra.mxu0 %v18000_v51  ;;  %14655 = vmatpush3.msra.mxu1 %v11438_v61  ;;  %v6441_v38 = vpop.f32.mrf.mxu1  ;;  %v11453_v51 = vld [vmem:[%s19248_s1 + $0xc28] sm:$0xff]  ;;  %v18318_v61 = vld [vmem:[#allocation2 + $0x2f0] sm:$0xff] }
 0x358   : > { %v18310_v8 = vadd.f32 %v14137_v62, %v6529_v27  ;;  %v6528_v42 = vadd.f32 %v6441_v38, %v18022_v7  ;;  %14734 = vmatprep.subr.mxu0 %v11454_v13  ;;  %14538 = vmatprep.mubr.f32.mxu1 %v18298_v53  ;;  %19470 = vst [vmem:[#allocation8_spill] sm:$0xff] %v18318_v61  ;;  %v18324_v7 = vld [vmem:[#allocation2 + $0x300] sm:$0xff] }
 0x359   : > { %v6811_v22 = vpop.f32.mrf.mxu0  ;;  %14735 = vmatpush3.msra.mxu0 %v11454_v13  ;;  %v14060_v49 = vpop.f32.mrf.mxu1  ;;  %14539 = vmatmul.mubr.f32.gmra.mxu1 %v18304_v54  ;;  %19471 = vst [vmem:[#allocation9_spill] sm:$0xff] %v18324_v7  ;;  %v11436_v62 = vld [vmem:[%s19248_s1 + $0xba0] sm:$0xff] }
 0x35a   : > { %v18320_v30 = vadd.f32 %v6811_v22, %v6528_v42  ;;  %v6531_v18 = vadd.f32 %v14060_v49, %v18032_v21  ;;  %14618 = vmatprep.mubr.f32.mxu0 %v18006_v24  ;;  %14656 = vmatprep.subr.mxu1 %v11437_v17  ;;  %v8819_v24 = vld [vmem:[#allocation2 + $0x301] sm:$0xff] }
 0x35b   : > { %v14140_v27 = vpop.f32.mrf.mxu0  ;;  %14619 = vmatmul.mubr.f32.gmra.mxu0 %v18020_v47  ;;  %14657 = vmatpush3.msra.mxu1 %v11437_v17  ;;  %v6451_v13 = vpop.f32.mrf.mxu1  ;;  %v11452_v47 = vld [vmem:[%s19248_s1 + $0xc20] sm:$0xff]  ;;  %v8450_v17 = vld [vmem:[#allocation2 + $0x330] sm:$0xff] }
 0x35c   : > { %v18330_v38 = vadd.f32 %v14140_v27, %v6531_v18  ;;  %v6530_v42 = vadd.f32 %v6451_v13, %v18040_v33  ;;  %14736 = vmatprep.subr.mxu0 %v11453_v51  ;;  %14541 = vmatprep.mubr.f32.mxu1 %v18318_v61  ;;  %v19472_v27 = vld [vmem:[#allocation22_spill] sm:$0xff]  ;;  %v18342_v33 = vld [vmem:[#allocation2 + $0x340] sm:$0xff] }
 0x35d   : > { %v6821_v21 = vpop.f32.mrf.mxu0  ;;  %14737 = vmatpush3.msra.mxu0 %v11453_v51  ;;  %v14063_v22 = vpop.f32.mrf.mxu1  ;;  %14542 = vmatmul.mubr.f32.gmra.mxu1 %v18324_v7  ;;  %19473 = vst [vmem:[#allocation10_spill] sm:$0xff] %v18342_v33  ;;  %v11435_v7 = vld [vmem:[%s19248_s1 + $0xb98] sm:$0xff] }
 0x35e   : > { %v18338_v49 = vadd.f32 %v6821_v21, %v6530_v42  ;;  %v6533_v18 = vadd.f32 %v14063_v22, %v18050_v45  ;;  %14621 = vmatprep.mubr.f32.mxu0 %v19472_v27  ;;  %14658 = vmatprep.subr.mxu1 %v11436_v62  ;;  %v19476_v27 = vld [vmem:[#allocation27_spill] sm:$0xff] }
 0x35f   : > { %v14143_v13 = vpop.f32.mrf.mxu0  ;;  %14622 = vmatmul.mubr.f32.gmra.mxu0 %v8819_v24  ;;  %14659 = vmatpush3.msra.mxu1 %v11436_v62  ;;  %v6461_v51 = vpop.f32.mrf.mxu1  ;;  %v11451_v62 = vld [vmem:[%s19248_s1 + $0xc18] sm:$0xff]  ;;  %v18354_v24 = vld [vmem:[#allocation2 + $0x350] sm:$0xff] }
 0x360   : > { %v18347_v61 = vadd.f32 %v14143_v13, %v6533_v18  ;;  %v6532_v42 = vadd.f32 %v6461_v51, %v18059_v35  ;;  %14738 = vmatprep.subr.mxu0 %v11452_v47  ;;  %14544 = vmatprep.mubr.f32.mxu1 %v8450_v17  ;;  %19475 = vst [vmem:[#allocation15_spill] sm:$0xff] %v18354_v24  ;;  %v19477_v13 = vld [vmem:[#allocation24_spill] sm:$0xff]  ;;  %v18360_v35 = vld [vmem:[#allocation2 + $0x360] sm:$0xff] }
 0x361   : > { %v6831_v45 = vpop.f32.mrf.mxu0  ;;  %14739 = vmatpush3.msra.mxu0 %v11452_v47  ;;  %v14066_v21 = vpop.f32.mrf.mxu1  ;;  %14545 = vmatmul.mubr.f32.gmra.mxu1 %v18342_v33  ;;  %19478 = vst [vmem:[#allocation16_spill] sm:$0xff] %v18360_v35  ;;  %v19479_v47 = vld [vmem:[#allocation25_spill] sm:$0xff] }
 0x362   : > { %19474 = vst [vmem:[#allocation11_spill] sm:$0xff] %v18347_v61  ;;  %v18356_v22 = vadd.f32 %v6831_v45, %v6532_v42  ;;  %v6535_v18 = vadd.f32 %v14066_v21, %v19476_v27  ;;  %14624 = vmatprep.mubr.f32.mxu0 %v19477_v13  ;;  %14660 = vmatprep.subr.mxu1 %v11435_v7  ;;  %v11434_v33 = vld [vmem:[%s19248_s1 + $0xb90] sm:$0xff] }
 0x363   : > { %v14146_v17 = vpop.f32.mrf.mxu0  ;;  %14625 = vmatmul.mubr.f32.gmra.mxu0 %v19479_v47  ;;  %14661 = vmatpush3.msra.mxu1 %v11435_v7  ;;  %v6471_v51 = vpop.f32.mrf.mxu1  ;;  %v11450_v7 = vld [vmem:[%s19248_s1 + $0xc10] sm:$0xff] }
 0x364   : > { %v18366_v61 = vadd.f32 %v14146_v17, %v6535_v18  ;;  %v6534_v42 = vadd.f32 %v6471_v51, %v18077_v44  ;;  %14740 = vmatprep.subr.mxu0 %v11451_v62  ;;  %14547 = vmatprep.mubr.f32.mxu1 %v18354_v24  ;;  %v18374_v27 = vld [vmem:[#allocation2 + $0x370] sm:$0xff]  ;;  %v19481_v17 = vld [vmem:[#allocation26_spill] sm:$0xff]  ;;  %v18380_v44 = vld [vmem:[#allocation2 + $0x380] sm:$0xff] }
 0x365   : > { %v6841_v45 = vpop.f32.mrf.mxu0  ;;  %14741 = vmatpush3.msra.mxu0 %v11451_v62  ;;  %v14069_v21 = vpop.f32.mrf.mxu1  ;;  %14548 = vmatmul.mubr.f32.gmra.mxu1 %v18360_v35  ;;  %19480 = vst [vmem:[#allocation12_spill] sm:$0xff] %v18374_v27  ;;  %19482 = vst [vmem:[#allocation13_spill] sm:$0xff] %v18380_v44  ;;  %v19483_v62 = vld [vmem:[#allocation28_spill] sm:$0xff] }
 0x366   : > { %v18376_v13 = vadd.f32 %v6841_v45, %v6534_v42  ;;  %v6537_v18 = vadd.f32 %v14069_v21, %v18085_v55  ;;  %14627 = vmatprep.mubr.f32.mxu0 %v19481_v17  ;;  %14662 = vmatprep.subr.mxu1 %v11434_v33  ;;  %v11433_v35 = vld [vmem:[%s19248_s1 + $0xb88] sm:$0xff]  ;;  %v18394_v21 = vld [vmem:[#allocation2 + $0x390] sm:$0xff] }
 0x367   : > { %v14149_v47 = vpop.f32.mrf.mxu0  ;;  %14628 = vmatmul.mubr.f32.gmra.mxu0 %v19483_v62  ;;  %14663 = vmatpush3.msra.mxu1 %v11434_v33  ;;  %v6481_v51 = vpop.f32.mrf.mxu1  ;;  %v11449_v33 = vld [vmem:[%s19248_s1 + $0xc08] sm:$0xff]  ;;  %19484 = vst [vmem:[#allocation14_spill] sm:$0xff] %v18394_v21 }
 0x368   : > { %v18386_v24 = vadd.f32 %v14149_v47, %v6537_v18  ;;  %v6536_v42 = vadd.f32 %v6481_v51, %v18095_v4  ;;  %14742 = vmatprep.subr.mxu0 %v11450_v7  ;;  %14550 = vmatprep.mubr.f32.mxu1 %v18374_v27  ;;  %v19485_v47 = vld [vmem:[#allocation29_spill] sm:$0xff]  ;;  %v18400_v4 = vld [vmem:[#allocation2 + $0x3a0] sm:$0xff] }
 0x369   : > { %v6851_v55 = vpop.f32.mrf.mxu0  ;;  %14743 = vmatpush3.msra.mxu0 %v11450_v7  ;;  %v14072_v45 = vpop.f32.mrf.mxu1  ;;  %14551 = vmatmul.mubr.f32.gmra.mxu1 %v18380_v44  ;;  %19486 = vst [vmem:[#allocation17_spill] sm:$0xff] %v18400_v4  ;;  %v19487_v7 = vld [vmem:[#allocation30_spill] sm:$0xff]  ;;  %v11432_v44 = vld [vmem:[%s19248_s1 + $0xb80] sm:$0xff] }
 0x36a   : > { %v18396_v17 = vadd.f32 %v6851_v55, %v6536_v42  ;;  %v6539_v18 = vadd.f32 %v14072_v45, %v18103_v46  ;;  %14630 = vmatprep.mubr.f32.mxu0 %v19485_v47  ;;  %14664 = vmatprep.subr.mxu1 %v11433_v35  ;;  %v8827_v46 = vld [vmem:[#allocation2 + $0x3a1] sm:$0xff]  ;;  %v9166_v47 = vld [vmem:[#allocation2 + $0x152] sm:$0xff] }
 0x36b   : > { %v14152_v62 = vpop.f32.mrf.mxu0  ;;  %14631 = vmatmul.mubr.f32.gmra.mxu0 %v19487_v7  ;;  %14665 = vmatpush3.msra.mxu1 %v11433_v35  ;;  %v6491_v51 = vpop.f32.mrf.mxu1  ;;  %v11448_v35 = vld [vmem:[%s19248_s1 + $0xc00] sm:$0xff] }
 0x36c   : > { %v18406_v27 = vadd.f32 %v14152_v62, %v6539_v18  ;;  %v6538_v42 = vadd.f32 %v6491_v51, %v18111_v31  ;;  %14744 = vmatprep.subr.mxu0 %v11449_v33  ;;  %14553 = vmatprep.mubr.f32.mxu1 %v18394_v21  ;;  %v19488_v62 = vld [vmem:[#allocation7_spill] sm:$0xff] }
 0x36d   : > { %v6861_v55 = vpop.f32.mrf.mxu0  ;;  %14745 = vmatpush3.msra.mxu0 %v11449_v33  ;;  %v14075_v45 = vpop.f32.mrf.mxu1  ;;  %14554 = vmatmul.mubr.f32.gmra.mxu1 %v18400_v4  ;;  %v18418_v31 = vld [vmem:[#allocation2 + $0x162] sm:$0xff]  ;;  %v11479_v4 = vld [vmem:[%s19248_s1 + $0xcf8] sm:$0xff] }
 0x36e   : > { %v18414_v7 = vadd.f32 %v6861_v55, %v6538_v42  ;;  %v6541_v18 = vadd.f32 %v14075_v45, %v18119_v19  ;;  %14633 = vmatprep.mubr.f32.mxu0 %v19488_v62  ;;  %14666 = vmatprep.subr.mxu1 %v11432_v44  ;;  %v11478_v62 = vld [vmem:[%s19248_s1 + $0xcf0] sm:$0xff] }
 0x36f   : > { %v14155_v51 = vpop.f32.mrf.mxu0  ;;  %14634 = vmatmul.mubr.f32.gmra.mxu0 %v8827_v46  ;;  %14667 = vmatpush3.msra.mxu1 %v11432_v44  ;;  %v6501_v33 = vpop.f32.mrf.mxu1  ;;  %v11495_v44 = vld [vmem:[%s19248_s1 + $0xd78] sm:$0xff] }
 0x370   : > { %v18423_v21 = vadd.f32 %v14155_v51, %v6541_v18  ;;  %v6540_v42 = vadd.f32 %v6501_v33, %v18128_v6  ;;  %14746 = vmatprep.subr.mxu0 %v11448_v35  ;;  %14668 = vmatprep.mubr.f32.mxu1 %v9166_v47  ;;  %v18430_v46 = vld [vmem:[#allocation2 + $0x172] sm:$0xff]  ;;  %v18436_v6 = vld [vmem:[#allocation2 + $0x182] sm:$0xff] }
 0x371   : > { %v6871_v19 = vpop.f32.mrf.mxu0  ;;  %14747 = vmatpush3.msra.mxu0 %v11448_v35  ;;  %v14190_v55 = vpop.f32.mrf.mxu1  ;;  %14669 = vmatmul.mubr.f32.vlgmr.msra.gmra.mxu1 %v18418_v31 }
 0x372   : > { %v18432_v45 = vadd.f32 %v6871_v19, %v6540_v42  ;;  %v7251_v18 = vadd.f32 %v14190_v55, %v18138_v1  ;;  %14748 = vmatprep.mubr.f32.mxu0 %v18114_v3  ;;  %14796 = vmatprep.subr.mxu1 %v11479_v4 }
 0x373   : > { %v14270_v47 = vpop.f32.mrf.mxu0  ;;  %14749 = vmatmul.mubr.f32.vlgmr.msra.gmra.mxu0 %v18126_v52  ;;  %14797 = vmatpush3.msra.mxu1 %v11479_v4  ;;  %v7091_v35 = vpop.f32.mrf.mxu1  ;;  %v11494_v52 = vld [vmem:[%s19248_s1 + $0xd70] sm:$0xff] }
 0x374   : > { %v18442_v51 = vadd.f32 %v14270_v47, %v7251_v18  ;;  %v7250_v33 = vadd.f32 %v7091_v35, %v18148_v15  ;;  %14876 = vmatprep.subr.mxu0 %v11495_v44  ;;  %14671 = vmatprep.mubr.f32.mxu1 %v18430_v46  ;;  %v18450_v4 = vld [vmem:[#allocation2 + $0x192] sm:$0xff]  ;;  %v18456_v15 = vld [vmem:[#allocation2 + $0x1a2] sm:$0xff] }
 0x375   : > { %v7462_v3 = vpop.f32.mrf.mxu0  ;;  %14877 = vmatpush3.msra.mxu0 %v11495_v44  ;;  %v14193_v1 = vpop.f32.mrf.mxu1  ;;  %14672 = vmatmul.mubr.f32.gmra.mxu1 %v18436_v6  ;;  %v11477_v18 = vld [vmem:[%s19248_s1 + $0xce8] sm:$0xff] }
 0x376   : > { %v18452_v42 = vadd.f32 %v7462_v3, %v7250_v33  ;;  %v7253_v19 = vadd.f32 %v14193_v1, %v18158_v48  ;;  %14751 = vmatprep.mubr.f32.mxu0 %v18132_v39  ;;  %14798 = vmatprep.subr.mxu1 %v11478_v62 }
 0x377   : > { %v14273_v55 = vpop.f32.mrf.mxu0  ;;  %14752 = vmatmul.mubr.f32.gmra.mxu0 %v18146_v2  ;;  %14799 = vmatpush3.msra.mxu1 %v11478_v62  ;;  %v7101_v44 = vpop.f32.mrf.mxu1  ;;  %v11493_v2 = vld [vmem:[%s19248_s1 + $0xd68] sm:$0xff]  ;;  %v18470_v62 = vld [vmem:[#allocation2 + $0x1b2] sm:$0xff] }
 0x378   : > { %v18462_v47 = vadd.f32 %v14273_v55, %v7253_v19  ;;  %v7252_v35 = vadd.f32 %v7101_v44, %v18168_v59  ;;  %14878 = vmatprep.subr.mxu0 %v11494_v52  ;;  %14674 = vmatprep.mubr.f32.mxu1 %v18450_v4  ;;  %v18476_v59 = vld [vmem:[#allocation2 + $0x1c2] sm:$0xff] }
 0x379   : > { %v7472_v39 = vpop.f32.mrf.mxu0  ;;  %14879 = vmatpush3.msra.mxu0 %v11494_v52  ;;  %v14196_v48 = vpop.f32.mrf.mxu1  ;;  %14675 = vmatmul.mubr.f32.gmra.mxu1 %v18456_v15  ;;  %v11476_v19 = vld [vmem:[%s19248_s1 + $0xce0] sm:$0xff] }
 0x37a   : > { %v18472_v33 = vadd.f32 %v7472_v39, %v7252_v35  ;;  %v7255_v3 = vadd.f32 %v14196_v48, %v18178_v11  ;;  %14754 = vmatprep.mubr.f32.mxu0 %v18152_v16  ;;  %14800 = vmatprep.subr.mxu1 %v11477_v18  ;;  %v9544_v16 = vld [vmem:[#allocation2 + $0x1d0] sm:$0xff] }
 0x37b   : > { %v14276_v1 = vpop.f32.mrf.mxu0  ;;  %14755 = vmatmul.mubr.f32.gmra.mxu0 %v18166_v20  ;;  %14801 = vmatpush3.msra.mxu1 %v11477_v18  ;;  %v7111_v52 = vpop.f32.mrf.mxu1  ;;  %v11492_v20 = vld [vmem:[%s19248_s1 + $0xd60] sm:$0xff]  ;;  %v9174_v18 = vld [vmem:[#allocation2 + $0x1f2] sm:$0xff] }
 0x37c   : > { %v18482_v55 = vadd.f32 %v14276_v1, %v7255_v3  ;;  %v7254_v44 = vadd.f32 %v7111_v52, %v18186_v60  ;;  %14880 = vmatprep.subr.mxu0 %v11493_v2  ;;  %14677 = vmatprep.mubr.f32.mxu1 %v18470_v62  ;;  %v18494_v60 = vld [vmem:[#allocation2 + $0x202] sm:$0xff]  ;;  %v11475_v1 = vld [vmem:[%s19248_s1 + $0xcd8] sm:$0xff] }
 0x37d   : > { %v7482_v11 = vpop.f32.mrf.mxu0  ;;  %14881 = vmatpush3.msra.mxu0 %v11493_v2  ;;  %v14199_v35 = vpop.f32.mrf.mxu1  ;;  %14678 = vmatmul.mubr.f32.gmra.mxu1 %v18476_v59 }
 0x37e   : > { %v18490_v39 = vadd.f32 %v7482_v11, %v7254_v44  ;;  %v7257_v48 = vadd.f32 %v14199_v35, %v18195_v5  ;;  %14757 = vmatprep.mubr.f32.mxu0 %v18172_v58  ;;  %14802 = vmatprep.subr.mxu1 %v11476_v19 }
 0x37f   : > { %v14279_v3 = vpop.f32.mrf.mxu0  ;;  %14758 = vmatmul.mubr.f32.gmra.mxu0 %v9544_v16  ;;  %14803 = vmatpush3.msra.mxu1 %v11476_v19  ;;  %v7121_v2 = vpop.f32.mrf.mxu1  ;;  %v11491_v19 = vld [vmem:[%s19248_s1 + $0xd58] sm:$0xff] }
 0x380   : > { %v18499_v52 = vadd.f32 %v14279_v3, %v7257_v48  ;;  %v7256_v44 = vadd.f32 %v7121_v2, %v18204_v56  ;;  %14882 = vmatprep.subr.mxu0 %v11492_v20  ;;  %14680 = vmatprep.mubr.f32.mxu1 %v9174_v18  ;;  %v18506_v16 = vld [vmem:[#allocation2 + $0x212] sm:$0xff]  ;;  %v18512_v56 = vld [vmem:[#allocation2 + $0x222] sm:$0xff] }
 0x381   : > { %v7492_v5 = vpop.f32.mrf.mxu0  ;;  %14883 = vmatpush3.msra.mxu0 %v11492_v20  ;;  %v14202_v58 = vpop.f32.mrf.mxu1  ;;  %14681 = vmatmul.mubr.f32.gmra.mxu1 %v18494_v60  ;;  %v11474_v48 = vld [vmem:[%s19248_s1 + $0xcd0] sm:$0xff] }
 0x382   : > { %v18508_v11 = vadd.f32 %v7492_v5, %v7256_v44  ;;  %v7259_v35 = vadd.f32 %v14202_v58, %v18214_v10  ;;  %14760 = vmatprep.mubr.f32.mxu0 %v18190_v32  ;;  %14804 = vmatprep.subr.mxu1 %v11475_v1 }
 0x383   : > { %v14282_v18 = vpop.f32.mrf.mxu0  ;;  %14761 = vmatmul.mubr.f32.gmra.mxu0 %v18202_v28  ;;  %14805 = vmatpush3.msra.mxu1 %v11475_v1  ;;  %v7131_v20 = vpop.f32.mrf.mxu1  ;;  %v11490_v28 = vld [vmem:[%s19248_s1 + $0xd50] sm:$0xff] }
 0x384   : > { %v18518_v3 = vadd.f32 %v14282_v18, %v7259_v35  ;;  %v7258_v2 = vadd.f32 %v7131_v20, %v18224_v43  ;;  %14884 = vmatprep.subr.mxu0 %v11491_v19  ;;  %14683 = vmatprep.mubr.f32.mxu1 %v18506_v16  ;;  %v18526_v1 = vld [vmem:[#allocation2 + $0x232] sm:$0xff]  ;;  %v18532_v43 = vld [vmem:[#allocation2 + $0x242] sm:$0xff] }
 0x385   : > { %v7502_v32 = vpop.f32.mrf.mxu0  ;;  %14885 = vmatpush3.msra.mxu0 %v11491_v19  ;;  %v14205_v10 = vpop.f32.mrf.mxu1  ;;  %14684 = vmatmul.mubr.f32.gmra.mxu1 %v18512_v56  ;;  %v11473_v35 = vld [vmem:[%s19248_s1 + $0xcc8] sm:$0xff] }
 0x386   : > { %v18528_v44 = vadd.f32 %v7502_v32, %v7258_v2  ;;  %v7261_v5 = vadd.f32 %v14205_v10, %v18234_v14  ;;  %14763 = vmatprep.mubr.f32.mxu0 %v18208_v0  ;;  %14806 = vmatprep.subr.mxu1 %v11474_v48 }
 0x387   : > { %v14285_v58 = vpop.f32.mrf.mxu0  ;;  %14764 = vmatmul.mubr.f32.gmra.mxu0 %v18222_v36  ;;  %14807 = vmatpush3.msra.mxu1 %v11474_v48  ;;  %v7141_v19 = vpop.f32.mrf.mxu1  ;;  %v11489_v36 = vld [vmem:[%s19248_s1 + $0xd48] sm:$0xff]  ;;  %v18546_v48 = vld [vmem:[#allocation2 + $0x252] sm:$0xff] }
 0x388   : > { %v18538_v18 = vadd.f32 %v14285_v58, %v7261_v5  ;;  %v7260_v20 = vadd.f32 %v7141_v19, %v18244_v12  ;;  %14886 = vmatprep.subr.mxu0 %v11490_v28  ;;  %14686 = vmatprep.mubr.f32.mxu1 %v18526_v1  ;;  %v18552_v12 = vld [vmem:[#allocation2 + $0x262] sm:$0xff] }
 0x389   : > { %v7512_v0 = vpop.f32.mrf.mxu0  ;;  %14887 = vmatpush3.msra.mxu0 %v11490_v28  ;;  %v14208_v14 = vpop.f32.mrf.mxu1  ;;  %14687 = vmatmul.mubr.f32.gmra.mxu1 %v18532_v43  ;;  %v11472_v5 = vld [vmem:[%s19248_s1 + $0xcc0] sm:$0xff] }
 0x38a   : > { %v18548_v2 = vadd.f32 %v7512_v0, %v7260_v20  ;;  %v7263_v32 = vadd.f32 %v14208_v14, %v18254_v26  ;;  %14766 = vmatprep.mubr.f32.mxu0 %v18228_v37  ;;  %14808 = vmatprep.subr.mxu1 %v11473_v35  ;;  %v9552_v37 = vld [vmem:[#allocation2 + $0x270] sm:$0xff] }
 0x38b   : > { %v14288_v10 = vpop.f32.mrf.mxu0  ;;  %14767 = vmatmul.mubr.f32.gmra.mxu0 %v18242_v63  ;;  %14809 = vmatpush3.msra.mxu1 %v11473_v35  ;;  %v7151_v28 = vpop.f32.mrf.mxu1  ;;  %v11488_v63 = vld [vmem:[%s19248_s1 + $0xd40] sm:$0xff]  ;;  %v9182_v35 = vld [vmem:[#allocation2 + $0x292] sm:$0xff] }
 0x38c   : > { %v18558_v58 = vadd.f32 %v14288_v10, %v7263_v32  ;;  %v7262_v19 = vadd.f32 %v7151_v28, %v18262_v25  ;;  %14888 = vmatprep.subr.mxu0 %v11489_v36  ;;  %14689 = vmatprep.mubr.f32.mxu1 %v18546_v48  ;;  %v18570_v25 = vld [vmem:[#allocation2 + $0x2a2] sm:$0xff]  ;;  %v11471_v10 = vld [vmem:[%s19248_s1 + $0xcb8] sm:$0xff] }
 0x38d   : > { %v7522_v26 = vpop.f32.mrf.mxu0  ;;  %14889 = vmatpush3.msra.mxu0 %v11489_v36  ;;  %v14211_v20 = vpop.f32.mrf.mxu1  ;;  %14690 = vmatmul.mubr.f32.gmra.mxu1 %v18552_v12 }
 0x38e   : > { %v18566_v0 = vadd.f32 %v7522_v26, %v7262_v19  ;;  %v7265_v14 = vadd.f32 %v14211_v20, %v18271_v40  ;;  %14769 = vmatprep.mubr.f32.mxu0 %v18248_v29  ;;  %14810 = vmatprep.subr.mxu1 %v11472_v5 }
 0x38f   : > { %v14291_v32 = vpop.f32.mrf.mxu0  ;;  %14770 = vmatmul.mubr.f32.gmra.mxu0 %v9552_v37  ;;  %14811 = vmatpush3.msra.mxu1 %v11472_v5  ;;  %v7161_v36 = vpop.f32.mrf.mxu1  ;;  %v11487_v5 = vld [vmem:[%s19248_s1 + $0xd38] sm:$0xff] }
 0x390   : > { %v18575_v28 = vadd.f32 %v14291_v32, %v7265_v14  ;;  %v7264_v19 = vadd.f32 %v7161_v36, %v18280_v41  ;;  %14890 = vmatprep.subr.mxu0 %v11488_v63  ;;  %14692 = vmatprep.mubr.f32.mxu1 %v9182_v35  ;;  %v18582_v37 = vld [vmem:[#allocation2 + $0x2b2] sm:$0xff]  ;;  %v18588_v41 = vld [vmem:[#allocation2 + $0x2c2] sm:$0xff] }
 0x391   : > { %v7532_v40 = vpop.f32.mrf.mxu0  ;;  %14891 = vmatpush3.msra.mxu0 %v11488_v63  ;;  %v14214_v29 = vpop.f32.mrf.mxu1  ;;  %14693 = vmatmul.mubr.f32.gmra.mxu1 %v18570_v25  ;;  %v11470_v14 = vld [vmem:[%s19248_s1 + $0xcb0] sm:$0xff] }
 0x392   : > { %v18584_v26 = vadd.f32 %v7532_v40, %v7264_v19  ;;  %v7267_v20 = vadd.f32 %v14214_v29, %v18290_v23  ;;  %14772 = vmatprep.mubr.f32.mxu0 %v18266_v9  ;;  %14812 = vmatprep.subr.mxu1 %v11471_v10 }
 0x393   : > { %v14294_v35 = vpop.f32.mrf.mxu0  ;;  %14773 = vmatmul.mubr.f32.gmra.mxu0 %v18278_v34  ;;  %14813 = vmatpush3.msra.mxu1 %v11471_v10  ;;  %v7171_v63 = vpop.f32.mrf.mxu1  ;;  %v11486_v34 = vld [vmem:[%s19248_s1 + $0xd30] sm:$0xff] }
 0x394   : > { %v18594_v32 = vadd.f32 %v14294_v35, %v7267_v20  ;;  %v7266_v36 = vadd.f32 %v7171_v63, %v18300_v57  ;;  %14892 = vmatprep.subr.mxu0 %v11487_v5  ;;  %14695 = vmatprep.mubr.f32.mxu1 %v18582_v37  ;;  %v18602_v10 = vld [vmem:[#allocation2 + $0x2d2] sm:$0xff]  ;;  %v18608_v57 = vld [vmem:[#allocation2 + $0x2e2] sm:$0xff] }
 0x395   : > { %v7542_v9 = vpop.f32.mrf.mxu0  ;;  %14893 = vmatpush3.msra.mxu0 %v11487_v5  ;;  %v14217_v23 = vpop.f32.mrf.mxu1  ;;  %14696 = vmatmul.mubr.f32.gmra.mxu1 %v18588_v41  ;;  %v11469_v20 = vld [vmem:[%s19248_s1 + $0xca8] sm:$0xff] }
 0x396   : > { %v18604_v19 = vadd.f32 %v7542_v9, %v7266_v36  ;;  %v7269_v40 = vadd.f32 %v14217_v23, %v18310_v8  ;;  %14775 = vmatprep.mubr.f32.mxu0 %v18284_v50  ;;  %14814 = vmatprep.subr.mxu1 %v11470_v14 }
 0x397   : > { %v14297_v29 = vpop.f32.mrf.mxu0  ;;  %14776 = vmatmul.mubr.f32.gmra.mxu0 %v18298_v53  ;;  %14815 = vmatpush3.msra.mxu1 %v11470_v14  ;;  %v7181_v5 = vpop.f32.mrf.mxu1  ;;  %v11485_v53 = vld [vmem:[%s19248_s1 + $0xd28] sm:$0xff]  ;;  %v18622_v14 = vld [vmem:[#allocation2 + $0x2f2] sm:$0xff] }
 0x398   : > { %v18614_v35 = vadd.f32 %v14297_v29, %v7269_v40  ;;  %v7268_v63 = vadd.f32 %v7181_v5, %v18320_v30  ;;  %14894 = vmatprep.subr.mxu0 %v11486_v34  ;;  %14698 = vmatprep.mubr.f32.mxu1 %v18602_v10  ;;  %19489 = vst [vmem:[#allocation18_spill] sm:$0xff] %v18622_v14  ;;  %v18628_v30 = vld [vmem:[#allocation2 + $0x302] sm:$0xff] }
 0x399   : > { %v7552_v50 = vpop.f32.mrf.mxu0  ;;  %14895 = vmatpush3.msra.mxu0 %v11486_v34  ;;  %v14220_v8 = vpop.f32.mrf.mxu1  ;;  %14699 = vmatmul.mubr.f32.gmra.mxu1 %v18608_v57  ;;  %19490 = vst [vmem:[#allocation19_spill] sm:$0xff] %v18628_v30  ;;  %v19491_v34 = vld [vmem:[#allocation8_spill] sm:$0xff]  ;;  %v11468_v29 = vld [vmem:[%s19248_s1 + $0xca0] sm:$0xff] }
 0x39a   : > { %v18624_v36 = vadd.f32 %v7552_v50, %v7268_v63  ;;  %v7271_v9 = vadd.f32 %v14220_v8, %v18330_v38  ;;  %14778 = vmatprep.mubr.f32.mxu0 %v18304_v54  ;;  %14816 = vmatprep.subr.mxu1 %v11469_v20  ;;  %v9560_v54 = vld [vmem:[#allocation2 + $0x310] sm:$0xff] }
 0x39b   : > { %v14300_v23 = vpop.f32.mrf.mxu0  ;;  %14779 = vmatmul.mubr.f32.gmra.mxu0 %v19491_v34  ;;  %14817 = vmatpush3.msra.mxu1 %v11469_v20  ;;  %v7191_v40 = vpop.f32.mrf.mxu1  ;;  %v11484_v20 = vld [vmem:[%s19248_s1 + $0xd20] sm:$0xff]  ;;  %v9190_v8 = vld [vmem:[#allocation2 + $0x332] sm:$0xff] }
 0x39c   : > { %v18634_v5 = vadd.f32 %v14300_v23, %v7271_v9  ;;  %v7270_v63 = vadd.f32 %v7191_v40, %v18338_v49  ;;  %14896 = vmatprep.subr.mxu0 %v11485_v53  ;;  %14701 = vmatprep.mubr.f32.mxu1 %v18622_v14  ;;  %v19493_v9 = vld [vmem:[#allocation11_spill] sm:$0xff] }
 0x39d   : > { %v7562_v38 = vpop.f32.mrf.mxu0  ;;  %14897 = vmatpush3.msra.mxu0 %v11485_v53  ;;  %v14223_v50 = vpop.f32.mrf.mxu1  ;;  %14702 = vmatmul.mubr.f32.gmra.mxu1 %v18628_v30  ;;  %v18646_v49 = vld [vmem:[#allocation2 + $0x342] sm:$0xff]  ;;  %v11467_v30 = vld [vmem:[%s19248_s1 + $0xc98] sm:$0xff] }
 0x39e   : > { %19492 = vst [vmem:[#allocation20_spill] sm:$0xff] %v18634_v5  ;;  %v18642_v34 = vadd.f32 %v7562_v38, %v7270_v63  ;;  %v7273_v23 = vadd.f32 %v14223_v50, %v19493_v9  ;;  %v19494_v5 = vld [vmem:[#allocation9_spill] sm:$0xff]  ;;  %14818 = vmatprep.subr.mxu1 %v11468_v29  ;;  %19495 = vst [vmem:[#allocation23_spill] sm:$0xff] %v18646_v49  ;;  %14898 = vmatprep.subr.mxu0 %v11484_v20 }
 0x39f   : > { %14781 = vmatprep.mubr.f32.mxu0 %v19494_v5  ;;  %v14303_v40 = vpop.f32.mrf.mxu0  ;;  %14819 = vmatpush3.msra.mxu1 %v11468_v29  ;;  %v7201_v53 = vpop.f32.mrf.mxu1  ;;  %v11483_v29 = vld [vmem:[%s19248_s1 + $0xd18] sm:$0xff] }
 0x3a0   : > { %14782 = vmatmul.mubr.f32.gmra.mxu0 %v9560_v54  ;;  %v18651_v14 = vadd.f32 %v14303_v40, %v7273_v23  ;;  %v7272_v63 = vadd.f32 %v7201_v53, %v18356_v22  ;;  %14704 = vmatprep.mubr.f32.mxu1 %v9190_v8  ;;  %v18658_v54 = vld [vmem:[#allocation2 + $0x352] sm:$0xff]  ;;  %v18664_v22 = vld [vmem:[#allocation2 + $0x362] sm:$0xff] }
 0x3a1   : > { %v7572_v38 = vpop.f32.mrf.mxu0  ;;  %14899 = vmatpush3.msra.mxu0 %v11484_v20  ;;  %v14226_v5 = vpop.f32.mrf.mxu1  ;;  %14705 = vmatmul.mubr.f32.gmra.mxu1 %v18646_v49  ;;  %19496 = vst [vmem:[#allocation21_spill] sm:$0xff] %v18658_v54  ;;  %v19497_v23 = vld [vmem:[#allocation10_spill] sm:$0xff]  ;;  %19498 = vst [vmem:[#allocation22_spill] sm:$0xff] %v18664_v22  ;;  %v19499_v20 = vld [vmem:[#allocation15_spill] sm:$0xff] }
 0x3a2   : > { %v18660_v50 = vadd.f32 %v7572_v38, %v7272_v63  ;;  %v7275_v9 = vadd.f32 %v14226_v5, %v18366_v61  ;;  %14784 = vmatprep.mubr.f32.mxu0 %v19497_v23  ;;  %14820 = vmatprep.subr.mxu1 %v11467_v30  ;;  %v11466_v53 = vld [vmem:[%s19248_s1 + $0xc90] sm:$0xff] }
 0x3a3   : > { %v14306_v8 = vpop.f32.mrf.mxu0  ;;  %14821 = vmatpush3.msra.mxu1 %v11467_v30  ;;  %v7211_v40 = vpop.f32.mrf.mxu1  ;;  %14900 = vmatprep.subr.mxu0 %v11483_v29  ;;  %v11482_v30 = vld [vmem:[%s19248_s1 + $0xd10] sm:$0xff] }
 0x3a4   : > { %14785 = vmatmul.mubr.f32.gmra.mxu0 %v19499_v20  ;;  %v18670_v49 = vadd.f32 %v14306_v8, %v7275_v9  ;;  %v7274_v63 = vadd.f32 %v7211_v40, %v18376_v13  ;;  %14707 = vmatprep.mubr.f32.mxu1 %v18658_v54  ;;  %v18678_v5 = vld [vmem:[#allocation2 + $0x372] sm:$0xff]  ;;  %v19501_v8 = vld [vmem:[#allocation16_spill] sm:$0xff] }
 0x3a5   : > { %v7582_v61 = vpop.f32.mrf.mxu0  ;;  %14901 = vmatpush3.msra.mxu0 %v11483_v29  ;;  %v14229_v38 = vpop.f32.mrf.mxu1  ;;  %14708 = vmatmul.mubr.f32.gmra.mxu1 %v18664_v22  ;;  %19500 = vst [vmem:[#allocation27_spill] sm:$0xff] %v18678_v5  ;;  %v18684_v13 = vld [vmem:[#allocation2 + $0x382] sm:$0xff] }
 0x3a6   : > { %v18680_v23 = vadd.f32 %v7582_v61, %v7274_v63  ;;  %v7277_v9 = vadd.f32 %v14229_v38, %v18386_v24  ;;  %14787 = vmatprep.mubr.f32.mxu0 %v19501_v8  ;;  %14822 = vmatprep.subr.mxu1 %v11466_v53  ;;  %19502 = vst [vmem:[#allocation24_spill] sm:$0xff] %v18684_v13  ;;  %v19503_v29 = vld [vmem:[#allocation12_spill] sm:$0xff]  ;;  %v18698_v38 = vld [vmem:[#allocation2 + $0x392] sm:$0xff] }
 0x3a7   : > { %v14309_v20 = vpop.f32.mrf.mxu0  ;;  %14823 = vmatpush3.msra.mxu1 %v11466_v53  ;;  %v7221_v40 = vpop.f32.mrf.mxu1  ;;  %v11465_v22 = vld [vmem:[%s19248_s1 + $0xc88] sm:$0xff]  ;;  %14902 = vmatprep.subr.mxu0 %v11482_v30  ;;  %19504 = vst [vmem:[#allocation25_spill] sm:$0xff] %v18698_v38 }
 0x3a8   : > { %14788 = vmatmul.mubr.f32.gmra.mxu0 %v19503_v29  ;;  %v18690_v54 = vadd.f32 %v14309_v20, %v7277_v9  ;;  %v7276_v63 = vadd.f32 %v7221_v40, %v18396_v17  ;;  %14710 = vmatprep.mubr.f32.mxu1 %v18678_v5  ;;  %v11481_v53 = vld [vmem:[%s19248_s1 + $0xd08] sm:$0xff]  ;;  %v19506_v20 = vld [vmem:[#allocation13_spill] sm:$0xff] }
 0x3a9   : > { %v7592_v24 = vpop.f32.mrf.mxu0  ;;  %14903 = vmatpush3.msra.mxu0 %v11482_v30  ;;  %v14232_v61 = vpop.f32.mrf.mxu1  ;;  %14711 = vmatmul.mubr.f32.gmra.mxu1 %v18684_v13  ;;  %v18704_v17 = vld [vmem:[#allocation2 + $0x3a2] sm:$0xff]  ;;  %v19508_v30 = vld [vmem:[#allocation14_spill] sm:$0xff] }
 0x3aa   : > { %v18700_v8 = vadd.f32 %v7592_v24, %v7276_v63  ;;  %v7279_v9 = vadd.f32 %v14232_v61, %v18406_v27  ;;  %14790 = vmatprep.mubr.f32.mxu0 %v19506_v20  ;;  %14824 = vmatprep.subr.mxu1 %v11465_v22  ;;  %19507 = vst [vmem:[#allocation28_spill] sm:$0xff] %v18704_v17  ;;  %v11464_v13 = vld [vmem:[%s19248_s1 + $0xc80] sm:$0xff]  ;;  %v9568_v27 = vld [vmem:[#allocation2 + $0x3b0] sm:$0xff] }
 0x3ab   : > { %v14312_v29 = vpop.f32.mrf.mxu0  ;;  %14825 = vmatpush3.msra.mxu1 %v11465_v22  ;;  %v7231_v40 = vpop.f32.mrf.mxu1  ;;  %14904 = vmatprep.subr.mxu0 %v11481_v53  ;;  %v11480_v22 = vld [vmem:[%s19248_s1 + $0xd00] sm:$0xff] }
 0x3ac   : > { %19505 = vst [vmem:[#allocation26_spill] sm:$0xff] %v18700_v8  ;;  %14791 = vmatmul.mubr.f32.gmra.mxu0 %v19508_v30  ;;  %v18710_v5 = vadd.f32 %v14312_v29, %v7279_v9  ;;  %v7278_v63 = vadd.f32 %v7231_v40, %v18414_v7  ;;  %14713 = vmatprep.mubr.f32.mxu1 %v18698_v38  ;;  %v9907_v20 = vld [vmem:[#allocation2 + $0x161] sm:$0xff]  ;;  %v19510_v29 = vld [vmem:[#allocation17_spill] sm:$0xff] }
 0x3ad   : > { %v7602_v24 = vpop.f32.mrf.mxu0  ;;  %14905 = vmatpush3.msra.mxu0 %v11481_v53  ;;  %v14235_v61 = vpop.f32.mrf.mxu1  ;;  %14714 = vmatmul.mubr.f32.gmra.mxu1 %v18704_v17  ;;  %v9908_v7 = vld [vmem:[#allocation2 + $0x171] sm:$0xff]  ;;  %v9909_v38 = vld [vmem:[#allocation2 + $0x181] sm:$0xff] }
 0x3ae   : > { %19509 = vst [vmem:[#allocation29_spill] sm:$0xff] %v18710_v5  ;;  %v18718_v30 = vadd.f32 %v7602_v24, %v7278_v63  ;;  %v7281_v9 = vadd.f32 %v14235_v61, %v18423_v21  ;;  %14793 = vmatprep.mubr.f32.mxu0 %v19510_v29  ;;  %14826 = vmatprep.subr.mxu1 %v11464_v13  ;;  %v9913_v29 = vld [vmem:[#allocation2 + $0x1c1] sm:$0xff] }
 0x3af   : > { %v14315_v40 = vpop.f32.mrf.mxu0  ;;  %14827 = vmatpush3.msra.mxu1 %v11464_v13  ;;  %v7241_v53 = vpop.f32.mrf.mxu1  ;;  %14906 = vmatprep.subr.mxu0 %v11480_v22  ;;  %v9910_v13 = vld [vmem:[#allocation2 + $0x191] sm:$0xff] }
 0x3b0   : > { %14794 = vmatmul.mubr.f32.gmra.mxu0 %v9568_v27  ;;  %v18722_v5 = vadd.f32 %v14315_v40, %v7281_v9  ;;  %v7280_v17 = vadd.f32 %v7241_v53, %v18432_v45  ;;  %14828 = vmatprep.mubr.f32.mxu1 %v9907_v20  ;;  %v9911_v9 = vld [vmem:[#allocation2 + $0x1a1] sm:$0xff] }
 0x3b1   : > { %v7612_v8 = vpop.f32.mrf.mxu0  ;;  %14907 = vmatpush3.msra.mxu0 %v11480_v22  ;;  %v14350_v63 = vpop.f32.mrf.mxu1  ;;  %14829 = vmatmul.mubr.f32.vlgmr.msra.gmra.mxu1 %v9908_v7 }
 0x3b2   : > { %v18725_v21 = vadd.f32 %v7612_v8, %v7280_v17  ;;  %v7992_v24 = vadd.f32 %v14350_v63, %v18442_v51  ;;  %14908 = vmatprep.mubr.f32.mxu0 %v18418_v31  ;;  %14831 = vmatprep.mubr.f32.mxu1 %v9909_v38  ;;  %v9912_v51 = vld [vmem:[#allocation2 + $0x1b1] sm:$0xff] }
 0x3b3   : > { %v14430_v27 = vpop.f32.mrf.mxu0  ;;  %v7832_v61 = vpop.f32.mrf.mxu1  ;;  %v9914_v63 = vld [vmem:[#allocation2 + $0x1d1] sm:$0xff] }
 0x3b4   : > { %14909 = vmatmul.mubr.f32.vlgmr.msra.gmra.mxu0 %v18430_v46  ;;  %v18730_v45 = vadd.f32 %v14430_v27, %v7992_v24  ;;  %v7991_v20 = vadd.f32 %v7832_v61, %v18452_v42 }
 0x3b5   : > { %14911 = vmatprep.mubr.f32.mxu0 %v18436_v6  ;;  %v8202_v22 = vpop.f32.mrf.mxu0  ;;  %v14353_v8 = vpop.f32.mrf.mxu1  ;;  %14832 = vmatmul.mubr.f32.gmra.mxu1 %v9910_v13  ;;  %v9915_v13 = vld [vmem:[#allocation2 + $0x201] sm:$0xff] }
 0x3b6   : > { %v18734_v17 = vadd.f32 %v8202_v22, %v7991_v20  ;;  %v7994_v31 = vadd.f32 %v14353_v8, %v18462_v47  ;;  %14834 = vmatprep.mubr.f32.mxu1 %v9911_v9  ;;  %v9916_v22 = vld [vmem:[#allocation2 + $0x211] sm:$0xff] }
 0x3b7   : > { %v14433_v38 = vpop.f32.mrf.mxu0  ;;  %v7842_v46 = vpop.f32.mrf.mxu1 }
 0x3b8   : > { %14912 = vmatmul.mubr.f32.gmra.mxu0 %v18450_v4  ;;  %v18738_v7 = vadd.f32 %v14433_v38, %v7994_v31  ;;  %v7993_v42 = vadd.f32 %v7842_v46, %v18472_v33  ;;  %v9917_v31 = vld [vmem:[#allocation2 + $0x221] sm:$0xff] }
 0x3b9   : > { %14914 = vmatprep.mubr.f32.mxu0 %v18456_v15  ;;  %v8212_v6 = vpop.f32.mrf.mxu0  ;;  %v14356_v40 = vpop.f32.mrf.mxu1  ;;  %14835 = vmatmul.mubr.f32.gmra.mxu1 %v9912_v51  ;;  %v10284_v15 = vld [vmem:[#allocation2 + $0x1d2] sm:$0xff] }
 0x3ba   : > { %v18742_v53 = vadd.f32 %v8212_v6, %v7993_v42  ;;  %v7996_v47 = vadd.f32 %v14356_v40, %v18482_v55  ;;  %14837 = vmatprep.mubr.f32.mxu1 %v9913_v29  ;;  %v9919_v40 = vld [vmem:[#allocation2 + $0x241] sm:$0xff] }
 0x3bb   : > { %v14436_v24 = vpop.f32.mrf.mxu0  ;;  %v7852_v4 = vpop.f32.mrf.mxu1 }
 0x3bc   : > { %14915 = vmatmul.mubr.f32.gmra.mxu0 %v18470_v62  ;;  %v18746_v27 = vadd.f32 %v14436_v24, %v7996_v47  ;;  %v7995_v33 = vadd.f32 %v7852_v4, %v18490_v39  ;;  %v9920_v4 = vld [vmem:[#allocation2 + $0x251] sm:$0xff] }
 0x3bd   : > { %14917 = vmatprep.mubr.f32.mxu0 %v18476_v59  ;;  %v8222_v61 = vpop.f32.mrf.mxu0  ;;  %v14359_v9 = vpop.f32.mrf.mxu1  ;;  %14838 = vmatmul.mubr.f32.gmra.mxu1 %v9914_v63 }
 0x3be   : > { %v18750_v20 = vadd.f32 %v8222_v61, %v7995_v33  ;;  %v7998_v55 = vadd.f32 %v14359_v9, %v18499_v52  ;;  %14840 = vmatprep.mubr.f32.mxu1 %v9915_v13  ;;  %v9918_v52 = vld [vmem:[#allocation2 + $0x231] sm:$0xff]  ;;  %v9921_v33 = vld [vmem:[#allocation2 + $0x261] sm:$0xff] }
 0x3bf   : > { %v14439_v8 = vpop.f32.mrf.mxu0  ;;  %v7862_v62 = vpop.f32.mrf.mxu1 }
 0x3c0   : > { %14918 = vmatmul.mubr.f32.gmra.mxu0 %v10284_v15  ;;  %v18753_v51 = vadd.f32 %v14439_v8, %v7998_v55  ;;  %v7997_v39 = vadd.f32 %v7862_v62, %v18508_v11  ;;  %v9922_v55 = vld [vmem:[#allocation2 + $0x271] sm:$0xff]  ;;  %v9923_v8 = vld [vmem:[#allocation2 + $0x2a1] sm:$0xff] }
 0x3c1   : > { %14920 = vmatprep.mubr.f32.mxu0 %v18494_v60  ;;  %v8232_v59 = vpop.f32.mrf.mxu0  ;;  %v14362_v38 = vpop.f32.mrf.mxu1  ;;  %14841 = vmatmul.mubr.f32.gmra.mxu1 %v9916_v22 }
 0x3c2   : > { %v18757_v46 = vadd.f32 %v8232_v59, %v7997_v39  ;;  %v8000_v29 = vadd.f32 %v14362_v38, %v18518_v3  ;;  %14843 = vmatprep.mubr.f32.mxu1 %v9917_v31  ;;  %v9924_v38 = vld [vmem:[#allocation2 + $0x2b1] sm:$0xff] }
 0x3c3   : > { %v14442_v42 = vpop.f32.mrf.mxu0  ;;  %v7872_v6 = vpop.f32.mrf.mxu1 }
 0x3c4   : > { %14921 = vmatmul.mubr.f32.gmra.mxu0 %v18506_v16  ;;  %v18761_v47 = vadd.f32 %v14442_v42, %v8000_v29  ;;  %v7999_v11 = vadd.f32 %v7872_v6, %v18528_v44 }
 0x3c5   : > { %14923 = vmatprep.mubr.f32.mxu0 %v18512_v56  ;;  %v8242_v60 = vpop.f32.mrf.mxu0  ;;  %v14365_v63 = vpop.f32.mrf.mxu1  ;;  %14844 = vmatmul.mubr.f32.gmra.mxu1 %v9918_v52  ;;  %v9925_v52 = vld [vmem:[#allocation2 + $0x2c1] sm:$0xff] }
 0x3c6   : > { %v18765_v24 = vadd.f32 %v8242_v60, %v7999_v11  ;;  %v8002_v3 = vadd.f32 %v14365_v63, %v18538_v18  ;;  %14846 = vmatprep.mubr.f32.mxu1 %v9919_v40 }
 0x3c7   : > { %v14445_v13 = vpop.f32.mrf.mxu0  ;;  %v7882_v16 = vpop.f32.mrf.mxu1 }
 0x3c8   : > { %14924 = vmatmul.mubr.f32.gmra.mxu0 %v18526_v1  ;;  %v18769_v15 = vadd.f32 %v14445_v13, %v8002_v3  ;;  %v8001_v44 = vadd.f32 %v7882_v16, %v18548_v2  ;;  %v9927_v3 = vld [vmem:[#allocation2 + $0x2e1] sm:$0xff] }
 0x3c9   : > { %14926 = vmatprep.mubr.f32.mxu0 %v18532_v43  ;;  %v8252_v56 = vpop.f32.mrf.mxu0  ;;  %v14368_v61 = vpop.f32.mrf.mxu1  ;;  %14847 = vmatmul.mubr.f32.gmra.mxu1 %v9920_v4  ;;  %v10292_v43 = vld [vmem:[#allocation2 + $0x272] sm:$0xff] }
 0x3ca   : > { %v18773_v9 = vadd.f32 %v8252_v56, %v8001_v44  ;;  %v8004_v18 = vadd.f32 %v14368_v61, %v18558_v58  ;;  %14849 = vmatprep.mubr.f32.mxu1 %v9921_v33  ;;  %v9928_v33 = vld [vmem:[#allocation2 + $0x2f1] sm:$0xff]  ;;  %v9929_v56 = vld [vmem:[#allocation2 + $0x301] sm:$0xff] }
 0x3cb   : > { %v14448_v22 = vpop.f32.mrf.mxu0  ;;  %v7892_v1 = vpop.f32.mrf.mxu1 }
 0x3cc   : > { %14927 = vmatmul.mubr.f32.gmra.mxu0 %v18546_v48  ;;  %v18777_v62 = vadd.f32 %v14448_v22, %v8004_v18  ;;  %v8003_v2 = vadd.f32 %v7892_v1, %v18566_v0  ;;  %v19511_v22 = vld [vmem:[#allocation20_spill] sm:$0xff]  ;;  %v9930_v1 = vld [vmem:[#allocation2 + $0x311] sm:$0xff] }
 0x3cd   : > { %14929 = vmatprep.mubr.f32.mxu0 %v18552_v12  ;;  %v8262_v31 = vpop.f32.mrf.mxu0  ;;  %v14371_v39 = vpop.f32.mrf.mxu1  ;;  %14850 = vmatmul.mubr.f32.gmra.mxu1 %v9922_v55 }
 0x3ce   : > { %v18781_v59 = vadd.f32 %v8262_v31, %v8003_v2  ;;  %v8006_v58 = vadd.f32 %v14371_v39, %v18575_v28  ;;  %14852 = vmatprep.mubr.f32.mxu1 %v9923_v8  ;;  %v9926_v28 = vld [vmem:[#allocation2 + $0x2d1] sm:$0xff]  ;;  %v19513_v39 = vld [vmem:[#allocation19_spill] sm:$0xff] }
 0x3cf   : > { %v14451_v29 = vpop.f32.mrf.mxu0  ;;  %v7902_v48 = vpop.f32.mrf.mxu1  ;;  %v19512_v2 = vld [vmem:[#allocation18_spill] sm:$0xff] }
 0x3d0   : > { %14930 = vmatmul.mubr.f32.gmra.mxu0 %v10292_v43  ;;  %v18784_v42 = vadd.f32 %v14451_v29, %v8006_v58  ;;  %v8005_v0 = vadd.f32 %v7902_v48, %v18584_v26  ;;  %v9931_v43 = vld [vmem:[#allocation2 + $0x341] sm:$0xff] }
 0x3d1   : > { %14932 = vmatprep.mubr.f32.mxu0 %v18570_v25  ;;  %v8272_v12 = vpop.f32.mrf.mxu0  ;;  %v14374_v6 = vpop.f32.mrf.mxu1  ;;  %14853 = vmatmul.mubr.f32.gmra.mxu1 %v9924_v38 }
 0x3d2   : > { %v18788_v40 = vadd.f32 %v8272_v12, %v8005_v0  ;;  %v8008_v11 = vadd.f32 %v14374_v6, %v18594_v32  ;;  %14855 = vmatprep.mubr.f32.mxu1 %v9925_v52  ;;  %v9932_v52 = vld [vmem:[#allocation2 + $0x351] sm:$0xff]  ;;  %v9933_v6 = vld [vmem:[#allocation2 + $0x361] sm:$0xff] }
 0x3d3   : > { %v14454_v60 = vpop.f32.mrf.mxu0  ;;  %v7912_v63 = vpop.f32.mrf.mxu1 }
 0x3d4   : > { %14933 = vmatmul.mubr.f32.gmra.mxu0 %v18582_v37  ;;  %v18792_v4 = vadd.f32 %v14454_v60, %v8008_v11  ;;  %v8007_v26 = vadd.f32 %v7912_v63, %v18604_v19 }
 0x3d5   : > { %14935 = vmatprep.mubr.f32.mxu0 %v18588_v41  ;;  %v8282_v25 = vpop.f32.mrf.mxu0  ;;  %v14377_v13 = vpop.f32.mrf.mxu1  ;;  %14856 = vmatmul.mubr.f32.gmra.mxu1 %v9926_v28  ;;  %v19514_v28 = vld [vmem:[#allocation23_spill] sm:$0xff] }
 0x3d6   : > { %v18796_v16 = vadd.f32 %v8282_v25, %v8007_v26  ;;  %v8010_v32 = vadd.f32 %v14377_v13, %v18614_v35  ;;  %14858 = vmatprep.mubr.f32.mxu1 %v9927_v3  ;;  %v19515_v13 = vld [vmem:[#allocation21_spill] sm:$0xff] }
 0x3d7   : > { %v14457_v44 = vpop.f32.mrf.mxu0  ;;  %v7922_v37 = vpop.f32.mrf.mxu1 }
 0x3d8   : > { %14936 = vmatmul.mubr.f32.gmra.mxu0 %v18602_v10  ;;  %v18800_v61 = vadd.f32 %v14457_v44, %v8010_v32  ;;  %v8009_v19 = vadd.f32 %v7922_v37, %v18624_v36  ;;  %v19516_v37 = vld [vmem:[#allocation22_spill] sm:$0xff] }
 0x3d9   : > { %14938 = vmatprep.mubr.f32.mxu0 %v18608_v57  ;;  %v8292_v41 = vpop.f32.mrf.mxu0  ;;  %v14380_v18 = vpop.f32.mrf.mxu1  ;;  %14859 = vmatmul.mubr.f32.gmra.mxu1 %v9928_v33  ;;  %v10300_v57 = vld [vmem:[#allocation2 + $0x312] sm:$0xff]  ;;  %v9935_v33 = vld [vmem:[#allocation2 + $0x381] sm:$0xff] }
 0x3da   : > { %v18804_v55 = vadd.f32 %v8292_v41, %v8009_v19  ;;  %v8012_v35 = vadd.f32 %v14380_v18, %v19511_v22  ;;  %14861 = vmatprep.mubr.f32.mxu1 %v9929_v56  ;;  %v9936_v18 = vld [vmem:[#allocation2 + $0x391] sm:$0xff] }
 0x3db   : > { %v14460_v8 = vpop.f32.mrf.mxu0  ;;  %v7932_v10 = vpop.f32.mrf.mxu1 }
 0x3dc   : > { %14939 = vmatmul.mubr.f32.gmra.mxu0 %v19512_v2  ;;  %v18808_v31 = vadd.f32 %v14460_v8, %v8012_v35  ;;  %v8011_v36 = vadd.f32 %v7932_v10, %v18642_v34  ;;  %v19517_v35 = vld [vmem:[#allocation27_spill] sm:$0xff]  ;;  %v19518_v10 = vld [vmem:[#allocation26_spill] sm:$0xff] }
 0x3dd   : > { %14941 = vmatprep.mubr.f32.mxu0 %v19513_v39  ;;  %v8302_v58 = vpop.f32.mrf.mxu0  ;;  %v14383_v38 = vpop.f32.mrf.mxu1  ;;  %14862 = vmatmul.mubr.f32.gmra.mxu1 %v9930_v1  ;;  %v9937_v8 = vld [vmem:[#allocation2 + $0x3a1] sm:$0xff] }
 0x3de   : > { %v18812_v29 = vadd.f32 %v8302_v58, %v8011_v36  ;;  %v8014_v48 = vadd.f32 %v14383_v38, %v18651_v14  ;;  %14864 = vmatprep.mubr.f32.mxu1 %v9931_v43  ;;  %v9934_v14 = vld [vmem:[#allocation2 + $0x371] sm:$0xff]  ;;  %v19519_v43 = vld [vmem:[#allocation24_spill] sm:$0xff] }
 0x3df   : > { %v14463_v0 = vpop.f32.mrf.mxu0  ;;  %v7942_v12 = vpop.f32.mrf.mxu1  ;;  %v19520_v58 = vld [vmem:[#allocation29_spill] sm:$0xff] }
 0x3e0   : > { %14942 = vmatmul.mubr.f32.gmra.mxu0 %v10300_v57  ;;  %v18815_v11 = vadd.f32 %v14463_v0, %v8014_v48  ;;  %v8013_v34 = vadd.f32 %v7942_v12, %v18660_v50  ;;  %v9938_v38 = vld [vmem:[#allocation2 + $0x3b1] sm:$0xff] }
 0x3e1   : > { %14944 = vmatprep.mubr.f32.mxu0 %v19514_v28  ;;  %v8312_v60 = vpop.f32.mrf.mxu0  ;;  %v14386_v63 = vpop.f32.mrf.mxu1  ;;  %14865 = vmatmul.mubr.f32.gmra.mxu1 %v9932_v52  ;;  %v19521_v52 = vld [vmem:[#allocation25_spill] sm:$0xff] }
 0x3e2   : > { %v18819_v3 = vadd.f32 %v8312_v60, %v8013_v34  ;;  %v8016_v26 = vadd.f32 %v14386_v63, %v18670_v49  ;;  %14867 = vmatprep.mubr.f32.mxu1 %v9933_v6  ;;  %v19522_v34 = vld [vmem:[#allocation28_spill] sm:$0xff]  ;;  %v10308_v28 = vld [vmem:[#allocation2 + $0x3b2] sm:$0xff] }
 0x3e3   : > { %v14466_v25 = vpop.f32.mrf.mxu0  ;;  %v7952_v32 = vpop.f32.mrf.mxu1 }
 0x3e4   : > { %14945 = vmatmul.mubr.f32.gmra.mxu0 %v19515_v13  ;;  %v18823_v44 = vadd.f32 %v14466_v25, %v8016_v26  ;;  %v8015_v50 = vadd.f32 %v7952_v32, %v18680_v23 }
 0x3e5   : > { %14947 = vmatprep.mubr.f32.mxu0 %v19516_v37  ;;  %v8322_v56 = vpop.f32.mrf.mxu0  ;;  %v14389_v19 = vpop.f32.mrf.mxu1  ;;  %14868 = vmatmul.mubr.f32.gmra.mxu1 %v9934_v14 }
 0x3e6   : > { %v18827_v41 = vadd.f32 %v8322_v56, %v8015_v50  ;;  %v8018_v49 = vadd.f32 %v14389_v19, %v18690_v54  ;;  %14870 = vmatprep.mubr.f32.mxu1 %v9935_v33 }
 0x3e7   : > { %v14469_v22 = vpop.f32.mrf.mxu0  ;;  %v7962_v1 = vpop.f32.mrf.mxu1 }
 0x3e8   : > { %14948 = vmatmul.mubr.f32.gmra.mxu0 %v19517_v35  ;;  %v18831_v2 = vadd.f32 %v14469_v22, %v8018_v49  ;;  %v8017_v23 = vadd.f32 %v7962_v1, %v19518_v10 }
 0x3e9   : > { %14950 = vmatprep.mubr.f32.mxu0 %v19519_v43  ;;  %v8332_v36 = vpop.f32.mrf.mxu0  ;;  %v14392_v39 = vpop.f32.mrf.mxu1  ;;  %14871 = vmatmul.mubr.f32.gmra.mxu1 %v9936_v18 }
 0x3ea   : > { %v18835_v57 = vadd.f32 %v8332_v36, %v8017_v23  ;;  %v8020_v54 = vadd.f32 %v14392_v39, %v19520_v58  ;;  %14873 = vmatprep.mubr.f32.mxu1 %v9937_v8 }
 0x3eb   : > { %v14472_v48 = vpop.f32.mrf.mxu0  ;;  %v7972_v0 = vpop.f32.mrf.mxu1 }
 0x3ec   : > { %14951 = vmatmul.mubr.f32.gmra.mxu0 %v19521_v52  ;;  %v18839_v12 = vadd.f32 %v14472_v48, %v8020_v54  ;;  %v8019_v6 = vadd.f32 %v7972_v0, %v18718_v30 }
 0x3ed   : > { %14953 = vmatprep.mubr.f32.mxu0 %v19522_v34  ;;  %v8342_v60 = vpop.f32.mrf.mxu0  ;;  %v14395_v63 = vpop.f32.mrf.mxu1  ;;  %14874 = vmatmul.mubr.f32.gmra.mxu1 %v9938_v38 }
 0x3ee   : > { %v18843_v26 = vadd.f32 %v8342_v60, %v8019_v6  ;;  %v8022_v14 = vadd.f32 %v14395_v63, %v18722_v5 }
 0x3ef   : > { %v14475_v25 = vpop.f32.mrf.mxu0  ;;  %v7982_v13 = vpop.f32.mrf.mxu1 }
 0x3f0   : > { %14954 = vmatmul.mubr.f32.gmra.mxu0 %v10308_v28  ;;  %v18846_v32 = vadd.f32 %v14475_v25, %v8022_v14  ;;  %v8021_v33 = vadd.f32 %v7982_v13, %v18725_v21 }
 0x3f1   : > { %v8352_v50 = vpop.f32.mrf.mxu0  ;;  %v14510_v37 = vpop.f32.mrf.mxu1 }
 0x3f2   : > { %v18849_v30 = vadd.f32 %v8352_v50, %v8021_v33  ;;  %v8733_v56 = vadd.f32 %v14510_v37, %v18730_v45 }
 0x3f3   : > { %v14590_v19 = vpop.f32.mrf.mxu0  ;;  %v8573_v49 = vpop.f32.mrf.mxu1 }
 0x3f4   : > { %v18852_v18 = vadd.f32 %v14590_v19, %v8733_v56  ;;  %v8732_v22 = vadd.f32 %v8573_v49, %v18734_v17 }
 0x3f5   : > { %v8943_v5 = vpop.f32.mrf.mxu0  ;;  %v14513_v35 = vpop.f32.mrf.mxu1 }
 0x3f6   : > { %v18855_v1 = vadd.f32 %v8943_v5, %v8732_v22  ;;  %v8735_v8 = vadd.f32 %v14513_v35, %v18738_v7 }
 0x3f7   : > { %v14593_v10 = vpop.f32.mrf.mxu0  ;;  %v8583_v21 = vpop.f32.mrf.mxu1 }
 0x3f8   : > { %v18858_v23 = vadd.f32 %v14593_v10, %v8735_v8  ;;  %v8734_v43 = vadd.f32 %v8583_v21, %v18742_v53 }
 0x3f9   : > { %v8953_v36 = vpop.f32.mrf.mxu0  ;;  %v14516_v45 = vpop.f32.mrf.mxu1 }
 0x3fa   : > { %v18861_v39 = vadd.f32 %v8953_v36, %v8734_v43  ;;  %v8737_v58 = vadd.f32 %v14516_v45, %v18746_v27 }
 0x3fb   : > { %v14596_v54 = vpop.f32.mrf.mxu0  ;;  %v8593_v17 = vpop.f32.mrf.mxu1 }
 0x3fc   : > { %v18864_v38 = vadd.f32 %v14596_v54, %v8737_v58  ;;  %v8736_v48 = vadd.f32 %v8593_v17, %v18750_v20 }
 0x3fd   : > { %v8963_v52 = vpop.f32.mrf.mxu0  ;;  %v14519_v7 = vpop.f32.mrf.mxu1 }
 0x3fe   : > { %v18867_v0 = vadd.f32 %v8963_v52, %v8736_v48  ;;  %v8739_v6 = vadd.f32 %v14519_v7, %v18753_v51 }
 0x3ff   : > { %v14599_v34 = vpop.f32.mrf.mxu0  ;;  %v8603_v53 = vpop.f32.mrf.mxu1 }
 0x400   : > { %v18870_v28 = vadd.f32 %v14599_v34, %v8739_v6  ;;  %v8738_v60 = vadd.f32 %v8603_v53, %v18757_v46 }
 0x401   : > { %v8973_v63 = vpop.f32.mrf.mxu0  ;;  %v14522_v27 = vpop.f32.mrf.mxu1 }
 0x402   : > { %v18873_v14 = vadd.f32 %v8973_v63, %v8738_v60  ;;  %v8741_v25 = vadd.f32 %v14522_v27, %v18761_v47 }
 0x403   : > { %v14602_v13 = vpop.f32.mrf.mxu0  ;;  %v8613_v20 = vpop.f32.mrf.mxu1 }
 0x404   : > { %v18876_v33 = vadd.f32 %v14602_v13, %v8741_v25  ;;  %v8740_v50 = vadd.f32 %v8613_v20, %v18765_v24 }
 0x405   : > { %v8983_v37 = vpop.f32.mrf.mxu0  ;;  %v14525_v51 = vpop.f32.mrf.mxu1 }
 0x406   : > { %v18879_v56 = vadd.f32 %v8983_v37, %v8740_v50  ;;  %v8743_v19 = vadd.f32 %v14525_v51, %v18769_v15 }
 0x407   : > { %v14605_v49 = vpop.f32.mrf.mxu0  ;;  %v8623_v46 = vpop.f32.mrf.mxu1 }
 0x408   : > { %v18882_v22 = vadd.f32 %v14605_v49, %v8743_v19  ;;  %v8742_v5 = vadd.f32 %v8623_v46, %v18773_v9 }
 0x409   : > { %v8993_v35 = vpop.f32.mrf.mxu0  ;;  %v14528_v47 = vpop.f32.mrf.mxu1 }
 0x40a   : > { %v18885_v8 = vadd.f32 %v8993_v35, %v8742_v5  ;;  %v8745_v10 = vadd.f32 %v14528_v47, %v18777_v62 }
 0x40b   : > { %v14608_v21 = vpop.f32.mrf.mxu0  ;;  %v8633_v24 = vpop.f32.mrf.mxu1 }
 0x40c   : > { %v18888_v43 = vadd.f32 %v14608_v21, %v8745_v10  ;;  %v8744_v36 = vadd.f32 %v8633_v24, %v18781_v59 }
 0x40d   : > { %v9003_v45 = vpop.f32.mrf.mxu0  ;;  %v14531_v15 = vpop.f32.mrf.mxu1 }
 0x40e   : > { %v18891_v58 = vadd.f32 %v9003_v45, %v8744_v36  ;;  %v8747_v54 = vadd.f32 %v14531_v15, %v18784_v42 }
 0x40f   : > { %v14611_v17 = vpop.f32.mrf.mxu0  ;;  %v8643_v9 = vpop.f32.mrf.mxu1 }
 0x410   : > { %v18894_v48 = vadd.f32 %v14611_v17, %v8747_v54  ;;  %v8746_v52 = vadd.f32 %v8643_v9, %v18788_v40 }
 0x411   : > { %v9013_v7 = vpop.f32.mrf.mxu0  ;;  %v14534_v62 = vpop.f32.mrf.mxu1 }
 0x412   : > { %v18897_v6 = vadd.f32 %v9013_v7, %v8746_v52  ;;  %v8749_v34 = vadd.f32 %v14534_v62, %v18792_v4 }
 0x413   : > { %v14614_v53 = vpop.f32.mrf.mxu0  ;;  %v8653_v59 = vpop.f32.mrf.mxu1 }
 0x414   : > { %v18900_v60 = vadd.f32 %v14614_v53, %v8749_v34  ;;  %v8748_v63 = vadd.f32 %v8653_v59, %v18796_v16 }
 0x415   : > { %v9023_v27 = vpop.f32.mrf.mxu0  ;;  %v14537_v42 = vpop.f32.mrf.mxu1 }
 0x416   : > { %v18903_v25 = vadd.f32 %v9023_v27, %v8748_v63  ;;  %v8751_v13 = vadd.f32 %v14537_v42, %v18800_v61 }
 0x417   : > { %v14617_v20 = vpop.f32.mrf.mxu0  ;;  %v8663_v40 = vpop.f32.mrf.mxu1 }
 0x418   : > { %v18906_v50 = vadd.f32 %v14617_v20, %v8751_v13  ;;  %v8750_v37 = vadd.f32 %v8663_v40, %v18804_v55 }
 0x419   : > { %v9033_v51 = vpop.f32.mrf.mxu0  ;;  %v14540_v4 = vpop.f32.mrf.mxu1 }
 0x41a   : > { %19523 = vst [vmem:[#allocation30_spill] sm:$0xff] %v18906_v50  ;;  %v18909_v19 = vadd.f32 %v9033_v51, %v8750_v37  ;;  %v8753_v49 = vadd.f32 %v14540_v4, %v18808_v31 }
 0x41b   : > { %v14620_v46 = vpop.f32.mrf.mxu0  ;;  %v8673_v16 = vpop.f32.mrf.mxu1 }
 0x41c   : > { %19524 = vst [vmem:[#allocation7_spill] sm:$0xff] %v18909_v19  ;;  %v18912_v5 = vadd.f32 %v14620_v46, %v8753_v49  ;;  %v8752_v35 = vadd.f32 %v8673_v16, %v18812_v29 }
 0x41d   : > { %v9043_v47 = vpop.f32.mrf.mxu0  ;;  %v14543_v61 = vpop.f32.mrf.mxu1 }
 0x41e   : > { %19525 = vst [vmem:[#allocation8_spill] sm:$0xff] %v18912_v5  ;;  %v18915_v10 = vadd.f32 %v9043_v47, %v8752_v35  ;;  %v8755_v21 = vadd.f32 %v14543_v61, %v18815_v11 }
 0x41f   : > { %v14623_v24 = vpop.f32.mrf.mxu0  ;;  %v8683_v55 = vpop.f32.mrf.mxu1 }
 0x420   : > { %19526 = vst [vmem:[#allocation11_spill] sm:$0xff] %v18915_v10  ;;  %v18918_v36 = vadd.f32 %v14623_v24, %v8755_v21  ;;  %v8754_v45 = vadd.f32 %v8683_v55, %v18819_v3 }
 0x421   : > { %v9053_v15 = vpop.f32.mrf.mxu0  ;;  %v14546_v31 = vpop.f32.mrf.mxu1 }
 0x422   : > { %19527 = vst [vmem:[#allocation9_spill] sm:$0xff] %v18918_v36  ;;  %v18921_v54 = vadd.f32 %v9053_v15, %v8754_v45  ;;  %v8757_v17 = vadd.f32 %v14546_v31, %v18823_v44 }
 0x423   : > { %v14626_v9 = vpop.f32.mrf.mxu0  ;;  %v8693_v29 = vpop.f32.mrf.mxu1 }
 0x424   : > { %19528 = vst [vmem:[#allocation10_spill] sm:$0xff] %v18921_v54  ;;  %v18924_v52 = vadd.f32 %v14626_v9, %v8757_v17  ;;  %v8756_v7 = vadd.f32 %v8693_v29, %v18827_v41 }
 0x425   : > { %v9063_v62 = vpop.f32.mrf.mxu0  ;;  %v14549_v11 = vpop.f32.mrf.mxu1 }
 0x426   : > { %19529 = vst [vmem:[#allocation15_spill] sm:$0xff] %v18924_v52  ;;  %v18927_v34 = vadd.f32 %v9063_v62, %v8756_v7  ;;  %v8759_v53 = vadd.f32 %v14549_v11, %v18831_v2 }
 0x427   : > { %v14629_v59 = vpop.f32.mrf.mxu0  ;;  %v8703_v3 = vpop.f32.mrf.mxu1 }
 0x428   : > { %19530 = vst [vmem:[#allocation16_spill] sm:$0xff] %v18927_v34  ;;  %v18930_v63 = vadd.f32 %v14629_v59, %v8759_v53  ;;  %v8758_v27 = vadd.f32 %v8703_v3, %v18835_v57 }
 0x429   : > { %v9073_v42 = vpop.f32.mrf.mxu0  ;;  %v14552_v44 = vpop.f32.mrf.mxu1 }
 0x42a   : > { %19531 = vst [vmem:[#allocation12_spill] sm:$0xff] %v18930_v63  ;;  %v18933_v13 = vadd.f32 %v9073_v42, %v8758_v27  ;;  %v8761_v20 = vadd.f32 %v14552_v44, %v18839_v12 }
 0x42b   : > { %v14632_v40 = vpop.f32.mrf.mxu0  ;;  %v8713_v41 = vpop.f32.mrf.mxu1 }
 0x42c   : > { %19532 = vst [vmem:[#allocation13_spill] sm:$0xff] %v18933_v13  ;;  %v18936_v37 = vadd.f32 %v14632_v40, %v8761_v20  ;;  %v8760_v51 = vadd.f32 %v8713_v41, %v18843_v26 }
 0x42d   : > { %v9083_v4 = vpop.f32.mrf.mxu0  ;;  %v14555_v2 = vpop.f32.mrf.mxu1 }
 0x42e   : > { %19533 = vst [vmem:[#allocation14_spill] sm:$0xff] %v18936_v37  ;;  %v18939_v49 = vadd.f32 %v9083_v4, %v8760_v51  ;;  %v8763_v46 = vadd.f32 %v14555_v2, %v18846_v32 }
 0x42f   : > { %v14635_v16 = vpop.f32.mrf.mxu0  ;;  %v8723_v57 = vpop.f32.mrf.mxu1 }
 0x430   : > { %19534 = vst [vmem:[#allocation17_spill] sm:$0xff] %v18939_v49  ;;  %v18942_v35 = vadd.f32 %v14635_v16, %v8763_v46  ;;  %v8762_v47 = vadd.f32 %v8723_v57, %v18849_v30 }
 0x431   : > { %v9093_v61 = vpop.f32.mrf.mxu0  ;;  %v14670_v12 = vpop.f32.mrf.mxu1 }
 0x432   : > { %19535 = vst [vmem:[#allocation20_spill] sm:$0xff] %v18942_v35  ;;  %v18945_v21 = vadd.f32 %v9093_v61, %v8762_v47 }
 0x433   : > { %v18947_v24 = vpop.f32.mrf.mxu0  ;;  %v9313_v55 = vpop.f32.mrf.mxu1 }
 0x434   : > { %19536 = vst [vmem:[#allocation18_spill] sm:$0xff] %v18945_v21 }
 0x435   : > { %v18949_v26 = vpop.f32.mrf.mxu0  ;;  %v14673_v45 = vpop.f32.mrf.mxu1 }
 0x437   : > { %v18951_v15 = vpop.f32.mrf.mxu0  ;;  %v18953_v31 = vpop.f32.mrf.mxu1 }
 0x439   : > { %v18955_v32 = vpop.f32.mrf.mxu0  ;;  %v18957_v17 = vpop.f32.mrf.mxu1 }
 0x43b   : > { %v18959_v9 = vpop.f32.mrf.mxu0  ;;  %v18961_v30 = vpop.f32.mrf.mxu1 }
 0x43d   : > { %v18963_v29 = vpop.f32.mrf.mxu0  ;;  %v18965_v7 = vpop.f32.mrf.mxu1 }
 0x43f   : > { %v18967_v62 = vpop.f32.mrf.mxu0  ;;  %v18969_v11 = vpop.f32.mrf.mxu1 }
 0x441   : > { %v18971_v53 = vpop.f32.mrf.mxu0  ;;  %v18973_v59 = vpop.f32.mrf.mxu1 }
 0x443   : > { %v18975_v3 = vpop.f32.mrf.mxu0  ;;  %v18977_v27 = vpop.f32.mrf.mxu1 }
 0x445   : > { %v18979_v42 = vpop.f32.mrf.mxu0  ;;  %v18981_v44 = vpop.f32.mrf.mxu1 }
 0x447   : > { %v18983_v20 = vpop.f32.mrf.mxu0  ;;  %v18985_v40 = vpop.f32.mrf.mxu1 }
 0x449   : > { %v18987_v41 = vpop.f32.mrf.mxu0  ;;  %v18989_v51 = vpop.f32.mrf.mxu1 }
 0x44b   : > { %v18991_v4 = vpop.f32.mrf.mxu0  ;;  %v18993_v2 = vpop.f32.mrf.mxu1 }
 0x44d   : > { %v18995_v46 = vpop.f32.mrf.mxu0  ;;  %v18997_v16 = vpop.f32.mrf.mxu1 }
 0x44f   : > { %v18999_v57 = vpop.f32.mrf.mxu0  ;;  %v19001_v47 = vpop.f32.mrf.mxu1 }
 0x451   : > { %v19003_v61 = vpop.f32.mrf.mxu0  ;;  %v19005_v21 = vpop.f32.mrf.mxu1 }
 0x453   : > { %v19007_v35 = vpop.f32.mrf.mxu0  ;;  %v19009_v49 = vpop.f32.mrf.mxu1 }
 0x455   : > { %v19011_v37 = vpop.f32.mrf.mxu0  ;;  %v19013_v13 = vpop.f32.mrf.mxu1 }
 0x456   : > { %19537 = vst [vmem:[#allocation19_spill] sm:$0xff] %v19011_v37  ;;  %19538 = vst [vmem:[#allocation23_spill] sm:$0xff] %v19013_v13 }
 0x457   : > { %v19015_v63 = vpop.f32.mrf.mxu0  ;;  %v19017_v34 = vpop.f32.mrf.mxu1 }
 0x458   : > { %19539 = vst [vmem:[#allocation21_spill] sm:$0xff] %v19015_v63  ;;  %19540 = vst [vmem:[#allocation22_spill] sm:$0xff] %v19017_v34 }
 0x459   : > { %v19019_v52 = vpop.f32.mrf.mxu0  ;;  %v19021_v54 = vpop.f32.mrf.mxu1 }
 0x45a   : > { %19541 = vst [vmem:[#allocation27_spill] sm:$0xff] %v19019_v52  ;;  %19542 = vst [vmem:[#allocation26_spill] sm:$0xff] %v19021_v54 }
 0x45b   : > { %v19023_v36 = vpop.f32.mrf.mxu0  ;;  %v19025_v10 = vpop.f32.mrf.mxu1 }
 0x45c   : > { %19543 = vst [vmem:[#allocation24_spill] sm:$0xff] %v19023_v36  ;;  %19544 = vst [vmem:[#allocation29_spill] sm:$0xff] %v19025_v10 }
 0x45d   : > { %v19027_v5 = vpop.f32.mrf.mxu0  ;;  %v19029_v19 = vpop.f32.mrf.mxu1 }
 0x45e   : > { %19545 = vst [vmem:[#allocation25_spill] sm:$0xff] %v19027_v5  ;;  %19546 = vst [vmem:[#allocation28_spill] sm:$0xff] %v19029_v19 }
 0x45f   : > { %v19033_v37 = vpop.f32.mrf.mxu1 }
 0x460   : > { %v19031_v50 = vpop.f32.mrf.mxu0  ;;  %19548 = vst [vmem:[#allocation32_spill] sm:$0xff] %v19033_v37 }
 0x461   : > { %19547 = vst [vmem:[#allocation31_spill] sm:$0xff] %v19031_v50  ;;  %v19037_v63 = vpop.f32.mrf.mxu1 }
 0x462   : > { %v19035_v13 = vpop.f32.mrf.mxu0  ;;  %19550 = vst [vmem:[#allocation34_spill] sm:$0xff] %v19037_v63 }
 0x463   : > { %19549 = vst [vmem:[#allocation33_spill] sm:$0xff] %v19035_v13  ;;  %v19041_v52 = vpop.f32.mrf.mxu1 }
 0x464   : > { %v19039_v34 = vpop.f32.mrf.mxu0  ;;  %19552 = vst [vmem:[#allocation36_spill] sm:$0xff] %v19041_v52 }
 0x465   : > { %19551 = vst [vmem:[#allocation35_spill] sm:$0xff] %v19039_v34  ;;  %v19045_v36 = vpop.f32.mrf.mxu1  ;;  %v9473_v34 = vadd.f32 %v14670_v12, %v18852_v18  ;;  %v9474_v18 = vadd.f32 %v18953_v31, %v18861_v39 }
 0x466   : > { %v19043_v54 = vpop.f32.mrf.mxu0  ;;  %19554 = vst [vmem:[#allocation38_spill] sm:$0xff] %v19045_v36  ;;  %v9472_v36 = vadd.f32 %v9313_v55, %v18855_v1  ;;  %v19079_v1 = vld [vmem:[%s19249_s2] ss:$0 sm:$0xff] }
 0x467   : > { %19553 = vst [vmem:[#allocation37_spill] sm:$0xff] %v19043_v54  ;;  %v19049_v5 = vpop.f32.mrf.mxu1 }
 0x468   : > { %v19047_v10 = vpop.f32.mrf.mxu0  ;;  %19556 = vst [vmem:[#allocation40_spill] sm:$0xff] %v19049_v5 }
 0x469   : > { %19555 = vst [vmem:[#allocation39_spill] sm:$0xff] %v19047_v10  ;;  %v19053_v50 = vpop.f32.mrf.mxu1 }
 0x46a   : > { %v19051_v19 = vpop.f32.mrf.mxu0  ;;  %19558 = vst [vmem:[#allocation42_spill] sm:$0xff] %v19053_v50  ;;  %v9475_v50 = vadd.f32 %v14673_v45, %v18858_v23  ;;  %v9477_v45 = vadd.f32 %v18957_v17, %v18864_v38 }
 0x46b   : > { %19557 = vst [vmem:[#allocation41_spill] sm:$0xff] %v19051_v19  ;;  %v19057_v13 = vpop.f32.mrf.mxu1  ;;  %v9844_v19 = vadd.f32 %v18947_v24, %v9473_v34 }
 0x46c   : > { %v19055_v37 = vpop.f32.mrf.mxu0  ;;  %19560 = vst [vmem:[#allocation44_spill] sm:$0xff] %v19057_v13  ;;  %v9843_v13 = vadd.f32 %v18949_v26, %v9472_v36  ;;  %v9846_v34 = vadd.f32 %v18951_v15, %v9475_v50  ;;  %v9476_v36 = vadd.f32 %v18961_v30, %v18867_v0  ;;  %v9479_v50 = vadd.f32 %v18965_v7, %v18870_v28 }
 0x46d   : > { %19559 = vst [vmem:[#allocation43_spill] sm:$0xff] %v19055_v37  ;;  %v19062_v52 = vpop.f32.mrf.mxu1  ;;  %v9848_v0 = vadd.f32 %v18959_v9, %v9477_v45 }
 0x46e   : > { %v19060_v63 = vpop.f32.mrf.mxu0  ;;  %19561 = vst [vmem:[#allocation45_spill] sm:$0xff] %v19062_v52  ;;  %v9847_v15 = vadd.f32 %v18963_v29, %v9476_v36  ;;  %v9850_v29 = vadd.f32 %v18967_v62, %v9479_v50 }
 0x46f   : > { %v19067_v10 = vpop.f32.mrf.mxu1 }
 0x470   : > { %v19065_v54 = vpop.f32.mrf.mxu0  ;;  %19563 = vst [vmem:[#allocation47_spill] sm:$0xff] %v19067_v10 }
 0x471   : > { %19562 = vst [vmem:[#allocation46_spill] sm:$0xff] %v19065_v54  ;;  %v14830_v37 = vpop.f32.mrf.mxu1 }
 0x472   : > { %v19071_v5 = vpop.f32.mrf.mxu0  ;;  %v10214_v12 = vadd.f32 %v14830_v37, %v9844_v19  ;;  %v9845_v37 = vadd.f32 %v18955_v32, %v9474_v18  ;;  %v9478_v32 = vadd.f32 %v18969_v11, %v18873_v14 }
 0x473   : > { %19564 = vst [vmem:[#allocation48_spill] sm:$0xff] %v19071_v5  ;;  %v10054_v55 = vpop.f32.mrf.mxu1 }
 0x474   : > { %v14910_v52 = vpop.f32.mrf.mxu0  ;;  %v10213_v24 = vadd.f32 %v10054_v55, %v9843_v13 }
 0x475   : > { %v10584_v23 = vadd.f32 %v14910_v52, %v10214_v12  ;;  %v14833_v19 = vpop.f32.mrf.mxu1 }
 0x476   : > { %v10424_v39 = vpop.f32.mrf.mxu0  ;;  %v10216_v5 = vadd.f32 %v14833_v19, %v9846_v34 }
 0x477   : > { %v10687_v26 = vadd.f32 %v19079_v1, %v10584_v23  ;;  %v10583_v31 = vadd.f32 %v10424_v39, %v10213_v24  ;;  %v10064_v10 = vpop.f32.mrf.mxu1  ;;  %v9849_v23 = vadd.f32 %v18971_v53, %v9478_v32  ;;  %v9480_v24 = vadd.f32 %v18977_v27, %v18879_v56 }
 0x478   : > { %v14913_v54 = vpop.f32.mrf.mxu0  ;;  %v10215_v13 = vadd.f32 %v10064_v10, %v9845_v37 }
 0x479   : > { %10828 = vst [vmem:[%s15138_s7 + $0x8] sm:$0xff] %v10687_v26  ;;  %v10686_v38 = vadd.f32 %v19079_v1, %v10583_v31  ;;  %v10586_v52 = vadd.f32 %v14913_v54, %v10216_v5  ;;  %v10756_v17 = vmul.f32 %v10687_v26, %v10687_v26  ;;  %v14836_v18 = vpop.f32.mrf.mxu1  ;;  %v9481_v5 = vadd.f32 %v18973_v59, %v18876_v33 }
 0x47a   : > { %v10434_v30 = vpop.f32.mrf.mxu0  ;;  %v10218_v10 = vadd.f32 %v14836_v18, %v9848_v0  ;;  %v9851_v0 = vadd.f32 %v18979_v42, %v9480_v24  ;;  %v9484_v42 = vadd.f32 %v18993_v2, %v18891_v58 }
 0x47b   : > { %v10718_v12 = vadd.f32 %v10687_v26, %v10686_v38  ;;  %v10755_v55 = vmul.f32 %v10686_v38, %v10686_v38  ;;  %10827 = vst [vmem:[%s15138_s7] sm:$0xff] %v10686_v38  ;;  %v10689_v28 = vadd.f32 %v19079_v1, %v10586_v52  ;;  %v10585_v7 = vadd.f32 %v10434_v30, %v10215_v13  ;;  %v10074_v9 = vpop.f32.mrf.mxu1 }
 0x47c   : > { %v14916_v54 = vpop.f32.mrf.mxu0  ;;  %v10217_v11 = vadd.f32 %v10074_v9, %v9847_v15  ;;  %v9852_v62 = vadd.f32 %v18975_v3, %v9481_v5  ;;  %v9483_v26 = vadd.f32 %v18981_v44, %v18882_v22  ;;  %v9482_v15 = vadd.f32 %v18985_v40, %v18885_v8 }
 0x47d   : > { %v10787_v34 = vadd.f32 %v10756_v17, %v10755_v55  ;;  %10830 = vst [vmem:[%s15138_s7 + $0x18] sm:$0xff] %v10689_v28  ;;  %v10688_v14 = vadd.f32 %v19079_v1, %v10585_v7  ;;  %v10588_v45 = vadd.f32 %v14916_v54, %v10218_v10  ;;  %v14839_v39 = vpop.f32.mrf.mxu1  ;;  %v10758_v31 = vmul.f32 %v10689_v28, %v10689_v28 }
 0x47e   : > { %v10444_v36 = vpop.f32.mrf.mxu0  ;;  %v10220_v37 = vadd.f32 %v14839_v39, %v9850_v29  ;;  %v9485_v3 = vadd.f32 %v18989_v51, %v18888_v43  ;;  %v9854_v55 = vadd.f32 %v18983_v20, %v9483_v26  ;;  %v9853_v54 = vadd.f32 %v18987_v41, %v9482_v15 }
 0x47f   : > { %v10719_v33 = vadd.f32 %v10718_v12, %v10688_v14  ;;  %v10757_v59 = vmul.f32 %v10688_v14, %v10688_v14  ;;  %10829 = vst [vmem:[%s15138_s7 + $0x10] sm:$0xff] %v10688_v14  ;;  %v10587_v19 = vadd.f32 %v10444_v36, %v10217_v11  ;;  %v10691_v53 = vadd.f32 %v19079_v1, %v10588_v45  ;;  %v10084_v56 = vpop.f32.mrf.mxu1 }
 0x480   : > { %v14919_v50 = vpop.f32.mrf.mxu0  ;;  %v10219_v22 = vadd.f32 %v10084_v56, %v9849_v23  ;;  %v9856_v14 = vadd.f32 %v18991_v4, %v9485_v3  ;;  %v9855_v23 = vadd.f32 %v18995_v46, %v9484_v42 }
 0x481   : > { %v10788_v27 = vadd.f32 %v10787_v34, %v10757_v59  ;;  %v10690_v38 = vadd.f32 %v19079_v1, %v10587_v19  ;;  %v10720_v52 = vadd.f32 %v10719_v33, %v10689_v28  ;;  %v10590_v13 = vadd.f32 %v14919_v50, %v10220_v37  ;;  %10832 = vst [vmem:[%s15138_s7 + $0x28] sm:$0xff] %v10691_v53  ;;  %v14842_v32 = vpop.f32.mrf.mxu1 }
 0x482   : > { %v10454_v44 = vpop.f32.mrf.mxu0  ;;  %v10222_v40 = vadd.f32 %v14842_v32, %v9852_v62  ;;  %v10760_v51 = vmul.f32 %v10691_v53, %v10691_v53  ;;  %v9487_v33 = vadd.f32 %v18997_v16, %v18894_v48  ;;  %v9486_v37 = vadd.f32 %v19001_v47, %v18897_v6 }
 0x483   : > { %v10721_v17 = vadd.f32 %v10720_v52, %v10690_v38  ;;  %v10759_v30 = vmul.f32 %v10690_v38, %v10690_v38  ;;  %v10789_v18 = vadd.f32 %v10788_v27, %v10758_v31  ;;  %10831 = vst [vmem:[%s15138_s7 + $0x20] sm:$0xff] %v10690_v38  ;;  %v10693_v12 = vadd.f32 %v19079_v1, %v10590_v13  ;;  %v10094_v43 = vpop.f32.mrf.mxu1 }
 0x484   : > { %v10589_v8 = vadd.f32 %v10454_v44, %v10219_v22  ;;  %v14922_v28 = vpop.f32.mrf.mxu0  ;;  %v10221_v10 = vadd.f32 %v10094_v43, %v9851_v0  ;;  %v9489_v16 = vadd.f32 %v19005_v21, %v18900_v60  ;;  %v9488_v38 = vadd.f32 %v19009_v49, %v18903_v25  ;;  %v19566_v43 = vld [vmem:[#allocation30_spill] sm:$0xff] }
 0x485   : > { %v10790_v7 = vadd.f32 %v10789_v18, %v10759_v30  ;;  %10834 = vst [vmem:[%s15138_s7 + $0x38] sm:$0xff] %v10693_v12  ;;  %v10722_v5 = vadd.f32 %v10721_v17, %v10691_v53  ;;  %v10592_v29 = vadd.f32 %v14922_v28, %v10222_v40  ;;  %v14845_v20 = vpop.f32.mrf.mxu1  ;;  %v10762_v62 = vmul.f32 %v10693_v12, %v10693_v12 }
 0x486   : > { %v10692_v9 = vadd.f32 %v19079_v1, %v10589_v8  ;;  %v10464_v34 = vpop.f32.mrf.mxu0  ;;  %v10224_v11 = vadd.f32 %v14845_v20, %v9854_v55  ;;  %v9858_v0 = vadd.f32 %v18999_v57, %v9487_v33  ;;  %v9857_v44 = vadd.f32 %v19003_v61, %v9486_v37  ;;  %v19565_v55 = vld [vmem:[#allocation19_spill] sm:$0xff] }
 0x487   : > { %v10791_v58 = vadd.f32 %v10790_v7, %v10760_v51  ;;  %v10591_v2 = vadd.f32 %v10464_v34, %v10221_v10  ;;  %v10695_v36 = vadd.f32 %v19079_v1, %v10592_v29  ;;  %v10104_v39 = vpop.f32.mrf.mxu1  ;;  %v9860_v57 = vadd.f32 %v19007_v35, %v9489_v16  ;;  %v19567_v51 = vld [vmem:[#allocation23_spill] sm:$0xff]  ;;  %v19569_v29 = vld [vmem:[#allocation22_spill] sm:$0xff] }
 0x488   : > { %v10723_v24 = vadd.f32 %v10722_v5, %v10692_v9  ;;  %v10761_v45 = vmul.f32 %v10692_v9, %v10692_v9  ;;  %10833 = vst [vmem:[%s15138_s7 + $0x30] sm:$0xff] %v10692_v9  ;;  %v14925_v41 = vpop.f32.mrf.mxu0  ;;  %v10223_v19 = vadd.f32 %v10104_v39, %v9853_v54  ;;  %v9859_v42 = vadd.f32 %v19565_v55, %v9488_v38  ;;  %v19568_v9 = vld [vmem:[#allocation7_spill] sm:$0xff] }
 0x489   : > { %v10694_v59 = vadd.f32 %v19079_v1, %v10591_v2  ;;  %v10594_v4 = vadd.f32 %v14925_v41, %v10224_v11  ;;  %10836 = vst [vmem:[%s15138_s7 + $0x48] sm:$0xff] %v10695_v36  ;;  %v14848_v53 = vpop.f32.mrf.mxu1  ;;  %v10764_v32 = vmul.f32 %v10695_v36, %v10695_v36  ;;  %v9491_v7 = vadd.f32 %v19567_v51, %v19566_v43  ;;  %v19571_v41 = vld [vmem:[#allocation26_spill] sm:$0xff]  ;;  %v19572_v33 = vld [vmem:[#allocation11_spill] sm:$0xff] }
 0x48a   : > { %v10792_v46 = vadd.f32 %v10791_v58, %v10761_v45  ;;  %v10724_v26 = vadd.f32 %v10723_v24, %v10693_v12  ;;  %v10474_v31 = vpop.f32.mrf.mxu0  ;;  %v10226_v48 = vadd.f32 %v14848_v53, %v9856_v14  ;;  %v9490_v34 = vadd.f32 %v19569_v29, %v19568_v9 }
 0x48b   : > { %v10763_v50 = vmul.f32 %v10694_v59, %v10694_v59  ;;  %10835 = vst [vmem:[%s15138_s7 + $0x40] sm:$0xff] %v10694_v59  ;;  %v10697_v56 = vadd.f32 %v19079_v1, %v10594_v4  ;;  %v10593_v27 = vadd.f32 %v10474_v31, %v10223_v19  ;;  %v10114_v13 = vpop.f32.mrf.mxu1 }
 0x48c   : > { %v10725_v6 = vadd.f32 %v10724_v26, %v10694_v59  ;;  %v10793_v47 = vadd.f32 %v10792_v46, %v10762_v62  ;;  %v14928_v52 = vpop.f32.mrf.mxu0  ;;  %v10225_v22 = vadd.f32 %v10114_v13, %v9855_v23  ;;  %v19573_v59 = vld [vmem:[#allocation29_spill] sm:$0xff] }
 0x48d   : > { %10838 = vst [vmem:[%s15138_s7 + $0x58] sm:$0xff] %v10697_v56  ;;  %v10696_v15 = vadd.f32 %v19079_v1, %v10593_v27  ;;  %v10596_v3 = vadd.f32 %v14928_v52, %v10226_v48  ;;  %v14851_v25 = vpop.f32.mrf.mxu1  ;;  %v10766_v20 = vmul.f32 %v10697_v56, %v10697_v56  ;;  %v9492_v4 = vadd.f32 %v19573_v59, %v19572_v33  ;;  %v19574_v26 = vld [vmem:[#allocation21_spill] sm:$0xff]  ;;  %v19575_v27 = vld [vmem:[#allocation27_spill] sm:$0xff] }
 0x48e   : > { %v10794_v17 = vadd.f32 %v10793_v47, %v10763_v50  ;;  %v10726_v60 = vadd.f32 %v10725_v6, %v10695_v36  ;;  %v10484_v21 = vpop.f32.mrf.mxu0  ;;  %v10228_v12 = vadd.f32 %v14851_v25, %v9858_v0  ;;  %v19570_v36 = vld [vmem:[#allocation8_spill] sm:$0xff]  ;;  %v9862_v31 = vadd.f32 %v19574_v26, %v9491_v7 }
 0x48f   : > { %v10765_v49 = vmul.f32 %v10696_v15, %v10696_v15  ;;  %10837 = vst [vmem:[%s15138_s7 + $0x50] sm:$0xff] %v10696_v15  ;;  %v10699_v30 = vadd.f32 %v19079_v1, %v10596_v3  ;;  %v10595_v18 = vadd.f32 %v10484_v21, %v10225_v22  ;;  %v10124_v28 = vpop.f32.mrf.mxu1  ;;  %v9493_v39 = vadd.f32 %v19571_v41, %v19570_v36  ;;  %v19576_v22 = vld [vmem:[#allocation24_spill] sm:$0xff] }
 0x490   : > { %v10727_v8 = vadd.f32 %v10726_v60, %v10696_v15  ;;  %v10795_v40 = vadd.f32 %v10794_v17, %v10764_v32  ;;  %v14931_v61 = vpop.f32.mrf.mxu0  ;;  %v10227_v54 = vadd.f32 %v10124_v28, %v9857_v44  ;;  %v9861_v48 = vadd.f32 %v19575_v27, %v9490_v34  ;;  %v19577_v32 = vld [vmem:[#allocation25_spill] sm:$0xff]  ;;  %v19582_v34 = vld [vmem:[#allocation15_spill] sm:$0xff] }
 0x491   : > { %10840 = vst [vmem:[%s15138_s7 + $0x68] sm:$0xff] %v10699_v30  ;;  %v10698_v5 = vadd.f32 %v19079_v1, %v10595_v18  ;;  %v10598_v10 = vadd.f32 %v14931_v61, %v10228_v12  ;;  %v14854_v2 = vpop.f32.mrf.mxu1  ;;  %v10768_v16 = vmul.f32 %v10699_v30, %v10699_v30  ;;  %v9864_v44 = vadd.f32 %v19576_v22, %v9493_v39  ;;  %v19578_v18 = vld [vmem:[#allocation9_spill] sm:$0xff]  ;;  %v19579_v12 = vld [vmem:[#allocation28_spill] sm:$0xff]  ;;  %v19591_v22 = vld [vmem:[#allocation38_spill] sm:$0xff] }
 0x492   : > { %v10796_v35 = vadd.f32 %v10795_v40, %v10765_v49  ;;  %v10728_v14 = vadd.f32 %v10727_v8, %v10697_v56  ;;  %v10494_v58 = vpop.f32.mrf.mxu0  ;;  %v10230_v45 = vadd.f32 %v14854_v2, %v9860_v57  ;;  %v9863_v17 = vadd.f32 %v19577_v32, %v9492_v4  ;;  %v19580_v8 = vld [vmem:[#allocation10_spill] sm:$0xff]  ;;  %v19581_v40 = vld [vmem:[#allocation32_spill] sm:$0xff]  ;;  %v19587_v4 = vld [vmem:[#allocation33_spill] sm:$0xff] }
 0x493   : > { %v10767_v11 = vmul.f32 %v10698_v5, %v10698_v5  ;;  %10839 = vst [vmem:[%s15138_s7 + $0x60] sm:$0xff] %v10698_v5  ;;  %v10701_v23 = vadd.f32 %v19079_v1, %v10598_v10  ;;  %v10597_v24 = vadd.f32 %v10494_v58, %v10227_v54  ;;  %v10134_v46 = vpop.f32.mrf.mxu1  ;;  %v9494_v61 = vadd.f32 %v19581_v40, %v19580_v8  ;;  %v19585_v58 = vld [vmem:[#allocation36_spill] sm:$0xff] }
 0x494   : > { %v10729_v19 = vadd.f32 %v10728_v14, %v10698_v5  ;;  %v10797_v37 = vadd.f32 %v10796_v35, %v10766_v20  ;;  %v14934_v62 = vpop.f32.mrf.mxu0  ;;  %v10229_v56 = vadd.f32 %v10134_v46, %v9859_v42  ;;  %v19583_v20 = vld [vmem:[#allocation34_spill] sm:$0xff]  ;;  %v19584_v14 = vld [vmem:[#allocation16_spill] sm:$0xff] }
 0x495   : > { %10842 = vst [vmem:[%s15138_s7 + $0x78] sm:$0xff] %v10701_v23  ;;  %v10700_v53 = vadd.f32 %v19079_v1, %v10597_v24  ;;  %v10600_v50 = vadd.f32 %v14934_v62, %v10230_v45  ;;  %v14857_v52 = vpop.f32.mrf.mxu1  ;;  %v10770_v28 = vmul.f32 %v10701_v23, %v10701_v23  ;;  %v9497_v35 = vadd.f32 %v19583_v20, %v19582_v34 }
 0x496   : > { %v10798_v38 = vadd.f32 %v10797_v37, %v10767_v11  ;;  %v10730_v6 = vadd.f32 %v10729_v19, %v10699_v30  ;;  %v10504_v47 = vpop.f32.mrf.mxu0  ;;  %v10232_v3 = vadd.f32 %v14857_v52, %v9862_v31  ;;  %v9495_v30 = vadd.f32 %v19579_v12, %v19578_v18 }
 0x497   : > { %v10769_v13 = vmul.f32 %v10700_v53, %v10700_v53  ;;  %10841 = vst [vmem:[%s15138_s7 + $0x70] sm:$0xff] %v10700_v53  ;;  %v10703_v0 = vadd.f32 %v19079_v1, %v10600_v50  ;;  %v10599_v15 = vadd.f32 %v10504_v47, %v10229_v56  ;;  %v10144_v49 = vpop.f32.mrf.mxu1  ;;  %v9496_v2 = vadd.f32 %v19585_v58, %v19584_v14 }
 0x498   : > { %v10731_v60 = vadd.f32 %v10730_v6, %v10700_v53  ;;  %v10799_v21 = vadd.f32 %v10798_v38, %v10768_v16  ;;  %v14937_v25 = vpop.f32.mrf.mxu0  ;;  %v10231_v42 = vadd.f32 %v10144_v49, %v9861_v48  ;;  %v9865_v19 = vadd.f32 %v19587_v4, %v9494_v61  ;;  %v19588_v48 = vld [vmem:[#allocation35_spill] sm:$0xff]  ;;  %v19589_v38 = vld [vmem:[#allocation37_spill] sm:$0xff]  ;;  %v19594_v61 = vld [vmem:[#allocation14_spill] sm:$0xff] }
 0x499   : > { %10844 = vst [vmem:[%s15138_s7 + $0x88] sm:$0xff] %v10703_v0  ;;  %v10702_v57 = vadd.f32 %v19079_v1, %v10599_v15  ;;  %v10602_v55 = vadd.f32 %v14937_v25, %v10232_v3  ;;  %v14860_v5 = vpop.f32.mrf.mxu1  ;;  %v10772_v37 = vmul.f32 %v10703_v0, %v10703_v0  ;;  %v9868_v16 = vadd.f32 %v19588_v48, %v9497_v35  ;;  %v19590_v3 = vld [vmem:[#allocation12_spill] sm:$0xff] }
 0x49a   : > { %v10800_v43 = vadd.f32 %v10799_v21, %v10769_v13  ;;  %v10732_v51 = vadd.f32 %v10731_v60, %v10701_v23  ;;  %v10514_v7 = vpop.f32.mrf.mxu0  ;;  %v10234_v29 = vadd.f32 %v14860_v5, %v9864_v44  ;;  %v19586_v23 = vld [vmem:[#allocation31_spill] sm:$0xff]  ;;  %v9867_v6 = vadd.f32 %v19589_v38, %v9496_v2  ;;  %v19592_v60 = vld [vmem:[#allocation13_spill] sm:$0xff]  ;;  %v19593_v21 = vld [vmem:[#allocation40_spill] sm:$0xff] }
 0x49b   : > { %v10771_v10 = vmul.f32 %v10702_v57, %v10702_v57  ;;  %10843 = vst [vmem:[%s15138_s7 + $0x80] sm:$0xff] %v10702_v57  ;;  %v10705_v54 = vadd.f32 %v19079_v1, %v10602_v55  ;;  %v10601_v9 = vadd.f32 %v10514_v7, %v10231_v42  ;;  %v10154_v36 = vpop.f32.mrf.mxu1  ;;  %v9866_v41 = vadd.f32 %v19586_v23, %v9495_v30  ;;  %v19597_v7 = vld [vmem:[#allocation44_spill] sm:$0xff]  ;;  %v19599_v2 = vld [vmem:[#allocation41_spill] sm:$0xff] }
 0x49c   : > { %v10733_v11 = vadd.f32 %v10732_v51, %v10702_v57  ;;  %v10801_v24 = vadd.f32 %v10800_v43, %v10770_v28  ;;  %v14940_v45 = vpop.f32.mrf.mxu0  ;;  %v10233_v59 = vadd.f32 %v10154_v36, %v9863_v17  ;;  %v9498_v25 = vadd.f32 %v19593_v21, %v19592_v60  ;;  %v19595_v28 = vld [vmem:[#allocation42_spill] sm:$0xff]  ;;  %v19596_v51 = vld [vmem:[#allocation17_spill] sm:$0xff] }
 0x49d   : > { %10846 = vst [vmem:[%s15138_s7 + $0x98] sm:$0xff] %v10705_v54  ;;  %v10704_v39 = vadd.f32 %v19079_v1, %v10601_v9  ;;  %v10604_v33 = vadd.f32 %v14940_v45, %v10234_v29  ;;  %v14863_v31 = vpop.f32.mrf.mxu1  ;;  %v10774_v49 = vmul.f32 %v10705_v54, %v10705_v54  ;;  %v9501_v43 = vadd.f32 %v19595_v28, %v19594_v61 }
 0x49e   : > { %v10802_v62 = vadd.f32 %v10801_v24, %v10771_v10  ;;  %v10734_v46 = vadd.f32 %v10733_v11, %v10703_v0  ;;  %v10524_v26 = vpop.f32.mrf.mxu0  ;;  %v10236_v27 = vadd.f32 %v14863_v31, %v9866_v41  ;;  %v9499_v0 = vadd.f32 %v19591_v22, %v19590_v3 }
 0x49f   : > { %v10773_v53 = vmul.f32 %v10704_v39, %v10704_v39  ;;  %10845 = vst [vmem:[%s15138_s7 + $0x90] sm:$0xff] %v10704_v39  ;;  %v10707_v50 = vadd.f32 %v19079_v1, %v10604_v33  ;;  %v10603_v56 = vadd.f32 %v10524_v26, %v10233_v59  ;;  %v10164_v15 = vpop.f32.mrf.mxu1  ;;  %v9500_v5 = vadd.f32 %v19597_v7, %v19596_v51 }
 0x4a0   : > { %v10735_v47 = vadd.f32 %v10734_v46, %v10704_v39  ;;  %v10803_v52 = vadd.f32 %v10802_v62, %v10772_v37  ;;  %v14943_v13 = vpop.f32.mrf.mxu0  ;;  %v10235_v17 = vadd.f32 %v10164_v15, %v9865_v19  ;;  %v9869_v11 = vadd.f32 %v19599_v2, %v9498_v25  ;;  %v19600_v19 = vld [vmem:[#allocation43_spill] sm:$0xff] }
 0x4a1   : > { %10848 = vst [vmem:[%s15138_s7 + $0xa8] sm:$0xff] %v10707_v50  ;;  %v10706_v44 = vadd.f32 %v19079_v1, %v10603_v56  ;;  %v10606_v32 = vadd.f32 %v14943_v13, %v10236_v27  ;;  %v14866_v57 = vpop.f32.mrf.mxu1  ;;  %v10776_v24 = vmul.f32 %v10707_v50, %v10707_v50  ;;  %v9872_v37 = vadd.f32 %v19600_v19, %v9501_v43  ;;  %v19601_v56 = vld [vmem:[#allocation20_spill] sm:$0xff]  ;;  %v19602_v27 = vld [vmem:[#allocation45_spill] sm:$0xff] }
 0x4a2   : > { %v10804_v18 = vadd.f32 %v10803_v52, %v10773_v53  ;;  %v10736_v12 = vadd.f32 %v10735_v47, %v10705_v54  ;;  %v10534_v30 = vpop.f32.mrf.mxu0  ;;  %v10238_v40 = vadd.f32 %v14866_v57, %v9868_v16  ;;  %v19598_v54 = vld [vmem:[#allocation39_spill] sm:$0xff]  ;;  %v9871_v62 = vadd.f32 %v19060_v63, %v9500_v5 }
 0x4a3   : > { %v10775_v55 = vmul.f32 %v10706_v44, %v10706_v44  ;;  %10847 = vst [vmem:[%s15138_s7 + $0xa0] sm:$0xff] %v10706_v44  ;;  %v10709_v42 = vadd.f32 %v19079_v1, %v10606_v32  ;;  %v10605_v8 = vadd.f32 %v10534_v30, %v10235_v17  ;;  %v10174_v34 = vpop.f32.mrf.mxu1  ;;  %v9870_v20 = vadd.f32 %v19598_v54, %v9499_v0  ;;  %v19604_v47 = vld [vmem:[#allocation47_spill] sm:$0xff] }
 0x4a4   : > { %v10737_v10 = vadd.f32 %v10736_v12, %v10706_v44  ;;  %v10805_v9 = vadd.f32 %v10804_v18, %v10774_v49  ;;  %v14946_v29 = vpop.f32.mrf.mxu0  ;;  %v10237_v58 = vadd.f32 %v10174_v34, %v9867_v6  ;;  %v19603_v6 = vld [vmem:[#allocation18_spill] sm:$0xff] }
 0x4a5   : > { %10850 = vst [vmem:[%s15138_s7 + $0xb8] sm:$0xff] %v10709_v42  ;;  %v10708_v35 = vadd.f32 %v19079_v1, %v10605_v8  ;;  %v10608_v14 = vadd.f32 %v14946_v29, %v10238_v40  ;;  %v14869_v41 = vpop.f32.mrf.mxu1  ;;  %v9502_v52 = vadd.f32 %v19604_v47, %v19603_v6  ;;  %v10778_v13 = vmul.f32 %v10709_v42, %v10709_v42  ;;  %v19605_v18 = vld [vmem:[#allocation46_spill] sm:$0xff] }
 0x4a6   : > { %v10806_v45 = vadd.f32 %v10805_v9, %v10775_v55  ;;  %v10738_v36 = vadd.f32 %v10737_v10, %v10707_v50  ;;  %v10544_v23 = vpop.f32.mrf.mxu0  ;;  %v10240_v4 = vadd.f32 %v14869_v41, %v9870_v20  ;;  %v9503_v50 = vadd.f32 %v19602_v27, %v19601_v56 }
 0x4a7   : > { %v10777_v39 = vmul.f32 %v10708_v35, %v10708_v35  ;;  %10849 = vst [vmem:[%s15138_s7 + $0xb0] sm:$0xff] %v10708_v35  ;;  %v10711_v33 = vadd.f32 %v19079_v1, %v10608_v14  ;;  %v10607_v59 = vadd.f32 %v10544_v23, %v10237_v58  ;;  %v10184_v53 = vpop.f32.mrf.mxu1 }
 0x4a8   : > { %v10739_v46 = vadd.f32 %v10738_v36, %v10708_v35  ;;  %v10807_v26 = vadd.f32 %v10806_v45, %v10776_v24  ;;  %v14949_v31 = vpop.f32.mrf.mxu0  ;;  %v10239_v38 = vadd.f32 %v10184_v53, %v9869_v11  ;;  %v9874_v12 = vadd.f32 %v19605_v18, %v9503_v50 }
 0x4a9   : > { %10852 = vst [vmem:[%s15138_s7 + $0xc8] sm:$0xff] %v10711_v33  ;;  %v10710_v48 = vadd.f32 %v19079_v1, %v10607_v59  ;;  %v10610_v16 = vadd.f32 %v14949_v31, %v10240_v4  ;;  %v14872_v22 = vpop.f32.mrf.mxu1  ;;  %v10780_v40 = vmul.f32 %v10711_v33, %v10711_v33 }
 0x4aa   : > { %v10808_v15 = vadd.f32 %v10807_v26, %v10777_v39  ;;  %v10740_v63 = vadd.f32 %v10739_v46, %v10709_v42  ;;  %v10554_v3 = vpop.f32.mrf.mxu0  ;;  %v10242_v17 = vadd.f32 %v14872_v22, %v9872_v37  ;;  %v19606_v42 = vld [vmem:[#allocation48_spill] sm:$0xff] }
 0x4ab   : > { %v10779_v0 = vmul.f32 %v10710_v48, %v10710_v48  ;;  %10851 = vst [vmem:[%s15138_s7 + $0xc0] sm:$0xff] %v10710_v48  ;;  %v10713_v44 = vadd.f32 %v19079_v1, %v10610_v16  ;;  %v10609_v32 = vadd.f32 %v10554_v3, %v10239_v38  ;;  %v10194_v49 = vpop.f32.mrf.mxu1  ;;  %v9873_v8 = vadd.f32 %v19606_v42, %v9502_v52 }
 0x4ac   : > { %v10741_v60 = vadd.f32 %v10740_v63, %v10710_v48  ;;  %v10809_v21 = vadd.f32 %v10808_v15, %v10778_v13  ;;  %v14952_v25 = vpop.f32.mrf.mxu0  ;;  %v10241_v55 = vadd.f32 %v10194_v49, %v9871_v62 }
 0x4ad   : > { %10854 = vst [vmem:[%s15138_s7 + $0xd8] sm:$0xff] %v10713_v44  ;;  %v10712_v30 = vadd.f32 %v19079_v1, %v10609_v32  ;;  %v10612_v57 = vadd.f32 %v14952_v25, %v10242_v17  ;;  %v14875_v51 = vpop.f32.mrf.mxu1  ;;  %v10782_v2 = vmul.f32 %v10713_v44, %v10713_v44 }
 0x4ae   : > { %v10810_v61 = vadd.f32 %v10809_v21, %v10779_v0  ;;  %v10742_v28 = vadd.f32 %v10741_v60, %v10711_v33  ;;  %v10564_v43 = vpop.f32.mrf.mxu0  ;;  %v10244_v9 = vadd.f32 %v14875_v51, %v9874_v12 }
 0x4af   : > { %v10781_v7 = vmul.f32 %v10712_v30, %v10712_v30  ;;  %10853 = vst [vmem:[%s15138_s7 + $0xd0] sm:$0xff] %v10712_v30  ;;  %v10715_v5 = vadd.f32 %v19079_v1, %v10612_v57  ;;  %v10611_v10 = vadd.f32 %v10564_v43, %v10241_v55  ;;  %v10204_v20 = vpop.f32.mrf.mxu1 }
 0x4b0   : > { %v10743_v29 = vadd.f32 %v10742_v28, %v10712_v30  ;;  %v10811_v34 = vadd.f32 %v10810_v61, %v10780_v40  ;;  %v14955_v54 = vpop.f32.mrf.mxu0  ;;  %v10243_v58 = vadd.f32 %v10204_v20, %v9873_v8 }
 0x4b1   : > { %10856 = vst [vmem:[%s15138_s7 + $0xe8] sm:$0xff] %v10715_v5  ;;  %v10714_v35 = vadd.f32 %v19079_v1, %v10611_v10  ;;  %v10614_v14 = vadd.f32 %v14955_v54, %v10244_v9  ;;  %v10784_v4 = vmul.f32 %v10715_v5, %v10715_v5 }
 0x4b2   : > { %v10812_v11 = vadd.f32 %v10811_v34, %v10781_v7  ;;  %v10744_v24 = vadd.f32 %v10743_v29, %v10713_v44  ;;  %v10574_v45 = vpop.f32.mrf.mxu0 }
 0x4b3   : > { %v10783_v36 = vmul.f32 %v10714_v35, %v10714_v35  ;;  %10855 = vst [vmem:[%s15138_s7 + $0xe0] sm:$0xff] %v10714_v35  ;;  %v10717_v23 = vadd.f32 %v19079_v1, %v10614_v14  ;;  %v10613_v41 = vadd.f32 %v10574_v45, %v10243_v58 }
 0x4b4   : > { %v10745_v39 = vadd.f32 %v10744_v24, %v10714_v35  ;;  %v10813_v33 = vadd.f32 %v10812_v11, %v10782_v2 }
 0x4b5   : > { %10858 = vst [vmem:[%s15138_s7 + $0xf8] sm:$0xff] %v10717_v23  ;;  %v10716_v59 = vadd.f32 %v19079_v1, %v10613_v41  ;;  %v10786_v31 = vmul.f32 %v10717_v23, %v10717_v23 }
 0x4b6   : > { %v10814_v19 = vadd.f32 %v10813_v33, %v10783_v36  ;;  %v10746_v37 = vadd.f32 %v10745_v39, %v10715_v5 }
 0x4b7   : > { %v10785_v62 = vmul.f32 %v10716_v59, %v10716_v59  ;;  %10857 = vst [vmem:[%s15138_s7 + $0xf0] sm:$0xff] %v10716_v59 }
 0x4b8   : > { %v10747_v46 = vadd.f32 %v10746_v37, %v10716_v59  ;;  %v10815_v26 = vadd.f32 %v10814_v19, %v10784_v4 }
 0x4ba   : > { %v10748_v53 = vadd.f32 %v10747_v46, %v10717_v23  ;;  %v10816_v56 = vadd.f32 %v10815_v26, %v10785_v62 }
 0x4bc   : > { %v10749_v27 = vrot.slane %v10748_v53, 4  ;;  %v10817_v50 = vadd.f32 %v10816_v56, %v10786_v31 }
 0x4be   : > { %v10750_v48 = vadd.f32 %v10749_v27, %v10748_v53  ;;  %v10818_v16 = vrot.slane %v10817_v50, 4 }
 0x4c0   : > { %v10751_v38 = vrot.slane %v10750_v48, 2  ;;  %v10819_v6 = vadd.f32 %v10818_v16, %v10817_v50 }
 0x4c2   : > { %v10752_v47 = vadd.f32 %v10751_v38, %v10750_v48  ;;  %v10820_v52 = vrot.slane %v10819_v6, 2 }
 0x4c4   : > { %v10753_v1 = vrot.slane %v10752_v47, 1  ;;  %v10821_v13 = vadd.f32 %v10820_v52, %v10819_v6 }
 0x4c6   : > { %v10822_v15 = vrot.slane %v10821_v13, 1  ;;  %v10754_v63 = vadd.f32 %v10753_v1, %v10752_v47 }
 0x4c8   : > { %v10823_v3 = vadd.f32 %v10822_v15, %v10821_v13 }
 0x4ca   : > { %v10825_v22 = vsel %vm10824_vm0, %v10754_v63, %v10823_v3 }
 0x4cb   : > { %10826 = vst [vmem:[%s15155_s22] sm:$0x3] %v10825_v22 }
 0x4cc PF: > { %s15_s19 = sadd.s32 1, %s15068_s19   ;;  %s19607_s15 = smov %s15060_s17 }
 0x4cd   : > { %p12_p8 = scmp.ge.s32.totalorder %s15_s19, 6   ;;  %s19608_s16 = smov %s15064_s18 }
 0x4ce   : > { %s19609_s17 = smov %s19612_s20  ;;  %s19610_s18 = smov %s19616_s21 }
 0x4cf   :  { %14 = sbr.rel (!%p12_p8) target bundleno = 3 (0x3), region = 153 }
 0x4d4   :  { %10913 = vsyncmov [#allocation4] }
 0x4d7   :  { %s10914_s7 = vpop.sfrf %10913 }
 0x4d8   :  { %p11499_p9 = scmp.ne.s32.totalorder %s10914_s7, 0 }
 0x4da   :  { %10918 = shalt.err (%p11499_p9)  }

</bundles_post_ra>
